<compile_context>
chip_gen: v7x
topology: tpu7x:2x2x1
jax: 0.10.0
libtpu: 0.0.40
codegen_flags: <defaults>
</compile_context>

<pallas_src>
import jax
import jax.numpy as jnp
from jax import lax
from jax.experimental import pallas as pl
from jax.experimental.pallas import tpu as pltpu

EPS = 1e-5


def _make_kernel(NB, Cin, Cout, H, W, K):
    UH, UW = 2 * H, 2 * W

    def kernel(x_ref, scale_ref, shift_ref, w_ref, b_ref, o_ref, pad_ref):
        # 0/1 selection matrices, built once per grid step from iotas:
        #   dp[u, i] = 1  iff u == 2i+1 or u == 2i+2   (row nearest-2x + zero border)
        #   e2[j, v] = 1  iff v == 2j+1 or v == 2j+2   (col nearest-2x + zero border)
        uu = lax.broadcasted_iota(jnp.int32, (UH + 2, H), 0)
        ii = lax.broadcasted_iota(jnp.int32, (UH + 2, H), 1)
        dp = jnp.logical_or(uu == 2 * ii + 1, uu == 2 * ii + 2).astype(jnp.float32)
        jj = lax.broadcasted_iota(jnp.int32, (W, UW + 2), 0)
        vv = lax.broadcasted_iota(jnp.int32, (W, UW + 2), 1)
        e2 = jnp.logical_or(vv == 2 * jj + 1, vv == 2 * jj + 2).astype(jnp.float32)

        for b in range(NB):
            n = pl.program_id(0) * NB + b

            # Conditional-BN affine + ReLU on the LOW-RES tile, then nearest-2x
            # upsample + 1-pixel zero pad via two small matmuls on the idle MXU:
            #   pad[u, v] = relu(affine(x))[(u-1)//2, (v-1)//2] in the interior,
            #   exactly 0 on the 1-pixel border  ->  no scratch zeroing needed,
            #   and every store into pad_ref is full-width and lane-aligned.
            for ci in range(Cin):
                a = jnp.maximum(
                    x_ref[b, ci] * scale_ref[n, ci] + shift_ref[n, ci], 0.0)
                pad_ref[ci] = jnp.dot(
                    dp, jnp.dot(a, e2, preferred_element_type=jnp.float32),
                    preferred_element_type=jnp.float32)

            # 3x3 conv (stride 1, pad 1) as unrolled scalar-weighted MACs (VPU).
            # Shifted-slice loads hoisted out of the Cout loop; bias folded into
            # the accumulator init.
            accs = [jnp.full((UH, UW), b_ref[co], dtype=jnp.float32)
                    for co in range(Cout)]
            for ci in range(Cin):
                for kh in range(K):
                    for kw in range(K):
                        tile = pad_ref[ci, kh:kh + UH, kw:kw + UW]
                        for co in range(Cout):
                            wv = w_ref[((co * Cin + ci) * K + kh) * K + kw]
                            accs[co] = accs[co] + wv * tile
            for co in range(Cout):
                o_ref[b, co] = accs[co]

    return kernel


def upsample_block_forward(x, c, params, *, samples_per_block=1):
    """Pallas implementation of UpSampleBlock.forward (isSN=True, isRes=False, ReLU)."""
    Ww, bw, Wb, bb, Wc, bc = (params[k] for k in ("Ww", "bw", "Wb", "bb", "Wc", "bc"))
    N, Cin, H, W = x.shape
    Cout, _, K, _ = Wc.shape
    UH, UW = 2 * H, 2 * W
    NB = samples_per_block
    assert N % NB == 0, "batch must be divisible by samples_per_block"

    # --- glue: BN batch statistics + conditional affine folded into a per-sample
    #     (scale, shift) pair (tiny reduction + tiny matmuls on `c`). ---
    mean = jnp.mean(x, axis=(0, 2, 3))                 # (Cin,)
    var = jnp.var(x, axis=(0, 2, 3))                   # biased, like BN training
    gamma = c @ Ww.T + bw                              # (N, Cin)
    beta = c @ Wb.T + bb                               # (N, Cin)
    inv = lax.rsqrt(var + EPS)                         # (Cin,)
    scale = gamma * inv                                # (N, Cin)
    shift = beta - mean * scale                        # (N, Cin)

    kernel = _make_kernel(NB, Cin, Cout, H, W, K)

    conv_flops = 2 * N * Cout * Cin * K * K * UH * UW
    up_flops = 2 * N * Cin * (H * W * (UW + 2) + (UH + 2) * W * (UW + 2))
    affine_flops = 3 * N * Cin * H * W
    bytes_accessed = 4 * (N * Cin * H * W + N * Cout * UH * UW
                          + 2 * N * Cin + Cout * Cin * K * K + Cout)
    cost = pl.CostEstimate(flops=int(conv_flops + up_flops + affine_flops),
                           transcendentals=0,
                           bytes_accessed=int(bytes_accessed))

    out = pl.pallas_call(
        kernel,
        out_shape=jax.ShapeDtypeStruct((N, Cout, UH, UW), jnp.float32),
        grid=(N // NB,),
        in_specs=[
            pl.BlockSpec((NB, Cin, H, W), lambda i: (i, 0, 0, 0)),   # low-res x tile
            pl.BlockSpec(memory_space=pltpu.MemorySpace.SMEM),       # scale (N, Cin)
            pl.BlockSpec(memory_space=pltpu.MemorySpace.SMEM),       # shift (N, Cin)
            pl.BlockSpec(memory_space=pltpu.MemorySpace.SMEM),       # conv W, flat
            pl.BlockSpec(memory_space=pltpu.MemorySpace.SMEM),       # conv bias
        ],
        out_specs=pl.BlockSpec((NB, Cout, UH, UW), lambda i: (i, 0, 0, 0)),
        scratch_shapes=[pltpu.VMEM((Cin, UH + 2, UW + 2), jnp.float32)],
        compiler_params=pltpu.CompilerParams(
            dimension_semantics=("parallel",)),
        cost_estimate=cost,
    )(
        x.astype(jnp.float32),
        scale.astype(jnp.float32),
        shift.astype(jnp.float32),
        Wc.reshape(-1).astype(jnp.float32),
        bc.astype(jnp.float32),
    )
    return out


def reference_forward(x, c, params):
    """Pure-JAX reference reproducing the PyTorch forward order exactly."""
    Ww, bw, Wb, bb, Wc, bc = (params[k] for k in ("Ww", "bw", "Wb", "bb", "Wc", "bc"))
    mean = jnp.mean(x, axis=(0, 2, 3), keepdims=True)
    var = jnp.var(x, axis=(0, 2, 3), keepdims=True)
    bn = (x - mean) / jnp.sqrt(var + EPS)
    gamma = (c @ Ww.T + bw)[:, :, None, None]
    beta = (c @ Wb.T + bb)[:, :, None, None]
    h = gamma * bn + beta
    h = jnp.maximum(h, 0.0)                                      # ReLU
    h = jnp.repeat(jnp.repeat(h, 2, axis=2), 2, axis=3)          # nearest 2x
    out = lax.conv_general_dilated(
        h, Wc, window_strides=(1, 1), padding=((1, 1), (1, 1)),
        dimension_numbers=("NCHW", "OIHW", "NCHW"))
    return out + bc[None, :, None, None]


def init_params(key, numClass, Cin, Cout, K):
    k1, k2, k3, k4, k5 = jax.random.split(key, 5)
    # ConditionalBatchNorm2d: weight Linear (orthogonal W, default-init bias),
    # bias Linear (zero W, default-init bias).
    Ww = jax.nn.initializers.orthogonal()(k1, (Cin, numClass), jnp.float32)
    bw = jax.random.uniform(k2, (Cin,), jnp.float32, -0.3, 0.3)
    Wb = jnp.zeros((Cin, numClass), jnp.float32)
    bb = jax.random.uniform(k3, (Cin,), jnp.float32, -0.3, 0.3)
    # Conv2d(Cin, Cout, K, 1, 1) with spectral norm.
    Wc = jax.random.normal(k4, (Cout, Cin, K, K), jnp.float32) * 0.2
    bc = jax.random.uniform(k5, (Cout,), jnp.float32, -0.1, 0.1)
    # TODO(synk): spectral_norm's stateful 1-step power iteration (persistent
    # random `u`) is approximated by a converged power iteration.
    Wmat = Wc.reshape(Cout, -1)
    u = jnp.ones((Cout,), jnp.float32)
    v = jnp.ones((Wmat.shape[1],), jnp.float32)
    for _ in range(30):
        v = Wmat.T @ u
        v = v / (jnp.linalg.norm(v) + 1e-12)
        u = Wmat @ v
        u = u / (jnp.linalg.norm(u) + 1e-12)
    sigma = u @ (Wmat @ v)
    Wc = Wc / sigma
    return dict(Ww=Ww, bw=bw, Wb=Wb, bb=bb, Wc=Wc, bc=bc)


if __name__ == "__main__":
    # UpSampleBlock(numClass=10, inChannel=4, outChannel=8, kernelSize=3,
    #               stride=1, padding=1, activation='ReLU', isSN=True, isRes=False)
    N, Cin, H, W = 2, 4, 16, 16
    numClass, Cout, K = 10, 8, 3

    key = jax.random.PRNGKey(0)
    kx, kc, kp = jax.random.split(key, 3)
    x = jax.random.normal(kx, (N, Cin, H, W), jnp.float32)
    c = jax.random.normal(kc, (N, numClass), jnp.float32)
    params = init_params(kp, numClass, Cin, Cout, K)

    out = upsample_block_forward(x, c, params)
    out = jax.block_until_ready(out)

    ref = reference_forward(x, c, params)
    assert out.shape == (N, Cout, 2 * H, 2 * W), out.shape
    err = jnp.max(jnp.abs(out - ref))
    if not jnp.allclose(out, ref, atol=1e-3, rtol=1e-3):
        raise AssertionError(f"kernel/reference mismatch, max abs err = {err}")
    print("KERNEL_OK")
</pallas_src>

<mosaic_0001>
module attributes {stable_mosaic.version = 11 : i64} {
  func.func @kernel(%arg0: i32, %arg1: memref<1x4x16x16xf32, #tpu.memory_space<vmem>>, %arg2: memref<2x4xf32, #tpu.memory_space<smem>>, %arg3: memref<2x4xf32, #tpu.memory_space<smem>>, %arg4: memref<288xf32, #tpu.memory_space<smem>>, %arg5: memref<8xf32, #tpu.memory_space<smem>>, %arg6: memref<1x8x32x32xf32, #tpu.memory_space<vmem>>, %arg7: memref<4x34x34xf32, #tpu.memory_space<vmem>>) attributes {dimension_semantics = [#tpu.dimension_semantics<parallel>], iteration_bounds = array<i64: 2>, scalar_prefetch = 0 : i64, scratch_operands = 1 : i64, tpu.core_type = #tpu.core_type<tc>, window_params = [{transform_indices = @transform_0, window_bounds = array<i64: 1, 4, 16, 16>}, {transform_indices = @transform_1, window_bounds = array<i64: 2, 4>}, {transform_indices = @transform_2, window_bounds = array<i64: 2, 4>}, {transform_indices = @transform_3, window_bounds = array<i64: 288>}, {transform_indices = @transform_4, window_bounds = array<i64: 8>}, {transform_indices = @transform_5, window_bounds = array<i64: 1, 8, 32, 32>}]} {
    %0 = tpu.iota {dimensions = array<i32: 0>} : vector<34x16xi32>
    %1 = tpu.iota {dimensions = array<i32: 1>} : vector<34x16xi32>
    %c2_i32 = arith.constant 2 : i32
    %2 = vector.broadcast %c2_i32 : i32 to vector<34x16xi32>
    %3 = arith.muli %2, %1 : vector<34x16xi32>
    %c1_i32 = arith.constant 1 : i32
    %4 = vector.broadcast %c1_i32 : i32 to vector<34x16xi32>
    %5 = arith.addi %3, %4 : vector<34x16xi32>
    %6 = arith.cmpi eq, %0, %5 : vector<34x16xi32>
    %c2_i32_0 = arith.constant 2 : i32
    %7 = vector.broadcast %c2_i32_0 : i32 to vector<34x16xi32>
    %8 = arith.muli %7, %1 : vector<34x16xi32>
    %c2_i32_1 = arith.constant 2 : i32
    %9 = vector.broadcast %c2_i32_1 : i32 to vector<34x16xi32>
    %10 = arith.addi %8, %9 : vector<34x16xi32>
    %11 = arith.cmpi eq, %0, %10 : vector<34x16xi32>
    %12 = arith.ori %6, %11 : vector<34x16xi1>
    %13 = arith.extui %12 : vector<34x16xi1> to vector<34x16xi32>
    %14 = arith.sitofp %13 : vector<34x16xi32> to vector<34x16xf32>
    %15 = tpu.iota {dimensions = array<i32: 0>} : vector<16x34xi32>
    %16 = tpu.iota {dimensions = array<i32: 1>} : vector<16x34xi32>
    %c2_i32_2 = arith.constant 2 : i32
    %17 = vector.broadcast %c2_i32_2 : i32 to vector<16x34xi32>
    %18 = arith.muli %17, %15 : vector<16x34xi32>
    %c1_i32_3 = arith.constant 1 : i32
    %19 = vector.broadcast %c1_i32_3 : i32 to vector<16x34xi32>
    %20 = arith.addi %18, %19 : vector<16x34xi32>
    %21 = arith.cmpi eq, %16, %20 : vector<16x34xi32>
    %c2_i32_4 = arith.constant 2 : i32
    %22 = vector.broadcast %c2_i32_4 : i32 to vector<16x34xi32>
    %23 = arith.muli %22, %15 : vector<16x34xi32>
    %c2_i32_5 = arith.constant 2 : i32
    %24 = vector.broadcast %c2_i32_5 : i32 to vector<16x34xi32>
    %25 = arith.addi %23, %24 : vector<16x34xi32>
    %26 = arith.cmpi eq, %16, %25 : vector<16x34xi32>
    %27 = arith.ori %21, %26 : vector<16x34xi1>
    %28 = arith.extui %27 : vector<16x34xi1> to vector<16x34xi32>
    %29 = arith.sitofp %28 : vector<16x34xi32> to vector<16x34xf32>
    %c1_i32_6 = arith.constant 1 : i32
    %30 = arith.muli %arg0, %c1_i32_6 : i32
    %c0_i32 = arith.constant 0 : i32
    %31 = arith.addi %30, %c0_i32 : i32
    %c0 = arith.constant 0 : index
    %c0_7 = arith.constant 0 : index
    %c0_8 = arith.constant 0 : index
    %c0_9 = arith.constant 0 : index
    %32 = vector.load %arg1[%c0, %c0_7, %c0_8, %c0_9] : memref<1x4x16x16xf32, #tpu.memory_space<vmem>>, vector<1x1x16x16xf32>
    %33 = vector.shape_cast %32 : vector<1x1x16x16xf32> to vector<16x16xf32>
    %34 = arith.index_cast %31 : i32 to index
    %c0_10 = arith.constant 0 : index
    %35 = memref.load %arg2[%34, %c0_10] : memref<2x4xf32, #tpu.memory_space<smem>>
    %36 = vector.broadcast %35 : f32 to vector<16x16xf32>
    %37 = arith.mulf %33, %36 : vector<16x16xf32>
    %38 = arith.index_cast %31 : i32 to index
    %c0_11 = arith.constant 0 : index
    %39 = memref.load %arg3[%38, %c0_11] : memref<2x4xf32, #tpu.memory_space<smem>>
    %40 = vector.broadcast %39 : f32 to vector<16x16xf32>
    %41 = arith.addf %37, %40 : vector<16x16xf32>
    %cst = arith.constant 0.000000e+00 : f32
    %42 = vector.broadcast %cst : f32 to vector<16x16xf32>
    %43 = arith.maximumf %41, %42 : vector<16x16xf32>
    %cst_12 = arith.constant dense<0.000000e+00> : vector<16x34xf32>
    %44 = tpu.matmul %43, %29, %cst_12 {dimension_numbers = #tpu.dot_dimension_numbers<[1], [0], [0], [1], [0, 0, 1, 1], [], []>} : vector<16x16xf32>, vector<16x34xf32>, vector<16x34xf32> -> vector<16x34xf32>
    %cst_13 = arith.constant dense<0.000000e+00> : vector<34x34xf32>
    %45 = tpu.matmul %14, %44, %cst_13 {dimension_numbers = #tpu.dot_dimension_numbers<[1], [0], [0], [1], [0, 0, 1, 1], [], []>} : vector<34x16xf32>, vector<16x34xf32>, vector<34x34xf32> -> vector<34x34xf32>
    %c0_14 = arith.constant 0 : index
    %c0_15 = arith.constant 0 : index
    %c0_16 = arith.constant 0 : index
    %46 = vector.load %arg7[%c0_14, %c0_15, %c0_16] : memref<4x34x34xf32, #tpu.memory_space<vmem>>, vector<1x34x34xf32>
    %47 = vector.shape_cast %46 : vector<1x34x34xf32> to vector<34x34xf32>
    %48 = vector.shape_cast %45 : vector<34x34xf32> to vector<1x34x34xf32>
    tpu.vector_store %arg7[%c0_14, %c0_15, %c0_16], %48 {strides = array<i32>} : memref<4x34x34xf32, #tpu.memory_space<vmem>>, vector<1x34x34xf32>,
    %c0_17 = arith.constant 0 : index
    %c1 = arith.constant 1 : index
    %c0_18 = arith.constant 0 : index
    %c0_19 = arith.constant 0 : index
    %49 = vector.load %arg1[%c0_17, %c1, %c0_18, %c0_19] : memref<1x4x16x16xf32, #tpu.memory_space<vmem>>, vector<1x1x16x16xf32>
    %50 = vector.shape_cast %49 : vector<1x1x16x16xf32> to vector<16x16xf32>
    %51 = arith.index_cast %31 : i32 to index
    %c1_20 = arith.constant 1 : index
    %52 = memref.load %arg2[%51, %c1_20] : memref<2x4xf32, #tpu.memory_space<smem>>
    %53 = vector.broadcast %52 : f32 to vector<16x16xf32>
    %54 = arith.mulf %50, %53 : vector<16x16xf32>
    %55 = arith.index_cast %31 : i32 to index
    %c1_21 = arith.constant 1 : index
    %56 = memref.load %arg3[%55, %c1_21] : memref<2x4xf32, #tpu.memory_space<smem>>
    %57 = vector.broadcast %56 : f32 to vector<16x16xf32>
    %58 = arith.addf %54, %57 : vector<16x16xf32>
    %cst_22 = arith.constant 0.000000e+00 : f32
    %59 = vector.broadcast %cst_22 : f32 to vector<16x16xf32>
    %60 = arith.maximumf %58, %59 : vector<16x16xf32>
    %cst_23 = arith.constant dense<0.000000e+00> : vector<16x34xf32>
    %61 = tpu.matmul %60, %29, %cst_23 {dimension_numbers = #tpu.dot_dimension_numbers<[1], [0], [0], [1], [0, 0, 1, 1], [], []>} : vector<16x16xf32>, vector<16x34xf32>, vector<16x34xf32> -> vector<16x34xf32>
    %cst_24 = arith.constant dense<0.000000e+00> : vector<34x34xf32>
    %62 = tpu.matmul %14, %61, %cst_24 {dimension_numbers = #tpu.dot_dimension_numbers<[1], [0], [0], [1], [0, 0, 1, 1], [], []>} : vector<34x16xf32>, vector<16x34xf32>, vector<34x34xf32> -> vector<34x34xf32>
    %c1_25 = arith.constant 1 : index
    %c0_26 = arith.constant 0 : index
    %c0_27 = arith.constant 0 : index
    %63 = vector.load %arg7[%c1_25, %c0_26, %c0_27] : memref<4x34x34xf32, #tpu.memory_space<vmem>>, vector<1x34x34xf32>
    %64 = vector.shape_cast %63 : vector<1x34x34xf32> to vector<34x34xf32>
    %65 = vector.shape_cast %62 : vector<34x34xf32> to vector<1x34x34xf32>
    tpu.vector_store %arg7[%c1_25, %c0_26, %c0_27], %65 {strides = array<i32>} : memref<4x34x34xf32, #tpu.memory_space<vmem>>, vector<1x34x34xf32>,
    %c0_28 = arith.constant 0 : index
    %c2 = arith.constant 2 : index
    %c0_29 = arith.constant 0 : index
    %c0_30 = arith.constant 0 : index
    %66 = vector.load %arg1[%c0_28, %c2, %c0_29, %c0_30] : memref<1x4x16x16xf32, #tpu.memory_space<vmem>>, vector<1x1x16x16xf32>
    %67 = vector.shape_cast %66 : vector<1x1x16x16xf32> to vector<16x16xf32>
    %68 = arith.index_cast %31 : i32 to index
    %c2_31 = arith.constant 2 : index
    %69 = memref.load %arg2[%68, %c2_31] : memref<2x4xf32, #tpu.memory_space<smem>>
    %70 = vector.broadcast %69 : f32 to vector<16x16xf32>
    %71 = arith.mulf %67, %70 : vector<16x16xf32>
    %72 = arith.index_cast %31 : i32 to index
    %c2_32 = arith.constant 2 : index
    %73 = memref.load %arg3[%72, %c2_32] : memref<2x4xf32, #tpu.memory_space<smem>>
    %74 = vector.broadcast %73 : f32 to vector<16x16xf32>
    %75 = arith.addf %71, %74 : vector<16x16xf32>
    %cst_33 = arith.constant 0.000000e+00 : f32
    %76 = vector.broadcast %cst_33 : f32 to vector<16x16xf32>
    %77 = arith.maximumf %75, %76 : vector<16x16xf32>
    %cst_34 = arith.constant dense<0.000000e+00> : vector<16x34xf32>
    %78 = tpu.matmul %77, %29, %cst_34 {dimension_numbers = #tpu.dot_dimension_numbers<[1], [0], [0], [1], [0, 0, 1, 1], [], []>} : vector<16x16xf32>, vector<16x34xf32>, vector<16x34xf32> -> vector<16x34xf32>
    %cst_35 = arith.constant dense<0.000000e+00> : vector<34x34xf32>
    %79 = tpu.matmul %14, %78, %cst_35 {dimension_numbers = #tpu.dot_dimension_numbers<[1], [0], [0], [1], [0, 0, 1, 1], [], []>} : vector<34x16xf32>, vector<16x34xf32>, vector<34x34xf32> -> vector<34x34xf32>
    %c2_36 = arith.constant 2 : index
    %c0_37 = arith.constant 0 : index
    %c0_38 = arith.constant 0 : index
    %80 = vector.load %arg7[%c2_36, %c0_37, %c0_38] : memref<4x34x34xf32, #tpu.memory_space<vmem>>, vector<1x34x34xf32>
    %81 = vector.shape_cast %80 : vector<1x34x34xf32> to vector<34x34xf32>
    %82 = vector.shape_cast %79 : vector<34x34xf32> to vector<1x34x34xf32>
    tpu.vector_store %arg7[%c2_36, %c0_37, %c0_38], %82 {strides = array<i32>} : memref<4x34x34xf32, #tpu.memory_space<vmem>>, vector<1x34x34xf32>,
    %c0_39 = arith.constant 0 : index
    %c3 = arith.constant 3 : index
    %c0_40 = arith.constant 0 : index
    %c0_41 = arith.constant 0 : index
    %83 = vector.load %arg1[%c0_39, %c3, %c0_40, %c0_41] : memref<1x4x16x16xf32, #tpu.memory_space<vmem>>, vector<1x1x16x16xf32>
    %84 = vector.shape_cast %83 : vector<1x1x16x16xf32> to vector<16x16xf32>
    %85 = arith.index_cast %31 : i32 to index
    %c3_42 = arith.constant 3 : index
    %86 = memref.load %arg2[%85, %c3_42] : memref<2x4xf32, #tpu.memory_space<smem>>
    %87 = vector.broadcast %86 : f32 to vector<16x16xf32>
    %88 = arith.mulf %84, %87 : vector<16x16xf32>
    %89 = arith.index_cast %31 : i32 to index
    %c3_43 = arith.constant 3 : index
    %90 = memref.load %arg3[%89, %c3_43] : memref<2x4xf32, #tpu.memory_space<smem>>
    %91 = vector.broadcast %90 : f32 to vector<16x16xf32>
    %92 = arith.addf %88, %91 : vector<16x16xf32>
    %cst_44 = arith.constant 0.000000e+00 : f32
    %93 = vector.broadcast %cst_44 : f32 to vector<16x16xf32>
    %94 = arith.maximumf %92, %93 : vector<16x16xf32>
    %cst_45 = arith.constant dense<0.000000e+00> : vector<16x34xf32>
    %95 = tpu.matmul %94, %29, %cst_45 {dimension_numbers = #tpu.dot_dimension_numbers<[1], [0], [0], [1], [0, 0, 1, 1], [], []>} : vector<16x16xf32>, vector<16x34xf32>, vector<16x34xf32> -> vector<16x34xf32>
    %cst_46 = arith.constant dense<0.000000e+00> : vector<34x34xf32>
    %96 = tpu.matmul %14, %95, %cst_46 {dimension_numbers = #tpu.dot_dimension_numbers<[1], [0], [0], [1], [0, 0, 1, 1], [], []>} : vector<34x16xf32>, vector<16x34xf32>, vector<34x34xf32> -> vector<34x34xf32>
    %c3_47 = arith.constant 3 : index
    %c0_48 = arith.constant 0 : index
    %c0_49 = arith.constant 0 : index
    %97 = vector.load %arg7[%c3_47, %c0_48, %c0_49] : memref<4x34x34xf32, #tpu.memory_space<vmem>>, vector<1x34x34xf32>
    %98 = vector.shape_cast %97 : vector<1x34x34xf32> to vector<34x34xf32>
    %99 = vector.shape_cast %96 : vector<34x34xf32> to vector<1x34x34xf32>
    tpu.vector_store %arg7[%c3_47, %c0_48, %c0_49], %99 {strides = array<i32>} : memref<4x34x34xf32, #tpu.memory_space<vmem>>, vector<1x34x34xf32>,
    %c0_50 = arith.constant 0 : index
    %100 = memref.load %arg5[%c0_50] : memref<8xf32, #tpu.memory_space<smem>>
    %101 = vector.broadcast %100 : f32 to vector<32x32xf32>
    %c1_51 = arith.constant 1 : index
    %102 = memref.load %arg5[%c1_51] : memref<8xf32, #tpu.memory_space<smem>>
    %103 = vector.broadcast %102 : f32 to vector<32x32xf32>
    %c2_52 = arith.constant 2 : index
    %104 = memref.load %arg5[%c2_52] : memref<8xf32, #tpu.memory_space<smem>>
    %105 = vector.broadcast %104 : f32 to vector<32x32xf32>
    %c3_53 = arith.constant 3 : index
    %106 = memref.load %arg5[%c3_53] : memref<8xf32, #tpu.memory_space<smem>>
    %107 = vector.broadcast %106 : f32 to vector<32x32xf32>
    %c4 = arith.constant 4 : index
    %108 = memref.load %arg5[%c4] : memref<8xf32, #tpu.memory_space<smem>>
    %109 = vector.broadcast %108 : f32 to vector<32x32xf32>
    %c5 = arith.constant 5 : index
    %110 = memref.load %arg5[%c5] : memref<8xf32, #tpu.memory_space<smem>>
    %111 = vector.broadcast %110 : f32 to vector<32x32xf32>
    %c6 = arith.constant 6 : index
    %112 = memref.load %arg5[%c6] : memref<8xf32, #tpu.memory_space<smem>>
    %113 = vector.broadcast %112 : f32 to vector<32x32xf32>
    %c7 = arith.constant 7 : index
    %114 = memref.load %arg5[%c7] : memref<8xf32, #tpu.memory_space<smem>>
    %115 = vector.broadcast %114 : f32 to vector<32x32xf32>
    %c0_54 = arith.constant 0 : index
    %c0_55 = arith.constant 0 : index
    %c0_56 = arith.constant 0 : index
    %116 = vector.load %arg7[%c0_54, %c0_55, %c0_56] : memref<4x34x34xf32, #tpu.memory_space<vmem>>, vector<1x32x32xf32>
    %117 = vector.shape_cast %116 : vector<1x32x32xf32> to vector<32x32xf32>
    %c0_57 = arith.constant 0 : index
    %118 = memref.load %arg4[%c0_57] : memref<288xf32, #tpu.memory_space<smem>>
    %119 = vector.broadcast %118 : f32 to vector<32x32xf32>
    %120 = arith.mulf %119, %117 : vector<32x32xf32>
    %121 = arith.addf %101, %120 : vector<32x32xf32>
    %c36 = arith.constant 36 : index
    %122 = memref.load %arg4[%c36] : memref<288xf32, #tpu.memory_space<smem>>
    %123 = vector.broadcast %122 : f32 to vector<32x32xf32>
    %124 = arith.mulf %123, %117 : vector<32x32xf32>
    %125 = arith.addf %103, %124 : vector<32x32xf32>
    %c72 = arith.constant 72 : index
    %126 = memref.load %arg4[%c72] : memref<288xf32, #tpu.memory_space<smem>>
    %127 = vector.broadcast %126 : f32 to vector<32x32xf32>
    %128 = arith.mulf %127, %117 : vector<32x32xf32>
    %129 = arith.addf %105, %128 : vector<32x32xf32>
    %c108 = arith.constant 108 : index
    %130 = memref.load %arg4[%c108] : memref<288xf32, #tpu.memory_space<smem>>
    %131 = vector.broadcast %130 : f32 to vector<32x32xf32>
    %132 = arith.mulf %131, %117 : vector<32x32xf32>
    %133 = arith.addf %107, %132 : vector<32x32xf32>
    %c144 = arith.constant 144 : index
    %134 = memref.load %arg4[%c144] : memref<288xf32, #tpu.memory_space<smem>>
    %135 = vector.broadcast %134 : f32 to vector<32x32xf32>
    %136 = arith.mulf %135, %117 : vector<32x32xf32>
    %137 = arith.addf %109, %136 : vector<32x32xf32>
    %c180 = arith.constant 180 : index
    %138 = memref.load %arg4[%c180] : memref<288xf32, #tpu.memory_space<smem>>
    %139 = vector.broadcast %138 : f32 to vector<32x32xf32>
    %140 = arith.mulf %139, %117 : vector<32x32xf32>
    %141 = arith.addf %111, %140 : vector<32x32xf32>
    %c216 = arith.constant 216 : index
    %142 = memref.load %arg4[%c216] : memref<288xf32, #tpu.memory_space<smem>>
    %143 = vector.broadcast %142 : f32 to vector<32x32xf32>
    %144 = arith.mulf %143, %117 : vector<32x32xf32>
    %145 = arith.addf %113, %144 : vector<32x32xf32>
    %c252 = arith.constant 252 : index
    %146 = memref.load %arg4[%c252] : memref<288xf32, #tpu.memory_space<smem>>
    %147 = vector.broadcast %146 : f32 to vector<32x32xf32>
    %148 = arith.mulf %147, %117 : vector<32x32xf32>
    %149 = arith.addf %115, %148 : vector<32x32xf32>
    %c0_58 = arith.constant 0 : index
    %c0_59 = arith.constant 0 : index
    %c1_60 = arith.constant 1 : index
    %150 = vector.load %arg7[%c0_58, %c0_59, %c1_60] : memref<4x34x34xf32, #tpu.memory_space<vmem>>, vector<1x32x32xf32>
    %151 = vector.shape_cast %150 : vector<1x32x32xf32> to vector<32x32xf32>
    %c1_61 = arith.constant 1 : index
    %152 = memref.load %arg4[%c1_61] : memref<288xf32, #tpu.memory_space<smem>>
    %153 = vector.broadcast %152 : f32 to vector<32x32xf32>
    %154 = arith.mulf %153, %151 : vector<32x32xf32>
    %155 = arith.addf %121, %154 : vector<32x32xf32>
    %c37 = arith.constant 37 : index
    %156 = memref.load %arg4[%c37] : memref<288xf32, #tpu.memory_space<smem>>
    %157 = vector.broadcast %156 : f32 to vector<32x32xf32>
    %158 = arith.mulf %157, %151 : vector<32x32xf32>
    %159 = arith.addf %125, %158 : vector<32x32xf32>
    %c73 = arith.constant 73 : index
    %160 = memref.load %arg4[%c73] : memref<288xf32, #tpu.memory_space<smem>>
    %161 = vector.broadcast %160 : f32 to vector<32x32xf32>
    %162 = arith.mulf %161, %151 : vector<32x32xf32>
    %163 = arith.addf %129, %162 : vector<32x32xf32>
    %c109 = arith.constant 109 : index
    %164 = memref.load %arg4[%c109] : memref<288xf32, #tpu.memory_space<smem>>
    %165 = vector.broadcast %164 : f32 to vector<32x32xf32>
    %166 = arith.mulf %165, %151 : vector<32x32xf32>
    %167 = arith.addf %133, %166 : vector<32x32xf32>
    %c145 = arith.constant 145 : index
    %168 = memref.load %arg4[%c145] : memref<288xf32, #tpu.memory_space<smem>>
    %169 = vector.broadcast %168 : f32 to vector<32x32xf32>
    %170 = arith.mulf %169, %151 : vector<32x32xf32>
    %171 = arith.addf %137, %170 : vector<32x32xf32>
    %c181 = arith.constant 181 : index
    %172 = memref.load %arg4[%c181] : memref<288xf32, #tpu.memory_space<smem>>
    %173 = vector.broadcast %172 : f32 to vector<32x32xf32>
    %174 = arith.mulf %173, %151 : vector<32x32xf32>
    %175 = arith.addf %141, %174 : vector<32x32xf32>
    %c217 = arith.constant 217 : index
    %176 = memref.load %arg4[%c217] : memref<288xf32, #tpu.memory_space<smem>>
    %177 = vector.broadcast %176 : f32 to vector<32x32xf32>
    %178 = arith.mulf %177, %151 : vector<32x32xf32>
    %179 = arith.addf %145, %178 : vector<32x32xf32>
    %c253 = arith.constant 253 : index
    %180 = memref.load %arg4[%c253] : memref<288xf32, #tpu.memory_space<smem>>
    %181 = vector.broadcast %180 : f32 to vector<32x32xf32>
    %182 = arith.mulf %181, %151 : vector<32x32xf32>
    %183 = arith.addf %149, %182 : vector<32x32xf32>
    %c0_62 = arith.constant 0 : index
    %c0_63 = arith.constant 0 : index
    %c2_64 = arith.constant 2 : index
    %184 = vector.load %arg7[%c0_62, %c0_63, %c2_64] : memref<4x34x34xf32, #tpu.memory_space<vmem>>, vector<1x32x32xf32>
    %185 = vector.shape_cast %184 : vector<1x32x32xf32> to vector<32x32xf32>
    %c2_65 = arith.constant 2 : index
    %186 = memref.load %arg4[%c2_65] : memref<288xf32, #tpu.memory_space<smem>>
    %187 = vector.broadcast %186 : f32 to vector<32x32xf32>
    %188 = arith.mulf %187, %185 : vector<32x32xf32>
    %189 = arith.addf %155, %188 : vector<32x32xf32>
    %c38 = arith.constant 38 : index
    %190 = memref.load %arg4[%c38] : memref<288xf32, #tpu.memory_space<smem>>
    %191 = vector.broadcast %190 : f32 to vector<32x32xf32>
    %192 = arith.mulf %191, %185 : vector<32x32xf32>
    %193 = arith.addf %159, %192 : vector<32x32xf32>
    %c74 = arith.constant 74 : index
    %194 = memref.load %arg4[%c74] : memref<288xf32, #tpu.memory_space<smem>>
    %195 = vector.broadcast %194 : f32 to vector<32x32xf32>
    %196 = arith.mulf %195, %185 : vector<32x32xf32>
    %197 = arith.addf %163, %196 : vector<32x32xf32>
    %c110 = arith.constant 110 : index
    %198 = memref.load %arg4[%c110] : memref<288xf32, #tpu.memory_space<smem>>
    %199 = vector.broadcast %198 : f32 to vector<32x32xf32>
    %200 = arith.mulf %199, %185 : vector<32x32xf32>
    %201 = arith.addf %167, %200 : vector<32x32xf32>
    %c146 = arith.constant 146 : index
    %202 = memref.load %arg4[%c146] : memref<288xf32, #tpu.memory_space<smem>>
    %203 = vector.broadcast %202 : f32 to vector<32x32xf32>
    %204 = arith.mulf %203, %185 : vector<32x32xf32>
    %205 = arith.addf %171, %204 : vector<32x32xf32>
    %c182 = arith.constant 182 : index
    %206 = memref.load %arg4[%c182] : memref<288xf32, #tpu.memory_space<smem>>
    %207 = vector.broadcast %206 : f32 to vector<32x32xf32>
    %208 = arith.mulf %207, %185 : vector<32x32xf32>
    %209 = arith.addf %175, %208 : vector<32x32xf32>
    %c218 = arith.constant 218 : index
    %210 = memref.load %arg4[%c218] : memref<288xf32, #tpu.memory_space<smem>>
    %211 = vector.broadcast %210 : f32 to vector<32x32xf32>
    %212 = arith.mulf %211, %185 : vector<32x32xf32>
    %213 = arith.addf %179, %212 : vector<32x32xf32>
    %c254 = arith.constant 254 : index
    %214 = memref.load %arg4[%c254] : memref<288xf32, #tpu.memory_space<smem>>
    %215 = vector.broadcast %214 : f32 to vector<32x32xf32>
    %216 = arith.mulf %215, %185 : vector<32x32xf32>
    %217 = arith.addf %183, %216 : vector<32x32xf32>
    %c0_66 = arith.constant 0 : index
    %c1_67 = arith.constant 1 : index
    %c0_68 = arith.constant 0 : index
    %218 = vector.load %arg7[%c0_66, %c1_67, %c0_68] : memref<4x34x34xf32, #tpu.memory_space<vmem>>, vector<1x32x32xf32>
    %219 = vector.shape_cast %218 : vector<1x32x32xf32> to vector<32x32xf32>
    %c3_69 = arith.constant 3 : index
    %220 = memref.load %arg4[%c3_69] : memref<288xf32, #tpu.memory_space<smem>>
    %221 = vector.broadcast %220 : f32 to vector<32x32xf32>
    %222 = arith.mulf %221, %219 : vector<32x32xf32>
    %223 = arith.addf %189, %222 : vector<32x32xf32>
    %c39 = arith.constant 39 : index
    %224 = memref.load %arg4[%c39] : memref<288xf32, #tpu.memory_space<smem>>
    %225 = vector.broadcast %224 : f32 to vector<32x32xf32>
    %226 = arith.mulf %225, %219 : vector<32x32xf32>
    %227 = arith.addf %193, %226 : vector<32x32xf32>
    %c75 = arith.constant 75 : index
    %228 = memref.load %arg4[%c75] : memref<288xf32, #tpu.memory_space<smem>>
    %229 = vector.broadcast %228 : f32 to vector<32x32xf32>
    %230 = arith.mulf %229, %219 : vector<32x32xf32>
    %231 = arith.addf %197, %230 : vector<32x32xf32>
    %c111 = arith.constant 111 : index
    %232 = memref.load %arg4[%c111] : memref<288xf32, #tpu.memory_space<smem>>
    %233 = vector.broadcast %232 : f32 to vector<32x32xf32>
    %234 = arith.mulf %233, %219 : vector<32x32xf32>
    %235 = arith.addf %201, %234 : vector<32x32xf32>
    %c147 = arith.constant 147 : index
    %236 = memref.load %arg4[%c147] : memref<288xf32, #tpu.memory_space<smem>>
    %237 = vector.broadcast %236 : f32 to vector<32x32xf32>
    %238 = arith.mulf %237, %219 : vector<32x32xf32>
    %239 = arith.addf %205, %238 : vector<32x32xf32>
    %c183 = arith.constant 183 : index
    %240 = memref.load %arg4[%c183] : memref<288xf32, #tpu.memory_space<smem>>
    %241 = vector.broadcast %240 : f32 to vector<32x32xf32>
    %242 = arith.mulf %241, %219 : vector<32x32xf32>
    %243 = arith.addf %209, %242 : vector<32x32xf32>
    %c219 = arith.constant 219 : index
    %244 = memref.load %arg4[%c219] : memref<288xf32, #tpu.memory_space<smem>>
    %245 = vector.broadcast %244 : f32 to vector<32x32xf32>
    %246 = arith.mulf %245, %219 : vector<32x32xf32>
    %247 = arith.addf %213, %246 : vector<32x32xf32>
    %c255 = arith.constant 255 : index
    %248 = memref.load %arg4[%c255] : memref<288xf32, #tpu.memory_space<smem>>
    %249 = vector.broadcast %248 : f32 to vector<32x32xf32>
    %250 = arith.mulf %249, %219 : vector<32x32xf32>
    %251 = arith.addf %217, %250 : vector<32x32xf32>
    %c0_70 = arith.constant 0 : index
    %c1_71 = arith.constant 1 : index
    %c1_72 = arith.constant 1 : index
    %252 = vector.load %arg7[%c0_70, %c1_71, %c1_72] : memref<4x34x34xf32, #tpu.memory_space<vmem>>, vector<1x32x32xf32>
    %253 = vector.shape_cast %252 : vector<1x32x32xf32> to vector<32x32xf32>
    %c4_73 = arith.constant 4 : index
    %254 = memref.load %arg4[%c4_73] : memref<288xf32, #tpu.memory_space<smem>>
    %255 = vector.broadcast %254 : f32 to vector<32x32xf32>
    %256 = arith.mulf %255, %253 : vector<32x32xf32>
    %257 = arith.addf %223, %256 : vector<32x32xf32>
    %c40 = arith.constant 40 : index
    %258 = memref.load %arg4[%c40] : memref<288xf32, #tpu.memory_space<smem>>
    %259 = vector.broadcast %258 : f32 to vector<32x32xf32>
    %260 = arith.mulf %259, %253 : vector<32x32xf32>
    %261 = arith.addf %227, %260 : vector<32x32xf32>
    %c76 = arith.constant 76 : index
    %262 = memref.load %arg4[%c76] : memref<288xf32, #tpu.memory_space<smem>>
    %263 = vector.broadcast %262 : f32 to vector<32x32xf32>
    %264 = arith.mulf %263, %253 : vector<32x32xf32>
    %265 = arith.addf %231, %264 : vector<32x32xf32>
    %c112 = arith.constant 112 : index
    %266 = memref.load %arg4[%c112] : memref<288xf32, #tpu.memory_space<smem>>
    %267 = vector.broadcast %266 : f32 to vector<32x32xf32>
    %268 = arith.mulf %267, %253 : vector<32x32xf32>
    %269 = arith.addf %235, %268 : vector<32x32xf32>
    %c148 = arith.constant 148 : index
    %270 = memref.load %arg4[%c148] : memref<288xf32, #tpu.memory_space<smem>>
    %271 = vector.broadcast %270 : f32 to vector<32x32xf32>
    %272 = arith.mulf %271, %253 : vector<32x32xf32>
    %273 = arith.addf %239, %272 : vector<32x32xf32>
    %c184 = arith.constant 184 : index
    %274 = memref.load %arg4[%c184] : memref<288xf32, #tpu.memory_space<smem>>
    %275 = vector.broadcast %274 : f32 to vector<32x32xf32>
    %276 = arith.mulf %275, %253 : vector<32x32xf32>
    %277 = arith.addf %243, %276 : vector<32x32xf32>
    %c220 = arith.constant 220 : index
    %278 = memref.load %arg4[%c220] : memref<288xf32, #tpu.memory_space<smem>>
    %279 = vector.broadcast %278 : f32 to vector<32x32xf32>
    %280 = arith.mulf %279, %253 : vector<32x32xf32>
    %281 = arith.addf %247, %280 : vector<32x32xf32>
    %c256 = arith.constant 256 : index
    %282 = memref.load %arg4[%c256] : memref<288xf32, #tpu.memory_space<smem>>
    %283 = vector.broadcast %282 : f32 to vector<32x32xf32>
    %284 = arith.mulf %283, %253 : vector<32x32xf32>
    %285 = arith.addf %251, %284 : vector<32x32xf32>
    %c0_74 = arith.constant 0 : index
    %c1_75 = arith.constant 1 : index
    %c2_76 = arith.constant 2 : index
    %286 = vector.load %arg7[%c0_74, %c1_75, %c2_76] : memref<4x34x34xf32, #tpu.memory_space<vmem>>, vector<1x32x32xf32>
    %287 = vector.shape_cast %286 : vector<1x32x32xf32> to vector<32x32xf32>
    %c5_77 = arith.constant 5 : index
    %288 = memref.load %arg4[%c5_77] : memref<288xf32, #tpu.memory_space<smem>>
    %289 = vector.broadcast %288 : f32 to vector<32x32xf32>
    %290 = arith.mulf %289, %287 : vector<32x32xf32>
    %291 = arith.addf %257, %290 : vector<32x32xf32>
    %c41 = arith.constant 41 : index
    %292 = memref.load %arg4[%c41] : memref<288xf32, #tpu.memory_space<smem>>
    %293 = vector.broadcast %292 : f32 to vector<32x32xf32>
    %294 = arith.mulf %293, %287 : vector<32x32xf32>
    %295 = arith.addf %261, %294 : vector<32x32xf32>
    %c77 = arith.constant 77 : index
    %296 = memref.load %arg4[%c77] : memref<288xf32, #tpu.memory_space<smem>>
    %297 = vector.broadcast %296 : f32 to vector<32x32xf32>
    %298 = arith.mulf %297, %287 : vector<32x32xf32>
    %299 = arith.addf %265, %298 : vector<32x32xf32>
    %c113 = arith.constant 113 : index
    %300 = memref.load %arg4[%c113] : memref<288xf32, #tpu.memory_space<smem>>
    %301 = vector.broadcast %300 : f32 to vector<32x32xf32>
    %302 = arith.mulf %301, %287 : vector<32x32xf32>
    %303 = arith.addf %269, %302 : vector<32x32xf32>
    %c149 = arith.constant 149 : index
    %304 = memref.load %arg4[%c149] : memref<288xf32, #tpu.memory_space<smem>>
    %305 = vector.broadcast %304 : f32 to vector<32x32xf32>
    %306 = arith.mulf %305, %287 : vector<32x32xf32>
    %307 = arith.addf %273, %306 : vector<32x32xf32>
    %c185 = arith.constant 185 : index
    %308 = memref.load %arg4[%c185] : memref<288xf32, #tpu.memory_space<smem>>
    %309 = vector.broadcast %308 : f32 to vector<32x32xf32>
    %310 = arith.mulf %309, %287 : vector<32x32xf32>
    %311 = arith.addf %277, %310 : vector<32x32xf32>
    %c221 = arith.constant 221 : index
    %312 = memref.load %arg4[%c221] : memref<288xf32, #tpu.memory_space<smem>>
    %313 = vector.broadcast %312 : f32 to vector<32x32xf32>
    %314 = arith.mulf %313, %287 : vector<32x32xf32>
    %315 = arith.addf %281, %314 : vector<32x32xf32>
    %c257 = arith.constant 257 : index
    %316 = memref.load %arg4[%c257] : memref<288xf32, #tpu.memory_space<smem>>
    %317 = vector.broadcast %316 : f32 to vector<32x32xf32>
    %318 = arith.mulf %317, %287 : vector<32x32xf32>
    %319 = arith.addf %285, %318 : vector<32x32xf32>
    %c0_78 = arith.constant 0 : index
    %c2_79 = arith.constant 2 : index
    %c0_80 = arith.constant 0 : index
    %320 = vector.load %arg7[%c0_78, %c2_79, %c0_80] : memref<4x34x34xf32, #tpu.memory_space<vmem>>, vector<1x32x32xf32>
    %321 = vector.shape_cast %320 : vector<1x32x32xf32> to vector<32x32xf32>
    %c6_81 = arith.constant 6 : index
    %322 = memref.load %arg4[%c6_81] : memref<288xf32, #tpu.memory_space<smem>>
    %323 = vector.broadcast %322 : f32 to vector<32x32xf32>
    %324 = arith.mulf %323, %321 : vector<32x32xf32>
    %325 = arith.addf %291, %324 : vector<32x32xf32>
    %c42 = arith.constant 42 : index
    %326 = memref.load %arg4[%c42] : memref<288xf32, #tpu.memory_space<smem>>
    %327 = vector.broadcast %326 : f32 to vector<32x32xf32>
    %328 = arith.mulf %327, %321 : vector<32x32xf32>
    %329 = arith.addf %295, %328 : vector<32x32xf32>
    %c78 = arith.constant 78 : index
    %330 = memref.load %arg4[%c78] : memref<288xf32, #tpu.memory_space<smem>>
    %331 = vector.broadcast %330 : f32 to vector<32x32xf32>
    %332 = arith.mulf %331, %321 : vector<32x32xf32>
    %333 = arith.addf %299, %332 : vector<32x32xf32>
    %c114 = arith.constant 114 : index
    %334 = memref.load %arg4[%c114] : memref<288xf32, #tpu.memory_space<smem>>
    %335 = vector.broadcast %334 : f32 to vector<32x32xf32>
    %336 = arith.mulf %335, %321 : vector<32x32xf32>
    %337 = arith.addf %303, %336 : vector<32x32xf32>
    %c150 = arith.constant 150 : index
    %338 = memref.load %arg4[%c150] : memref<288xf32, #tpu.memory_space<smem>>
    %339 = vector.broadcast %338 : f32 to vector<32x32xf32>
    %340 = arith.mulf %339, %321 : vector<32x32xf32>
    %341 = arith.addf %307, %340 : vector<32x32xf32>
    %c186 = arith.constant 186 : index
    %342 = memref.load %arg4[%c186] : memref<288xf32, #tpu.memory_space<smem>>
    %343 = vector.broadcast %342 : f32 to vector<32x32xf32>
    %344 = arith.mulf %343, %321 : vector<32x32xf32>
    %345 = arith.addf %311, %344 : vector<32x32xf32>
    %c222 = arith.constant 222 : index
    %346 = memref.load %arg4[%c222] : memref<288xf32, #tpu.memory_space<smem>>
    %347 = vector.broadcast %346 : f32 to vector<32x32xf32>
    %348 = arith.mulf %347, %321 : vector<32x32xf32>
    %349 = arith.addf %315, %348 : vector<32x32xf32>
    %c258 = arith.constant 258 : index
    %350 = memref.load %arg4[%c258] : memref<288xf32, #tpu.memory_space<smem>>
    %351 = vector.broadcast %350 : f32 to vector<32x32xf32>
    %352 = arith.mulf %351, %321 : vector<32x32xf32>
    %353 = arith.addf %319, %352 : vector<32x32xf32>
    %c0_82 = arith.constant 0 : index
    %c2_83 = arith.constant 2 : index
    %c1_84 = arith.constant 1 : index
    %354 = vector.load %arg7[%c0_82, %c2_83, %c1_84] : memref<4x34x34xf32, #tpu.memory_space<vmem>>, vector<1x32x32xf32>
    %355 = vector.shape_cast %354 : vector<1x32x32xf32> to vector<32x32xf32>
    %c7_85 = arith.constant 7 : index
    %356 = memref.load %arg4[%c7_85] : memref<288xf32, #tpu.memory_space<smem>>
    %357 = vector.broadcast %356 : f32 to vector<32x32xf32>
    %358 = arith.mulf %357, %355 : vector<32x32xf32>
    %359 = arith.addf %325, %358 : vector<32x32xf32>
    %c43 = arith.constant 43 : index
    %360 = memref.load %arg4[%c43] : memref<288xf32, #tpu.memory_space<smem>>
    %361 = vector.broadcast %360 : f32 to vector<32x32xf32>
    %362 = arith.mulf %361, %355 : vector<32x32xf32>
    %363 = arith.addf %329, %362 : vector<32x32xf32>
    %c79 = arith.constant 79 : index
    %364 = memref.load %arg4[%c79] : memref<288xf32, #tpu.memory_space<smem>>
    %365 = vector.broadcast %364 : f32 to vector<32x32xf32>
    %366 = arith.mulf %365, %355 : vector<32x32xf32>
    %367 = arith.addf %333, %366 : vector<32x32xf32>
    %c115 = arith.constant 115 : index
    %368 = memref.load %arg4[%c115] : memref<288xf32, #tpu.memory_space<smem>>
    %369 = vector.broadcast %368 : f32 to vector<32x32xf32>
    %370 = arith.mulf %369, %355 : vector<32x32xf32>
    %371 = arith.addf %337, %370 : vector<32x32xf32>
    %c151 = arith.constant 151 : index
    %372 = memref.load %arg4[%c151] : memref<288xf32, #tpu.memory_space<smem>>
    %373 = vector.broadcast %372 : f32 to vector<32x32xf32>
    %374 = arith.mulf %373, %355 : vector<32x32xf32>
    %375 = arith.addf %341, %374 : vector<32x32xf32>
    %c187 = arith.constant 187 : index
    %376 = memref.load %arg4[%c187] : memref<288xf32, #tpu.memory_space<smem>>
    %377 = vector.broadcast %376 : f32 to vector<32x32xf32>
    %378 = arith.mulf %377, %355 : vector<32x32xf32>
    %379 = arith.addf %345, %378 : vector<32x32xf32>
    %c223 = arith.constant 223 : index
    %380 = memref.load %arg4[%c223] : memref<288xf32, #tpu.memory_space<smem>>
    %381 = vector.broadcast %380 : f32 to vector<32x32xf32>
    %382 = arith.mulf %381, %355 : vector<32x32xf32>
    %383 = arith.addf %349, %382 : vector<32x32xf32>
    %c259 = arith.constant 259 : index
    %384 = memref.load %arg4[%c259] : memref<288xf32, #tpu.memory_space<smem>>
    %385 = vector.broadcast %384 : f32 to vector<32x32xf32>
    %386 = arith.mulf %385, %355 : vector<32x32xf32>
    %387 = arith.addf %353, %386 : vector<32x32xf32>
    %c0_86 = arith.constant 0 : index
    %c2_87 = arith.constant 2 : index
    %c2_88 = arith.constant 2 : index
    %388 = vector.load %arg7[%c0_86, %c2_87, %c2_88] : memref<4x34x34xf32, #tpu.memory_space<vmem>>, vector<1x32x32xf32>
    %389 = vector.shape_cast %388 : vector<1x32x32xf32> to vector<32x32xf32>
    %c8 = arith.constant 8 : index
    %390 = memref.load %arg4[%c8] : memref<288xf32, #tpu.memory_space<smem>>
    %391 = vector.broadcast %390 : f32 to vector<32x32xf32>
    %392 = arith.mulf %391, %389 : vector<32x32xf32>
    %393 = arith.addf %359, %392 : vector<32x32xf32>
    %c44 = arith.constant 44 : index
    %394 = memref.load %arg4[%c44] : memref<288xf32, #tpu.memory_space<smem>>
    %395 = vector.broadcast %394 : f32 to vector<32x32xf32>
    %396 = arith.mulf %395, %389 : vector<32x32xf32>
    %397 = arith.addf %363, %396 : vector<32x32xf32>
    %c80 = arith.constant 80 : index
    %398 = memref.load %arg4[%c80] : memref<288xf32, #tpu.memory_space<smem>>
    %399 = vector.broadcast %398 : f32 to vector<32x32xf32>
    %400 = arith.mulf %399, %389 : vector<32x32xf32>
    %401 = arith.addf %367, %400 : vector<32x32xf32>
    %c116 = arith.constant 116 : index
    %402 = memref.load %arg4[%c116] : memref<288xf32, #tpu.memory_space<smem>>
    %403 = vector.broadcast %402 : f32 to vector<32x32xf32>
    %404 = arith.mulf %403, %389 : vector<32x32xf32>
    %405 = arith.addf %371, %404 : vector<32x32xf32>
    %c152 = arith.constant 152 : index
    %406 = memref.load %arg4[%c152] : memref<288xf32, #tpu.memory_space<smem>>
    %407 = vector.broadcast %406 : f32 to vector<32x32xf32>
    %408 = arith.mulf %407, %389 : vector<32x32xf32>
    %409 = arith.addf %375, %408 : vector<32x32xf32>
    %c188 = arith.constant 188 : index
    %410 = memref.load %arg4[%c188] : memref<288xf32, #tpu.memory_space<smem>>
    %411 = vector.broadcast %410 : f32 to vector<32x32xf32>
    %412 = arith.mulf %411, %389 : vector<32x32xf32>
    %413 = arith.addf %379, %412 : vector<32x32xf32>
    %c224 = arith.constant 224 : index
    %414 = memref.load %arg4[%c224] : memref<288xf32, #tpu.memory_space<smem>>
    %415 = vector.broadcast %414 : f32 to vector<32x32xf32>
    %416 = arith.mulf %415, %389 : vector<32x32xf32>
    %417 = arith.addf %383, %416 : vector<32x32xf32>
    %c260 = arith.constant 260 : index
    %418 = memref.load %arg4[%c260] : memref<288xf32, #tpu.memory_space<smem>>
    %419 = vector.broadcast %418 : f32 to vector<32x32xf32>
    %420 = arith.mulf %419, %389 : vector<32x32xf32>
    %421 = arith.addf %387, %420 : vector<32x32xf32>
    %c1_89 = arith.constant 1 : index
    %c0_90 = arith.constant 0 : index
    %c0_91 = arith.constant 0 : index
    %422 = vector.load %arg7[%c1_89, %c0_90, %c0_91] : memref<4x34x34xf32, #tpu.memory_space<vmem>>, vector<1x32x32xf32>
    %423 = vector.shape_cast %422 : vector<1x32x32xf32> to vector<32x32xf32>
    %c9 = arith.constant 9 : index
    %424 = memref.load %arg4[%c9] : memref<288xf32, #tpu.memory_space<smem>>
    %425 = vector.broadcast %424 : f32 to vector<32x32xf32>
    %426 = arith.mulf %425, %423 : vector<32x32xf32>
    %427 = arith.addf %393, %426 : vector<32x32xf32>
    %c45 = arith.constant 45 : index
    %428 = memref.load %arg4[%c45] : memref<288xf32, #tpu.memory_space<smem>>
    %429 = vector.broadcast %428 : f32 to vector<32x32xf32>
    %430 = arith.mulf %429, %423 : vector<32x32xf32>
    %431 = arith.addf %397, %430 : vector<32x32xf32>
    %c81 = arith.constant 81 : index
    %432 = memref.load %arg4[%c81] : memref<288xf32, #tpu.memory_space<smem>>
    %433 = vector.broadcast %432 : f32 to vector<32x32xf32>
    %434 = arith.mulf %433, %423 : vector<32x32xf32>
    %435 = arith.addf %401, %434 : vector<32x32xf32>
    %c117 = arith.constant 117 : index
    %436 = memref.load %arg4[%c117] : memref<288xf32, #tpu.memory_space<smem>>
    %437 = vector.broadcast %436 : f32 to vector<32x32xf32>
    %438 = arith.mulf %437, %423 : vector<32x32xf32>
    %439 = arith.addf %405, %438 : vector<32x32xf32>
    %c153 = arith.constant 153 : index
    %440 = memref.load %arg4[%c153] : memref<288xf32, #tpu.memory_space<smem>>
    %441 = vector.broadcast %440 : f32 to vector<32x32xf32>
    %442 = arith.mulf %441, %423 : vector<32x32xf32>
    %443 = arith.addf %409, %442 : vector<32x32xf32>
    %c189 = arith.constant 189 : index
    %444 = memref.load %arg4[%c189] : memref<288xf32, #tpu.memory_space<smem>>
    %445 = vector.broadcast %444 : f32 to vector<32x32xf32>
    %446 = arith.mulf %445, %423 : vector<32x32xf32>
    %447 = arith.addf %413, %446 : vector<32x32xf32>
    %c225 = arith.constant 225 : index
    %448 = memref.load %arg4[%c225] : memref<288xf32, #tpu.memory_space<smem>>
    %449 = vector.broadcast %448 : f32 to vector<32x32xf32>
    %450 = arith.mulf %449, %423 : vector<32x32xf32>
    %451 = arith.addf %417, %450 : vector<32x32xf32>
    %c261 = arith.constant 261 : index
    %452 = memref.load %arg4[%c261] : memref<288xf32, #tpu.memory_space<smem>>
    %453 = vector.broadcast %452 : f32 to vector<32x32xf32>
    %454 = arith.mulf %453, %423 : vector<32x32xf32>
    %455 = arith.addf %421, %454 : vector<32x32xf32>
    %c1_92 = arith.constant 1 : index
    %c0_93 = arith.constant 0 : index
    %c1_94 = arith.constant 1 : index
    %456 = vector.load %arg7[%c1_92, %c0_93, %c1_94] : memref<4x34x34xf32, #tpu.memory_space<vmem>>, vector<1x32x32xf32>
    %457 = vector.shape_cast %456 : vector<1x32x32xf32> to vector<32x32xf32>
    %c10 = arith.constant 10 : index
    %458 = memref.load %arg4[%c10] : memref<288xf32, #tpu.memory_space<smem>>
    %459 = vector.broadcast %458 : f32 to vector<32x32xf32>
    %460 = arith.mulf %459, %457 : vector<32x32xf32>
    %461 = arith.addf %427, %460 : vector<32x32xf32>
    %c46 = arith.constant 46 : index
    %462 = memref.load %arg4[%c46] : memref<288xf32, #tpu.memory_space<smem>>
    %463 = vector.broadcast %462 : f32 to vector<32x32xf32>
    %464 = arith.mulf %463, %457 : vector<32x32xf32>
    %465 = arith.addf %431, %464 : vector<32x32xf32>
    %c82 = arith.constant 82 : index
    %466 = memref.load %arg4[%c82] : memref<288xf32, #tpu.memory_space<smem>>
    %467 = vector.broadcast %466 : f32 to vector<32x32xf32>
    %468 = arith.mulf %467, %457 : vector<32x32xf32>
    %469 = arith.addf %435, %468 : vector<32x32xf32>
    %c118 = arith.constant 118 : index
    %470 = memref.load %arg4[%c118] : memref<288xf32, #tpu.memory_space<smem>>
    %471 = vector.broadcast %470 : f32 to vector<32x32xf32>
    %472 = arith.mulf %471, %457 : vector<32x32xf32>
    %473 = arith.addf %439, %472 : vector<32x32xf32>
    %c154 = arith.constant 154 : index
    %474 = memref.load %arg4[%c154] : memref<288xf32, #tpu.memory_space<smem>>
    %475 = vector.broadcast %474 : f32 to vector<32x32xf32>
    %476 = arith.mulf %475, %457 : vector<32x32xf32>
    %477 = arith.addf %443, %476 : vector<32x32xf32>
    %c190 = arith.constant 190 : index
    %478 = memref.load %arg4[%c190] : memref<288xf32, #tpu.memory_space<smem>>
    %479 = vector.broadcast %478 : f32 to vector<32x32xf32>
    %480 = arith.mulf %479, %457 : vector<32x32xf32>
    %481 = arith.addf %447, %480 : vector<32x32xf32>
    %c226 = arith.constant 226 : index
    %482 = memref.load %arg4[%c226] : memref<288xf32, #tpu.memory_space<smem>>
    %483 = vector.broadcast %482 : f32 to vector<32x32xf32>
    %484 = arith.mulf %483, %457 : vector<32x32xf32>
    %485 = arith.addf %451, %484 : vector<32x32xf32>
    %c262 = arith.constant 262 : index
    %486 = memref.load %arg4[%c262] : memref<288xf32, #tpu.memory_space<smem>>
    %487 = vector.broadcast %486 : f32 to vector<32x32xf32>
    %488 = arith.mulf %487, %457 : vector<32x32xf32>
    %489 = arith.addf %455, %488 : vector<32x32xf32>
    %c1_95 = arith.constant 1 : index
    %c0_96 = arith.constant 0 : index
    %c2_97 = arith.constant 2 : index
    %490 = vector.load %arg7[%c1_95, %c0_96, %c2_97] : memref<4x34x34xf32, #tpu.memory_space<vmem>>, vector<1x32x32xf32>
    %491 = vector.shape_cast %490 : vector<1x32x32xf32> to vector<32x32xf32>
    %c11 = arith.constant 11 : index
    %492 = memref.load %arg4[%c11] : memref<288xf32, #tpu.memory_space<smem>>
    %493 = vector.broadcast %492 : f32 to vector<32x32xf32>
    %494 = arith.mulf %493, %491 : vector<32x32xf32>
    %495 = arith.addf %461, %494 : vector<32x32xf32>
    %c47 = arith.constant 47 : index
    %496 = memref.load %arg4[%c47] : memref<288xf32, #tpu.memory_space<smem>>
    %497 = vector.broadcast %496 : f32 to vector<32x32xf32>
    %498 = arith.mulf %497, %491 : vector<32x32xf32>
    %499 = arith.addf %465, %498 : vector<32x32xf32>
    %c83 = arith.constant 83 : index
    %500 = memref.load %arg4[%c83] : memref<288xf32, #tpu.memory_space<smem>>
    %501 = vector.broadcast %500 : f32 to vector<32x32xf32>
    %502 = arith.mulf %501, %491 : vector<32x32xf32>
    %503 = arith.addf %469, %502 : vector<32x32xf32>
    %c119 = arith.constant 119 : index
    %504 = memref.load %arg4[%c119] : memref<288xf32, #tpu.memory_space<smem>>
    %505 = vector.broadcast %504 : f32 to vector<32x32xf32>
    %506 = arith.mulf %505, %491 : vector<32x32xf32>
    %507 = arith.addf %473, %506 : vector<32x32xf32>
    %c155 = arith.constant 155 : index
    %508 = memref.load %arg4[%c155] : memref<288xf32, #tpu.memory_space<smem>>
    %509 = vector.broadcast %508 : f32 to vector<32x32xf32>
    %510 = arith.mulf %509, %491 : vector<32x32xf32>
    %511 = arith.addf %477, %510 : vector<32x32xf32>
    %c191 = arith.constant 191 : index
    %512 = memref.load %arg4[%c191] : memref<288xf32, #tpu.memory_space<smem>>
    %513 = vector.broadcast %512 : f32 to vector<32x32xf32>
    %514 = arith.mulf %513, %491 : vector<32x32xf32>
    %515 = arith.addf %481, %514 : vector<32x32xf32>
    %c227 = arith.constant 227 : index
    %516 = memref.load %arg4[%c227] : memref<288xf32, #tpu.memory_space<smem>>
    %517 = vector.broadcast %516 : f32 to vector<32x32xf32>
    %518 = arith.mulf %517, %491 : vector<32x32xf32>
    %519 = arith.addf %485, %518 : vector<32x32xf32>
    %c263 = arith.constant 263 : index
    %520 = memref.load %arg4[%c263] : memref<288xf32, #tpu.memory_space<smem>>
    %521 = vector.broadcast %520 : f32 to vector<32x32xf32>
    %522 = arith.mulf %521, %491 : vector<32x32xf32>
    %523 = arith.addf %489, %522 : vector<32x32xf32>
    %c1_98 = arith.constant 1 : index
    %c1_99 = arith.constant 1 : index
    %c0_100 = arith.constant 0 : index
    %524 = vector.load %arg7[%c1_98, %c1_99, %c0_100] : memref<4x34x34xf32, #tpu.memory_space<vmem>>, vector<1x32x32xf32>
    %525 = vector.shape_cast %524 : vector<1x32x32xf32> to vector<32x32xf32>
    %c12 = arith.constant 12 : index
    %526 = memref.load %arg4[%c12] : memref<288xf32, #tpu.memory_space<smem>>
    %527 = vector.broadcast %526 : f32 to vector<32x32xf32>
    %528 = arith.mulf %527, %525 : vector<32x32xf32>
    %529 = arith.addf %495, %528 : vector<32x32xf32>
    %c48 = arith.constant 48 : index
    %530 = memref.load %arg4[%c48] : memref<288xf32, #tpu.memory_space<smem>>
    %531 = vector.broadcast %530 : f32 to vector<32x32xf32>
    %532 = arith.mulf %531, %525 : vector<32x32xf32>
    %533 = arith.addf %499, %532 : vector<32x32xf32>
    %c84 = arith.constant 84 : index
    %534 = memref.load %arg4[%c84] : memref<288xf32, #tpu.memory_space<smem>>
    %535 = vector.broadcast %534 : f32 to vector<32x32xf32>
    %536 = arith.mulf %535, %525 : vector<32x32xf32>
    %537 = arith.addf %503, %536 : vector<32x32xf32>
    %c120 = arith.constant 120 : index
    %538 = memref.load %arg4[%c120] : memref<288xf32, #tpu.memory_space<smem>>
    %539 = vector.broadcast %538 : f32 to vector<32x32xf32>
    %540 = arith.mulf %539, %525 : vector<32x32xf32>
    %541 = arith.addf %507, %540 : vector<32x32xf32>
    %c156 = arith.constant 156 : index
    %542 = memref.load %arg4[%c156] : memref<288xf32, #tpu.memory_space<smem>>
    %543 = vector.broadcast %542 : f32 to vector<32x32xf32>
    %544 = arith.mulf %543, %525 : vector<32x32xf32>
    %545 = arith.addf %511, %544 : vector<32x32xf32>
    %c192 = arith.constant 192 : index
    %546 = memref.load %arg4[%c192] : memref<288xf32, #tpu.memory_space<smem>>
    %547 = vector.broadcast %546 : f32 to vector<32x32xf32>
    %548 = arith.mulf %547, %525 : vector<32x32xf32>
    %549 = arith.addf %515, %548 : vector<32x32xf32>
    %c228 = arith.constant 228 : index
    %550 = memref.load %arg4[%c228] : memref<288xf32, #tpu.memory_space<smem>>
    %551 = vector.broadcast %550 : f32 to vector<32x32xf32>
    %552 = arith.mulf %551, %525 : vector<32x32xf32>
    %553 = arith.addf %519, %552 : vector<32x32xf32>
    %c264 = arith.constant 264 : index
    %554 = memref.load %arg4[%c264] : memref<288xf32, #tpu.memory_space<smem>>
    %555 = vector.broadcast %554 : f32 to vector<32x32xf32>
    %556 = arith.mulf %555, %525 : vector<32x32xf32>
    %557 = arith.addf %523, %556 : vector<32x32xf32>
    %c1_101 = arith.constant 1 : index
    %c1_102 = arith.constant 1 : index
    %c1_103 = arith.constant 1 : index
    %558 = vector.load %arg7[%c1_101, %c1_102, %c1_103] : memref<4x34x34xf32, #tpu.memory_space<vmem>>, vector<1x32x32xf32>
    %559 = vector.shape_cast %558 : vector<1x32x32xf32> to vector<32x32xf32>
    %c13 = arith.constant 13 : index
    %560 = memref.load %arg4[%c13] : memref<288xf32, #tpu.memory_space<smem>>
    %561 = vector.broadcast %560 : f32 to vector<32x32xf32>
    %562 = arith.mulf %561, %559 : vector<32x32xf32>
    %563 = arith.addf %529, %562 : vector<32x32xf32>
    %c49 = arith.constant 49 : index
    %564 = memref.load %arg4[%c49] : memref<288xf32, #tpu.memory_space<smem>>
    %565 = vector.broadcast %564 : f32 to vector<32x32xf32>
    %566 = arith.mulf %565, %559 : vector<32x32xf32>
    %567 = arith.addf %533, %566 : vector<32x32xf32>
    %c85 = arith.constant 85 : index
    %568 = memref.load %arg4[%c85] : memref<288xf32, #tpu.memory_space<smem>>
    %569 = vector.broadcast %568 : f32 to vector<32x32xf32>
    %570 = arith.mulf %569, %559 : vector<32x32xf32>
    %571 = arith.addf %537, %570 : vector<32x32xf32>
    %c121 = arith.constant 121 : index
    %572 = memref.load %arg4[%c121] : memref<288xf32, #tpu.memory_space<smem>>
    %573 = vector.broadcast %572 : f32 to vector<32x32xf32>
    %574 = arith.mulf %573, %559 : vector<32x32xf32>
    %575 = arith.addf %541, %574 : vector<32x32xf32>
    %c157 = arith.constant 157 : index
    %576 = memref.load %arg4[%c157] : memref<288xf32, #tpu.memory_space<smem>>
    %577 = vector.broadcast %576 : f32 to vector<32x32xf32>
    %578 = arith.mulf %577, %559 : vector<32x32xf32>
    %579 = arith.addf %545, %578 : vector<32x32xf32>
    %c193 = arith.constant 193 : index
    %580 = memref.load %arg4[%c193] : memref<288xf32, #tpu.memory_space<smem>>
    %581 = vector.broadcast %580 : f32 to vector<32x32xf32>
    %582 = arith.mulf %581, %559 : vector<32x32xf32>
    %583 = arith.addf %549, %582 : vector<32x32xf32>
    %c229 = arith.constant 229 : index
    %584 = memref.load %arg4[%c229] : memref<288xf32, #tpu.memory_space<smem>>
    %585 = vector.broadcast %584 : f32 to vector<32x32xf32>
    %586 = arith.mulf %585, %559 : vector<32x32xf32>
    %587 = arith.addf %553, %586 : vector<32x32xf32>
    %c265 = arith.constant 265 : index
    %588 = memref.load %arg4[%c265] : memref<288xf32, #tpu.memory_space<smem>>
    %589 = vector.broadcast %588 : f32 to vector<32x32xf32>
    %590 = arith.mulf %589, %559 : vector<32x32xf32>
    %591 = arith.addf %557, %590 : vector<32x32xf32>
    %c1_104 = arith.constant 1 : index
    %c1_105 = arith.constant 1 : index
    %c2_106 = arith.constant 2 : index
    %592 = vector.load %arg7[%c1_104, %c1_105, %c2_106] : memref<4x34x34xf32, #tpu.memory_space<vmem>>, vector<1x32x32xf32>
    %593 = vector.shape_cast %592 : vector<1x32x32xf32> to vector<32x32xf32>
    %c14 = arith.constant 14 : index
    %594 = memref.load %arg4[%c14] : memref<288xf32, #tpu.memory_space<smem>>
    %595 = vector.broadcast %594 : f32 to vector<32x32xf32>
    %596 = arith.mulf %595, %593 : vector<32x32xf32>
    %597 = arith.addf %563, %596 : vector<32x32xf32>
    %c50 = arith.constant 50 : index
    %598 = memref.load %arg4[%c50] : memref<288xf32, #tpu.memory_space<smem>>
    %599 = vector.broadcast %598 : f32 to vector<32x32xf32>
    %600 = arith.mulf %599, %593 : vector<32x32xf32>
    %601 = arith.addf %567, %600 : vector<32x32xf32>
    %c86 = arith.constant 86 : index
    %602 = memref.load %arg4[%c86] : memref<288xf32, #tpu.memory_space<smem>>
    %603 = vector.broadcast %602 : f32 to vector<32x32xf32>
    %604 = arith.mulf %603, %593 : vector<32x32xf32>
    %605 = arith.addf %571, %604 : vector<32x32xf32>
    %c122 = arith.constant 122 : index
    %606 = memref.load %arg4[%c122] : memref<288xf32, #tpu.memory_space<smem>>
    %607 = vector.broadcast %606 : f32 to vector<32x32xf32>
    %608 = arith.mulf %607, %593 : vector<32x32xf32>
    %609 = arith.addf %575, %608 : vector<32x32xf32>
    %c158 = arith.constant 158 : index
    %610 = memref.load %arg4[%c158] : memref<288xf32, #tpu.memory_space<smem>>
    %611 = vector.broadcast %610 : f32 to vector<32x32xf32>
    %612 = arith.mulf %611, %593 : vector<32x32xf32>
    %613 = arith.addf %579, %612 : vector<32x32xf32>
    %c194 = arith.constant 194 : index
    %614 = memref.load %arg4[%c194] : memref<288xf32, #tpu.memory_space<smem>>
    %615 = vector.broadcast %614 : f32 to vector<32x32xf32>
    %616 = arith.mulf %615, %593 : vector<32x32xf32>
    %617 = arith.addf %583, %616 : vector<32x32xf32>
    %c230 = arith.constant 230 : index
    %618 = memref.load %arg4[%c230] : memref<288xf32, #tpu.memory_space<smem>>
    %619 = vector.broadcast %618 : f32 to vector<32x32xf32>
    %620 = arith.mulf %619, %593 : vector<32x32xf32>
    %621 = arith.addf %587, %620 : vector<32x32xf32>
    %c266 = arith.constant 266 : index
    %622 = memref.load %arg4[%c266] : memref<288xf32, #tpu.memory_space<smem>>
    %623 = vector.broadcast %622 : f32 to vector<32x32xf32>
    %624 = arith.mulf %623, %593 : vector<32x32xf32>
    %625 = arith.addf %591, %624 : vector<32x32xf32>
    %c1_107 = arith.constant 1 : index
    %c2_108 = arith.constant 2 : index
    %c0_109 = arith.constant 0 : index
    %626 = vector.load %arg7[%c1_107, %c2_108, %c0_109] : memref<4x34x34xf32, #tpu.memory_space<vmem>>, vector<1x32x32xf32>
    %627 = vector.shape_cast %626 : vector<1x32x32xf32> to vector<32x32xf32>
    %c15 = arith.constant 15 : index
    %628 = memref.load %arg4[%c15] : memref<288xf32, #tpu.memory_space<smem>>
    %629 = vector.broadcast %628 : f32 to vector<32x32xf32>
    %630 = arith.mulf %629, %627 : vector<32x32xf32>
    %631 = arith.addf %597, %630 : vector<32x32xf32>
    %c51 = arith.constant 51 : index
    %632 = memref.load %arg4[%c51] : memref<288xf32, #tpu.memory_space<smem>>
    %633 = vector.broadcast %632 : f32 to vector<32x32xf32>
    %634 = arith.mulf %633, %627 : vector<32x32xf32>
    %635 = arith.addf %601, %634 : vector<32x32xf32>
    %c87 = arith.constant 87 : index
    %636 = memref.load %arg4[%c87] : memref<288xf32, #tpu.memory_space<smem>>
    %637 = vector.broadcast %636 : f32 to vector<32x32xf32>
    %638 = arith.mulf %637, %627 : vector<32x32xf32>
    %639 = arith.addf %605, %638 : vector<32x32xf32>
    %c123 = arith.constant 123 : index
    %640 = memref.load %arg4[%c123] : memref<288xf32, #tpu.memory_space<smem>>
    %641 = vector.broadcast %640 : f32 to vector<32x32xf32>
    %642 = arith.mulf %641, %627 : vector<32x32xf32>
    %643 = arith.addf %609, %642 : vector<32x32xf32>
    %c159 = arith.constant 159 : index
    %644 = memref.load %arg4[%c159] : memref<288xf32, #tpu.memory_space<smem>>
    %645 = vector.broadcast %644 : f32 to vector<32x32xf32>
    %646 = arith.mulf %645, %627 : vector<32x32xf32>
    %647 = arith.addf %613, %646 : vector<32x32xf32>
    %c195 = arith.constant 195 : index
    %648 = memref.load %arg4[%c195] : memref<288xf32, #tpu.memory_space<smem>>
    %649 = vector.broadcast %648 : f32 to vector<32x32xf32>
    %650 = arith.mulf %649, %627 : vector<32x32xf32>
    %651 = arith.addf %617, %650 : vector<32x32xf32>
    %c231 = arith.constant 231 : index
    %652 = memref.load %arg4[%c231] : memref<288xf32, #tpu.memory_space<smem>>
    %653 = vector.broadcast %652 : f32 to vector<32x32xf32>
    %654 = arith.mulf %653, %627 : vector<32x32xf32>
    %655 = arith.addf %621, %654 : vector<32x32xf32>
    %c267 = arith.constant 267 : index
    %656 = memref.load %arg4[%c267] : memref<288xf32, #tpu.memory_space<smem>>
    %657 = vector.broadcast %656 : f32 to vector<32x32xf32>
    %658 = arith.mulf %657, %627 : vector<32x32xf32>
    %659 = arith.addf %625, %658 : vector<32x32xf32>
    %c1_110 = arith.constant 1 : index
    %c2_111 = arith.constant 2 : index
    %c1_112 = arith.constant 1 : index
    %660 = vector.load %arg7[%c1_110, %c2_111, %c1_112] : memref<4x34x34xf32, #tpu.memory_space<vmem>>, vector<1x32x32xf32>
    %661 = vector.shape_cast %660 : vector<1x32x32xf32> to vector<32x32xf32>
    %c16 = arith.constant 16 : index
    %662 = memref.load %arg4[%c16] : memref<288xf32, #tpu.memory_space<smem>>
    %663 = vector.broadcast %662 : f32 to vector<32x32xf32>
    %664 = arith.mulf %663, %661 : vector<32x32xf32>
    %665 = arith.addf %631, %664 : vector<32x32xf32>
    %c52 = arith.constant 52 : index
    %666 = memref.load %arg4[%c52] : memref<288xf32, #tpu.memory_space<smem>>
    %667 = vector.broadcast %666 : f32 to vector<32x32xf32>
    %668 = arith.mulf %667, %661 : vector<32x32xf32>
    %669 = arith.addf %635, %668 : vector<32x32xf32>
    %c88 = arith.constant 88 : index
    %670 = memref.load %arg4[%c88] : memref<288xf32, #tpu.memory_space<smem>>
    %671 = vector.broadcast %670 : f32 to vector<32x32xf32>
    %672 = arith.mulf %671, %661 : vector<32x32xf32>
    %673 = arith.addf %639, %672 : vector<32x32xf32>
    %c124 = arith.constant 124 : index
    %674 = memref.load %arg4[%c124] : memref<288xf32, #tpu.memory_space<smem>>
    %675 = vector.broadcast %674 : f32 to vector<32x32xf32>
    %676 = arith.mulf %675, %661 : vector<32x32xf32>
    %677 = arith.addf %643, %676 : vector<32x32xf32>
    %c160 = arith.constant 160 : index
    %678 = memref.load %arg4[%c160] : memref<288xf32, #tpu.memory_space<smem>>
    %679 = vector.broadcast %678 : f32 to vector<32x32xf32>
    %680 = arith.mulf %679, %661 : vector<32x32xf32>
    %681 = arith.addf %647, %680 : vector<32x32xf32>
    %c196 = arith.constant 196 : index
    %682 = memref.load %arg4[%c196] : memref<288xf32, #tpu.memory_space<smem>>
    %683 = vector.broadcast %682 : f32 to vector<32x32xf32>
    %684 = arith.mulf %683, %661 : vector<32x32xf32>
    %685 = arith.addf %651, %684 : vector<32x32xf32>
    %c232 = arith.constant 232 : index
    %686 = memref.load %arg4[%c232] : memref<288xf32, #tpu.memory_space<smem>>
    %687 = vector.broadcast %686 : f32 to vector<32x32xf32>
    %688 = arith.mulf %687, %661 : vector<32x32xf32>
    %689 = arith.addf %655, %688 : vector<32x32xf32>
    %c268 = arith.constant 268 : index
    %690 = memref.load %arg4[%c268] : memref<288xf32, #tpu.memory_space<smem>>
    %691 = vector.broadcast %690 : f32 to vector<32x32xf32>
    %692 = arith.mulf %691, %661 : vector<32x32xf32>
    %693 = arith.addf %659, %692 : vector<32x32xf32>
    %c1_113 = arith.constant 1 : index
    %c2_114 = arith.constant 2 : index
    %c2_115 = arith.constant 2 : index
    %694 = vector.load %arg7[%c1_113, %c2_114, %c2_115] : memref<4x34x34xf32, #tpu.memory_space<vmem>>, vector<1x32x32xf32>
    %695 = vector.shape_cast %694 : vector<1x32x32xf32> to vector<32x32xf32>
    %c17 = arith.constant 17 : index
    %696 = memref.load %arg4[%c17] : memref<288xf32, #tpu.memory_space<smem>>
    %697 = vector.broadcast %696 : f32 to vector<32x32xf32>
    %698 = arith.mulf %697, %695 : vector<32x32xf32>
    %699 = arith.addf %665, %698 : vector<32x32xf32>
    %c53 = arith.constant 53 : index
    %700 = memref.load %arg4[%c53] : memref<288xf32, #tpu.memory_space<smem>>
    %701 = vector.broadcast %700 : f32 to vector<32x32xf32>
    %702 = arith.mulf %701, %695 : vector<32x32xf32>
    %703 = arith.addf %669, %702 : vector<32x32xf32>
    %c89 = arith.constant 89 : index
    %704 = memref.load %arg4[%c89] : memref<288xf32, #tpu.memory_space<smem>>
    %705 = vector.broadcast %704 : f32 to vector<32x32xf32>
    %706 = arith.mulf %705, %695 : vector<32x32xf32>
    %707 = arith.addf %673, %706 : vector<32x32xf32>
    %c125 = arith.constant 125 : index
    %708 = memref.load %arg4[%c125] : memref<288xf32, #tpu.memory_space<smem>>
    %709 = vector.broadcast %708 : f32 to vector<32x32xf32>
    %710 = arith.mulf %709, %695 : vector<32x32xf32>
    %711 = arith.addf %677, %710 : vector<32x32xf32>
    %c161 = arith.constant 161 : index
    %712 = memref.load %arg4[%c161] : memref<288xf32, #tpu.memory_space<smem>>
    %713 = vector.broadcast %712 : f32 to vector<32x32xf32>
    %714 = arith.mulf %713, %695 : vector<32x32xf32>
    %715 = arith.addf %681, %714 : vector<32x32xf32>
    %c197 = arith.constant 197 : index
    %716 = memref.load %arg4[%c197] : memref<288xf32, #tpu.memory_space<smem>>
    %717 = vector.broadcast %716 : f32 to vector<32x32xf32>
    %718 = arith.mulf %717, %695 : vector<32x32xf32>
    %719 = arith.addf %685, %718 : vector<32x32xf32>
    %c233 = arith.constant 233 : index
    %720 = memref.load %arg4[%c233] : memref<288xf32, #tpu.memory_space<smem>>
    %721 = vector.broadcast %720 : f32 to vector<32x32xf32>
    %722 = arith.mulf %721, %695 : vector<32x32xf32>
    %723 = arith.addf %689, %722 : vector<32x32xf32>
    %c269 = arith.constant 269 : index
    %724 = memref.load %arg4[%c269] : memref<288xf32, #tpu.memory_space<smem>>
    %725 = vector.broadcast %724 : f32 to vector<32x32xf32>
    %726 = arith.mulf %725, %695 : vector<32x32xf32>
    %727 = arith.addf %693, %726 : vector<32x32xf32>
    %c2_116 = arith.constant 2 : index
    %c0_117 = arith.constant 0 : index
    %c0_118 = arith.constant 0 : index
    %728 = vector.load %arg7[%c2_116, %c0_117, %c0_118] : memref<4x34x34xf32, #tpu.memory_space<vmem>>, vector<1x32x32xf32>
    %729 = vector.shape_cast %728 : vector<1x32x32xf32> to vector<32x32xf32>
    %c18 = arith.constant 18 : index
    %730 = memref.load %arg4[%c18] : memref<288xf32, #tpu.memory_space<smem>>
    %731 = vector.broadcast %730 : f32 to vector<32x32xf32>
    %732 = arith.mulf %731, %729 : vector<32x32xf32>
    %733 = arith.addf %699, %732 : vector<32x32xf32>
    %c54 = arith.constant 54 : index
    %734 = memref.load %arg4[%c54] : memref<288xf32, #tpu.memory_space<smem>>
    %735 = vector.broadcast %734 : f32 to vector<32x32xf32>
    %736 = arith.mulf %735, %729 : vector<32x32xf32>
    %737 = arith.addf %703, %736 : vector<32x32xf32>
    %c90 = arith.constant 90 : index
    %738 = memref.load %arg4[%c90] : memref<288xf32, #tpu.memory_space<smem>>
    %739 = vector.broadcast %738 : f32 to vector<32x32xf32>
    %740 = arith.mulf %739, %729 : vector<32x32xf32>
    %741 = arith.addf %707, %740 : vector<32x32xf32>
    %c126 = arith.constant 126 : index
    %742 = memref.load %arg4[%c126] : memref<288xf32, #tpu.memory_space<smem>>
    %743 = vector.broadcast %742 : f32 to vector<32x32xf32>
    %744 = arith.mulf %743, %729 : vector<32x32xf32>
    %745 = arith.addf %711, %744 : vector<32x32xf32>
    %c162 = arith.constant 162 : index
    %746 = memref.load %arg4[%c162] : memref<288xf32, #tpu.memory_space<smem>>
    %747 = vector.broadcast %746 : f32 to vector<32x32xf32>
    %748 = arith.mulf %747, %729 : vector<32x32xf32>
    %749 = arith.addf %715, %748 : vector<32x32xf32>
    %c198 = arith.constant 198 : index
    %750 = memref.load %arg4[%c198] : memref<288xf32, #tpu.memory_space<smem>>
    %751 = vector.broadcast %750 : f32 to vector<32x32xf32>
    %752 = arith.mulf %751, %729 : vector<32x32xf32>
    %753 = arith.addf %719, %752 : vector<32x32xf32>
    %c234 = arith.constant 234 : index
    %754 = memref.load %arg4[%c234] : memref<288xf32, #tpu.memory_space<smem>>
    %755 = vector.broadcast %754 : f32 to vector<32x32xf32>
    %756 = arith.mulf %755, %729 : vector<32x32xf32>
    %757 = arith.addf %723, %756 : vector<32x32xf32>
    %c270 = arith.constant 270 : index
    %758 = memref.load %arg4[%c270] : memref<288xf32, #tpu.memory_space<smem>>
    %759 = vector.broadcast %758 : f32 to vector<32x32xf32>
    %760 = arith.mulf %759, %729 : vector<32x32xf32>
    %761 = arith.addf %727, %760 : vector<32x32xf32>
    %c2_119 = arith.constant 2 : index
    %c0_120 = arith.constant 0 : index
    %c1_121 = arith.constant 1 : index
    %762 = vector.load %arg7[%c2_119, %c0_120, %c1_121] : memref<4x34x34xf32, #tpu.memory_space<vmem>>, vector<1x32x32xf32>
    %763 = vector.shape_cast %762 : vector<1x32x32xf32> to vector<32x32xf32>
    %c19 = arith.constant 19 : index
    %764 = memref.load %arg4[%c19] : memref<288xf32, #tpu.memory_space<smem>>
    %765 = vector.broadcast %764 : f32 to vector<32x32xf32>
    %766 = arith.mulf %765, %763 : vector<32x32xf32>
    %767 = arith.addf %733, %766 : vector<32x32xf32>
    %c55 = arith.constant 55 : index
    %768 = memref.load %arg4[%c55] : memref<288xf32, #tpu.memory_space<smem>>
    %769 = vector.broadcast %768 : f32 to vector<32x32xf32>
    %770 = arith.mulf %769, %763 : vector<32x32xf32>
    %771 = arith.addf %737, %770 : vector<32x32xf32>
    %c91 = arith.constant 91 : index
    %772 = memref.load %arg4[%c91] : memref<288xf32, #tpu.memory_space<smem>>
    %773 = vector.broadcast %772 : f32 to vector<32x32xf32>
    %774 = arith.mulf %773, %763 : vector<32x32xf32>
    %775 = arith.addf %741, %774 : vector<32x32xf32>
    %c127 = arith.constant 127 : index
    %776 = memref.load %arg4[%c127] : memref<288xf32, #tpu.memory_space<smem>>
    %777 = vector.broadcast %776 : f32 to vector<32x32xf32>
    %778 = arith.mulf %777, %763 : vector<32x32xf32>
    %779 = arith.addf %745, %778 : vector<32x32xf32>
    %c163 = arith.constant 163 : index
    %780 = memref.load %arg4[%c163] : memref<288xf32, #tpu.memory_space<smem>>
    %781 = vector.broadcast %780 : f32 to vector<32x32xf32>
    %782 = arith.mulf %781, %763 : vector<32x32xf32>
    %783 = arith.addf %749, %782 : vector<32x32xf32>
    %c199 = arith.constant 199 : index
    %784 = memref.load %arg4[%c199] : memref<288xf32, #tpu.memory_space<smem>>
    %785 = vector.broadcast %784 : f32 to vector<32x32xf32>
    %786 = arith.mulf %785, %763 : vector<32x32xf32>
    %787 = arith.addf %753, %786 : vector<32x32xf32>
    %c235 = arith.constant 235 : index
    %788 = memref.load %arg4[%c235] : memref<288xf32, #tpu.memory_space<smem>>
    %789 = vector.broadcast %788 : f32 to vector<32x32xf32>
    %790 = arith.mulf %789, %763 : vector<32x32xf32>
    %791 = arith.addf %757, %790 : vector<32x32xf32>
    %c271 = arith.constant 271 : index
    %792 = memref.load %arg4[%c271] : memref<288xf32, #tpu.memory_space<smem>>
    %793 = vector.broadcast %792 : f32 to vector<32x32xf32>
    %794 = arith.mulf %793, %763 : vector<32x32xf32>
    %795 = arith.addf %761, %794 : vector<32x32xf32>
    %c2_122 = arith.constant 2 : index
    %c0_123 = arith.constant 0 : index
    %c2_124 = arith.constant 2 : index
    %796 = vector.load %arg7[%c2_122, %c0_123, %c2_124] : memref<4x34x34xf32, #tpu.memory_space<vmem>>, vector<1x32x32xf32>
    %797 = vector.shape_cast %796 : vector<1x32x32xf32> to vector<32x32xf32>
    %c20 = arith.constant 20 : index
    %798 = memref.load %arg4[%c20] : memref<288xf32, #tpu.memory_space<smem>>
    %799 = vector.broadcast %798 : f32 to vector<32x32xf32>
    %800 = arith.mulf %799, %797 : vector<32x32xf32>
    %801 = arith.addf %767, %800 : vector<32x32xf32>
    %c56 = arith.constant 56 : index
    %802 = memref.load %arg4[%c56] : memref<288xf32, #tpu.memory_space<smem>>
    %803 = vector.broadcast %802 : f32 to vector<32x32xf32>
    %804 = arith.mulf %803, %797 : vector<32x32xf32>
    %805 = arith.addf %771, %804 : vector<32x32xf32>
    %c92 = arith.constant 92 : index
    %806 = memref.load %arg4[%c92] : memref<288xf32, #tpu.memory_space<smem>>
    %807 = vector.broadcast %806 : f32 to vector<32x32xf32>
    %808 = arith.mulf %807, %797 : vector<32x32xf32>
    %809 = arith.addf %775, %808 : vector<32x32xf32>
    %c128 = arith.constant 128 : index
    %810 = memref.load %arg4[%c128] : memref<288xf32, #tpu.memory_space<smem>>
    %811 = vector.broadcast %810 : f32 to vector<32x32xf32>
    %812 = arith.mulf %811, %797 : vector<32x32xf32>
    %813 = arith.addf %779, %812 : vector<32x32xf32>
    %c164 = arith.constant 164 : index
    %814 = memref.load %arg4[%c164] : memref<288xf32, #tpu.memory_space<smem>>
    %815 = vector.broadcast %814 : f32 to vector<32x32xf32>
    %816 = arith.mulf %815, %797 : vector<32x32xf32>
    %817 = arith.addf %783, %816 : vector<32x32xf32>
    %c200 = arith.constant 200 : index
    %818 = memref.load %arg4[%c200] : memref<288xf32, #tpu.memory_space<smem>>
    %819 = vector.broadcast %818 : f32 to vector<32x32xf32>
    %820 = arith.mulf %819, %797 : vector<32x32xf32>
    %821 = arith.addf %787, %820 : vector<32x32xf32>
    %c236 = arith.constant 236 : index
    %822 = memref.load %arg4[%c236] : memref<288xf32, #tpu.memory_space<smem>>
    %823 = vector.broadcast %822 : f32 to vector<32x32xf32>
    %824 = arith.mulf %823, %797 : vector<32x32xf32>
    %825 = arith.addf %791, %824 : vector<32x32xf32>
    %c272 = arith.constant 272 : index
    %826 = memref.load %arg4[%c272] : memref<288xf32, #tpu.memory_space<smem>>
    %827 = vector.broadcast %826 : f32 to vector<32x32xf32>
    %828 = arith.mulf %827, %797 : vector<32x32xf32>
    %829 = arith.addf %795, %828 : vector<32x32xf32>
    %c2_125 = arith.constant 2 : index
    %c1_126 = arith.constant 1 : index
    %c0_127 = arith.constant 0 : index
    %830 = vector.load %arg7[%c2_125, %c1_126, %c0_127] : memref<4x34x34xf32, #tpu.memory_space<vmem>>, vector<1x32x32xf32>
    %831 = vector.shape_cast %830 : vector<1x32x32xf32> to vector<32x32xf32>
    %c21 = arith.constant 21 : index
    %832 = memref.load %arg4[%c21] : memref<288xf32, #tpu.memory_space<smem>>
    %833 = vector.broadcast %832 : f32 to vector<32x32xf32>
    %834 = arith.mulf %833, %831 : vector<32x32xf32>
    %835 = arith.addf %801, %834 : vector<32x32xf32>
    %c57 = arith.constant 57 : index
    %836 = memref.load %arg4[%c57] : memref<288xf32, #tpu.memory_space<smem>>
    %837 = vector.broadcast %836 : f32 to vector<32x32xf32>
    %838 = arith.mulf %837, %831 : vector<32x32xf32>
    %839 = arith.addf %805, %838 : vector<32x32xf32>
    %c93 = arith.constant 93 : index
    %840 = memref.load %arg4[%c93] : memref<288xf32, #tpu.memory_space<smem>>
    %841 = vector.broadcast %840 : f32 to vector<32x32xf32>
    %842 = arith.mulf %841, %831 : vector<32x32xf32>
    %843 = arith.addf %809, %842 : vector<32x32xf32>
    %c129 = arith.constant 129 : index
    %844 = memref.load %arg4[%c129] : memref<288xf32, #tpu.memory_space<smem>>
    %845 = vector.broadcast %844 : f32 to vector<32x32xf32>
    %846 = arith.mulf %845, %831 : vector<32x32xf32>
    %847 = arith.addf %813, %846 : vector<32x32xf32>
    %c165 = arith.constant 165 : index
    %848 = memref.load %arg4[%c165] : memref<288xf32, #tpu.memory_space<smem>>
    %849 = vector.broadcast %848 : f32 to vector<32x32xf32>
    %850 = arith.mulf %849, %831 : vector<32x32xf32>
    %851 = arith.addf %817, %850 : vector<32x32xf32>
    %c201 = arith.constant 201 : index
    %852 = memref.load %arg4[%c201] : memref<288xf32, #tpu.memory_space<smem>>
    %853 = vector.broadcast %852 : f32 to vector<32x32xf32>
    %854 = arith.mulf %853, %831 : vector<32x32xf32>
    %855 = arith.addf %821, %854 : vector<32x32xf32>
    %c237 = arith.constant 237 : index
    %856 = memref.load %arg4[%c237] : memref<288xf32, #tpu.memory_space<smem>>
    %857 = vector.broadcast %856 : f32 to vector<32x32xf32>
    %858 = arith.mulf %857, %831 : vector<32x32xf32>
    %859 = arith.addf %825, %858 : vector<32x32xf32>
    %c273 = arith.constant 273 : index
    %860 = memref.load %arg4[%c273] : memref<288xf32, #tpu.memory_space<smem>>
    %861 = vector.broadcast %860 : f32 to vector<32x32xf32>
    %862 = arith.mulf %861, %831 : vector<32x32xf32>
    %863 = arith.addf %829, %862 : vector<32x32xf32>
    %c2_128 = arith.constant 2 : index
    %c1_129 = arith.constant 1 : index
    %c1_130 = arith.constant 1 : index
    %864 = vector.load %arg7[%c2_128, %c1_129, %c1_130] : memref<4x34x34xf32, #tpu.memory_space<vmem>>, vector<1x32x32xf32>
    %865 = vector.shape_cast %864 : vector<1x32x32xf32> to vector<32x32xf32>
    %c22 = arith.constant 22 : index
    %866 = memref.load %arg4[%c22] : memref<288xf32, #tpu.memory_space<smem>>
    %867 = vector.broadcast %866 : f32 to vector<32x32xf32>
    %868 = arith.mulf %867, %865 : vector<32x32xf32>
    %869 = arith.addf %835, %868 : vector<32x32xf32>
    %c58 = arith.constant 58 : index
    %870 = memref.load %arg4[%c58] : memref<288xf32, #tpu.memory_space<smem>>
    %871 = vector.broadcast %870 : f32 to vector<32x32xf32>
    %872 = arith.mulf %871, %865 : vector<32x32xf32>
    %873 = arith.addf %839, %872 : vector<32x32xf32>
    %c94 = arith.constant 94 : index
    %874 = memref.load %arg4[%c94] : memref<288xf32, #tpu.memory_space<smem>>
    %875 = vector.broadcast %874 : f32 to vector<32x32xf32>
    %876 = arith.mulf %875, %865 : vector<32x32xf32>
    %877 = arith.addf %843, %876 : vector<32x32xf32>
    %c130 = arith.constant 130 : index
    %878 = memref.load %arg4[%c130] : memref<288xf32, #tpu.memory_space<smem>>
    %879 = vector.broadcast %878 : f32 to vector<32x32xf32>
    %880 = arith.mulf %879, %865 : vector<32x32xf32>
    %881 = arith.addf %847, %880 : vector<32x32xf32>
    %c166 = arith.constant 166 : index
    %882 = memref.load %arg4[%c166] : memref<288xf32, #tpu.memory_space<smem>>
    %883 = vector.broadcast %882 : f32 to vector<32x32xf32>
    %884 = arith.mulf %883, %865 : vector<32x32xf32>
    %885 = arith.addf %851, %884 : vector<32x32xf32>
    %c202 = arith.constant 202 : index
    %886 = memref.load %arg4[%c202] : memref<288xf32, #tpu.memory_space<smem>>
    %887 = vector.broadcast %886 : f32 to vector<32x32xf32>
    %888 = arith.mulf %887, %865 : vector<32x32xf32>
    %889 = arith.addf %855, %888 : vector<32x32xf32>
    %c238 = arith.constant 238 : index
    %890 = memref.load %arg4[%c238] : memref<288xf32, #tpu.memory_space<smem>>
    %891 = vector.broadcast %890 : f32 to vector<32x32xf32>
    %892 = arith.mulf %891, %865 : vector<32x32xf32>
    %893 = arith.addf %859, %892 : vector<32x32xf32>
    %c274 = arith.constant 274 : index
    %894 = memref.load %arg4[%c274] : memref<288xf32, #tpu.memory_space<smem>>
    %895 = vector.broadcast %894 : f32 to vector<32x32xf32>
    %896 = arith.mulf %895, %865 : vector<32x32xf32>
    %897 = arith.addf %863, %896 : vector<32x32xf32>
    %c2_131 = arith.constant 2 : index
    %c1_132 = arith.constant 1 : index
    %c2_133 = arith.constant 2 : index
    %898 = vector.load %arg7[%c2_131, %c1_132, %c2_133] : memref<4x34x34xf32, #tpu.memory_space<vmem>>, vector<1x32x32xf32>
    %899 = vector.shape_cast %898 : vector<1x32x32xf32> to vector<32x32xf32>
    %c23 = arith.constant 23 : index
    %900 = memref.load %arg4[%c23] : memref<288xf32, #tpu.memory_space<smem>>
    %901 = vector.broadcast %900 : f32 to vector<32x32xf32>
    %902 = arith.mulf %901, %899 : vector<32x32xf32>
    %903 = arith.addf %869, %902 : vector<32x32xf32>
    %c59 = arith.constant 59 : index
    %904 = memref.load %arg4[%c59] : memref<288xf32, #tpu.memory_space<smem>>
    %905 = vector.broadcast %904 : f32 to vector<32x32xf32>
    %906 = arith.mulf %905, %899 : vector<32x32xf32>
    %907 = arith.addf %873, %906 : vector<32x32xf32>
    %c95 = arith.constant 95 : index
    %908 = memref.load %arg4[%c95] : memref<288xf32, #tpu.memory_space<smem>>
    %909 = vector.broadcast %908 : f32 to vector<32x32xf32>
    %910 = arith.mulf %909, %899 : vector<32x32xf32>
    %911 = arith.addf %877, %910 : vector<32x32xf32>
    %c131 = arith.constant 131 : index
    %912 = memref.load %arg4[%c131] : memref<288xf32, #tpu.memory_space<smem>>
    %913 = vector.broadcast %912 : f32 to vector<32x32xf32>
    %914 = arith.mulf %913, %899 : vector<32x32xf32>
    %915 = arith.addf %881, %914 : vector<32x32xf32>
    %c167 = arith.constant 167 : index
    %916 = memref.load %arg4[%c167] : memref<288xf32, #tpu.memory_space<smem>>
    %917 = vector.broadcast %916 : f32 to vector<32x32xf32>
    %918 = arith.mulf %917, %899 : vector<32x32xf32>
    %919 = arith.addf %885, %918 : vector<32x32xf32>
    %c203 = arith.constant 203 : index
    %920 = memref.load %arg4[%c203] : memref<288xf32, #tpu.memory_space<smem>>
    %921 = vector.broadcast %920 : f32 to vector<32x32xf32>
    %922 = arith.mulf %921, %899 : vector<32x32xf32>
    %923 = arith.addf %889, %922 : vector<32x32xf32>
    %c239 = arith.constant 239 : index
    %924 = memref.load %arg4[%c239] : memref<288xf32, #tpu.memory_space<smem>>
    %925 = vector.broadcast %924 : f32 to vector<32x32xf32>
    %926 = arith.mulf %925, %899 : vector<32x32xf32>
    %927 = arith.addf %893, %926 : vector<32x32xf32>
    %c275 = arith.constant 275 : index
    %928 = memref.load %arg4[%c275] : memref<288xf32, #tpu.memory_space<smem>>
    %929 = vector.broadcast %928 : f32 to vector<32x32xf32>
    %930 = arith.mulf %929, %899 : vector<32x32xf32>
    %931 = arith.addf %897, %930 : vector<32x32xf32>
    %c2_134 = arith.constant 2 : index
    %c2_135 = arith.constant 2 : index
    %c0_136 = arith.constant 0 : index
    %932 = vector.load %arg7[%c2_134, %c2_135, %c0_136] : memref<4x34x34xf32, #tpu.memory_space<vmem>>, vector<1x32x32xf32>
    %933 = vector.shape_cast %932 : vector<1x32x32xf32> to vector<32x32xf32>
    %c24 = arith.constant 24 : index
    %934 = memref.load %arg4[%c24] : memref<288xf32, #tpu.memory_space<smem>>
    %935 = vector.broadcast %934 : f32 to vector<32x32xf32>
    %936 = arith.mulf %935, %933 : vector<32x32xf32>
    %937 = arith.addf %903, %936 : vector<32x32xf32>
    %c60 = arith.constant 60 : index
    %938 = memref.load %arg4[%c60] : memref<288xf32, #tpu.memory_space<smem>>
    %939 = vector.broadcast %938 : f32 to vector<32x32xf32>
    %940 = arith.mulf %939, %933 : vector<32x32xf32>
    %941 = arith.addf %907, %940 : vector<32x32xf32>
    %c96 = arith.constant 96 : index
    %942 = memref.load %arg4[%c96] : memref<288xf32, #tpu.memory_space<smem>>
    %943 = vector.broadcast %942 : f32 to vector<32x32xf32>
    %944 = arith.mulf %943, %933 : vector<32x32xf32>
    %945 = arith.addf %911, %944 : vector<32x32xf32>
    %c132 = arith.constant 132 : index
    %946 = memref.load %arg4[%c132] : memref<288xf32, #tpu.memory_space<smem>>
    %947 = vector.broadcast %946 : f32 to vector<32x32xf32>
    %948 = arith.mulf %947, %933 : vector<32x32xf32>
    %949 = arith.addf %915, %948 : vector<32x32xf32>
    %c168 = arith.constant 168 : index
    %950 = memref.load %arg4[%c168] : memref<288xf32, #tpu.memory_space<smem>>
    %951 = vector.broadcast %950 : f32 to vector<32x32xf32>
    %952 = arith.mulf %951, %933 : vector<32x32xf32>
    %953 = arith.addf %919, %952 : vector<32x32xf32>
    %c204 = arith.constant 204 : index
    %954 = memref.load %arg4[%c204] : memref<288xf32, #tpu.memory_space<smem>>
    %955 = vector.broadcast %954 : f32 to vector<32x32xf32>
    %956 = arith.mulf %955, %933 : vector<32x32xf32>
    %957 = arith.addf %923, %956 : vector<32x32xf32>
    %c240 = arith.constant 240 : index
    %958 = memref.load %arg4[%c240] : memref<288xf32, #tpu.memory_space<smem>>
    %959 = vector.broadcast %958 : f32 to vector<32x32xf32>
    %960 = arith.mulf %959, %933 : vector<32x32xf32>
    %961 = arith.addf %927, %960 : vector<32x32xf32>
    %c276 = arith.constant 276 : index
    %962 = memref.load %arg4[%c276] : memref<288xf32, #tpu.memory_space<smem>>
    %963 = vector.broadcast %962 : f32 to vector<32x32xf32>
    %964 = arith.mulf %963, %933 : vector<32x32xf32>
    %965 = arith.addf %931, %964 : vector<32x32xf32>
    %c2_137 = arith.constant 2 : index
    %c2_138 = arith.constant 2 : index
    %c1_139 = arith.constant 1 : index
    %966 = vector.load %arg7[%c2_137, %c2_138, %c1_139] : memref<4x34x34xf32, #tpu.memory_space<vmem>>, vector<1x32x32xf32>
    %967 = vector.shape_cast %966 : vector<1x32x32xf32> to vector<32x32xf32>
    %c25 = arith.constant 25 : index
    %968 = memref.load %arg4[%c25] : memref<288xf32, #tpu.memory_space<smem>>
    %969 = vector.broadcast %968 : f32 to vector<32x32xf32>
    %970 = arith.mulf %969, %967 : vector<32x32xf32>
    %971 = arith.addf %937, %970 : vector<32x32xf32>
    %c61 = arith.constant 61 : index
    %972 = memref.load %arg4[%c61] : memref<288xf32, #tpu.memory_space<smem>>
    %973 = vector.broadcast %972 : f32 to vector<32x32xf32>
    %974 = arith.mulf %973, %967 : vector<32x32xf32>
    %975 = arith.addf %941, %974 : vector<32x32xf32>
    %c97 = arith.constant 97 : index
    %976 = memref.load %arg4[%c97] : memref<288xf32, #tpu.memory_space<smem>>
    %977 = vector.broadcast %976 : f32 to vector<32x32xf32>
    %978 = arith.mulf %977, %967 : vector<32x32xf32>
    %979 = arith.addf %945, %978 : vector<32x32xf32>
    %c133 = arith.constant 133 : index
    %980 = memref.load %arg4[%c133] : memref<288xf32, #tpu.memory_space<smem>>
    %981 = vector.broadcast %980 : f32 to vector<32x32xf32>
    %982 = arith.mulf %981, %967 : vector<32x32xf32>
    %983 = arith.addf %949, %982 : vector<32x32xf32>
    %c169 = arith.constant 169 : index
    %984 = memref.load %arg4[%c169] : memref<288xf32, #tpu.memory_space<smem>>
    %985 = vector.broadcast %984 : f32 to vector<32x32xf32>
    %986 = arith.mulf %985, %967 : vector<32x32xf32>
    %987 = arith.addf %953, %986 : vector<32x32xf32>
    %c205 = arith.constant 205 : index
    %988 = memref.load %arg4[%c205] : memref<288xf32, #tpu.memory_space<smem>>
    %989 = vector.broadcast %988 : f32 to vector<32x32xf32>
    %990 = arith.mulf %989, %967 : vector<32x32xf32>
    %991 = arith.addf %957, %990 : vector<32x32xf32>
    %c241 = arith.constant 241 : index
    %992 = memref.load %arg4[%c241] : memref<288xf32, #tpu.memory_space<smem>>
    %993 = vector.broadcast %992 : f32 to vector<32x32xf32>
    %994 = arith.mulf %993, %967 : vector<32x32xf32>
    %995 = arith.addf %961, %994 : vector<32x32xf32>
    %c277 = arith.constant 277 : index
    %996 = memref.load %arg4[%c277] : memref<288xf32, #tpu.memory_space<smem>>
    %997 = vector.broadcast %996 : f32 to vector<32x32xf32>
    %998 = arith.mulf %997, %967 : vector<32x32xf32>
    %999 = arith.addf %965, %998 : vector<32x32xf32>
    %c2_140 = arith.constant 2 : index
    %c2_141 = arith.constant 2 : index
    %c2_142 = arith.constant 2 : index
    %1000 = vector.load %arg7[%c2_140, %c2_141, %c2_142] : memref<4x34x34xf32, #tpu.memory_space<vmem>>, vector<1x32x32xf32>
    %1001 = vector.shape_cast %1000 : vector<1x32x32xf32> to vector<32x32xf32>
    %c26 = arith.constant 26 : index
    %1002 = memref.load %arg4[%c26] : memref<288xf32, #tpu.memory_space<smem>>
    %1003 = vector.broadcast %1002 : f32 to vector<32x32xf32>
    %1004 = arith.mulf %1003, %1001 : vector<32x32xf32>
    %1005 = arith.addf %971, %1004 : vector<32x32xf32>
    %c62 = arith.constant 62 : index
    %1006 = memref.load %arg4[%c62] : memref<288xf32, #tpu.memory_space<smem>>
    %1007 = vector.broadcast %1006 : f32 to vector<32x32xf32>
    %1008 = arith.mulf %1007, %1001 : vector<32x32xf32>
    %1009 = arith.addf %975, %1008 : vector<32x32xf32>
    %c98 = arith.constant 98 : index
    %1010 = memref.load %arg4[%c98] : memref<288xf32, #tpu.memory_space<smem>>
    %1011 = vector.broadcast %1010 : f32 to vector<32x32xf32>
    %1012 = arith.mulf %1011, %1001 : vector<32x32xf32>
    %1013 = arith.addf %979, %1012 : vector<32x32xf32>
    %c134 = arith.constant 134 : index
    %1014 = memref.load %arg4[%c134] : memref<288xf32, #tpu.memory_space<smem>>
    %1015 = vector.broadcast %1014 : f32 to vector<32x32xf32>
    %1016 = arith.mulf %1015, %1001 : vector<32x32xf32>
    %1017 = arith.addf %983, %1016 : vector<32x32xf32>
    %c170 = arith.constant 170 : index
    %1018 = memref.load %arg4[%c170] : memref<288xf32, #tpu.memory_space<smem>>
    %1019 = vector.broadcast %1018 : f32 to vector<32x32xf32>
    %1020 = arith.mulf %1019, %1001 : vector<32x32xf32>
    %1021 = arith.addf %987, %1020 : vector<32x32xf32>
    %c206 = arith.constant 206 : index
    %1022 = memref.load %arg4[%c206] : memref<288xf32, #tpu.memory_space<smem>>
    %1023 = vector.broadcast %1022 : f32 to vector<32x32xf32>
    %1024 = arith.mulf %1023, %1001 : vector<32x32xf32>
    %1025 = arith.addf %991, %1024 : vector<32x32xf32>
    %c242 = arith.constant 242 : index
    %1026 = memref.load %arg4[%c242] : memref<288xf32, #tpu.memory_space<smem>>
    %1027 = vector.broadcast %1026 : f32 to vector<32x32xf32>
    %1028 = arith.mulf %1027, %1001 : vector<32x32xf32>
    %1029 = arith.addf %995, %1028 : vector<32x32xf32>
    %c278 = arith.constant 278 : index
    %1030 = memref.load %arg4[%c278] : memref<288xf32, #tpu.memory_space<smem>>
    %1031 = vector.broadcast %1030 : f32 to vector<32x32xf32>
    %1032 = arith.mulf %1031, %1001 : vector<32x32xf32>
    %1033 = arith.addf %999, %1032 : vector<32x32xf32>
    %c3_143 = arith.constant 3 : index
    %c0_144 = arith.constant 0 : index
    %c0_145 = arith.constant 0 : index
    %1034 = vector.load %arg7[%c3_143, %c0_144, %c0_145] : memref<4x34x34xf32, #tpu.memory_space<vmem>>, vector<1x32x32xf32>
    %1035 = vector.shape_cast %1034 : vector<1x32x32xf32> to vector<32x32xf32>
    %c27 = arith.constant 27 : index
    %1036 = memref.load %arg4[%c27] : memref<288xf32, #tpu.memory_space<smem>>
    %1037 = vector.broadcast %1036 : f32 to vector<32x32xf32>
    %1038 = arith.mulf %1037, %1035 : vector<32x32xf32>
    %1039 = arith.addf %1005, %1038 : vector<32x32xf32>
    %c63 = arith.constant 63 : index
    %1040 = memref.load %arg4[%c63] : memref<288xf32, #tpu.memory_space<smem>>
    %1041 = vector.broadcast %1040 : f32 to vector<32x32xf32>
    %1042 = arith.mulf %1041, %1035 : vector<32x32xf32>
    %1043 = arith.addf %1009, %1042 : vector<32x32xf32>
    %c99 = arith.constant 99 : index
    %1044 = memref.load %arg4[%c99] : memref<288xf32, #tpu.memory_space<smem>>
    %1045 = vector.broadcast %1044 : f32 to vector<32x32xf32>
    %1046 = arith.mulf %1045, %1035 : vector<32x32xf32>
    %1047 = arith.addf %1013, %1046 : vector<32x32xf32>
    %c135 = arith.constant 135 : index
    %1048 = memref.load %arg4[%c135] : memref<288xf32, #tpu.memory_space<smem>>
    %1049 = vector.broadcast %1048 : f32 to vector<32x32xf32>
    %1050 = arith.mulf %1049, %1035 : vector<32x32xf32>
    %1051 = arith.addf %1017, %1050 : vector<32x32xf32>
    %c171 = arith.constant 171 : index
    %1052 = memref.load %arg4[%c171] : memref<288xf32, #tpu.memory_space<smem>>
    %1053 = vector.broadcast %1052 : f32 to vector<32x32xf32>
    %1054 = arith.mulf %1053, %1035 : vector<32x32xf32>
    %1055 = arith.addf %1021, %1054 : vector<32x32xf32>
    %c207 = arith.constant 207 : index
    %1056 = memref.load %arg4[%c207] : memref<288xf32, #tpu.memory_space<smem>>
    %1057 = vector.broadcast %1056 : f32 to vector<32x32xf32>
    %1058 = arith.mulf %1057, %1035 : vector<32x32xf32>
    %1059 = arith.addf %1025, %1058 : vector<32x32xf32>
    %c243 = arith.constant 243 : index
    %1060 = memref.load %arg4[%c243] : memref<288xf32, #tpu.memory_space<smem>>
    %1061 = vector.broadcast %1060 : f32 to vector<32x32xf32>
    %1062 = arith.mulf %1061, %1035 : vector<32x32xf32>
    %1063 = arith.addf %1029, %1062 : vector<32x32xf32>
    %c279 = arith.constant 279 : index
    %1064 = memref.load %arg4[%c279] : memref<288xf32, #tpu.memory_space<smem>>
    %1065 = vector.broadcast %1064 : f32 to vector<32x32xf32>
    %1066 = arith.mulf %1065, %1035 : vector<32x32xf32>
    %1067 = arith.addf %1033, %1066 : vector<32x32xf32>
    %c3_146 = arith.constant 3 : index
    %c0_147 = arith.constant 0 : index
    %c1_148 = arith.constant 1 : index
    %1068 = vector.load %arg7[%c3_146, %c0_147, %c1_148] : memref<4x34x34xf32, #tpu.memory_space<vmem>>, vector<1x32x32xf32>
    %1069 = vector.shape_cast %1068 : vector<1x32x32xf32> to vector<32x32xf32>
    %c28 = arith.constant 28 : index
    %1070 = memref.load %arg4[%c28] : memref<288xf32, #tpu.memory_space<smem>>
    %1071 = vector.broadcast %1070 : f32 to vector<32x32xf32>
    %1072 = arith.mulf %1071, %1069 : vector<32x32xf32>
    %1073 = arith.addf %1039, %1072 : vector<32x32xf32>
    %c64 = arith.constant 64 : index
    %1074 = memref.load %arg4[%c64] : memref<288xf32, #tpu.memory_space<smem>>
    %1075 = vector.broadcast %1074 : f32 to vector<32x32xf32>
    %1076 = arith.mulf %1075, %1069 : vector<32x32xf32>
    %1077 = arith.addf %1043, %1076 : vector<32x32xf32>
    %c100 = arith.constant 100 : index
    %1078 = memref.load %arg4[%c100] : memref<288xf32, #tpu.memory_space<smem>>
    %1079 = vector.broadcast %1078 : f32 to vector<32x32xf32>
    %1080 = arith.mulf %1079, %1069 : vector<32x32xf32>
    %1081 = arith.addf %1047, %1080 : vector<32x32xf32>
    %c136 = arith.constant 136 : index
    %1082 = memref.load %arg4[%c136] : memref<288xf32, #tpu.memory_space<smem>>
    %1083 = vector.broadcast %1082 : f32 to vector<32x32xf32>
    %1084 = arith.mulf %1083, %1069 : vector<32x32xf32>
    %1085 = arith.addf %1051, %1084 : vector<32x32xf32>
    %c172 = arith.constant 172 : index
    %1086 = memref.load %arg4[%c172] : memref<288xf32, #tpu.memory_space<smem>>
    %1087 = vector.broadcast %1086 : f32 to vector<32x32xf32>
    %1088 = arith.mulf %1087, %1069 : vector<32x32xf32>
    %1089 = arith.addf %1055, %1088 : vector<32x32xf32>
    %c208 = arith.constant 208 : index
    %1090 = memref.load %arg4[%c208] : memref<288xf32, #tpu.memory_space<smem>>
    %1091 = vector.broadcast %1090 : f32 to vector<32x32xf32>
    %1092 = arith.mulf %1091, %1069 : vector<32x32xf32>
    %1093 = arith.addf %1059, %1092 : vector<32x32xf32>
    %c244 = arith.constant 244 : index
    %1094 = memref.load %arg4[%c244] : memref<288xf32, #tpu.memory_space<smem>>
    %1095 = vector.broadcast %1094 : f32 to vector<32x32xf32>
    %1096 = arith.mulf %1095, %1069 : vector<32x32xf32>
    %1097 = arith.addf %1063, %1096 : vector<32x32xf32>
    %c280 = arith.constant 280 : index
    %1098 = memref.load %arg4[%c280] : memref<288xf32, #tpu.memory_space<smem>>
    %1099 = vector.broadcast %1098 : f32 to vector<32x32xf32>
    %1100 = arith.mulf %1099, %1069 : vector<32x32xf32>
    %1101 = arith.addf %1067, %1100 : vector<32x32xf32>
    %c3_149 = arith.constant 3 : index
    %c0_150 = arith.constant 0 : index
    %c2_151 = arith.constant 2 : index
    %1102 = vector.load %arg7[%c3_149, %c0_150, %c2_151] : memref<4x34x34xf32, #tpu.memory_space<vmem>>, vector<1x32x32xf32>
    %1103 = vector.shape_cast %1102 : vector<1x32x32xf32> to vector<32x32xf32>
    %c29 = arith.constant 29 : index
    %1104 = memref.load %arg4[%c29] : memref<288xf32, #tpu.memory_space<smem>>
    %1105 = vector.broadcast %1104 : f32 to vector<32x32xf32>
    %1106 = arith.mulf %1105, %1103 : vector<32x32xf32>
    %1107 = arith.addf %1073, %1106 : vector<32x32xf32>
    %c65 = arith.constant 65 : index
    %1108 = memref.load %arg4[%c65] : memref<288xf32, #tpu.memory_space<smem>>
    %1109 = vector.broadcast %1108 : f32 to vector<32x32xf32>
    %1110 = arith.mulf %1109, %1103 : vector<32x32xf32>
    %1111 = arith.addf %1077, %1110 : vector<32x32xf32>
    %c101 = arith.constant 101 : index
    %1112 = memref.load %arg4[%c101] : memref<288xf32, #tpu.memory_space<smem>>
    %1113 = vector.broadcast %1112 : f32 to vector<32x32xf32>
    %1114 = arith.mulf %1113, %1103 : vector<32x32xf32>
    %1115 = arith.addf %1081, %1114 : vector<32x32xf32>
    %c137 = arith.constant 137 : index
    %1116 = memref.load %arg4[%c137] : memref<288xf32, #tpu.memory_space<smem>>
    %1117 = vector.broadcast %1116 : f32 to vector<32x32xf32>
    %1118 = arith.mulf %1117, %1103 : vector<32x32xf32>
    %1119 = arith.addf %1085, %1118 : vector<32x32xf32>
    %c173 = arith.constant 173 : index
    %1120 = memref.load %arg4[%c173] : memref<288xf32, #tpu.memory_space<smem>>
    %1121 = vector.broadcast %1120 : f32 to vector<32x32xf32>
    %1122 = arith.mulf %1121, %1103 : vector<32x32xf32>
    %1123 = arith.addf %1089, %1122 : vector<32x32xf32>
    %c209 = arith.constant 209 : index
    %1124 = memref.load %arg4[%c209] : memref<288xf32, #tpu.memory_space<smem>>
    %1125 = vector.broadcast %1124 : f32 to vector<32x32xf32>
    %1126 = arith.mulf %1125, %1103 : vector<32x32xf32>
    %1127 = arith.addf %1093, %1126 : vector<32x32xf32>
    %c245 = arith.constant 245 : index
    %1128 = memref.load %arg4[%c245] : memref<288xf32, #tpu.memory_space<smem>>
    %1129 = vector.broadcast %1128 : f32 to vector<32x32xf32>
    %1130 = arith.mulf %1129, %1103 : vector<32x32xf32>
    %1131 = arith.addf %1097, %1130 : vector<32x32xf32>
    %c281 = arith.constant 281 : index
    %1132 = memref.load %arg4[%c281] : memref<288xf32, #tpu.memory_space<smem>>
    %1133 = vector.broadcast %1132 : f32 to vector<32x32xf32>
    %1134 = arith.mulf %1133, %1103 : vector<32x32xf32>
    %1135 = arith.addf %1101, %1134 : vector<32x32xf32>
    %c3_152 = arith.constant 3 : index
    %c1_153 = arith.constant 1 : index
    %c0_154 = arith.constant 0 : index
    %1136 = vector.load %arg7[%c3_152, %c1_153, %c0_154] : memref<4x34x34xf32, #tpu.memory_space<vmem>>, vector<1x32x32xf32>
    %1137 = vector.shape_cast %1136 : vector<1x32x32xf32> to vector<32x32xf32>
    %c30 = arith.constant 30 : index
    %1138 = memref.load %arg4[%c30] : memref<288xf32, #tpu.memory_space<smem>>
    %1139 = vector.broadcast %1138 : f32 to vector<32x32xf32>
    %1140 = arith.mulf %1139, %1137 : vector<32x32xf32>
    %1141 = arith.addf %1107, %1140 : vector<32x32xf32>
    %c66 = arith.constant 66 : index
    %1142 = memref.load %arg4[%c66] : memref<288xf32, #tpu.memory_space<smem>>
    %1143 = vector.broadcast %1142 : f32 to vector<32x32xf32>
    %1144 = arith.mulf %1143, %1137 : vector<32x32xf32>
    %1145 = arith.addf %1111, %1144 : vector<32x32xf32>
    %c102 = arith.constant 102 : index
    %1146 = memref.load %arg4[%c102] : memref<288xf32, #tpu.memory_space<smem>>
    %1147 = vector.broadcast %1146 : f32 to vector<32x32xf32>
    %1148 = arith.mulf %1147, %1137 : vector<32x32xf32>
    %1149 = arith.addf %1115, %1148 : vector<32x32xf32>
    %c138 = arith.constant 138 : index
    %1150 = memref.load %arg4[%c138] : memref<288xf32, #tpu.memory_space<smem>>
    %1151 = vector.broadcast %1150 : f32 to vector<32x32xf32>
    %1152 = arith.mulf %1151, %1137 : vector<32x32xf32>
    %1153 = arith.addf %1119, %1152 : vector<32x32xf32>
    %c174 = arith.constant 174 : index
    %1154 = memref.load %arg4[%c174] : memref<288xf32, #tpu.memory_space<smem>>
    %1155 = vector.broadcast %1154 : f32 to vector<32x32xf32>
    %1156 = arith.mulf %1155, %1137 : vector<32x32xf32>
    %1157 = arith.addf %1123, %1156 : vector<32x32xf32>
    %c210 = arith.constant 210 : index
    %1158 = memref.load %arg4[%c210] : memref<288xf32, #tpu.memory_space<smem>>
    %1159 = vector.broadcast %1158 : f32 to vector<32x32xf32>
    %1160 = arith.mulf %1159, %1137 : vector<32x32xf32>
    %1161 = arith.addf %1127, %1160 : vector<32x32xf32>
    %c246 = arith.constant 246 : index
    %1162 = memref.load %arg4[%c246] : memref<288xf32, #tpu.memory_space<smem>>
    %1163 = vector.broadcast %1162 : f32 to vector<32x32xf32>
    %1164 = arith.mulf %1163, %1137 : vector<32x32xf32>
    %1165 = arith.addf %1131, %1164 : vector<32x32xf32>
    %c282 = arith.constant 282 : index
    %1166 = memref.load %arg4[%c282] : memref<288xf32, #tpu.memory_space<smem>>
    %1167 = vector.broadcast %1166 : f32 to vector<32x32xf32>
    %1168 = arith.mulf %1167, %1137 : vector<32x32xf32>
    %1169 = arith.addf %1135, %1168 : vector<32x32xf32>
    %c3_155 = arith.constant 3 : index
    %c1_156 = arith.constant 1 : index
    %c1_157 = arith.constant 1 : index
    %1170 = vector.load %arg7[%c3_155, %c1_156, %c1_157] : memref<4x34x34xf32, #tpu.memory_space<vmem>>, vector<1x32x32xf32>
    %1171 = vector.shape_cast %1170 : vector<1x32x32xf32> to vector<32x32xf32>
    %c31 = arith.constant 31 : index
    %1172 = memref.load %arg4[%c31] : memref<288xf32, #tpu.memory_space<smem>>
    %1173 = vector.broadcast %1172 : f32 to vector<32x32xf32>
    %1174 = arith.mulf %1173, %1171 : vector<32x32xf32>
    %1175 = arith.addf %1141, %1174 : vector<32x32xf32>
    %c67 = arith.constant 67 : index
    %1176 = memref.load %arg4[%c67] : memref<288xf32, #tpu.memory_space<smem>>
    %1177 = vector.broadcast %1176 : f32 to vector<32x32xf32>
    %1178 = arith.mulf %1177, %1171 : vector<32x32xf32>
    %1179 = arith.addf %1145, %1178 : vector<32x32xf32>
    %c103 = arith.constant 103 : index
    %1180 = memref.load %arg4[%c103] : memref<288xf32, #tpu.memory_space<smem>>
    %1181 = vector.broadcast %1180 : f32 to vector<32x32xf32>
    %1182 = arith.mulf %1181, %1171 : vector<32x32xf32>
    %1183 = arith.addf %1149, %1182 : vector<32x32xf32>
    %c139 = arith.constant 139 : index
    %1184 = memref.load %arg4[%c139] : memref<288xf32, #tpu.memory_space<smem>>
    %1185 = vector.broadcast %1184 : f32 to vector<32x32xf32>
    %1186 = arith.mulf %1185, %1171 : vector<32x32xf32>
    %1187 = arith.addf %1153, %1186 : vector<32x32xf32>
    %c175 = arith.constant 175 : index
    %1188 = memref.load %arg4[%c175] : memref<288xf32, #tpu.memory_space<smem>>
    %1189 = vector.broadcast %1188 : f32 to vector<32x32xf32>
    %1190 = arith.mulf %1189, %1171 : vector<32x32xf32>
    %1191 = arith.addf %1157, %1190 : vector<32x32xf32>
    %c211 = arith.constant 211 : index
    %1192 = memref.load %arg4[%c211] : memref<288xf32, #tpu.memory_space<smem>>
    %1193 = vector.broadcast %1192 : f32 to vector<32x32xf32>
    %1194 = arith.mulf %1193, %1171 : vector<32x32xf32>
    %1195 = arith.addf %1161, %1194 : vector<32x32xf32>
    %c247 = arith.constant 247 : index
    %1196 = memref.load %arg4[%c247] : memref<288xf32, #tpu.memory_space<smem>>
    %1197 = vector.broadcast %1196 : f32 to vector<32x32xf32>
    %1198 = arith.mulf %1197, %1171 : vector<32x32xf32>
    %1199 = arith.addf %1165, %1198 : vector<32x32xf32>
    %c283 = arith.constant 283 : index
    %1200 = memref.load %arg4[%c283] : memref<288xf32, #tpu.memory_space<smem>>
    %1201 = vector.broadcast %1200 : f32 to vector<32x32xf32>
    %1202 = arith.mulf %1201, %1171 : vector<32x32xf32>
    %1203 = arith.addf %1169, %1202 : vector<32x32xf32>
    %c3_158 = arith.constant 3 : index
    %c1_159 = arith.constant 1 : index
    %c2_160 = arith.constant 2 : index
    %1204 = vector.load %arg7[%c3_158, %c1_159, %c2_160] : memref<4x34x34xf32, #tpu.memory_space<vmem>>, vector<1x32x32xf32>
    %1205 = vector.shape_cast %1204 : vector<1x32x32xf32> to vector<32x32xf32>
    %c32 = arith.constant 32 : index
    %1206 = memref.load %arg4[%c32] : memref<288xf32, #tpu.memory_space<smem>>
    %1207 = vector.broadcast %1206 : f32 to vector<32x32xf32>
    %1208 = arith.mulf %1207, %1205 : vector<32x32xf32>
    %1209 = arith.addf %1175, %1208 : vector<32x32xf32>
    %c68 = arith.constant 68 : index
    %1210 = memref.load %arg4[%c68] : memref<288xf32, #tpu.memory_space<smem>>
    %1211 = vector.broadcast %1210 : f32 to vector<32x32xf32>
    %1212 = arith.mulf %1211, %1205 : vector<32x32xf32>
    %1213 = arith.addf %1179, %1212 : vector<32x32xf32>
    %c104 = arith.constant 104 : index
    %1214 = memref.load %arg4[%c104] : memref<288xf32, #tpu.memory_space<smem>>
    %1215 = vector.broadcast %1214 : f32 to vector<32x32xf32>
    %1216 = arith.mulf %1215, %1205 : vector<32x32xf32>
    %1217 = arith.addf %1183, %1216 : vector<32x32xf32>
    %c140 = arith.constant 140 : index
    %1218 = memref.load %arg4[%c140] : memref<288xf32, #tpu.memory_space<smem>>
    %1219 = vector.broadcast %1218 : f32 to vector<32x32xf32>
    %1220 = arith.mulf %1219, %1205 : vector<32x32xf32>
    %1221 = arith.addf %1187, %1220 : vector<32x32xf32>
    %c176 = arith.constant 176 : index
    %1222 = memref.load %arg4[%c176] : memref<288xf32, #tpu.memory_space<smem>>
    %1223 = vector.broadcast %1222 : f32 to vector<32x32xf32>
    %1224 = arith.mulf %1223, %1205 : vector<32x32xf32>
    %1225 = arith.addf %1191, %1224 : vector<32x32xf32>
    %c212 = arith.constant 212 : index
    %1226 = memref.load %arg4[%c212] : memref<288xf32, #tpu.memory_space<smem>>
    %1227 = vector.broadcast %1226 : f32 to vector<32x32xf32>
    %1228 = arith.mulf %1227, %1205 : vector<32x32xf32>
    %1229 = arith.addf %1195, %1228 : vector<32x32xf32>
    %c248 = arith.constant 248 : index
    %1230 = memref.load %arg4[%c248] : memref<288xf32, #tpu.memory_space<smem>>
    %1231 = vector.broadcast %1230 : f32 to vector<32x32xf32>
    %1232 = arith.mulf %1231, %1205 : vector<32x32xf32>
    %1233 = arith.addf %1199, %1232 : vector<32x32xf32>
    %c284 = arith.constant 284 : index
    %1234 = memref.load %arg4[%c284] : memref<288xf32, #tpu.memory_space<smem>>
    %1235 = vector.broadcast %1234 : f32 to vector<32x32xf32>
    %1236 = arith.mulf %1235, %1205 : vector<32x32xf32>
    %1237 = arith.addf %1203, %1236 : vector<32x32xf32>
    %c3_161 = arith.constant 3 : index
    %c2_162 = arith.constant 2 : index
    %c0_163 = arith.constant 0 : index
    %1238 = vector.load %arg7[%c3_161, %c2_162, %c0_163] : memref<4x34x34xf32, #tpu.memory_space<vmem>>, vector<1x32x32xf32>
    %1239 = vector.shape_cast %1238 : vector<1x32x32xf32> to vector<32x32xf32>
    %c33 = arith.constant 33 : index
    %1240 = memref.load %arg4[%c33] : memref<288xf32, #tpu.memory_space<smem>>
    %1241 = vector.broadcast %1240 : f32 to vector<32x32xf32>
    %1242 = arith.mulf %1241, %1239 : vector<32x32xf32>
    %1243 = arith.addf %1209, %1242 : vector<32x32xf32>
    %c69 = arith.constant 69 : index
    %1244 = memref.load %arg4[%c69] : memref<288xf32, #tpu.memory_space<smem>>
    %1245 = vector.broadcast %1244 : f32 to vector<32x32xf32>
    %1246 = arith.mulf %1245, %1239 : vector<32x32xf32>
    %1247 = arith.addf %1213, %1246 : vector<32x32xf32>
    %c105 = arith.constant 105 : index
    %1248 = memref.load %arg4[%c105] : memref<288xf32, #tpu.memory_space<smem>>
    %1249 = vector.broadcast %1248 : f32 to vector<32x32xf32>
    %1250 = arith.mulf %1249, %1239 : vector<32x32xf32>
    %1251 = arith.addf %1217, %1250 : vector<32x32xf32>
    %c141 = arith.constant 141 : index
    %1252 = memref.load %arg4[%c141] : memref<288xf32, #tpu.memory_space<smem>>
    %1253 = vector.broadcast %1252 : f32 to vector<32x32xf32>
    %1254 = arith.mulf %1253, %1239 : vector<32x32xf32>
    %1255 = arith.addf %1221, %1254 : vector<32x32xf32>
    %c177 = arith.constant 177 : index
    %1256 = memref.load %arg4[%c177] : memref<288xf32, #tpu.memory_space<smem>>
    %1257 = vector.broadcast %1256 : f32 to vector<32x32xf32>
    %1258 = arith.mulf %1257, %1239 : vector<32x32xf32>
    %1259 = arith.addf %1225, %1258 : vector<32x32xf32>
    %c213 = arith.constant 213 : index
    %1260 = memref.load %arg4[%c213] : memref<288xf32, #tpu.memory_space<smem>>
    %1261 = vector.broadcast %1260 : f32 to vector<32x32xf32>
    %1262 = arith.mulf %1261, %1239 : vector<32x32xf32>
    %1263 = arith.addf %1229, %1262 : vector<32x32xf32>
    %c249 = arith.constant 249 : index
    %1264 = memref.load %arg4[%c249] : memref<288xf32, #tpu.memory_space<smem>>
    %1265 = vector.broadcast %1264 : f32 to vector<32x32xf32>
    %1266 = arith.mulf %1265, %1239 : vector<32x32xf32>
    %1267 = arith.addf %1233, %1266 : vector<32x32xf32>
    %c285 = arith.constant 285 : index
    %1268 = memref.load %arg4[%c285] : memref<288xf32, #tpu.memory_space<smem>>
    %1269 = vector.broadcast %1268 : f32 to vector<32x32xf32>
    %1270 = arith.mulf %1269, %1239 : vector<32x32xf32>
    %1271 = arith.addf %1237, %1270 : vector<32x32xf32>
    %c3_164 = arith.constant 3 : index
    %c2_165 = arith.constant 2 : index
    %c1_166 = arith.constant 1 : index
    %1272 = vector.load %arg7[%c3_164, %c2_165, %c1_166] : memref<4x34x34xf32, #tpu.memory_space<vmem>>, vector<1x32x32xf32>
    %1273 = vector.shape_cast %1272 : vector<1x32x32xf32> to vector<32x32xf32>
    %c34 = arith.constant 34 : index
    %1274 = memref.load %arg4[%c34] : memref<288xf32, #tpu.memory_space<smem>>
    %1275 = vector.broadcast %1274 : f32 to vector<32x32xf32>
    %1276 = arith.mulf %1275, %1273 : vector<32x32xf32>
    %1277 = arith.addf %1243, %1276 : vector<32x32xf32>
    %c70 = arith.constant 70 : index
    %1278 = memref.load %arg4[%c70] : memref<288xf32, #tpu.memory_space<smem>>
    %1279 = vector.broadcast %1278 : f32 to vector<32x32xf32>
    %1280 = arith.mulf %1279, %1273 : vector<32x32xf32>
    %1281 = arith.addf %1247, %1280 : vector<32x32xf32>
    %c106 = arith.constant 106 : index
    %1282 = memref.load %arg4[%c106] : memref<288xf32, #tpu.memory_space<smem>>
    %1283 = vector.broadcast %1282 : f32 to vector<32x32xf32>
    %1284 = arith.mulf %1283, %1273 : vector<32x32xf32>
    %1285 = arith.addf %1251, %1284 : vector<32x32xf32>
    %c142 = arith.constant 142 : index
    %1286 = memref.load %arg4[%c142] : memref<288xf32, #tpu.memory_space<smem>>
    %1287 = vector.broadcast %1286 : f32 to vector<32x32xf32>
    %1288 = arith.mulf %1287, %1273 : vector<32x32xf32>
    %1289 = arith.addf %1255, %1288 : vector<32x32xf32>
    %c178 = arith.constant 178 : index
    %1290 = memref.load %arg4[%c178] : memref<288xf32, #tpu.memory_space<smem>>
    %1291 = vector.broadcast %1290 : f32 to vector<32x32xf32>
    %1292 = arith.mulf %1291, %1273 : vector<32x32xf32>
    %1293 = arith.addf %1259, %1292 : vector<32x32xf32>
    %c214 = arith.constant 214 : index
    %1294 = memref.load %arg4[%c214] : memref<288xf32, #tpu.memory_space<smem>>
    %1295 = vector.broadcast %1294 : f32 to vector<32x32xf32>
    %1296 = arith.mulf %1295, %1273 : vector<32x32xf32>
    %1297 = arith.addf %1263, %1296 : vector<32x32xf32>
    %c250 = arith.constant 250 : index
    %1298 = memref.load %arg4[%c250] : memref<288xf32, #tpu.memory_space<smem>>
    %1299 = vector.broadcast %1298 : f32 to vector<32x32xf32>
    %1300 = arith.mulf %1299, %1273 : vector<32x32xf32>
    %1301 = arith.addf %1267, %1300 : vector<32x32xf32>
    %c286 = arith.constant 286 : index
    %1302 = memref.load %arg4[%c286] : memref<288xf32, #tpu.memory_space<smem>>
    %1303 = vector.broadcast %1302 : f32 to vector<32x32xf32>
    %1304 = arith.mulf %1303, %1273 : vector<32x32xf32>
    %1305 = arith.addf %1271, %1304 : vector<32x32xf32>
    %c3_167 = arith.constant 3 : index
    %c2_168 = arith.constant 2 : index
    %c2_169 = arith.constant 2 : index
    %1306 = vector.load %arg7[%c3_167, %c2_168, %c2_169] : memref<4x34x34xf32, #tpu.memory_space<vmem>>, vector<1x32x32xf32>
    %1307 = vector.shape_cast %1306 : vector<1x32x32xf32> to vector<32x32xf32>
    %c35 = arith.constant 35 : index
    %1308 = memref.load %arg4[%c35] : memref<288xf32, #tpu.memory_space<smem>>
    %1309 = vector.broadcast %1308 : f32 to vector<32x32xf32>
    %1310 = arith.mulf %1309, %1307 : vector<32x32xf32>
    %1311 = arith.addf %1277, %1310 : vector<32x32xf32>
    %c71 = arith.constant 71 : index
    %1312 = memref.load %arg4[%c71] : memref<288xf32, #tpu.memory_space<smem>>
    %1313 = vector.broadcast %1312 : f32 to vector<32x32xf32>
    %1314 = arith.mulf %1313, %1307 : vector<32x32xf32>
    %1315 = arith.addf %1281, %1314 : vector<32x32xf32>
    %c107 = arith.constant 107 : index
    %1316 = memref.load %arg4[%c107] : memref<288xf32, #tpu.memory_space<smem>>
    %1317 = vector.broadcast %1316 : f32 to vector<32x32xf32>
    %1318 = arith.mulf %1317, %1307 : vector<32x32xf32>
    %1319 = arith.addf %1285, %1318 : vector<32x32xf32>
    %c143 = arith.constant 143 : index
    %1320 = memref.load %arg4[%c143] : memref<288xf32, #tpu.memory_space<smem>>
    %1321 = vector.broadcast %1320 : f32 to vector<32x32xf32>
    %1322 = arith.mulf %1321, %1307 : vector<32x32xf32>
    %1323 = arith.addf %1289, %1322 : vector<32x32xf32>
    %c179 = arith.constant 179 : index
    %1324 = memref.load %arg4[%c179] : memref<288xf32, #tpu.memory_space<smem>>
    %1325 = vector.broadcast %1324 : f32 to vector<32x32xf32>
    %1326 = arith.mulf %1325, %1307 : vector<32x32xf32>
    %1327 = arith.addf %1293, %1326 : vector<32x32xf32>
    %c215 = arith.constant 215 : index
    %1328 = memref.load %arg4[%c215] : memref<288xf32, #tpu.memory_space<smem>>
    %1329 = vector.broadcast %1328 : f32 to vector<32x32xf32>
    %1330 = arith.mulf %1329, %1307 : vector<32x32xf32>
    %1331 = arith.addf %1297, %1330 : vector<32x32xf32>
    %c251 = arith.constant 251 : index
    %1332 = memref.load %arg4[%c251] : memref<288xf32, #tpu.memory_space<smem>>
    %1333 = vector.broadcast %1332 : f32 to vector<32x32xf32>
    %1334 = arith.mulf %1333, %1307 : vector<32x32xf32>
    %1335 = arith.addf %1301, %1334 : vector<32x32xf32>
    %c287 = arith.constant 287 : index
    %1336 = memref.load %arg4[%c287] : memref<288xf32, #tpu.memory_space<smem>>
    %1337 = vector.broadcast %1336 : f32 to vector<32x32xf32>
    %1338 = arith.mulf %1337, %1307 : vector<32x32xf32>
    %1339 = arith.addf %1305, %1338 : vector<32x32xf32>
    %c0_170 = arith.constant 0 : index
    %c0_171 = arith.constant 0 : index
    %c0_172 = arith.constant 0 : index
    %c0_173 = arith.constant 0 : index
    %1340 = vector.load %arg6[%c0_170, %c0_171, %c0_172, %c0_173] : memref<1x8x32x32xf32, #tpu.memory_space<vmem>>, vector<1x1x32x32xf32>
    %1341 = vector.shape_cast %1340 : vector<1x1x32x32xf32> to vector<32x32xf32>
    %1342 = vector.shape_cast %1311 : vector<32x32xf32> to vector<1x1x32x32xf32>
    tpu.vector_store %arg6[%c0_170, %c0_171, %c0_172, %c0_173], %1342 {strides = array<i32>} : memref<1x8x32x32xf32, #tpu.memory_space<vmem>>, vector<1x1x32x32xf32>,
    %c0_174 = arith.constant 0 : index
    %c1_175 = arith.constant 1 : index
    %c0_176 = arith.constant 0 : index
    %c0_177 = arith.constant 0 : index
    %1343 = vector.load %arg6[%c0_174, %c1_175, %c0_176, %c0_177] : memref<1x8x32x32xf32, #tpu.memory_space<vmem>>, vector<1x1x32x32xf32>
    %1344 = vector.shape_cast %1343 : vector<1x1x32x32xf32> to vector<32x32xf32>
    %1345 = vector.shape_cast %1315 : vector<32x32xf32> to vector<1x1x32x32xf32>
    tpu.vector_store %arg6[%c0_174, %c1_175, %c0_176, %c0_177], %1345 {strides = array<i32>} : memref<1x8x32x32xf32, #tpu.memory_space<vmem>>, vector<1x1x32x32xf32>,
    %c0_178 = arith.constant 0 : index
    %c2_179 = arith.constant 2 : index
    %c0_180 = arith.constant 0 : index
    %c0_181 = arith.constant 0 : index
    %1346 = vector.load %arg6[%c0_178, %c2_179, %c0_180, %c0_181] : memref<1x8x32x32xf32, #tpu.memory_space<vmem>>, vector<1x1x32x32xf32>
    %1347 = vector.shape_cast %1346 : vector<1x1x32x32xf32> to vector<32x32xf32>
    %1348 = vector.shape_cast %1319 : vector<32x32xf32> to vector<1x1x32x32xf32>
    tpu.vector_store %arg6[%c0_178, %c2_179, %c0_180, %c0_181], %1348 {strides = array<i32>} : memref<1x8x32x32xf32, #tpu.memory_space<vmem>>, vector<1x1x32x32xf32>,
    %c0_182 = arith.constant 0 : index
    %c3_183 = arith.constant 3 : index
    %c0_184 = arith.constant 0 : index
    %c0_185 = arith.constant 0 : index
    %1349 = vector.load %arg6[%c0_182, %c3_183, %c0_184, %c0_185] : memref<1x8x32x32xf32, #tpu.memory_space<vmem>>, vector<1x1x32x32xf32>
    %1350 = vector.shape_cast %1349 : vector<1x1x32x32xf32> to vector<32x32xf32>
    %1351 = vector.shape_cast %1323 : vector<32x32xf32> to vector<1x1x32x32xf32>
    tpu.vector_store %arg6[%c0_182, %c3_183, %c0_184, %c0_185], %1351 {strides = array<i32>} : memref<1x8x32x32xf32, #tpu.memory_space<vmem>>, vector<1x1x32x32xf32>,
    %c0_186 = arith.constant 0 : index
    %c4_187 = arith.constant 4 : index
    %c0_188 = arith.constant 0 : index
    %c0_189 = arith.constant 0 : index
    %1352 = vector.load %arg6[%c0_186, %c4_187, %c0_188, %c0_189] : memref<1x8x32x32xf32, #tpu.memory_space<vmem>>, vector<1x1x32x32xf32>
    %1353 = vector.shape_cast %1352 : vector<1x1x32x32xf32> to vector<32x32xf32>
    %1354 = vector.shape_cast %1327 : vector<32x32xf32> to vector<1x1x32x32xf32>
    tpu.vector_store %arg6[%c0_186, %c4_187, %c0_188, %c0_189], %1354 {strides = array<i32>} : memref<1x8x32x32xf32, #tpu.memory_space<vmem>>, vector<1x1x32x32xf32>,
    %c0_190 = arith.constant 0 : index
    %c5_191 = arith.constant 5 : index
    %c0_192 = arith.constant 0 : index
    %c0_193 = arith.constant 0 : index
    %1355 = vector.load %arg6[%c0_190, %c5_191, %c0_192, %c0_193] : memref<1x8x32x32xf32, #tpu.memory_space<vmem>>, vector<1x1x32x32xf32>
    %1356 = vector.shape_cast %1355 : vector<1x1x32x32xf32> to vector<32x32xf32>
    %1357 = vector.shape_cast %1331 : vector<32x32xf32> to vector<1x1x32x32xf32>
    tpu.vector_store %arg6[%c0_190, %c5_191, %c0_192, %c0_193], %1357 {strides = array<i32>} : memref<1x8x32x32xf32, #tpu.memory_space<vmem>>, vector<1x1x32x32xf32>,
    %c0_194 = arith.constant 0 : index
    %c6_195 = arith.constant 6 : index
    %c0_196 = arith.constant 0 : index
    %c0_197 = arith.constant 0 : index
    %1358 = vector.load %arg6[%c0_194, %c6_195, %c0_196, %c0_197] : memref<1x8x32x32xf32, #tpu.memory_space<vmem>>, vector<1x1x32x32xf32>
    %1359 = vector.shape_cast %1358 : vector<1x1x32x32xf32> to vector<32x32xf32>
    %1360 = vector.shape_cast %1335 : vector<32x32xf32> to vector<1x1x32x32xf32>
    tpu.vector_store %arg6[%c0_194, %c6_195, %c0_196, %c0_197], %1360 {strides = array<i32>} : memref<1x8x32x32xf32, #tpu.memory_space<vmem>>, vector<1x1x32x32xf32>,
    %c0_198 = arith.constant 0 : index
    %c7_199 = arith.constant 7 : index
    %c0_200 = arith.constant 0 : index
    %c0_201 = arith.constant 0 : index
    %1361 = vector.load %arg6[%c0_198, %c7_199, %c0_200, %c0_201] : memref<1x8x32x32xf32, #tpu.memory_space<vmem>>, vector<1x1x32x32xf32>
    %1362 = vector.shape_cast %1361 : vector<1x1x32x32xf32> to vector<32x32xf32>
    %1363 = vector.shape_cast %1339 : vector<32x32xf32> to vector<1x1x32x32xf32>
    tpu.vector_store %arg6[%c0_198, %c7_199, %c0_200, %c0_201], %1363 {strides = array<i32>} : memref<1x8x32x32xf32, #tpu.memory_space<vmem>>, vector<1x1x32x32xf32>,
    return
  }
  func.func @transform_0(%arg0: i32) -> (i32, i32, i32, i32) {
    %c0_i32 = arith.constant 0 : i32
    %c0_i32_0 = arith.constant 0 : i32
    %c0_i32_1 = arith.constant 0 : i32
    %c0_i32_2 = arith.constant 0 : i32
    return %arg0, %c0_i32, %c0_i32_0, %c0_i32_1 : i32, i32, i32, i32
  }
  func.func @transform_1(%arg0: i32) -> (i32, i32) {
    %c0_i32 = arith.constant 0 : i32
    %c0_i32_0 = arith.constant 0 : i32
    %c0_i32_1 = arith.constant 0 : i32
    return %c0_i32, %c0_i32_0 : i32, i32
  }
  func.func @transform_2(%arg0: i32) -> (i32, i32) {
    %c0_i32 = arith.constant 0 : i32
    %c0_i32_0 = arith.constant 0 : i32
    %c0_i32_1 = arith.constant 0 : i32
    return %c0_i32, %c0_i32_0 : i32, i32
  }
  func.func @transform_3(%arg0: i32) -> i32 {
    %c0_i32 = arith.constant 0 : i32
    %c0_i32_0 = arith.constant 0 : i32
    return %c0_i32 : i32
  }
  func.func @transform_4(%arg0: i32) -> i32 {
    %c0_i32 = arith.constant 0 : i32
    %c0_i32_0 = arith.constant 0 : i32
    return %c0_i32 : i32
  }
  func.func @transform_5(%arg0: i32) -> (i32, i32, i32, i32) {
    %c0_i32 = arith.constant 0 : i32
    %c0_i32_0 = arith.constant 0 : i32
    %c0_i32_1 = arith.constant 0 : i32
    %c0_i32_2 = arith.constant 0 : i32
    return %arg0, %c0_i32, %c0_i32_0, %c0_i32_1 : i32, i32, i32, i32
  }
}

</mosaic_0001>

<bundles_post_ra>
// kernel: tpu_custom_call.1
= control target key start
LH: loop header
LB: loop body
LE: loop exit
PB: predicated region body
PF: predicated region fallthrough
CT: control target
= control target key end

     0   :  { %s14163_s0 = inlined_call_operand.hbm [shape: f32[2,4,16,16], index: 0, kind: input, shape index: {}]   ;;  %s14164_s1 = inlined_call_operand.vmem [shape: f32[2,4], index: 1, kind: input, shape index: {}]   ;;  %s14165_s2 = inlined_call_operand.hbm [shape: f32[2,4], index: 2, kind: input, shape index: {}]   ;;  %s14166_s3 = inlined_call_operand.vmem [shape: f32[288], index: 3, kind: input, shape index: {}]   ;;  %s14167_s4 = inlined_call_operand.vmem [shape: f32[8], index: 4, kind: input, shape index: {}]   ;;  %s14168_s5 = inlined_call_operand.hbm [shape: f32[2,8,32,32], index: 5, kind: output, shape index: {}]  }
   0x1   :  { %14353 = sst [smem:[#allocation132_spill]] %s14163_s0 }
   0x2   :  { %14354 = sst [smem:[#allocation133_spill]] %s14164_s1 }
   0x3   :  { %14355 = sst [smem:[#allocation134_spill]] %s14165_s2 }
   0x4   :  { %14356 = sst [smem:[#allocation135_spill]] %s14166_s3 }
   0x5   :  { %14357 = sst [smem:[#allocation136_spill]] %s14167_s4 }
   0x6   :  { %10 = vsyncpa [#allocation4], 0 }
   0x7   :  { %12 = vsyncpa [#allocation4 + $0x1], 0 }
   0x8   :  { %13 = vsyncpa [#allocation7], 0 }
   0x9   :  { %14 = vsyncpa [#allocation6], 0 }
   0xa   :  { %15 = vsyncpa [#allocation11], 0 }
   0xb   :  { %16 = vsyncpa [#allocation5], 0 }
   0xc   :  { %18 = vsyncpa [#allocation5 + $0x1], 0  ;;  %s8208_s18 = smov 0   ;;  %s8210_s19 = smov 0  }
   0xd   :  { %s8212_s20 = smov 0   ;;  %s8214_s21 = smov 0  }
   0xe LB: > { %14358 = sst [smem:[#allocation19_spill]] %s8152_s19  ;;  %s8229_s22 = sadd.s32 4294967295, %s8160_s21   ;;  %s8160_s21 = sphi %s8214_s21, %s15125_s21   ;;  %s8156_s20 = sphi %s8212_s20, %s15124_s20   ;;  %s8152_s19 = sphi %s8210_s19, %s15123_s19   ;;  %s8148_s18 = sphi %s8208_s18, %s15122_s18  }
   0xf   : > { %14359 = sst [smem:[#allocation20_spill]] %s8156_s20  ;;  %s7311_s23 = sadd.s32 4294967294, %s8160_s21  }
  0x10   : > { %p44_p0 = scmp.ne.s32.totalorder %s8152_s19, %s8148_s18  ;;  %p14169_p1 = scmp.eq.s32.totalorder %s8229_s22, 0 }
  0x11   : > { %p158_p3 = scmp.eq.s32.totalorder %s7311_s23, 1  ;;  %p7312_p5 = scmp.ge.s32.totalorder %s8160_s21, 1 }
  0x12   : > { %p8238_p4 = por %p14169_p1, %p44_p0  ;;  %p165_p7 = scmp.lt.s32.totalorder %s8160_s21, 3 }
  0x13   : > { %p8243_p6 = por %p158_p3, %p44_p0  ;;  %s14362_s3 = sld [smem:[#allocation135_spill]] }
  0x14   : > { %s14360_s24 = scalar_select %p8238_p4, 1, 0 }
  0x15   : > { %s14361_s25 = scalar_select %p8243_p6, 1, 0 }
  0x16   : > { %p8251_p8 = pnand %p7312_p5, %p165_p7  ;;  %s14364_s1 = sld [smem:[#allocation133_spill]] }
  0x17   : > { %s14366_s4 = sld [smem:[#allocation136_spill]] }
  0x18   : > { %s14363_s29 = scalar_select %p8251_p8, 1, 0 }
  0x19   : > { %s198_s28 = sshll.u32 %s14362_s3, 4  ;;  %p7903_p10 = pneg %p8251_p8  ;;  %s199_s28 = int_to_ptr.vmem [resolvable:$true] %s198_s28 }
  0x1a   : > { %s7994_s12 = scalar_lea.vmem %s199_s28, 48  ;;  %s8001_s13 = scalar_lea.vmem %s199_s28, 64 }
  0x1b   : > { %p8263_p11 = pnand %p7903_p10, %p14169_p1  ;;  %p7995_p12 = scmp.ne.s32.totalorder %s199_s28, %s7994_s12 }
  0x1c   : > { %s178_s7 = sshll.u32 %s14364_s1, 4  ;;  %p8002_p5 = scmp.lt.s32.totalorder %s199_s28, %s199_s28  ;;  %s179_s7 = int_to_ptr.vmem [resolvable:$true] %s178_s7 }
  0x1d   : > { %s209_s11 = sshll.u32 %s14366_s4, 4  ;;  %p7996_p13 = pneg %p8263_p11  ;;  %s8270_s11 = int_to_ptr.vmem [resolvable:$true] %s209_s11 }
  0x1e   : > { %p8003_p7 = scmp.lt.s32.totalorder %s8001_s13, %s7994_s12 }
  0x1f   : > { %p7997_p0 = pnand %p7996_p13, %p7995_p12 }
  0x20   : > { %p8004_p10 = por %p8003_p7, %p8002_p5 }
  0x21   : > { %p7998_p3 = pneg %p7997_p0 }
  0x23   : > { %p8005_p9 = pnand %p8004_p10, %p7998_p3 }
  0x25   : > { %8008 = shalt.err (!%p8005_p9)
}
  0x26   : > { %s8162_s14 = smov [#allocation10]   ;;  %s8009_s15 = scalar_lea.vmem %s179_s7, 32 }
  0x27   : > { %7912 = dma.vmem_to_smem (!%p8263_p11), %s199_s28, 48, %s8162_s14, [#allocation11]  }
  0x28   : > { %p8010_p1 = scmp.ne.s32.totalorder %s179_s7, %s8009_s15  ;;  %p8017_p4 = scmp.lt.s32.totalorder %s179_s7, %s179_s7 }
  0x29   : > { %p8018_p12 = scmp.lt.s32.totalorder %s8009_s15, %s8009_s15 }
  0x2a   : > { %p8012_p2 = pnand %p8010_p1, %p7996_p13 }
  0x2b   : > { %p8019_p0 = por %p8018_p12, %p8017_p4 }
  0x2c   : > { %p8013_p6 = pneg %p8012_p2 }
  0x2e   : > { %p8020_p8 = pnand %p8019_p0, %p8013_p6 }
  0x30   : > { %8023 = shalt.err (!%p8020_p8)
}
  0x31   : > { %s8163_s16 = smov [#allocation8]   ;;  %s14367_s2 = sld [smem:[#allocation134_spill]] }
  0x32   : > { %7906 = dma.vmem_to_smem (!%p8263_p11), %s179_s7, 32, %s8163_s16, [#allocation7]  }
  0x37   : > { %s8024_s26 = scalar_lea.hbm %s14367_s2, 32 }
  0x38   : > { %p8025_p9 = scmp.ne.s32.totalorder %s14367_s2, %s8024_s26  ;;  %p8031_p4 = scmp.lt.u32.totalorder %s8024_s26, %s14367_s2 }
  0x3a   : > { %p8027_p1 = pnand %p8025_p9, %p7996_p13 }
  0x3c   : > { %p8028_p2 = pneg %p8027_p1 }
  0x3e   : > { %p8033_p6 = pnand %p8031_p4, %p8028_p2 }
  0x40   : > { %8036 = shalt.err (!%p8033_p6)
}
  0x41   : > { %s8164_s9 = smov [#allocation9]   ;;  %s8037_s12 = scalar_lea.vmem %s8270_s11, 16 }
  0x42   : > { %7909 = dma.hbm_to_smem (!%p8263_p11), %s14367_s2, 32, %s8164_s9, [#allocation6]  }
  0x43   : > { %p8038_p8 = scmp.ne.s32.totalorder %s8270_s11, %s8037_s12  ;;  %p8045_p7 = scmp.lt.s32.totalorder %s8270_s11, %s8270_s11 }
  0x44   : > { %p8046_p10 = scmp.lt.s32.totalorder %s8037_s12, %s8037_s12 }
  0x45   : > { %p8040_p3 = pnand %p8038_p8, %p7996_p13 }
  0x46   : > { %p8047_p12 = por %p8046_p10, %p8045_p7 }
  0x47   : > { %p8041_p5 = pneg %p8040_p3 }
  0x49   : > { %p8048_p0 = pnand %p8047_p12, %p8041_p5 }
  0x4b   : > { %8051 = shalt.err (!%p8048_p0)
}
  0x4c   : > { %s8165_s13 = smov [#allocation12]   ;;  %s8312_s14 = sadd.s32 1, %s8160_s21  }
  0x4d   : > { %7915 = dma.vmem_to_smem (!%p8263_p11), %s8270_s11, 16, %s8165_s13, [#allocation11]  }
  0x4e   : > { %s28_s15 = ssub.s32 %s8160_s21, %s8312_s14  ;;  %s31_s16 = sadd.s32 1, %s8156_s20 }
  0x4f   : > { %p29_p13 = scmp.eq.s32.totalorder %s28_s15, 0  ;;  %p38_p9 = scmp.ne.s32.totalorder %s8156_s20, %s8152_s19 }
  0x50   : > { %p39_p1 = scmp.eq.s32.totalorder %s8160_s21, 0  ;;  %p14369_p4 = scmp.eq.s32.totalorder %s8229_s22, 1 }
  0x51   : > { %s8321_s8 = scalar_select %p29_p13, %s8156_s20, %s31_s16  }
  0x52   : > { %p40_p2 = por %p39_p1, %p38_p9  ;;  %p8325_p6 = por %p14369_p4, %p38_p9 }
  0x53   : > { %14368 = sst [smem:[#allocation21_spill]] %s8321_s8  ;;  %p7928_p8 = scmp.lt.s32.totalorder %s8160_s21, 2 }
  0x54   : > { %s220_s23 = sand.u32 1, %s8156_s20   ;;  %s7705_s11 = sshll.u32 %s8160_s21, 10 }
  0x55   : > { %s7318_s26 = sshll.u32 %s220_s23, 6  ;;  %s14371_s0 = sld [smem:[#allocation132_spill]] }
  0x56   : > { %s224_s6 = scalar_lea.vmem [#allocation3], %s7318_s26  ;;  %p8339_p11 = pnand %p7928_p8, %p40_p2 }
  0x57   : > { %s231_s9 = sshll.u32 %s224_s6, 4  ;;  %s8343_s10 = scalar_lea.sflag [#allocation4], %s220_s23  ;;  %s8337_s9 = int_to_ptr.vmem [resolvable:$true] %s231_s9 }
  0x58   : > { %p8054_p5 = pneg %p8339_p11 }
  0x5b   : > { %s8335_s30 = scalar_lea.hbm %s14371_s0, %s7705_s11  ;;  %s8057_s16 = scalar_lea.hbm %s14371_s0, 2048 }
  0x5c   : > { %s8052_s12 = scalar_lea.hbm %s8335_s30, 1024  ;;  %p8058_p12 = scmp.lt.u32.totalorder %s8335_s30, %s14371_s0 }
  0x5d   : > { %p8053_p3 = scmp.ne.s32.totalorder %s8335_s30, %s8052_s12  ;;  %p8059_p0 = scmp.lt.u32.totalorder %s8057_s16, %s8052_s12 }
  0x5e   : > { %p8061_p9 = scmp.lt.u32.totalorder %s8052_s12, %s8335_s30 }
  0x5f   : > { %p8055_p7 = pnand %p8054_p5, %p8053_p3  ;;  %p8060_p13 = por %p8059_p0, %p8058_p12 }
  0x61   : > { %p8056_p10 = pneg %p8055_p7  ;;  %p8062_p1 = por %p8061_p9, %p8060_p13 }
  0x63   : > { %p8063_p2 = pnand %p8062_p1, %p8056_p10 }
  0x65   : > { %8066 = shalt.err (!%p8063_p2)
}
  0x66   : > { %s8067_s23 = scalar_lea.vmem %s8337_s9, 1024  ;;  %s8166_s27 = smov [#allocation3]  }
  0x67   : > { %p8068_p4 = scmp.ne.s32.totalorder %s8337_s9, %s8067_s23  ;;  %s8072_s28 = sshll.u32 %s8166_s27, 4  ;;  %s8073_s28 = int_to_ptr.vmem [resolvable:$false] %s8072_s28 }
  0x68   : > { %s8074_s6 = scalar_lea.vmem %s8073_s28, 2048  ;;  %p8075_p7 = scmp.lt.s32.totalorder %s8337_s9, %s8073_s28 }
  0x69   : > { %p8070_p8 = pnand %p8068_p4, %p8054_p5  ;;  %p8076_p12 = scmp.lt.s32.totalorder %s8074_s6, %s8067_s23 }
  0x6b   : > { %p8071_p3 = pneg %p8070_p8  ;;  %p8077_p0 = por %p8076_p12, %p8075_p7 }
  0x6d   : > { %p8078_p13 = pnand %p8077_p0, %p8071_p3 }
  0x6f   : > { %8081 = shalt.err (!%p8078_p13)
}
  0x70   : > { %s8167_s12 = smov 128   ;;  %s8168_s13 = smov 8  }
  0x71   : > { %7919 = dma.hbm_to_vmem [thread:$0]  (!%p8339_p11), %s8335_s30, 1024, %s8337_s9, %s8343_s10, %s8167_s12, %s8167_s12, %s8168_s13  }
  0x72   : > { %p14373_p5 = scmp.ne.s32.totalorder %s14363_s29, 0 }
  0x74   : > { %243 = sbr.rel (%p14373_p5) target bundleno = 2265 (0x8d9), region = 40 }
  0x7b   : > { %s8374_s15 = sand.u32 1, %s8152_s19   ;;  %p14374_p10 = scmp.ne.s32.totalorder %s14360_s24, 0 }
  0x7c   : > { %s7322_s16 = sshll.u32 %s8374_s15, 6  ;;  %s246_s26 = scalar_lea.sflag [#allocation4], %s8374_s15 }
  0x7d   : > { %s8378_s11 = scalar_lea.vmem [#allocation3], %s7322_s16 }
  0x7e   : > { %8127 = dma.done.wait (%p14374_p10), %s246_s26, 1024  }
  0x7f   : > { %8129 = vsyncadd (%p14374_p10), %s246_s26, 4294966272  ;;  %p14375_p11 = scmp.eq.s32.totalorder %s8229_s22, 0 }
  0x81   : > { %8131 = dma.done.wait (%p14375_p11), [#allocation7], 32   ;;  %p14376_p9 = pmov %p14375_p11 }
  0x83   : > { %8133 = vsyncadd (%p14376_p9), [#allocation7], 4294967264  ;;  %p14377_p1 = pmov %p14376_p9 }
  0x85   : > { %8135 = dma.done.wait (%p14377_p1), [#allocation6], 32   ;;  %p14378_p2 = pmov %p14377_p1 }
  0x86   : > { %p14379_p4 = pmov %p14377_p1 }
  0x87   : > { %8137 = vsyncadd (%p14378_p2), [#allocation6], 4294967264 }
  0x88   : > { %8139 = dma.done.wait (%p14379_p4), [#allocation11], 64   ;;  %p14380_p8 = pmov %p14377_p1 }
  0x8a   : > { %8141 = vsyncadd (%p14380_p8), [#allocation11], 4294967232 }
  0x8b   : > { %270 = sfence }
  0x8c   : > { %v293_v0 = vlaneseq  ;;  %s8397_s24 = sshll.u32 %s8229_s22, 7  ;;  %v345_v8 = vld [vmem:[%s8378_s11] sm:$0xff]  ;;  %v346_v9 = vld [vmem:[%s8378_s11 + $0x8] sm:$0xff]  ;;  %v7345_v12 = vld [vmem:[%s8378_s11 + $0x10] sm:$0xff]  ;;  %vm358_vm7 = vcmask 130048   ;;  %v8170_v32 = vmov 0.0|0.0  }
  0x8d   : > { %s348_s29 = sld [smem:[#allocation8 + %s8397_s24]]  ;;  %s555_s9 = sadd.s32 1, %s8397_s24  ;;  %v7346_v13 = vld [vmem:[%s8378_s11 + $0x18] sm:$0xff]  ;;  %v8169_v27 = vmov 1.0|1.0   ;;  %vm8171_vm8 = vmmov 0  }
  0x8e   : > { %s8401_s30 = sld [smem:[#allocation9 + %s8397_s24]]  ;;  %v8403_v1 = vshrl.u32 %v293_v0, 7  ;;  %v300_v3 = vand.u32 127, %v293_v0  ;;  %v14176_v33 = vmov 0.0   ;;  %s14174_s12 = smov 127  }
  0x8f   : > { %s556_s7 = sld [smem:[#allocation8 + %s555_s9]] }
  0x90   : > { %s8406_s10 = sld [smem:[#allocation9 + %s555_s9]]  ;;  %v8409_v2 = vadd.s32 8, %v8403_v1  ;;  %v329_v4 = vmul.u32 2, %v8403_v1  ;;  %v301_v34 = vmul.u32 2, %v300_v3  ;;  %v296_v42 = vadd.s32 16, %v8403_v1 }
  0x91   : > { %v297_v45 = vadd.s32 24, %v8403_v1  ;;  %v298_v49 = vadd.s32 32, %v8403_v1  ;;  %s7392_s23 = sld [smem:[#allocation10 + $0x1]]  ;;  %s7393_s27 = sld [smem:[#allocation10 + $0x25]] }
  0x92   : > { %v330_v5 = vmul.u32 2, %v8409_v2  ;;  %v331_v6 = vadd.s32 1, %v329_v4  ;;  %v335_v7 = vadd.s32 2, %v329_v4  ;;  %v302_v35 = vadd.s32 1, %v301_v34  ;;  %s7394_s28 = sld [smem:[#allocation10 + $0x49]]  ;;  %s7395_s6 = sld [smem:[#allocation10 + $0x6d]] }
  0x93   : > { %v349_v10 = vstv %s348_s29  ;;  %v308_v36 = vadd.s32 2, %v301_v34  ;;  %s7396_s13 = sld [smem:[#allocation10 + $0x91]]  ;;  %s7397_s16 = sld [smem:[#allocation10 + $0xb5]] }
  0x94   : > { %v353_v11 = vstv %s8401_s30  ;;  %v332_v14 = vadd.s32 1, %v330_v5  ;;  %vm333_vm0 = vcmp.eq.s32.totalorder %v300_v3, %v331_v6  ;;  %v336_v15 = vadd.s32 2, %v330_v5  ;;  %s7398_s26 = sld [smem:[#allocation10 + $0xd9]]  ;;  %s7399_s29 = sld [smem:[#allocation10 + $0xfd]] }
  0x95   : > { %vm337_vm1 = vcmp.eq.s32.totalorder %v300_v3, %v335_v7  ;;  %v350_v16 = vmul.f32 %v349_v10, %v345_v8  ;;  %v351_v17 = vmul.f32 %v349_v10, %v346_v9  ;;  %v557_v18 = vstv %s556_s7  ;;  %s7400_s30 = sld [smem:[#allocation10 + $0x2]]  ;;  %s7401_s9 = sld [smem:[#allocation10 + $0x26]] }
  0x96   : > { %vm339_vm2 = vmor %vm333_vm0, %vm337_vm1  ;;  %v561_v19 = vstv %s8406_s10  ;;  %vm334_vm3 = vcmp.eq.s32.totalorder %v300_v3, %v332_v14  ;;  %vm338_vm4 = vcmp.eq.s32.totalorder %v300_v3, %v336_v15  ;;  %v558_v20 = vmul.f32 %v7345_v12, %v557_v18  ;;  %s7402_s7 = sld [smem:[#allocation10 + $0x4a]]  ;;  %s7403_s10 = sld [smem:[#allocation10 + $0x6e]] }
  0x97   : > { %v559_v21 = vmul.f32 %v7346_v13, %v557_v18  ;;  %vm340_vm5 = vmor %vm334_vm3, %vm338_vm4  ;;  %v354_v22 = vadd.f32 %v353_v11, %v350_v16  ;;  %v355_v23 = vadd.f32 %v353_v11, %v351_v17  ;;  %vm303_vm9 = vcmp.eq.s32.totalorder %v8403_v1, %v302_v35  ;;  %s8832_s0 = sld [smem:[#allocation10 + $0x90]]  ;;  %s8834_s1 = sld [smem:[#allocation12 + $0x5]] }
  0x98   : > { %vm8419_vm6 = vmpackc.low %vm340_vm5, %vm339_vm2  ;;  %v562_v25 = vadd.f32 %v561_v19, %v558_v20  ;;  %vm309_vm10 = vcmp.eq.s32.totalorder %v8403_v1, %v308_v36  ;;  %vm304_vm12 = vcmp.eq.s32.totalorder %v8409_v2, %v302_v35  ;;  %vm310_vm13 = vcmp.eq.s32.totalorder %v8409_v2, %v308_v36  ;;  %s8836_s2 = sld [smem:[#allocation10 + $0xb4]]  ;;  %s8854_s3 = sld [smem:[#allocation10 + $0xd8]] }
  0x99   : > { %v563_v26 = vadd.f32 %v561_v19, %v559_v21  ;;  %7856 = vmatprep.subr.msk.bf16.mxu1 %vm8419_vm6, %v8169_v27  ;;  %v356_v28 = vmax.f32 %v354_v22, 0.0  ;;  %v357_v29 = vmax.f32 %v355_v23, 0.0  ;;  %7863 = vmatprep.subr.msk.bf16.mxu0 %vm8419_vm6, %v8169_v27  ;;  %vm314_vm11 = vmor %vm303_vm9, %vm309_vm10  ;;  %vm305_vm15 = vcmp.eq.s32.totalorder %v296_v42, %v302_v35  ;;  %s8856_s4 = sld [smem:[#allocation10 + $0x3]]  ;;  %s8858_s8 = sld [smem:[#allocation12 + $0x6]] }
  0x9a   : > { %7858 = vmatpush3.bf16.msk.msra.mxu1 %vm8419_vm6, %v8169_v27  ;;  %7865 = vmatpush3.bf16.msk.msra.mxu0 %vm8419_vm6, %v8169_v27  ;;  %v564_v30 = vmax.f32 %v562_v25, 0.0  ;;  %v8445_v44 = vsel %vm314_vm11, 1.0, %v14176_v33  ;;  %vm315_vm14 = vmor %vm304_vm12, %vm310_vm13  ;;  %vm311_vm0 = vcmp.eq.s32.totalorder %v296_v42, %v308_v36  ;;  %vm306_vm2 = vcmp.eq.s32.totalorder %v297_v45, %v302_v35  ;;  %s8896_s20 = sld [smem:[#allocation10 + $0x71]]  ;;  %s8898_s19 = sld [smem:[#allocation10 + $0x27]] }
  0x9b   : > { %v565_v31 = vmax.f32 %v563_v26, 0.0  ;;  %7755 = vmatprep.mubr.msk.f32.mxu1 %vm358_vm7, %v356_v28  ;;  %7859 = vmatprep.subr.bf16.mxu1 %v8170_v32  ;;  %14383 = vst [vmem:[#allocation22_spill] sm:$0xff] %v8445_v44  ;;  %v8459_v46 = vsel %vm315_vm14, 1.0, %v14176_v33  ;;  %vm316_vm1 = vmor %vm305_vm15, %vm311_vm0  ;;  %vm312_vm3 = vcmp.eq.s32.totalorder %v297_v45, %v308_v36  ;;  %vm307_vm5 = vcmp.eq.s32.totalorder %v298_v49, %v302_v35 }
  0x9c   : > { %7781 = vmatprep.mubr.msk.f32.mxu0 %vm358_vm7, %v564_v30  ;;  %7866 = vmatprep.subr.bf16.mxu0 %v8170_v32  ;;  %14384 = vst [vmem:[#allocation23_spill] sm:$0xff] %v8459_v46  ;;  %v8474_v47 = vsel %vm316_vm1, 1.0, %v14176_v33  ;;  %vm317_vm4 = vmor %vm306_vm2, %vm312_vm3  ;;  %vm545_vm10 = vcmask 277504   ;;  %v8509_v59 = vstv %s7392_s23  ;;  %v8517_v2 = vstv %s7393_s27  ;;  %s14172_s23 = smov 126   ;;  %s7404_s27 = sld [smem:[#allocation10 + $0x92]] }
  0x9d   : > { %7756 = vmatmul.mubr.msk.f32.vlgmr.msra.gmra.mrb[0].mxu1 %vm358_vm7, %v357_v29  ;;  %7782 = vmatmul.mubr.msk.f32.vlgmr.msra.gmra.mrb[0].mxu0 %vm358_vm7, %v565_v31  ;;  %14385 = vst [vmem:[#allocation24_spill] sm:$0xff] %v8474_v47  ;;  %v8485_v48 = vsel %vm317_vm4, 1.0, %v14176_v33  ;;  %v8527_v8 = vstv %s7394_s28  ;;  %v8535_v11 = vstv %s7395_s6  ;;  %v8543_v14 = vstv %s7396_s13  ;;  %s7405_s28 = sld [smem:[#allocation10 + $0xb6]]  ;;  %s7406_s6 = sld [smem:[#allocation10 + $0xda]] }
  0x9e   : > { %7762 = vmatprep.mubr.msk.f32.mxu1 %vm8171_vm8, %v14176_v33  ;;  %7788 = vmatprep.mubr.msk.f32.mxu0 %vm8171_vm8, %v14176_v33  ;;  %14386 = vst [vmem:[#allocation25_spill] sm:$0xff] %v8485_v48  ;;  %v8551_v17 = vstv %s7397_s16  ;;  %v8559_v20 = vstv %s7398_s26  ;;  %v8567_v23 = vstv %s7399_s29  ;;  %v8575_v26 = vstv %s7400_s30  ;;  %s7407_s13 = sld [smem:[#allocation10 + $0xfe]]  ;;  %s7464_s16 = sld [smem:[#allocation10 + $0xa]] }
  0x9f   : > { %v8583_v29 = vstv %s7401_s9  ;;  %s7465_s26 = sld [smem:[#allocation10 + $0x2e]]  ;;  %s7466_s29 = sld [smem:[#allocation10 + $0x52]]  ;;  %vm550_vm11 = vcmask 271360  }
  0xa0   : > { %s7467_s30 = sld [smem:[#allocation10 + $0x76]]  ;;  %s7468_s9 = sld [smem:[#allocation10 + $0x9a]] }
  0xa3   : > { %v8615_v42 = vstv %s7405_s28  ;;  %s7472_s28 = sld [smem:[#allocation10 + $0xb]] }
  0xa4   : > { %14389 = vst [vmem:[#allocation28_spill] sm:$0xff] %v8615_v42 }
 0x170   : > { %v7757_v37 = vpop.f32.mrb[0].mxu1  ;;  %v7783_v38 = vpop.f32.mrb[0].mxu0 }
 0x171   : > { %v431_v39 = vpop.f32.mrb[1].mxu1  ;;  %v638_v40 = vpop.f32.mrb[1].mxu0 }
 0x172   : > { %v7860_v41 = vpack.c.bf16 %v7757_v37, %v431_v39  ;;  %v7867_v43 = vpack.c.bf16 %v7783_v38, %v638_v40  ;;  %v8607_v39 = vstv %s7404_s27  ;;  %s7471_s27 = sld [smem:[#allocation10 + $0x106]] }
 0x173   : > { %14388 = vst [vmem:[#allocation27_spill] sm:$0xff] %v8607_v39 }
 0x174   : > { %7861 = vmatpush3.bf16.msra.mxu1 %v7860_v41  ;;  %7868 = vmatpush3.bf16.msra.mxu0 %v7867_v43 }
 0x175   : > { %7870 = vmatprep.subr.msk.bf16.mxu1 %vm8419_vm6, %v8169_v27  ;;  %7877 = vmatprep.subr.msk.bf16.mxu0 %vm8419_vm6, %v8169_v27 }
 0x177   : > { %7763 = vmatmul.mubr.msk.f32.vlgmr.msra.gmra.mrb[2].mxu1 %vm358_vm7, %v8445_v44  ;;  %7789 = vmatmul.mubr.msk.f32.vlgmr.msra.gmra.mrb[2].mxu0 %vm358_vm7, %v8445_v44 }
 0x178   : > { %7765 = vmatprep.mubr.msk.f32.mxu1 %vm8171_vm8, %v14176_v33  ;;  %7791 = vmatprep.mubr.msk.f32.mxu0 %vm8171_vm8, %v14176_v33 }
 0x179   : > { %7872 = vmatpush3.bf16.msk.msra.mxu1 %vm8419_vm6, %v8169_v27  ;;  %7879 = vmatpush3.bf16.msk.msra.mxu0 %vm8419_vm6, %v8169_v27  ;;  %vm313_vm6 = vcmp.eq.s32.totalorder %v298_v49, %v308_v36  ;;  %v8599_v36 = vstv %s7403_s10  ;;  %v8623_v49 = vstv %s7406_s6  ;;  %s7470_s10 = sld [smem:[#allocation10 + $0xe2]]  ;;  %s7473_s6 = sld [smem:[#allocation10 + $0x2f]] }
 0x17a   : > { %7873 = vmatprep.subr.bf16.mxu1 %v8170_v32  ;;  %7880 = vmatprep.subr.bf16.mxu0 %v8170_v32  ;;  %vm318_vm9 = vmor %vm307_vm5, %vm313_vm6  ;;  %v8591_v32 = vstv %s7402_s7  ;;  %14390 = vst [vmem:[#allocation29_spill] sm:$0xff] %v8623_v49  ;;  %s7469_s7 = sld [smem:[#allocation10 + $0xbe]] }
 0x17b   : > { %7766 = vmatmul.mubr.msk.f32.gmra.mrb[4].mxu1 %vm358_vm7, %v8459_v46  ;;  %7792 = vmatmul.mubr.msk.f32.gmra.mrb[4].mxu0 %vm358_vm7, %v8459_v46  ;;  %v8499_v50 = vsel %vm318_vm9, 1.0, %v14176_v33 }
 0x17c   : > { %7768 = vmatprep.mubr.msk.f32.mxu1 %vm8171_vm8, %v14176_v33  ;;  %7794 = vmatprep.mubr.msk.f32.mxu0 %vm8171_vm8, %v14176_v33  ;;  %14387 = vst [vmem:[#allocation26_spill] sm:$0xff] %v8499_v50 }
 0x17f   : > { %7769 = vmatmul.mubr.msk.f32.gmra.mrb[6].mxu1 %vm358_vm7, %v8474_v47  ;;  %7795 = vmatmul.mubr.msk.f32.gmra.mrb[6].mxu0 %vm358_vm7, %v8474_v47 }
 0x180   : > { %7771 = vmatprep.mubr.msk.f32.mxu1 %vm8171_vm8, %v14176_v33  ;;  %7797 = vmatprep.mubr.msk.f32.mxu0 %vm8171_vm8, %v14176_v33 }
 0x183   : > { %7772 = vmatmul.mubr.msk.f32.gmra.mrb[8].mxu1 %vm358_vm7, %v8485_v48  ;;  %7798 = vmatmul.mubr.msk.f32.gmra.mrb[8].mxu0 %vm358_vm7, %v8485_v48 }
 0x184   : > { %7774 = vmatprep.mubr.msk.f32.mxu1 %vm8171_vm8, %v14176_v33  ;;  %7800 = vmatprep.mubr.msk.f32.mxu0 %vm8171_vm8, %v14176_v33 }
 0x187   : > { %7775 = vmatmul.mubr.msk.f32.gmra.mrb[10].mxu1 %vm358_vm7, %v8499_v50  ;;  %7801 = vmatmul.mubr.msk.f32.gmra.mrb[10].mxu0 %vm358_vm7, %v8499_v50 }
 0x24a   : > { %v521_v51 = vpop.f32.mrb[2].mxu1  ;;  %v713_v52 = vpop.f32.mrb[2].mxu0 }
 0x24b   : > { %546 = vst.msk [vmem:[#allocation2] sm:$0xff] %vm545_vm10, %v521_v51  ;;  %v7764_v53 = vpop.f32.mrb[3].mxu1  ;;  %738 = vst.msk [vmem:[#allocation2 + $0x28] sm:$0xff] %vm545_vm10, %v713_v52  ;;  %v7790_v54 = vpop.f32.mrb[3].mxu0 }
 0x24c   : > { %v8631_v53 = vstv %s7407_s13  ;;  %s7474_s13 = sld [smem:[#allocation10 + $0x53]] }
 0x24d   : > { %14391 = vst [vmem:[#allocation30_spill] sm:$0xff] %v8631_v53 }
 0x24e   : > { %v526_v55 = vpop.f32.mrb[4].mxu1  ;;  %v718_v56 = vpop.f32.mrb[4].mxu0 }
 0x24f   : > { %547 = vst.msk [vmem:[#allocation2 + $0x8] sm:$0xff] %vm545_vm10, %v526_v55  ;;  %v7767_v57 = vpop.f32.mrb[5].mxu1  ;;  %739 = vst.msk [vmem:[#allocation2 + $0x30] sm:$0xff] %vm545_vm10, %v718_v56  ;;  %v7793_v58 = vpop.f32.mrb[5].mxu0 }
 0x250   : > { %v8643_v58 = vstv %s7464_s16  ;;  %s7416_s16 = sld [smem:[#allocation10 + $0x4]] }
 0x251   : > { %14392 = vst [vmem:[#allocation31_spill] sm:$0xff] %v8643_v58 }
 0x252   : > { %v8511_v60 = vld [vmem:[#allocation2] sm:$0xff]  ;;  %v531_v61 = vpop.f32.mrb[6].mxu1  ;;  %v723_v62 = vpop.f32.mrb[6].mxu0  ;;  %v8641_v57 = vld [vmem:[#allocation2 + $0x28] sm:$0xff] }
 0x253   : > { %548 = vst.msk [vmem:[#allocation2 + $0x10] sm:$0xff] %vm545_vm10, %v531_v61  ;;  %v1227_v63 = vmul.f32 %v8509_v59, %v8511_v60  ;;  %740 = vst.msk [vmem:[#allocation2 + $0x38] sm:$0xff] %vm545_vm10, %v723_v62  ;;  %v7770_v0 = vpop.f32.mrb[7].mxu1  ;;  %v7796_v1 = vpop.f32.mrb[7].mxu0  ;;  %v1253_v5 = vmul.f32 %v8517_v2, %v8511_v60  ;;  %v1279_v9 = vmul.f32 %v8527_v8, %v8511_v60 }
 0x254   : > { %v1305_v12 = vmul.f32 %v8535_v11, %v8511_v60  ;;  %v1331_v15 = vmul.f32 %v8543_v14, %v8511_v60  ;;  %v1357_v18 = vmul.f32 %v8551_v17, %v8511_v60  ;;  %v1383_v21 = vmul.f32 %v8559_v20, %v8511_v60 }
 0x255   : > { %1235 = vrot.lane.b32.xlu0 %v1227_v63, %s14174_s12  ;;  %v1409_v24 = vmul.f32 %v8567_v23, %v8511_v60  ;;  %v1435_v27 = vmul.f32 %v8575_v26, %v8511_v60  ;;  %v1461_v30 = vmul.f32 %v8583_v29, %v8511_v60  ;;  %v1487_v34 = vmul.f32 %v8591_v32, %v8511_v60 }
 0x256   : > { %v8520_v3 = vld [vmem:[#allocation2 + $0x8] sm:$0xff]  ;;  %v536_v4 = vpop.f32.mrb[8].mxu1  ;;  %v1513_v37 = vmul.f32 %v8599_v36, %v8511_v60  ;;  %v1539_v40 = vmul.f32 %v8607_v39, %v8511_v60  ;;  %v1565_v43 = vmul.f32 %v8615_v42, %v8511_v60  ;;  %v1591_v51 = vmul.f32 %v8623_v49, %v8511_v60  ;;  %v8635_v54 = vld [vmem:[#allocation2 + $0x30] sm:$0xff] }
 0x257   : > { %v1254_v6 = vmul.f32 %v8517_v2, %v8520_v3  ;;  %549 = vst.msk [vmem:[#allocation2 + $0x18] sm:$0xff] %vm545_vm10, %v536_v4  ;;  %v7773_v7 = vpop.f32.mrb[9].mxu1  ;;  %v1280_v10 = vmul.f32 %v8527_v8, %v8520_v3  ;;  %v1306_v13 = vmul.f32 %v8535_v11, %v8520_v3  ;;  %v1332_v16 = vmul.f32 %v8543_v14, %v8520_v3 }
 0x258   : > { %v1358_v19 = vmul.f32 %v8551_v17, %v8520_v3  ;;  %v1384_v22 = vmul.f32 %v8559_v20, %v8520_v3  ;;  %v1410_v25 = vmul.f32 %v8567_v23, %v8520_v3  ;;  %v1436_v28 = vmul.f32 %v8575_v26, %v8520_v3 }
 0x259   : > { %1261 = vrot.lane.b32.xlu0 %v1253_v5, %s14174_s12  ;;  %1263 = vrot.lane.b32.xlu1 %v1254_v6, %s14174_s12  ;;  %v1462_v31 = vmul.f32 %v8583_v29, %v8520_v3  ;;  %v1488_v35 = vmul.f32 %v8591_v32, %v8520_v3  ;;  %v1514_v38 = vmul.f32 %v8599_v36, %v8520_v3  ;;  %v8651_v63 = vstv %s7465_s26  ;;  %s7417_s26 = sld [smem:[#allocation10 + $0x28]] }
 0x25a   : > { %v1540_v41 = vmul.f32 %v8607_v39, %v8520_v3  ;;  %v1566_v45 = vmul.f32 %v8615_v42, %v8520_v3  ;;  %v1592_v52 = vmul.f32 %v8623_v49, %v8520_v3  ;;  %v1617_v55 = vmul.f32 %v8631_v53, %v8511_v60  ;;  %14393 = vst [vmem:[#allocation32_spill] sm:$0xff] %v8651_v63 }
 0x25b   : > { %v1618_v56 = vmul.f32 %v8631_v53, %v8520_v3  ;;  %v2728_v61 = vmul.f32 %v8643_v58, %v8635_v54  ;;  %v2727_v62 = vmul.f32 %v8643_v58, %v8641_v57  ;;  %v2753_v0 = vmul.f32 %v8651_v63, %v8641_v57 }
 0x25c   : > { %v2754_v1 = vmul.f32 %v8651_v63, %v8635_v54  ;;  %v8659_v4 = vstv %s7466_s29  ;;  %v8667_v7 = vstv %s7467_s30  ;;  %s7418_s29 = sld [smem:[#allocation10 + $0x4c]]  ;;  %s7419_s30 = sld [smem:[#allocation10 + $0x70]]  ;;  %v8977_v42 = vstv %s8896_s20 }
 0x25d   : > { %1287 = vrot.lane.b32.xlu0 %v1279_v9, %s14174_s12  ;;  %1289 = vrot.lane.b32.xlu1 %v1280_v10, %s14174_s12  ;;  %14394 = vst [vmem:[#allocation33_spill] sm:$0xff] %v8659_v4  ;;  %v2779_v5 = vmul.f32 %v8659_v4, %v8641_v57  ;;  %v2780_v6 = vmul.f32 %v8659_v4, %v8635_v54  ;;  %14395 = vst [vmem:[#allocation34_spill] sm:$0xff] %v8667_v7  ;;  %s9017_s20 = sld [smem:[#allocation10 + $0x93]] }
 0x25e   : > { %v2805_v9 = vmul.f32 %v8667_v7, %v8641_v57  ;;  %v2806_v10 = vmul.f32 %v8667_v7, %v8635_v54  ;;  %14433 = vst [vmem:[#allocation70_spill] sm:$0xff] %v8977_v42 }
 0x261   : > { %1313 = vrot.lane.b32.xlu0 %v1305_v12, %s14174_s12  ;;  %1315 = vrot.lane.b32.xlu1 %v1306_v13, %s14174_s12  ;;  %v8675_v12 = vstv %s7468_s9  ;;  %s7420_s9 = sld [smem:[#allocation10 + $0x94]] }
 0x262   : > { %14396 = vst [vmem:[#allocation35_spill] sm:$0xff] %v8675_v12  ;;  %v2831_v13 = vmul.f32 %v8675_v12, %v8641_v57 }
 0x265   : > { %1339 = vrot.lane.b32.xlu0 %v1331_v15, %s14174_s12  ;;  %1341 = vrot.lane.b32.xlu1 %v1332_v16, %s14174_s12  ;;  %v2832_v15 = vmul.f32 %v8675_v12, %v8635_v54  ;;  %v8683_v16 = vstv %s7469_s7  ;;  %s7421_s7 = sld [smem:[#allocation10 + $0xb8]] }
 0x266   : > { %14397 = vst [vmem:[#allocation36_spill] sm:$0xff] %v8683_v16 }
 0x269   : > { %1365 = vrot.lane.b32.xlu0 %v1357_v18, %s14174_s12  ;;  %1367 = vrot.lane.b32.xlu1 %v1358_v19, %s14174_s12  ;;  %v2857_v18 = vmul.f32 %v8683_v16, %v8641_v57  ;;  %v2858_v19 = vmul.f32 %v8683_v16, %v8635_v54  ;;  %v8952_v16 = vstv %s8858_s8  ;;  %s9043_s8 = sld [smem:[#allocation10 + $0x101]] }
 0x26a   : > { %14429 = vst [vmem:[#allocation66_spill] sm:$0xff] %v8952_v16 }
 0x26d   : > { %1391 = vrot.lane.b32.xlu0 %v1383_v21, %s14174_s12  ;;  %1393 = vrot.lane.b32.xlu1 %v1384_v22, %s14174_s12  ;;  %v8691_v21 = vstv %s7470_s10  ;;  %s7422_s10 = sld [smem:[#allocation10 + $0xdc]] }
 0x26e   : > { %14398 = vst [vmem:[#allocation37_spill] sm:$0xff] %v8691_v21  ;;  %v2883_v22 = vmul.f32 %v8691_v21, %v8641_v57 }
 0x271   : > { %1417 = vrot.lane.b32.xlu0 %v1409_v24, %s14174_s12  ;;  %1419 = vrot.lane.b32.xlu1 %v1410_v25, %s14174_s12  ;;  %v2884_v24 = vmul.f32 %v8691_v21, %v8635_v54  ;;  %v8699_v25 = vstv %s7471_s27  ;;  %s7423_s27 = sld [smem:[#allocation10 + $0x100]]  ;;  %v8937_v21 = vstv %s8854_s3  ;;  %s8979_s3 = sld [smem:[#allocation10 + $0xb9]] }
 0x272   : > { %14399 = vst [vmem:[#allocation38_spill] sm:$0xff] %v8699_v25  ;;  %14426 = vst [vmem:[#allocation64_spill] sm:$0xff] %v8937_v21 }
 0x275   : > { %1443 = vrot.lane.b32.xlu0 %v1435_v27, %s14172_s23  ;;  %1445 = vrot.lane.b32.xlu1 %v1436_v28, %s14172_s23  ;;  %v2909_v27 = vmul.f32 %v8699_v25, %v8641_v57  ;;  %v2910_v28 = vmul.f32 %v8699_v25, %v8635_v54 }
 0x279   : > { %1469 = vrot.lane.b32.xlu0 %v1461_v30, %s14172_s23  ;;  %1471 = vrot.lane.b32.xlu1 %v1462_v31, %s14172_s23  ;;  %v8707_v30 = vstv %s7472_s28  ;;  %s1145_s28 = sld [smem:[#allocation10]] }
 0x27a   : > { %14400 = vst [vmem:[#allocation39_spill] sm:$0xff] %v8707_v30  ;;  %v2935_v31 = vmul.f32 %v8707_v30, %v8641_v57 }
 0x27d   : > { %1495 = vrot.lane.b32.xlu0 %v1487_v34, %s14172_s23  ;;  %1497 = vrot.lane.b32.xlu1 %v1488_v35, %s14172_s23  ;;  %v2936_v34 = vmul.f32 %v8707_v30, %v8635_v54  ;;  %v8715_v35 = vstv %s7473_s6  ;;  %s8802_s6 = sld [smem:[#allocation12]] }
 0x27e   : > { %14401 = vst [vmem:[#allocation40_spill] sm:$0xff] %v8715_v35 }
 0x281   : > { %1521 = vrot.lane.b32.xlu0 %v1513_v37, %s14172_s23  ;;  %1523 = vrot.lane.b32.xlu1 %v1514_v38, %s14172_s23  ;;  %v2961_v37 = vmul.f32 %v8715_v35, %v8641_v57  ;;  %v2962_v38 = vmul.f32 %v8715_v35, %v8635_v54 }
 0x285   : > { %1547 = vrot.lane.b32.xlu0 %v1539_v40, %s14172_s23  ;;  %1549 = vrot.lane.b32.xlu1 %v1540_v41, %s14172_s23  ;;  %v8723_v40 = vstv %s7474_s13  ;;  %v8727_v41 = vld [vmem:[#allocation2 + $0x10] sm:$0xff]  ;;  %s8804_s13 = sld [smem:[#allocation10 + $0x24]] }
 0x286   : > { %14402 = vst [vmem:[#allocation41_spill] sm:$0xff] %v8723_v40 }
 0x289   : > { %1573 = vrot.lane.b32.xlu0 %v1565_v43, %s14172_s23  ;;  %1575 = vrot.lane.b32.xlu1 %v1566_v45, %s14172_s23  ;;  %v2987_v43 = vmul.f32 %v8723_v40, %v8641_v57  ;;  %v2988_v45 = vmul.f32 %v8723_v40, %v8635_v54  ;;  %v8740_v57 = vld [vmem:[#allocation2 + $0x1] sm:$0xff]  ;;  %v8744_v54 = vstv %s7416_s16  ;;  %s8806_s16 = sld [smem:[#allocation10 + $0x48]] }
 0x28a   : > { %14403 = vst [vmem:[#allocation42_spill] sm:$0xff] %v8744_v54 }
 0x28b   : > { %v8880_v33 = vstv %s8804_s13  ;;  %s9080_s13 = sld [smem:[#allocation10 + $0xdb]] }
 0x28c   : > { %14413 = vst [vmem:[#allocation52_spill] sm:$0xff] %v8880_v33  ;;  %v1157_v40 = vmul.f32 %v8880_v33, %v8511_v60  ;;  %v1158_v35 = vmul.f32 %v8880_v33, %v8520_v3 }
 0x28d   : > { %1599 = vrot.lane.b32.xlu0 %v1591_v51, %s14172_s23  ;;  %1601 = vrot.lane.b32.xlu1 %v1592_v52, %s14172_s23  ;;  %v541_v51 = vpop.f32.mrb[10].mxu1  ;;  %v1229_v52 = vmul.f32 %v8509_v59, %v8727_v41 }
 0x28e   : > { %551 = vst.msk [vmem:[#allocation2 + $0x20] sm:$0x3] %vm550_vm11, %v541_v51  ;;  %v8798_v51 = vstv %s7421_s7  ;;  %s8826_s7 = sld [smem:[#allocation12 + $0x3]] }
 0x28f   : > { %14408 = vst [vmem:[#allocation47_spill] sm:$0xff] %v8798_v51  ;;  %v8883_v50 = vstv %s8806_s16  ;;  %s9110_s16 = sld [smem:[#allocation10 + $0xff]] }
 0x290   : > { %14414 = vst [vmem:[#allocation53_spill] sm:$0xff] %v8883_v50  ;;  %v1167_v25 = vmul.f32 %v8883_v50, %v8511_v60 }
 0x291   : > { %1625 = vrot.lane.b32.xlu0 %v1617_v55, %s14172_s23  ;;  %1627 = vrot.lane.b32.xlu1 %v1618_v56, %s14172_s23  ;;  %v7776_v55 = vpop.f32.mrb[11].mxu1  ;;  %v1228_v56 = vmul.f32 %v8509_v59, %v8520_v3 }
 0x295   : > { %2735 = vrot.lane.b32.xlu0 %v2727_v62, %s14174_s12  ;;  %2737 = vrot.lane.b32.xlu1 %v2728_v61, %s14174_s12  ;;  %v8742_v61 = vld [vmem:[#allocation2 + $0x9] sm:$0xff]  ;;  %v1727_v62 = vmul.f32 %v8744_v54, %v8740_v57 }
 0x299   : > { %2761 = vrot.lane.b32.xlu0 %v2753_v0, %s14174_s12  ;;  %2763 = vrot.lane.b32.xlu1 %v2754_v1, %s14174_s12  ;;  %v1728_v0 = vmul.f32 %v8744_v54, %v8742_v61  ;;  %v8752_v1 = vstv %s7417_s26  ;;  %s8808_s26 = sld [smem:[#allocation10 + $0x6c]] }
 0x29a   : > { %14404 = vst [vmem:[#allocation43_spill] sm:$0xff] %v8752_v1 }
 0x29d   : > { %2787 = vrot.lane.b32.xlu0 %v2779_v5, %s14174_s12  ;;  %2789 = vrot.lane.b32.xlu1 %v2780_v6, %s14174_s12  ;;  %v1753_v6 = vmul.f32 %v8752_v1, %v8740_v57 }
 0x29f   : > { %v8892_v46 = vstv %s8808_s26  ;;  %s9126_s26 = sld [smem:[#allocation10 + $0x2b]] }
 0x2a0   : > { %14417 = vst [vmem:[#allocation56_spill] sm:$0xff] %v8892_v46 }
 0x2a1   : > { %2813 = vrot.lane.b32.xlu0 %v2805_v9, %s14174_s12  ;;  %2815 = vrot.lane.b32.xlu1 %v2806_v10, %s14174_s12  ;;  %v1754_v9 = vmul.f32 %v8752_v1, %v8742_v61  ;;  %v8762_v10 = vstv %s7418_s29  ;;  %s8818_s29 = sld [smem:[#allocation12 + $0x1]] }
 0x2a2   : > { %14405 = vst [vmem:[#allocation44_spill] sm:$0xff] %v8762_v10 }
 0x2a5   : > { %2839 = vrot.lane.b32.xlu0 %v2831_v13, %s14174_s12  ;;  %2841 = vrot.lane.b32.xlu1 %v2832_v15, %s14174_s12 }
 0x2a7   : > { %v8889_v47 = vstv %s8818_s29  ;;  %s7442_s29 = sld [smem:[#allocation10 + $0x4f]] }
 0x2a8   : > { %14416 = vst [vmem:[#allocation55_spill] sm:$0xff] %v8889_v47  ;;  %v1162_v63 = vadd.f32 %v1158_v35, %v8889_v47 }
 0x2a9   : > { %2865 = vrot.lane.b32.xlu0 %v2857_v18, %s14174_s12  ;;  %2867 = vrot.lane.b32.xlu1 %v2858_v19, %s14174_s12  ;;  %v1779_v18 = vmul.f32 %v8762_v10, %v8740_v57  ;;  %v1780_v19 = vmul.f32 %v8762_v10, %v8742_v61 }
 0x2ad   : > { %2891 = vrot.lane.b32.xlu0 %v2883_v22, %s14174_s12  ;;  %2893 = vrot.lane.b32.xlu1 %v2884_v24, %s14174_s12  ;;  %v8774_v22 = vstv %s7419_s30  ;;  %s8822_s30 = sld [smem:[#allocation10 + $0x5]] }
 0x2ae   : > { %14406 = vst [vmem:[#allocation45_spill] sm:$0xff] %v8774_v22 }
 0x2b1   : > { %2917 = vrot.lane.b32.xlu0 %v2909_v27, %s14174_s12  ;;  %2919 = vrot.lane.b32.xlu1 %v2910_v28, %s14174_s12  ;;  %v1805_v28 = vmul.f32 %v8774_v22, %v8740_v57 }
 0x2b3   : > { %v8886_v48 = vstv %s8822_s30  ;;  %s7443_s30 = sld [smem:[#allocation10 + $0x73]] }
 0x2b4   : > { %14415 = vst [vmem:[#allocation54_spill] sm:$0xff] %v8886_v48  ;;  %v1935_v10 = vmul.f32 %v8886_v48, %v8740_v57  ;;  %v1936_v1 = vmul.f32 %v8886_v48, %v8742_v61  ;;  %v1168_v48 = vmul.f32 %v8883_v50, %v8520_v3  ;;  %v1161_v50 = vadd.f32 %v1157_v40, %v8889_v47 }
 0x2b5   : > { %2943 = vrot.lane.b32.xlu0 %v2935_v31, %s14172_s23  ;;  %2945 = vrot.lane.b32.xlu1 %v2936_v34, %s14172_s23  ;;  %v1806_v31 = vmul.f32 %v8774_v22, %v8742_v61  ;;  %v8786_v34 = vstv %s7420_s9  ;;  %s8824_s9 = sld [smem:[#allocation12 + $0x2]] }
 0x2b6   : > { %14407 = vst [vmem:[#allocation46_spill] sm:$0xff] %v8786_v34 }
 0x2b9   : > { %2969 = vrot.lane.b32.xlu0 %v2961_v37, %s14172_s23  ;;  %2971 = vrot.lane.b32.xlu1 %v2962_v38, %s14172_s23 }
 0x2bb   : > { %v8901_v44 = vstv %s8824_s9  ;;  %s7444_s9 = sld [smem:[#allocation10 + $0x97]] }
 0x2bc   : > { %14419 = vst [vmem:[#allocation57_spill] sm:$0xff] %v8901_v44  ;;  %v1171_v49 = vadd.f32 %v1167_v25, %v8901_v44  ;;  %v1172_v40 = vadd.f32 %v1168_v48, %v8901_v44 }
 0x2bd   : > { %2995 = vrot.lane.b32.xlu0 %v2987_v43, %s14172_s23  ;;  %2997 = vrot.lane.b32.xlu1 %v2988_v45, %s14172_s23  ;;  %v1831_v43 = vmul.f32 %v8786_v34, %v8740_v57  ;;  %v1832_v45 = vmul.f32 %v8786_v34, %v8742_v61  ;;  %s8830_s23 = sld [smem:[#allocation12 + $0x4]]  ;;  %v8913_v34 = vstv %s8834_s1  ;;  %s8941_s1 = sld [smem:[#allocation10 + $0x95]] }
 0x2be   : > { %14423 = vst [vmem:[#allocation61_spill] sm:$0xff] %v8913_v34 }
 0x2c1   : > { %1237 = vrot.lane.b32.xlu0 %v1228_v56, %s14174_s12  ;;  %1239 = vrot.lane.b32.xlu1 %v1229_v52, %s14174_s12  ;;  %v1857_v56 = vmul.f32 %v8798_v51, %v8740_v57 }
 0x2c3   : > { %v9010_v44 = vstv %s8941_s1 }
 0x2c4   : > { %14435 = vst [vmem:[#allocation72_spill] sm:$0xff] %v9010_v44 }
 0x2c5   : > { %1735 = vrot.lane.b32.xlu0 %v1727_v62, %s14174_s12  ;;  %1737 = vrot.lane.b32.xlu1 %v1728_v0, %s14174_s12  ;;  %v1858_v62 = vmul.f32 %v8798_v51, %v8742_v61  ;;  %v8820_v0 = vstv %s7422_s10  ;;  %s8848_s10 = sld [smem:[#allocation10 + $0x29]]  ;;  %v8910_v51 = vstv %s8832_s0  ;;  %s14427_s0 = smov 126  }
 0x2c6   : > { %14409 = vst [vmem:[#allocation48_spill] sm:$0xff] %v8820_v0  ;;  %14422 = vst [vmem:[#allocation60_spill] sm:$0xff] %v8910_v51 }
 0x2c7   : > { %v8756_v5 = vpop.permute.xlu0 %1235 }
 0x2c9   : > { %1761 = vrot.lane.b32.xlu0 %v1753_v6, %s14174_s12  ;;  %1763 = vrot.lane.b32.xlu1 %v1754_v9, %s14174_s12 }
 0x2cb   : > { %v8766_v13 = vpop.permute.xlu0 %1261  ;;  %v8768_v15 = vpop.permute.xlu1 %1263  ;;  %v8932_v30 = vstv %s8848_s10  ;;  %s7446_s10 = sld [smem:[#allocation10 + $0xdf]] }
 0x2cc   : > { %14425 = vst [vmem:[#allocation63_spill] sm:$0xff] %v8932_v30  ;;  %v1961_v4 = vmul.f32 %v8932_v30, %v8740_v57  ;;  %v1273_v35 = vadd.f32 %v8766_v13, %v1161_v50  ;;  %v1187_v13 = vmul.f32 %v8910_v51, %v8511_v60 }
 0x2cd   : > { %1787 = vrot.lane.b32.xlu0 %v1779_v18, %s14174_s12  ;;  %1789 = vrot.lane.b32.xlu1 %v1780_v19, %s14174_s12  ;;  %v1883_v18 = vmul.f32 %v8820_v0, %v8740_v57  ;;  %v1884_v19 = vmul.f32 %v8820_v0, %v8742_v61  ;;  %v8907_v0 = vstv %s8830_s23  ;;  %s9075_s23 = sld [smem:[#allocation10 + $0x7]] }
 0x2ce   : > { %14421 = vst [vmem:[#allocation59_spill] sm:$0xff] %v8907_v0 }
 0x2cf   : > { %v8778_v24 = vpop.permute.xlu0 %1287  ;;  %v8780_v27 = vpop.permute.xlu1 %1289 }
 0x2d1   : > { %1813 = vrot.lane.b32.xlu0 %v1805_v28, %s14174_s12  ;;  %1815 = vrot.lane.b32.xlu1 %v1806_v31, %s14174_s12  ;;  %v8846_v28 = vstv %s7423_s27  ;;  %v8850_v31 = vstv %s1145_s28  ;;  %s8860_s27 = sld [smem:[#allocation10 + $0xfc]]  ;;  %s8873_s28 = sld [smem:[#allocation12 + $0x7]] }
 0x2d2   : > { %14410 = vst [vmem:[#allocation49_spill] sm:$0xff] %v8846_v28  ;;  %14411 = vst [vmem:[#allocation50_spill] sm:$0xff] %v8850_v31 }
 0x2d3   : > { %v8790_v37 = vpop.permute.xlu0 %1313  ;;  %v8792_v38 = vpop.permute.xlu1 %1315 }
 0x2d5   : > { %1839 = vrot.lane.b32.xlu0 %v1831_v43, %s14174_s12  ;;  %1841 = vrot.lane.b32.xlu1 %v1832_v45, %s14174_s12  ;;  %v8863_v43 = vstv %s8802_s6  ;;  %s14418_s6 = smov 127  }
 0x2d6   : > { %14412 = vst [vmem:[#allocation51_spill] sm:$0xff] %v8863_v43 }
 0x2d7   : > { %v8810_v52 = vpop.permute.xlu0 %1339  ;;  %v8812_v55 = vpop.permute.xlu1 %1341  ;;  %v8955_v12 = vstv %s8860_s27  ;;  %s7447_s27 = sld [smem:[#allocation10 + $0x103]] }
 0x2d8   : > { %14430 = vst [vmem:[#allocation67_spill] sm:$0xff] %v8955_v12 }
 0x2d9   : > { %1865 = vrot.lane.b32.xlu0 %v1857_v56, %s14174_s12  ;;  %1867 = vrot.lane.b32.xlu1 %v1858_v62, %s14174_s12  ;;  %v1909_v62 = vmul.f32 %v8846_v28, %v8740_v57 }
 0x2db   : > { %v8838_v6 = vpop.permute.xlu0 %1365  ;;  %v8840_v9 = vpop.permute.xlu1 %1367 }
 0x2dd   : > { %1891 = vrot.lane.b32.xlu0 %v1883_v18, %s14174_s12  ;;  %1893 = vrot.lane.b32.xlu1 %v1884_v19, %s14174_s12  ;;  %v1910_v18 = vmul.f32 %v8846_v28, %v8742_v61  ;;  %s8875_s12 = sld [smem:[#allocation10 + $0x4d]]  ;;  %v1147_v19 = vmul.f32 %v8850_v31, %v8511_v60  ;;  %v8904_v28 = vstv %s8826_s7  ;;  %s7445_s7 = sld [smem:[#allocation10 + $0xbb]] }
 0x2de   : > { %14420 = vst [vmem:[#allocation58_spill] sm:$0xff] %v8904_v28 }
 0x2df   : > { %v8865_v45 = vpop.permute.xlu0 %1391  ;;  %v8867_v56 = vpop.permute.xlu1 %1393  ;;  %v1151_v54 = vadd.f32 %v1147_v19, %v8863_v43  ;;  %v8944_v19 = vstv %s8856_s4  ;;  %s8984_s4 = sld [smem:[#allocation10 + $0x6f]] }
 0x2e0   : > { %14428 = vst [vmem:[#allocation65_spill] sm:$0xff] %v8944_v19  ;;  %v1647_v53 = vmul.f32 %v8944_v19, %v8740_v57 }
 0x2e1   : > { %1917 = vrot.lane.b32.xlu0 %v1909_v62, %s14418_s6  ;;  %1919 = vrot.lane.b32.xlu1 %v1910_v18, %s14418_s6  ;;  %v8916_v62 = vstv %s8836_s2  ;;  %s8946_s2 = sld [smem:[#allocation10 + $0x4b]]  ;;  %v1247_v33 = vadd.f32 %v8756_v5, %v1151_v54  ;;  %v1962_v54 = vmul.f32 %v8932_v30, %v8742_v61  ;;  %v8982_v30 = vstv %s8898_s19  ;;  %s9012_s19 = sld [smem:[#allocation10 + $0xdd]] }
 0x2e2   : > { %14424 = vst [vmem:[#allocation62_spill] sm:$0xff] %v8916_v62  ;;  %14434 = vst [vmem:[#allocation71_spill] sm:$0xff] %v8982_v30 }
 0x2e3   : > { %v8918_v18 = vpop.permute.xlu0 %1417  ;;  %v8920_v22 = vpop.permute.xlu1 %1419  ;;  %v8967_v5 = vstv %s8875_s12  ;;  %s9048_s12 = sld [smem:[#allocation10 + $0xb7]] }
 0x2e4   : > { %14432 = vst [vmem:[#allocation69_spill] sm:$0xff] %v8967_v5  ;;  %v1987_v39 = vmul.f32 %v8967_v5, %v8740_v57  ;;  %v1988_v50 = vmul.f32 %v8967_v5, %v8742_v61  ;;  %v2013_v5 = vmul.f32 %v8977_v42, %v8740_v57 }
 0x2e5   : > { %1943 = vrot.lane.b32.xlu0 %v1935_v10, %s14427_s0  ;;  %1945 = vrot.lane.b32.xlu1 %v1936_v1, %s14427_s0  ;;  %v8958_v10 = vstv %s8873_s28  ;;  %s746_s28 = sadd.s32 2, %s8397_s24 }
 0x2e6   : > { %14431 = vst [vmem:[#allocation68_spill] sm:$0xff] %v8958_v10  ;;  %s747_s1 = sld [smem:[#allocation8 + %s746_s28]] }
 0x2e7   : > { %v1444_v1 = vpop.permute.xlu0 %1443  ;;  %v8960_v7 = vpop.permute.xlu1 %1445 }
 0x2e8   : > { %v1455_v58 = vadd.f32 %v1444_v1, %v1247_v33  ;;  %v1274_v33 = vadd.f32 %v8768_v15, %v1162_v63  ;;  %v1178_v1 = vmul.f32 %v8892_v46, %v8520_v3  ;;  %v1188_v15 = vmul.f32 %v8910_v51, %v8520_v3 }
 0x2e9   : > { %1969 = vrot.lane.b32.xlu0 %v1961_v4, %s14427_s0  ;;  %1971 = vrot.lane.b32.xlu1 %v1962_v54, %s14427_s0  ;;  %v1177_v4 = vmul.f32 %v8892_v46, %v8511_v60 }
 0x2ea   : > { %v8989_v25 = vadd.f32 %v1647_v53, %v1455_v58  ;;  %v1657_v53 = vmul.f32 %v8982_v30, %v8740_v57  ;;  %v1658_v58 = vmul.f32 %v8982_v30, %v8742_v61 }
 0x2eb   : > { %v1470_v54 = vpop.permute.xlu0 %1469  ;;  %v1472_v47 = vpop.permute.xlu1 %1471 }
 0x2ec   : > { %v1481_v63 = vadd.f32 %v1470_v54, %v1273_v35  ;;  %v1482_v48 = vadd.f32 %v1472_v47, %v1274_v33  ;;  %v9015_v47 = vstv %s8946_s2  ;;  %v1299_v35 = vadd.f32 %v8778_v24, %v1171_v49  ;;  %s751_s2 = sld [smem:[#allocation9 + %s746_s28]] }
 0x2ed   : > { %1995 = vrot.lane.b32.xlu0 %v1987_v39, %s14427_s0  ;;  %1997 = vrot.lane.b32.xlu1 %v1988_v50, %s14427_s0  ;;  %14436 = vst [vmem:[#allocation73_spill] sm:$0xff] %v9015_v47  ;;  %v1300_v33 = vadd.f32 %v8780_v27, %v1172_v40  ;;  %v1181_v39 = vadd.f32 %v1177_v4, %v8904_v28  ;;  %s7475_s28 = sld [smem:[#allocation10 + $0x77]] }
 0x2ee   : > { %v9021_v54 = vadd.f32 %v1657_v53, %v1481_v63  ;;  %v9023_v51 = vadd.f32 %v1658_v58, %v1482_v48  ;;  %v1182_v50 = vadd.f32 %v1178_v1, %v8904_v28  ;;  %v2014_v49 = vmul.f32 %v8977_v42, %v8742_v61 }
 0x2ef   : > { %v1496_v30 = vpop.permute.xlu0 %1495  ;;  %v1498_v46 = vpop.permute.xlu1 %1497  ;;  %v1667_v40 = vmul.f32 %v9015_v47, %v8740_v57  ;;  %v1668_v63 = vmul.f32 %v9015_v47, %v8742_v61  ;;  %v1191_v4 = vadd.f32 %v1187_v13, %v8907_v0  ;;  %v1197_v1 = vmul.f32 %v8916_v62, %v8511_v60 }
 0x2f0   : > { %v1507_v24 = vadd.f32 %v1496_v30, %v1299_v35  ;;  %v1508_v27 = vadd.f32 %v1498_v46, %v1300_v33  ;;  %v9041_v48 = vstv %s8979_s3  ;;  %v9046_v46 = vstv %s8984_s4  ;;  %s7448_s3 = sld [smem:[#allocation10 + $0x8]]  ;;  %s7449_s4 = sld [smem:[#allocation10 + $0x2c]] }
 0x2f1   : > { %2021 = vrot.lane.b32.xlu0 %v2013_v5, %s14427_s0  ;;  %2023 = vrot.lane.b32.xlu1 %v2014_v49, %s14427_s0  ;;  %14437 = vst [vmem:[#allocation74_spill] sm:$0xff] %v9041_v48  ;;  %14438 = vst [vmem:[#allocation75_spill] sm:$0xff] %v9046_v46  ;;  %v1325_v30 = vadd.f32 %v8790_v37, %v1181_v39  ;;  %v1326_v53 = vadd.f32 %v8792_v38, %v1182_v50 }
 0x2f2   : > { %v9052_v58 = vadd.f32 %v1667_v40, %v1507_v24  ;;  %v9054_v13 = vadd.f32 %v1668_v63, %v1508_v27  ;;  %v1192_v5 = vadd.f32 %v1188_v15, %v8907_v0  ;;  %v1198_v35 = vmul.f32 %v8916_v62, %v8520_v3 }
 0x2f3   : > { %v1522_v33 = vpop.permute.xlu0 %1521  ;;  %v1524_v49 = vpop.permute.xlu1 %1523  ;;  %v2039_v47 = vmul.f32 %v9010_v44, %v8740_v57  ;;  %v2040_v37 = vmul.f32 %v9010_v44, %v8742_v61  ;;  %v1677_v50 = vmul.f32 %v9046_v46, %v8740_v57  ;;  %v1678_v15 = vmul.f32 %v9046_v46, %v8742_v61 }
 0x2f4   : > { %v1533_v38 = vadd.f32 %v1522_v33, %v1325_v30  ;;  %v1534_v39 = vadd.f32 %v1524_v49, %v1326_v53  ;;  %v1201_v24 = vadd.f32 %v1197_v1, %v8913_v34  ;;  %v1207_v27 = vmul.f32 %v8937_v21, %v8511_v60 }
 0x2f5   : > { %2047 = vrot.lane.b32.xlu0 %v2039_v47, %s14427_s0  ;;  %2049 = vrot.lane.b32.xlu1 %v2040_v37, %s14427_s0  ;;  %v9073_v40 = vstv %s9012_s19  ;;  %v9078_v63 = vstv %s9017_s20  ;;  %v1351_v30 = vadd.f32 %v8810_v52, %v1191_v4  ;;  %v1352_v53 = vadd.f32 %v8812_v55, %v1192_v5  ;;  %s7450_s19 = sld [smem:[#allocation10 + $0x50]]  ;;  %s7451_s20 = sld [smem:[#allocation10 + $0x74]] }
 0x2f6   : > { %14439 = vst [vmem:[#allocation76_spill] sm:$0xff] %v9073_v40  ;;  %14440 = vst [vmem:[#allocation77_spill] sm:$0xff] %v9078_v63  ;;  %v9084_v1 = vadd.f32 %v1677_v50, %v1533_v38  ;;  %v9086_v33 = vadd.f32 %v1678_v15, %v1534_v39  ;;  %v1202_v47 = vadd.f32 %v1198_v35, %v8913_v34  ;;  %v9105_v50 = vstv %s9043_s8  ;;  %s7452_s8 = sld [smem:[#allocation10 + $0x98]] }
 0x2f7   : > { %v1208_v49 = vmul.f32 %v8937_v21, %v8520_v3  ;;  %v1548_v37 = vpop.permute.xlu0 %1547  ;;  %v1550_v46 = vpop.permute.xlu1 %1549  ;;  %v2065_v62 = vmul.f32 %v9041_v48, %v8740_v57  ;;  %v2066_v52 = vmul.f32 %v9041_v48, %v8742_v61  ;;  %v1687_v5 = vmul.f32 %v9078_v63, %v8740_v57  ;;  %14441 = vst [vmem:[#allocation78_spill] sm:$0xff] %v9105_v50 }
 0x2f8   : > { %v1559_v55 = vadd.f32 %v1548_v37, %v1351_v30  ;;  %v1560_v4 = vadd.f32 %v1550_v46, %v1352_v53  ;;  %v1688_v38 = vmul.f32 %v9078_v63, %v8742_v61  ;;  %v1211_v35 = vadd.f32 %v1207_v27, %v8952_v16  ;;  %v728_v46 = vpop.f32.mrb[8].mxu0 }
 0x2f9   : > { %v1217_v39 = vmul.f32 %v8955_v12, %v8511_v60  ;;  %2073 = vrot.lane.b32.xlu0 %v2065_v62, %s14427_s0  ;;  %2075 = vrot.lane.b32.xlu1 %v2066_v52, %s14427_s0  ;;  %v9108_v15 = vstv %s9048_s12  ;;  %v1377_v30 = vadd.f32 %v8838_v6, %v1201_v24  ;;  %v1378_v53 = vadd.f32 %v8840_v9, %v1202_v47  ;;  %v7799_v60 = vpop.f32.mrb[9].mxu0  ;;  %s7453_s12 = sld [smem:[#allocation10 + $0xbc]] }
 0x2fa   : > { %14442 = vst [vmem:[#allocation79_spill] sm:$0xff] %v9108_v15  ;;  %v9114_v37 = vadd.f32 %v1687_v5, %v1559_v55  ;;  %v9116_v27 = vadd.f32 %v1688_v38, %v1560_v4  ;;  %741 = vst.msk [vmem:[#allocation2 + $0x40] sm:$0xff] %vm545_vm10, %v728_v46  ;;  %v1212_v62 = vadd.f32 %v1208_v49, %v8952_v16  ;;  %v9138_v4 = vstv %s9080_s13  ;;  %v733_v5 = vpop.f32.mrb[10].mxu0  ;;  %s7455_s13 = sld [smem:[#allocation10 + $0x104]] }
 0x2fb   : > { %v1218_v52 = vmul.f32 %v8955_v12, %v8520_v3  ;;  %v1574_v63 = vpop.permute.xlu0 %1573  ;;  %v1576_v21 = vpop.permute.xlu1 %1575  ;;  %v2091_v6 = vmul.f32 %v9073_v40, %v8740_v57  ;;  %v2092_v9 = vmul.f32 %v9073_v40, %v8742_v61  ;;  %v1697_v55 = vmul.f32 %v9108_v15, %v8740_v57  ;;  %14444 = vst [vmem:[#allocation81_spill] sm:$0xff] %v9138_v4 }
 0x2fc   : > { %v1585_v24 = vadd.f32 %v1574_v63, %v1377_v30  ;;  %v1586_v47 = vadd.f32 %v1576_v21, %v1378_v53  ;;  %v1698_v49 = vmul.f32 %v9108_v15, %v8742_v61  ;;  %v9135_v3 = vstv %s9075_s23  ;;  %742 = vst.msk [vmem:[#allocation2 + $0x48] sm:$0x3] %vm550_vm11, %v733_v5  ;;  %v7802_v30 = vpop.f32.mrb[11].mxu0  ;;  %s7454_s23 = sld [smem:[#allocation10 + $0xe0]] }
 0x2fd   : > { %2099 = vrot.lane.b32.xlu0 %v2091_v6, %s14427_s0  ;;  %2101 = vrot.lane.b32.xlu1 %v2092_v9, %s14427_s0  ;;  %14443 = vst [vmem:[#allocation80_spill] sm:$0xff] %v9135_v3  ;;  %v1403_v38 = vadd.f32 %v8865_v45, %v1211_v35  ;;  %v1404_v63 = vadd.f32 %v8867_v56, %v1212_v62  ;;  %v9153_v56 = vld [vmem:[#allocation2 + $0x2] sm:$0xff]  ;;  %v9155_v35 = vld [vmem:[#allocation2 + $0xa] sm:$0xff]  ;;  %v9272_v16 = vstv %s7448_s3  ;;  %s7458_s3 = sld [smem:[#allocation10 + $0x51]] }
 0x2fe   : > { %v9142_v21 = vadd.f32 %v1697_v55, %v1585_v24  ;;  %v9144_v46 = vadd.f32 %v1698_v49, %v1586_v47  ;;  %v1221_v53 = vadd.f32 %v1217_v39, %v8958_v10  ;;  %v1222_v60 = vadd.f32 %v1218_v52, %v8958_v10  ;;  %14461 = vst [vmem:[#allocation98_spill] sm:$0xff] %v9272_v16 }
 0x2ff   : > { %v1600_v6 = vpop.permute.xlu0 %1599  ;;  %v1602_v9 = vpop.permute.xlu1 %1601  ;;  %v2117_v15 = vmul.f32 %v9105_v50, %v8740_v57  ;;  %v2118_v45 = vmul.f32 %v9105_v50, %v8742_v61  ;;  %v1707_v39 = vmul.f32 %v9138_v4, %v8740_v57  ;;  %v1708_v52 = vmul.f32 %v9138_v4, %v8742_v61 }
 0x300   : > { %v1611_v62 = vadd.f32 %v1600_v6, %v1403_v38  ;;  %v1612_v24 = vadd.f32 %v1602_v9, %v1404_v63  ;;  %v9164_v47 = vstv %s9110_s16  ;;  %v1429_v55 = vadd.f32 %v8918_v18, %v1221_v53  ;;  %s7432_s16 = sld [smem:[#allocation10 + $0x6]] }
 0x301   : > { %2125 = vrot.lane.b32.xlu0 %v2117_v15, %s14427_s0  ;;  %2127 = vrot.lane.b32.xlu1 %v2118_v45, %s14427_s0  ;;  %14445 = vst [vmem:[#allocation82_spill] sm:$0xff] %v9164_v47  ;;  %v1430_v49 = vadd.f32 %v8920_v22, %v1222_v60  ;;  %v2227_v6 = vmul.f32 %v9135_v3, %v9153_v56  ;;  %v9177_v9 = vstv %s9126_s26  ;;  %s7433_s26 = sld [smem:[#allocation10 + $0x2a]] }
 0x302   : > { %v9168_v5 = vadd.f32 %v1707_v39, %v1611_v62  ;;  %v9170_v38 = vadd.f32 %v1708_v52, %v1612_v24  ;;  %v2228_v15 = vmul.f32 %v9135_v3, %v9155_v35  ;;  %14446 = vst [vmem:[#allocation83_spill] sm:$0xff] %v9177_v9  ;;  %v1717_v22 = vmul.f32 %v9164_v47, %v8740_v57 }
 0x303   : > { %v1626_v63 = vpop.permute.xlu0 %1625  ;;  %v1628_v30 = vpop.permute.xlu1 %1627  ;;  %v1718_v18 = vmul.f32 %v9164_v47, %v8742_v61  ;;  %v2253_v39 = vmul.f32 %v9177_v9, %v9153_v56  ;;  %v2254_v57 = vmul.f32 %v9177_v9, %v9155_v35  ;;  %v9197_v52 = vstv %s7442_s29  ;;  %s7434_s29 = sld [smem:[#allocation10 + $0x4e]] }
 0x304   : > { %v1637_v45 = vadd.f32 %v1626_v63, %v1429_v55  ;;  %v1638_v4 = vadd.f32 %v1628_v30, %v1430_v49  ;;  %14447 = vst [vmem:[#allocation84_spill] sm:$0xff] %v9197_v52  ;;  %v2279_v49 = vmul.f32 %v9197_v52, %v9153_v56  ;;  %v2280_v63 = vmul.f32 %v9197_v52, %v9155_v35 }
 0x305   : > { %2235 = vrot.lane.b32.xlu0 %v2227_v6, %s14418_s6  ;;  %2237 = vrot.lane.b32.xlu1 %v2228_v15, %s14418_s6  ;;  %v9209_v30 = vstv %s7443_s30  ;;  %v9233_v52 = vstv %s7445_s7  ;;  %v1255_v0 = vmul.f32 %v8517_v2, %v8727_v41  ;;  %s9436_s30 = sld [smem:[#allocation10 + $0x72]] }
 0x306   : > { %v9185_v53 = vadd.f32 %v1717_v22, %v1637_v45  ;;  %v9187_v60 = vadd.f32 %v1718_v18, %v1638_v4  ;;  %14448 = vst [vmem:[#allocation85_spill] sm:$0xff] %v9209_v30  ;;  %v2305_v45 = vmul.f32 %v9209_v30, %v9153_v56  ;;  %v2306_v22 = vmul.f32 %v9209_v30, %v9155_v35  ;;  %s9479_s7 = sld [smem:[#allocation10 + $0xba]] }
 0x307   : > { %v9189_v62 = vpop.permute.xlu0 %2735  ;;  %v9191_v24 = vpop.permute.xlu1 %2737  ;;  %v9221_v18 = vstv %s7444_s9  ;;  %14452 = vst [vmem:[#allocation89_spill] sm:$0xff] %v9233_v52  ;;  %v9246_v30 = vstv %s7446_s10  ;;  %v752_v9 = vstv %s751_s2  ;;  %v9260_v3 = vstv %s7447_s27  ;;  %s9456_s9 = sld [smem:[#allocation10 + $0x96]]  ;;  %s9527_s27 = sld [smem:[#allocation10 + $0x102]] }
 0x308   : > { %14449 = vst [vmem:[#allocation86_spill] sm:$0xff] %v9221_v18  ;;  %14455 = vst [vmem:[#allocation92_spill] sm:$0xff] %v9246_v30  ;;  %v2384_v47 = vmul.f32 %v9246_v30, %v9155_v35  ;;  %v2410_v12 = vmul.f32 %v9260_v3, %v9155_v35  ;;  %s9504_s10 = sld [smem:[#allocation10 + $0xde]]  ;;  %s7457_s2 = sld [smem:[#allocation10 + $0x2d]] }
 0x309   : > { %2261 = vrot.lane.b32.xlu0 %v2253_v39, %s14418_s6  ;;  %2263 = vrot.lane.b32.xlu1 %v2254_v57, %s14418_s6  ;;  %14458 = vst [vmem:[#allocation95_spill] sm:$0xff] %v9260_v3 }
 0x30b   : > { %v9201_v55 = vpop.permute.xlu0 %2761  ;;  %v9203_v4 = vpop.permute.xlu1 %2763 }
 0x30d   : > { %2287 = vrot.lane.b32.xlu0 %v2279_v49, %s14418_s6  ;;  %2289 = vrot.lane.b32.xlu1 %v2280_v63, %s14418_s6  ;;  %v2331_v49 = vmul.f32 %v9221_v18, %v9153_v56  ;;  %v2332_v63 = vmul.f32 %v9221_v18, %v9155_v35  ;;  %v2358_v18 = vmul.f32 %v9233_v52, %v9155_v35 }
 0x30f   : > { %v9213_v6 = vpop.permute.xlu0 %2787  ;;  %v9215_v15 = vpop.permute.xlu1 %2789 }
 0x311   : > { %2313 = vrot.lane.b32.xlu0 %v2305_v45, %s14418_s6  ;;  %2315 = vrot.lane.b32.xlu1 %v2306_v22, %s14418_s6 }
 0x313   : > { %v9225_v39 = vpop.permute.xlu0 %2813  ;;  %v9227_v57 = vpop.permute.xlu1 %2815 }
 0x314   : > { %14450 = vst [vmem:[#allocation87_spill] sm:$0xff] %v9225_v39  ;;  %14451 = vst [vmem:[#allocation88_spill] sm:$0xff] %v9227_v57  ;;  %v2357_v39 = vmul.f32 %v9233_v52, %v9153_v56  ;;  %v748_v52 = vstv %s747_s1  ;;  %s7456_s1 = sld [smem:[#allocation10 + $0x9]] }
 0x315   : > { %2339 = vrot.lane.b32.xlu0 %v2331_v49, %s14418_s6  ;;  %2341 = vrot.lane.b32.xlu1 %v2332_v63, %s14418_s6  ;;  %v7356_v49 = vld [vmem:[%s8378_s11 + $0x20] sm:$0xff]  ;;  %v7357_v63 = vld [vmem:[%s8378_s11 + $0x28] sm:$0xff] }
 0x316   : > { %v750_v10 = vmul.f32 %v7357_v63, %v748_v52  ;;  %v9286_v63 = vstv %s7449_s4  ;;  %s7480_s4 = sld [smem:[#allocation10 + $0xc]] }
 0x317   : > { %v9238_v45 = vpop.permute.xlu0 %2839  ;;  %v9240_v22 = vpop.permute.xlu1 %2841  ;;  %14464 = vst [vmem:[#allocation101_spill] sm:$0xff] %v9286_v63 }
 0x318   : > { %14453 = vst [vmem:[#allocation90_spill] sm:$0xff] %v9238_v45  ;;  %14454 = vst [vmem:[#allocation91_spill] sm:$0xff] %v9240_v22  ;;  %v2383_v22 = vmul.f32 %v9246_v30, %v9153_v56  ;;  %v2409_v30 = vmul.f32 %v9260_v3, %v9153_v56 }
 0x319   : > { %2365 = vrot.lane.b32.xlu0 %v2357_v39, %s14418_s6  ;;  %2367 = vrot.lane.b32.xlu1 %v2358_v18, %s14418_s6  ;;  %v749_v39 = vmul.f32 %v7356_v49, %v748_v52 }
 0x31b   : > { %v9252_v57 = vpop.permute.xlu0 %2865  ;;  %v9254_v45 = vpop.permute.xlu1 %2867  ;;  %v753_v18 = vadd.f32 %v752_v9, %v749_v39  ;;  %v2461_v39 = vmul.f32 %v9286_v63, %v9153_v56 }
 0x31c   : > { %14456 = vst [vmem:[#allocation93_spill] sm:$0xff] %v9252_v57  ;;  %14457 = vst [vmem:[#allocation94_spill] sm:$0xff] %v9254_v45  ;;  %v754_v57 = vadd.f32 %v752_v9, %v750_v10  ;;  %v2435_v9 = vmul.f32 %v9272_v16, %v9153_v56 }
 0x31d   : > { %2391 = vrot.lane.b32.xlu0 %v2383_v22, %s14418_s6  ;;  %2393 = vrot.lane.b32.xlu1 %v2384_v47, %s14418_s6  ;;  %v755_v52 = vmax.f32 %v753_v18, 0.0  ;;  %v2436_v22 = vmul.f32 %v9272_v16, %v9155_v35  ;;  %v2462_v18 = vmul.f32 %v9286_v63, %v9155_v35  ;;  %v9325_v16 = vstv %s7452_s8  ;;  %s10003_s8 = sld [smem:[#allocation10 + $0x75]] }
 0x31e   : > { %v756_v49 = vmax.f32 %v754_v57, 0.0  ;;  %14470 = vst [vmem:[#allocation106_spill] sm:$0xff] %v9325_v16  ;;  %v2539_v3 = vmul.f32 %v9325_v16, %v9153_v56 }
 0x31f   : > { %v9264_v45 = vpop.permute.xlu0 %2891  ;;  %v9266_v50 = vpop.permute.xlu1 %2893  ;;  %7807 = vmatprep.mubr.msk.f32.mxu1 %vm358_vm7, %v755_v52  ;;  %v9300_v52 = vstv %s7450_s19  ;;  %s9679_s19 = sld [smem:[#allocation10 + $0x30]] }
 0x320   : > { %14459 = vst [vmem:[#allocation96_spill] sm:$0xff] %v9264_v45  ;;  %14460 = vst [vmem:[#allocation97_spill] sm:$0xff] %v9266_v50  ;;  %7808 = vmatmul.mubr.msk.f32.vlgmr.msra.gmra.mrb[12].mxu1 %vm358_vm7, %v756_v49 }
 0x321   : > { %2417 = vrot.lane.b32.xlu0 %v2409_v30, %s14418_s6  ;;  %2419 = vrot.lane.b32.xlu1 %v2410_v12, %s14418_s6  ;;  %v14465_v30 = vmov 0.0   ;;  %14466 = vst [vmem:[#allocation102_spill] sm:$0xff] %v9300_v52 }
 0x322   : > { %7814 = vmatprep.mubr.msk.f32.mxu1 %vm8171_vm8, %v14465_v30  ;;  %v2540_v30 = vmul.f32 %v9325_v16, %v9155_v35  ;;  %v9347_v16 = vstv %s7454_s23  ;;  %s7476_s23 = sld [smem:[#allocation10 + $0x9b]] }
 0x323   : > { %v9277_v10 = vpop.permute.xlu0 %2917  ;;  %v9279_v47 = vpop.permute.xlu1 %2919  ;;  %14473 = vst [vmem:[#allocation109_spill] sm:$0xff] %v9347_v16 }
 0x324   : > { %14462 = vst [vmem:[#allocation99_spill] sm:$0xff] %v9277_v10  ;;  %14463 = vst [vmem:[#allocation100_spill] sm:$0xff] %v9279_v47  ;;  %v2488_v47 = vmul.f32 %v9300_v52, %v9155_v35  ;;  %v9312_v10 = vstv %s7451_s20  ;;  %s9721_s20 = sld [smem:[#allocation10 + $0x54]] }
 0x325   : > { %2443 = vrot.lane.b32.xlu0 %v2435_v9, %s14427_s0  ;;  %2445 = vrot.lane.b32.xlu1 %v2436_v22, %s14427_s0  ;;  %v2487_v22 = vmul.f32 %v9300_v52, %v9153_v56  ;;  %14467 = vst [vmem:[#allocation103_spill] sm:$0xff] %v9312_v10  ;;  %v2513_v63 = vmul.f32 %v9312_v10, %v9153_v56 }
 0x326   : > { %v2514_v52 = vmul.f32 %v9312_v10, %v9155_v35  ;;  %v9336_v10 = vstv %s7453_s12  ;;  %s7483_s12 = sld [smem:[#allocation10 + $0x78]] }
 0x327   : > { %v9292_v12 = vpop.permute.xlu0 %2943  ;;  %v9294_v57 = vpop.permute.xlu1 %2945  ;;  %14472 = vst [vmem:[#allocation108_spill] sm:$0xff] %v9336_v10  ;;  %v2565_v48 = vmul.f32 %v9336_v10, %v9153_v56 }
 0x329   : > { %2469 = vrot.lane.b32.xlu0 %v2461_v39, %s14427_s0  ;;  %2471 = vrot.lane.b32.xlu1 %v2462_v18, %s14427_s0  ;;  %v7980_v39 = vld [vmem:[#allocation2 + $0x8] sm:$0xff] }
 0x32a   : > { %v1148_v18 = vmul.f32 %v7980_v39, %v8850_v31  ;;  %v1385_v31 = vmul.f32 %v8559_v20, %v8727_v41 }
 0x32b   : > { %v9304_v49 = vpop.permute.xlu0 %2969  ;;  %v9306_v9 = vpop.permute.xlu1 %2971 }
 0x32d   : > { %2495 = vrot.lane.b32.xlu0 %v2487_v22, %s14427_s0  ;;  %2497 = vrot.lane.b32.xlu1 %v2488_v47, %s14427_s0  ;;  %v1152_v47 = vadd.f32 %v1148_v18, %v8863_v43 }
 0x32f   : > { %v9317_v50 = vpop.permute.xlu0 %2995  ;;  %v9319_v45 = vpop.permute.xlu1 %2997 }
 0x330   : > { %14468 = vst [vmem:[#allocation104_spill] sm:$0xff] %v9317_v50  ;;  %14469 = vst [vmem:[#allocation105_spill] sm:$0xff] %v9319_v45 }
 0x331   : > { %2521 = vrot.lane.b32.xlu0 %v2513_v63, %s14427_s0  ;;  %2523 = vrot.lane.b32.xlu1 %v2514_v52, %s14427_s0  ;;  %v1648_v52 = vmul.f32 %v8944_v19, %v8742_v61  ;;  %v2591_v61 = vmul.f32 %v9347_v16, %v9153_v56 }
 0x333   : > { %v1238_v22 = vpop.permute.xlu0 %1237  ;;  %v9330_v39 = vpop.permute.xlu1 %1239 }
 0x334   : > { %14471 = vst [vmem:[#allocation107_spill] sm:$0xff] %v9330_v39  ;;  %v1248_v40 = vadd.f32 %v1238_v22, %v1152_v47  ;;  %v2566_v47 = vmul.f32 %v9336_v10, %v9155_v35 }
 0x335   : > { %2547 = vrot.lane.b32.xlu0 %v2539_v3, %s14427_s0  ;;  %2549 = vrot.lane.b32.xlu1 %v2540_v30, %s14427_s0  ;;  %v9355_v30 = vstv %s7455_s13  ;;  %s7477_s13 = sld [smem:[#allocation10 + $0xbf]] }
 0x336   : > { %v1456_v63 = vadd.f32 %v8960_v7, %v1248_v40  ;;  %v2592_v40 = vmul.f32 %v9347_v16, %v9155_v35  ;;  %14474 = vst [vmem:[#allocation110_spill] sm:$0xff] %v9355_v30  ;;  %v2618_v10 = vmul.f32 %v9355_v30, %v9155_v35 }
 0x337   : > { %v1736_v18 = vpop.permute.xlu0 %1735  ;;  %v1738_v34 = vpop.permute.xlu1 %1737 }
 0x338   : > { %v1652_v22 = vadd.f32 %v1648_v52, %v1456_v63  ;;  %v9359_v63 = vld [vmem:[#allocation2 + $0x18] sm:$0xff] }
 0x339   : > { %2573 = vrot.lane.b32.xlu0 %v2565_v48, %s14427_s0  ;;  %2575 = vrot.lane.b32.xlu1 %v2566_v47, %s14427_s0  ;;  %v2617_v47 = vmul.f32 %v9355_v30, %v9153_v56  ;;  %v1308_v42 = vmul.f32 %v8535_v11, %v9359_v63  ;;  %v1334_v19 = vmul.f32 %v8543_v14, %v9359_v63 }
 0x33a   : > { %v1360_v45 = vmul.f32 %v8551_v17, %v9359_v63 }
 0x33b   : > { %v1762_v3 = vpop.permute.xlu0 %1761  ;;  %v1764_v7 = vpop.permute.xlu1 %1763 }
 0x33d   : > { %2599 = vrot.lane.b32.xlu0 %v2591_v61, %s14427_s0  ;;  %2601 = vrot.lane.b32.xlu1 %v2592_v40, %s14427_s0  ;;  %v1230_v61 = vmul.f32 %v8509_v59, %v9359_v63  ;;  %v1256_v59 = vmul.f32 %v8517_v2, %v9359_v63 }
 0x33f   : > { %v9361_v52 = vpop.permute.xlu0 %1787  ;;  %v9363_v48 = vpop.permute.xlu1 %1789 }
 0x341   : > { %2625 = vrot.lane.b32.xlu0 %v2617_v47, %s14427_s0  ;;  %2627 = vrot.lane.b32.xlu1 %v2618_v10, %s14427_s0  ;;  %v1281_v10 = vmul.f32 %v8527_v8, %v8727_v41 }
 0x343   : > { %v9373_v40 = vpop.permute.xlu0 %1813  ;;  %v9375_v16 = vpop.permute.xlu1 %1815 }
 0x345   : > { %1265 = vrot.lane.b32.xlu0 %v1255_v0, %s14418_s6  ;;  %1241 = vrot.lane.b32.xlu1 %v1230_v61, %s14418_s6  ;;  %v1307_v0 = vmul.f32 %v8535_v11, %v8727_v41  ;;  %v1282_v61 = vmul.f32 %v8527_v8, %v9359_v63  ;;  %v9421_v11 = vstv %s7432_s16  ;;  %s7478_s16 = sld [smem:[#allocation10 + $0xe3]] }
 0x346   : > { %14475 = vst [vmem:[#allocation111_spill] sm:$0xff] %v9421_v11 }
 0x347   : > { %v9381_v44 = vpop.permute.xlu0 %1839  ;;  %v9383_v30 = vpop.permute.xlu1 %1841 }
 0x349   : > { %1291 = vrot.lane.b32.xlu0 %v1281_v10, %s14418_s6  ;;  %1267 = vrot.lane.b32.xlu1 %v1256_v59, %s14418_s6  ;;  %v1333_v59 = vmul.f32 %v8543_v14, %v8727_v41 }
 0x34b   : > { %v9391_v47 = vpop.permute.xlu0 %1865  ;;  %v9393_v28 = vpop.permute.xlu1 %1867 }
 0x34d   : > { %1317 = vrot.lane.b32.xlu0 %v1307_v0, %s14418_s6  ;;  %1293 = vrot.lane.b32.xlu1 %v1282_v61, %s14418_s6  ;;  %v1359_v61 = vmul.f32 %v8551_v17, %v8727_v41  ;;  %v1774_v17 = vadd.f32 %v1764_v7, %v9023_v51 }
 0x34f   : > { %v9401_v2 = vpop.permute.xlu0 %1891  ;;  %v9403_v10 = vpop.permute.xlu1 %1893 }
 0x351   : > { %1343 = vrot.lane.b32.xlu0 %v1333_v59, %s14418_s6  ;;  %1319 = vrot.lane.b32.xlu1 %v1308_v42, %s14418_s6  ;;  %v1747_v42 = vadd.f32 %v1736_v18, %v8989_v25  ;;  %v1748_v59 = vadd.f32 %v1738_v34, %v1652_v22  ;;  %v9434_v34 = vstv %s7433_s26  ;;  %v1773_v25 = vadd.f32 %v1762_v3, %v9021_v54  ;;  %s7479_s26 = sld [smem:[#allocation10 + $0x107]] }
 0x352   : > { %v2158_v51 = vmul.f32 %v9434_v34, %v9155_v35  ;;  %v9454_v54 = vstv %s7434_s29  ;;  %s10313_s29 = sld [smem:[#allocation10 + $0xd]] }
 0x353   : > { %v9411_v8 = vpop.permute.xlu0 %1917  ;;  %v9413_v0 = vpop.permute.xlu1 %1919 }
 0x355   : > { %1369 = vrot.lane.b32.xlu0 %v1359_v61, %s14418_s6  ;;  %1345 = vrot.lane.b32.xlu1 %v1334_v19, %s14418_s6  ;;  %v2147_v61 = vmul.f32 %v9421_v11, %v9153_v56  ;;  %v2148_v19 = vmul.f32 %v9421_v11, %v9155_v35  ;;  %v2157_v11 = vmul.f32 %v9434_v34, %v9153_v56 }
 0x357   : > { %v1944_v39 = vpop.permute.xlu0 %1943  ;;  %v1946_v43 = vpop.permute.xlu1 %1945 }
 0x358   : > { %v1955_v50 = vadd.f32 %v1944_v39, %v1747_v42  ;;  %v1956_v14 = vadd.f32 %v1946_v43, %v1748_v59  ;;  %v1411_v42 = vmul.f32 %v8567_v23, %v8727_v41 }
 0x359   : > { %1395 = vrot.lane.b32.xlu0 %v1385_v31, %s14418_s6  ;;  %1371 = vrot.lane.b32.xlu1 %v1360_v45, %s14418_s6  ;;  %v1386_v31 = vmul.f32 %v8559_v20, %v9359_v63  ;;  %v1799_v20 = vadd.f32 %v9361_v52, %v9052_v58  ;;  %v2167_v58 = vmul.f32 %v9454_v54, %v9153_v56  ;;  %v9477_v52 = vstv %s9436_s30  ;;  %s7489_s30 = sld [smem:[#allocation10 + $0x31]] }
 0x35a   : > { %v9440_v39 = vadd.f32 %v2147_v61, %v1955_v50  ;;  %v9442_v43 = vadd.f32 %v2148_v19, %v1956_v14  ;;  %v1800_v50 = vadd.f32 %v9363_v48, %v9054_v13  ;;  %v1437_v19 = vmul.f32 %v8575_v26, %v8727_v41 }
 0x35b   : > { %v1970_v18 = vpop.permute.xlu0 %1969  ;;  %v1972_v22 = vpop.permute.xlu1 %1971  ;;  %v2168_v13 = vmul.f32 %v9454_v54, %v9155_v35  ;;  %v1826_v41 = vadd.f32 %v9375_v16, %v9086_v33  ;;  %v2178_v16 = vmul.f32 %v9477_v52, %v9155_v35  ;;  %v9502_v33 = vstv %s9456_s9  ;;  %s7490_s9 = sld [smem:[#allocation10 + $0x55]] }
 0x35c   : > { %v1981_v45 = vadd.f32 %v1970_v18, %v1773_v25  ;;  %v1982_v59 = vadd.f32 %v1972_v22, %v1774_v17  ;;  %v1412_v25 = vmul.f32 %v8567_v23, %v9359_v63  ;;  %v1825_v23 = vadd.f32 %v9373_v40, %v9084_v1 }
 0x35d   : > { %1421 = vrot.lane.b32.xlu0 %v1411_v42, %s14418_s6  ;;  %1397 = vrot.lane.b32.xlu1 %v1386_v31, %s14418_s6  ;;  %v9489_v31 = vld [vmem:[#allocation2 + $0x10] sm:$0xff]  ;;  %v2177_v1 = vmul.f32 %v9477_v52, %v9153_v56  ;;  %v1852_v40 = vadd.f32 %v9383_v30, %v9116_v27  ;;  %v9525_v27 = vstv %s9479_s7  ;;  %v1878_v30 = vadd.f32 %v9393_v28, %v9144_v46  ;;  %s7491_s7 = sld [smem:[#allocation10 + $0x79]] }
 0x35e   : > { %v9462_v3 = vadd.f32 %v2157_v11, %v1981_v45  ;;  %v9464_v7 = vadd.f32 %v2158_v51, %v1982_v59  ;;  %v1463_v45 = vmul.f32 %v9489_v31, %v8583_v29  ;;  %v1438_v59 = vmul.f32 %v8575_v26, %v9359_v63 }
 0x35f   : > { %v1996_v14 = vpop.permute.xlu0 %1995  ;;  %v1998_v61 = vpop.permute.xlu1 %1997  ;;  %v1851_v26 = vadd.f32 %v9381_v44, %v9114_v37  ;;  %v2187_v44 = vmul.f32 %v9502_v33, %v9153_v56  ;;  %v2188_v37 = vmul.f32 %v9502_v33, %v9155_v35  ;;  %v2198_v28 = vmul.f32 %v9525_v27, %v9155_v35 }
 0x360   : > { %v2007_v17 = vadd.f32 %v1996_v14, %v1799_v20  ;;  %v2008_v18 = vadd.f32 %v1998_v61, %v1800_v50  ;;  %v9548_v46 = vstv %s9504_s10  ;;  %s7492_s10 = sld [smem:[#allocation10 + $0x9d]] }
 0x361   : > { %1447 = vrot.lane.b32.xlu0 %v1437_v19, %s14427_s0  ;;  %1423 = vrot.lane.b32.xlu1 %v1412_v25, %s14418_s6  ;;  %v1489_v25 = vmul.f32 %v9489_v31, %v8591_v32 }
 0x362   : > { %v9485_v48 = vadd.f32 %v2167_v58, %v2007_v17  ;;  %v9487_v11 = vadd.f32 %v2168_v13, %v2008_v18  ;;  %v1464_v17 = vmul.f32 %v8583_v29, %v9359_v63  ;;  %v1877_v29 = vadd.f32 %v9391_v47, %v9142_v21 }
 0x363   : > { %v2022_v22 = vpop.permute.xlu0 %2021  ;;  %v2024_v42 = vpop.permute.xlu1 %2023  ;;  %v2197_v21 = vmul.f32 %v9525_v27, %v9153_v56  ;;  %v1903_v47 = vadd.f32 %v9401_v2, %v9168_v5  ;;  %v2207_v5 = vmul.f32 %v9548_v46, %v9153_v56  ;;  %v9569_v2 = vstv %s9527_s27  ;;  %s7493_s27 = sld [smem:[#allocation10 + $0xc1]] }
 0x364   : > { %v2033_v51 = vadd.f32 %v2022_v22, %v1825_v23  ;;  %v2034_v20 = vadd.f32 %v2024_v42, %v1826_v41  ;;  %v1515_v42 = vmul.f32 %v9489_v31, %v8599_v36 }
 0x365   : > { %1473 = vrot.lane.b32.xlu0 %v1463_v45, %s14427_s0  ;;  %1449 = vrot.lane.b32.xlu1 %v1438_v59, %s14427_s0  ;;  %v1490_v45 = vmul.f32 %v8591_v32, %v9359_v63  ;;  %v1904_v32 = vadd.f32 %v9403_v10, %v9170_v38  ;;  %v2208_v38 = vmul.f32 %v9548_v46, %v9155_v35 }
 0x366   : > { %v9510_v50 = vadd.f32 %v2177_v1, %v2033_v51  ;;  %v9512_v14 = vadd.f32 %v2178_v16, %v2034_v20  ;;  %v1929_v10 = vadd.f32 %v9411_v8, %v9185_v53  ;;  %v2217_v53 = vmul.f32 %v9569_v2, %v9153_v56  ;;  %v9599_v56 = vld [vmem:[#allocation2 + $0x38] sm:$0xff] }
 0x367   : > { %v2048_v61 = vpop.permute.xlu0 %2047  ;;  %v2050_v19 = vpop.permute.xlu1 %2049 }
 0x368   : > { %14476 = vst [vmem:[#allocation112_spill] sm:$0xff] %v9510_v50  ;;  %v2059_v18 = vadd.f32 %v2048_v61, %v1851_v26  ;;  %v2060_v58 = vadd.f32 %v2050_v19, %v1852_v40  ;;  %v14481_v40 = vld [vmem:[#allocation27_spill] sm:$0xff]  ;;  %v1516_v19 = vmul.f32 %v8599_v36, %v9359_v63  ;;  %v1930_v36 = vadd.f32 %v9413_v0, %v9187_v60 }
 0x369   : > { %1499 = vrot.lane.b32.xlu0 %v1489_v25, %s14427_s0  ;;  %1475 = vrot.lane.b32.xlu1 %v1464_v17, %s14427_s0  ;;  %v1541_v61 = vmul.f32 %v9489_v31, %v14481_v40  ;;  %v2218_v60 = vmul.f32 %v9569_v2, %v9155_v35 }
 0x36a   : > { %v9533_v13 = vadd.f32 %v2187_v44, %v2059_v18  ;;  %v9535_v23 = vadd.f32 %v2188_v37, %v2060_v58 }
 0x36b   : > { %v2074_v41 = vpop.permute.xlu0 %2073  ;;  %v2076_v22 = vpop.permute.xlu1 %2075 }
 0x36c   : > { %14477 = vst [vmem:[#allocation113_spill] sm:$0xff] %v9533_v13  ;;  %14478 = vst [vmem:[#allocation114_spill] sm:$0xff] %v9535_v23  ;;  %v2085_v59 = vadd.f32 %v2074_v41, %v1877_v29  ;;  %v2086_v51 = vadd.f32 %v2076_v22, %v1878_v30  ;;  %v14484_v29 = vld [vmem:[#allocation28_spill] sm:$0xff]  ;;  %v1542_v41 = vmul.f32 %v14481_v40, %v9359_v63  ;;  %v14489_v40 = vld [vmem:[#allocation31_spill] sm:$0xff] }
 0x36d   : > { %1525 = vrot.lane.b32.xlu0 %v1515_v42, %s14427_s0  ;;  %1501 = vrot.lane.b32.xlu1 %v1490_v45, %s14427_s0  ;;  %v1567_v30 = vmul.f32 %v9489_v31, %v14484_v29  ;;  %v14547_v23 = vld [vmem:[#allocation55_spill] sm:$0xff] }
 0x36e   : > { %v9554_v20 = vadd.f32 %v2197_v21, %v2085_v59  ;;  %v9556_v1 = vadd.f32 %v2198_v28, %v2086_v51  ;;  %v14487_v51 = vld [vmem:[#allocation29_spill] sm:$0xff]  ;;  %v1568_v28 = vmul.f32 %v14484_v29, %v9359_v63  ;;  %v9631_v29 = vld [vmem:[#allocation2 + $0x30] sm:$0xff] }
 0x36f   : > { %v2100_v16 = vpop.permute.xlu0 %2099  ;;  %v2102_v26 = vpop.permute.xlu1 %2101  ;;  %v1593_v21 = vmul.f32 %v9489_v31, %v14487_v51 }
 0x370   : > { %14479 = vst [vmem:[#allocation115_spill] sm:$0xff] %v9554_v20  ;;  %14480 = vst [vmem:[#allocation116_spill] sm:$0xff] %v9556_v1  ;;  %v2111_v25 = vadd.f32 %v2100_v16, %v1903_v47  ;;  %v2112_v17 = vadd.f32 %v2102_v26, %v1904_v32  ;;  %v14488_v32 = vld [vmem:[#allocation30_spill] sm:$0xff]  ;;  %v1594_v26 = vmul.f32 %v14487_v51, %v9359_v63 }
 0x371   : > { %1551 = vrot.lane.b32.xlu0 %v1541_v61, %s14427_s0  ;;  %1527 = vrot.lane.b32.xlu1 %v1516_v19, %s14427_s0  ;;  %v1619_v16 = vmul.f32 %v9489_v31, %v14488_v32  ;;  %v2729_v61 = vmul.f32 %v14489_v40, %v9599_v56 }
 0x372   : > { %v9575_v18 = vadd.f32 %v2207_v5, %v2111_v25  ;;  %v9577_v58 = vadd.f32 %v2208_v38, %v2112_v17  ;;  %v1620_v17 = vmul.f32 %v14488_v32, %v9359_v63  ;;  %v14490_v5 = vld [vmem:[#allocation32_spill] sm:$0xff] }
 0x373   : > { %v2126_v44 = vpop.permute.xlu0 %2125  ;;  %v2128_v37 = vpop.permute.xlu1 %2127  ;;  %v2755_v38 = vmul.f32 %v14490_v5, %v9599_v56 }
 0x374   : > { %14482 = vst [vmem:[#allocation27_spill] sm:$0xff] %v9575_v18  ;;  %14483 = vst [vmem:[#allocation117_spill] sm:$0xff] %v9577_v58  ;;  %v2137_v22 = vadd.f32 %v2126_v44, %v1929_v10  ;;  %v2138_v42 = vadd.f32 %v2128_v37, %v1930_v36  ;;  %v9623_v10 = vld [vmem:[#allocation2 + $0x40] sm:$0xff]  ;;  %v9625_v36 = vstv %s7475_s28  ;;  %s7494_s28 = sld [smem:[#allocation10 + $0xe5]] }
 0x375   : > { %1577 = vrot.lane.b32.xlu0 %v1567_v30, %s14427_s0  ;;  %1553 = vrot.lane.b32.xlu1 %v1542_v41, %s14427_s0  ;;  %v3014_v30 = vmul.f32 %v9631_v29, %v9625_v36  ;;  %v2730_v41 = vmul.f32 %v14489_v40, %v9623_v10 }
 0x376   : > { %v9589_v8 = vadd.f32 %v2217_v53, %v2137_v22  ;;  %v9591_v0 = vadd.f32 %v2218_v60, %v2138_v42  ;;  %v14494_v53 = vld [vmem:[#allocation33_spill] sm:$0xff] }
 0x377   : > { %v2236_v45 = vpop.permute.xlu0 %2235  ;;  %v2238_v59 = vpop.permute.xlu1 %2237  ;;  %v2781_v60 = vmul.f32 %v14494_v53, %v9599_v56 }
 0x378   : > { %14485 = vst [vmem:[#allocation28_spill] sm:$0xff] %v9589_v8  ;;  %14486 = vst [vmem:[#allocation118_spill] sm:$0xff] %v9591_v0 }
 0x379   : > { %1603 = vrot.lane.b32.xlu0 %v1593_v21, %s14427_s0  ;;  %1579 = vrot.lane.b32.xlu1 %v1568_v28, %s14427_s0  ;;  %v14497_v28 = vld [vmem:[#allocation34_spill] sm:$0xff] }
 0x37a   : > { %v2807_v32 = vmul.f32 %v14497_v28, %v9599_v56 }
 0x37b   : > { %v9601_v35 = vpop.permute.xlu0 %2261  ;;  %v9603_v47 = vpop.permute.xlu1 %2263 }
 0x37c   : > { %v2273_v58 = vadd.f32 %v9601_v35, %v9462_v3  ;;  %v9715_v35 = vld [vmem:[#allocation2 + $0x29] sm:$0xff] }
 0x37d   : > { %1629 = vrot.lane.b32.xlu0 %v1619_v16, %s14427_s0  ;;  %1605 = vrot.lane.b32.xlu1 %v1594_v26, %s14427_s0  ;;  %v2756_v16 = vmul.f32 %v14490_v5, %v9623_v10 }
 0x37f   : > { %v9613_v19 = vpop.permute.xlu0 %2287  ;;  %v9615_v25 = vpop.permute.xlu1 %2289 }
 0x381   : > { %2739 = vrot.lane.b32.xlu0 %v2729_v61, %s14418_s6  ;;  %1631 = vrot.lane.b32.xlu1 %v1620_v17, %s14427_s0  ;;  %v14500_v61 = vld [vmem:[#allocation35_spill] sm:$0xff] }
 0x382   : > { %v2833_v17 = vmul.f32 %v14500_v61, %v9599_v56 }
 0x383   : > { %v9627_v44 = vpop.permute.xlu0 %2313  ;;  %v9629_v37 = vpop.permute.xlu1 %2315 }
 0x384   : > { %14491 = vst [vmem:[#allocation29_spill] sm:$0xff] %v9627_v44  ;;  %v14550_v44 = vld [vmem:[#allocation56_spill] sm:$0xff] }
 0x385   : > { %2765 = vrot.lane.b32.xlu0 %v2755_v38, %s14418_s6  ;;  %3023 = vrot.lane.b32.xlu1 %v3014_v30, %s14427_s0  ;;  %v2782_v38 = vmul.f32 %v14494_v53, %v9623_v10  ;;  %v9677_v53 = vstv %s7456_s1  ;;  %s7460_s1 = sld [smem:[#allocation10 + $0x99]] }
 0x387   : > { %v9639_v22 = vpop.permute.xlu0 %2339  ;;  %v9641_v42 = vpop.permute.xlu1 %2341 }
 0x388   : > { %14492 = vst [vmem:[#allocation30_spill] sm:$0xff] %v9639_v22  ;;  %14493 = vst [vmem:[#allocation31_spill] sm:$0xff] %v9641_v42 }
 0x389   : > { %2791 = vrot.lane.b32.xlu0 %v2781_v60, %s14418_s6  ;;  %2741 = vrot.lane.b32.xlu1 %v2730_v41, %s14418_s6  ;;  %v14503_v41 = vld [vmem:[#allocation36_spill] sm:$0xff] }
 0x38a   : > { %v2859_v60 = vmul.f32 %v14503_v41, %v9599_v56  ;;  %14504 = vst [vmem:[#allocation36_spill] sm:$0xff] %v9677_v53 }
 0x38b   : > { %v9647_v51 = vpop.permute.xlu0 %2365  ;;  %v9649_v21 = vpop.permute.xlu1 %2367 }
 0x38c   : > { %14495 = vst [vmem:[#allocation32_spill] sm:$0xff] %v9647_v51  ;;  %14496 = vst [vmem:[#allocation33_spill] sm:$0xff] %v9649_v21  ;;  %v2860_v21 = vmul.f32 %v14503_v41, %v9623_v10  ;;  %v2300_v41 = vadd.f32 %v9615_v25, %v9487_v11 }
 0x38d   : > { %2817 = vrot.lane.b32.xlu0 %v2807_v32, %s14418_s6  ;;  %2767 = vrot.lane.b32.xlu1 %v2756_v16, %s14418_s6  ;;  %v2808_v32 = vmul.f32 %v14497_v28, %v9623_v10  ;;  %v2247_v16 = vadd.f32 %v2236_v45, %v9440_v39  ;;  %v2834_v28 = vmul.f32 %v14500_v61, %v9623_v10  ;;  %v9701_v61 = vstv %s7480_s4  ;;  %s10523_s4 = sld [smem:[#allocation10 + $0xbd]] }
 0x38e   : > { %14508 = vst [vmem:[#allocation122_spill] sm:$0xff] %v9701_v61 }
 0x38f   : > { %v9657_v26 = vpop.permute.xlu0 %2391  ;;  %v9659_v40 = vpop.permute.xlu1 %2393 }
 0x390   : > { %14498 = vst [vmem:[#allocation34_spill] sm:$0xff] %v9657_v26  ;;  %14499 = vst [vmem:[#allocation119_spill] sm:$0xff] %v9659_v40  ;;  %v2274_v26 = vadd.f32 %v9603_v47, %v9464_v7  ;;  %v9717_v7 = vld [vmem:[#allocation2 + $0x31] sm:$0xff] }
 0x391   : > { %2843 = vrot.lane.b32.xlu0 %v2833_v17, %s14418_s6  ;;  %2793 = vrot.lane.b32.xlu1 %v2782_v38, %s14418_s6  ;;  %v2248_v17 = vadd.f32 %v2238_v59, %v9442_v43  ;;  %v9683_v38 = vstv %s7457_s2  ;;  %v2648_v43 = vmul.f32 %v9631_v29, %v9677_v53  ;;  %s7495_s2 = sld [smem:[#allocation10 + $0x109]] }
 0x392   : > { %14505 = vst [vmem:[#allocation121_spill] sm:$0xff] %v9683_v38 }
 0x393   : > { %v9667_v5 = vpop.permute.xlu0 %2417  ;;  %v9669_v30 = vpop.permute.xlu1 %2419 }
 0x394   : > { %14501 = vst [vmem:[#allocation35_spill] sm:$0xff] %v9667_v5  ;;  %14502 = vst [vmem:[#allocation120_spill] sm:$0xff] %v9669_v30  ;;  %v14506_v5 = vld [vmem:[#allocation37_spill] sm:$0xff] }
 0x395   : > { %2869 = vrot.lane.b32.xlu0 %v2859_v60, %s14418_s6  ;;  %2819 = vrot.lane.b32.xlu1 %v2808_v32, %s14418_s6  ;;  %v2885_v8 = vmul.f32 %v14506_v5, %v9599_v56  ;;  %v9689_v60 = vstv %s7458_s3  ;;  %v9691_v32 = vld [vmem:[#allocation2 + $0x28] sm:$0xff]  ;;  %v2886_v25 = vmul.f32 %v14506_v5, %v9623_v10  ;;  %s7496_s3 = sld [smem:[#allocation10 + $0xe]] }
 0x396   : > { %14507 = vst [vmem:[#allocation37_spill] sm:$0xff] %v9689_v60  ;;  %v2647_v40 = vmul.f32 %v9691_v32, %v9677_v53  ;;  %v2657_v59 = vmul.f32 %v9691_v32, %v9683_v38  ;;  %v2667_v3 = vmul.f32 %v9691_v32, %v9689_v60  ;;  %v2668_v1 = vmul.f32 %v9631_v29, %v9689_v60 }
 0x397   : > { %v2444_v30 = vpop.permute.xlu0 %2443  ;;  %v2446_v0 = vpop.permute.xlu1 %2445 }
 0x398   : > { %v2455_v39 = vadd.f32 %v2444_v30, %v2247_v16  ;;  %v2456_v45 = vadd.f32 %v2446_v0, %v2248_v17  ;;  %v2658_v0 = vmul.f32 %v9631_v29, %v9683_v38  ;;  %v14509_v17 = vld [vmem:[#allocation38_spill] sm:$0xff] }
 0x399   : > { %2895 = vrot.lane.b32.xlu0 %v2885_v8, %s14418_s6  ;;  %2845 = vrot.lane.b32.xlu1 %v2834_v28, %s14418_s6  ;;  %v2911_v28 = vmul.f32 %v14509_v17, %v9599_v56 }
 0x39a   : > { %v2651_v30 = vadd.f32 %v2647_v40, %v2455_v39  ;;  %v2652_v16 = vadd.f32 %v2648_v43, %v2456_v45  ;;  %v2299_v45 = vadd.f32 %v9613_v19, %v9485_v48  ;;  %v14511_v19 = vld [vmem:[#allocation39_spill] sm:$0xff] }
 0x39b   : > { %v2470_v18 = vpop.permute.xlu0 %2469  ;;  %v2472_v8 = vpop.permute.xlu1 %2471  ;;  %v2937_v11 = vmul.f32 %v14511_v19, %v9599_v56 }
 0x39c   : > { %v2747_v47 = vadd.f32 %v9189_v62, %v2651_v30  ;;  %v2748_v40 = vadd.f32 %v9191_v24, %v2652_v16  ;;  %v2481_v39 = vadd.f32 %v2470_v18, %v2273_v58  ;;  %v2482_v43 = vadd.f32 %v2472_v8, %v2274_v26 }
 0x39d   : > { %2921 = vrot.lane.b32.xlu0 %v2911_v28, %s14418_s6  ;;  %2871 = vrot.lane.b32.xlu1 %v2860_v21, %s14418_s6  ;;  %v9732_v62 = vstv %s9679_s19  ;;  %v3147_v21 = vmul.f32 %v9701_v61, %v9715_v35  ;;  %v3148_v16 = vmul.f32 %v9701_v61, %v9717_v7  ;;  %s10557_s19 = sld [smem:[#allocation10 + $0x32]] }
 0x39e   : > { %14510 = vst [vmem:[#allocation38_spill] sm:$0xff] %v9732_v62  ;;  %v2661_v24 = vadd.f32 %v2657_v59, %v2481_v39  ;;  %v2662_v18 = vadd.f32 %v2658_v0, %v2482_v43  ;;  %v2955_v58 = vadd.f32 %v9292_v12, %v2747_v47  ;;  %v2956_v26 = vadd.f32 %v9294_v57, %v2748_v40  ;;  %v14515_v43 = vld [vmem:[#allocation40_spill] sm:$0xff] }
 0x39f   : > { %v2496_v30 = vpop.permute.xlu0 %2495  ;;  %v2498_v48 = vpop.permute.xlu1 %2497 }
 0x3a0   : > { %v2773_v59 = vadd.f32 %v9201_v55, %v2661_v24  ;;  %v2774_v12 = vadd.f32 %v9203_v4, %v2662_v18  ;;  %v2507_v0 = vadd.f32 %v2496_v30, %v2299_v45  ;;  %v2508_v57 = vadd.f32 %v2498_v48, %v2300_v41  ;;  %v14520_v30 = vld [vmem:[#allocation105_spill] sm:$0xff] }
 0x3a1   : > { %2947 = vrot.lane.b32.xlu0 %v2937_v11, %s14427_s0  ;;  %2897 = vrot.lane.b32.xlu1 %v2886_v25, %s14418_s6  ;;  %v9748_v8 = vadd.f32 %v3147_v21, %v2955_v58  ;;  %v9750_v5 = vadd.f32 %v3148_v16, %v2956_v26  ;;  %v2963_v45 = vmul.f32 %v14515_v43, %v9599_v56 }
 0x3a2   : > { %v2671_v28 = vadd.f32 %v2667_v3, %v2507_v0  ;;  %v2672_v47 = vadd.f32 %v2668_v1, %v2508_v57  ;;  %v2981_v40 = vadd.f32 %v9304_v49, %v2773_v59  ;;  %v2982_v39 = vadd.f32 %v9306_v9, %v2774_v12  ;;  %v9791_v12 = vld [vmem:[#allocation2 + $0x11] sm:$0xff] }
 0x3a3   : > { %14512 = vst [vmem:[#allocation39_spill] sm:$0xff] %v9748_v8  ;;  %14513 = vst [vmem:[#allocation123_spill] sm:$0xff] %v9750_v5  ;;  %v9754_v55 = vpop.permute.xlu0 %2521  ;;  %v9756_v4 = vpop.permute.xlu1 %2523  ;;  %v2912_v41 = vmul.f32 %v14509_v17, %v9623_v10  ;;  %v3157_v24 = vmul.f32 %v9732_v62, %v9715_v35  ;;  %v3158_v1 = vmul.f32 %v9732_v62, %v9717_v7  ;;  %v9769_v3 = vstv %s9721_s20  ;;  %v14519_v17 = vld [vmem:[#allocation104_spill] sm:$0xff]  ;;  %v14551_v62 = vld [vmem:[#allocation57_spill] sm:$0xff]  ;;  %s10574_s20 = sld [smem:[#allocation10 + $0xe1]] }
 0x3a4   : > { %14514 = vst [vmem:[#allocation124_spill] sm:$0xff] %v9754_v55  ;;  %v2799_v49 = vadd.f32 %v9213_v6, %v2671_v28  ;;  %v2800_v9 = vadd.f32 %v9215_v15, %v2672_v47  ;;  %14516 = vst [vmem:[#allocation40_spill] sm:$0xff] %v9769_v3  ;;  %v14523_v6 = vld [vmem:[#allocation41_spill] sm:$0xff]  ;;  %v2938_v21 = vmul.f32 %v14511_v19, %v9623_v10  ;;  %v14528_v19 = vld [vmem:[#allocation42_spill] sm:$0xff] }
 0x3a5   : > { %2973 = vrot.lane.b32.xlu0 %v2963_v45, %s14427_s0  ;;  %2923 = vrot.lane.b32.xlu1 %v2912_v41, %s14418_s6  ;;  %v9773_v18 = vadd.f32 %v3157_v24, %v2981_v40  ;;  %v9775_v58 = vadd.f32 %v3158_v1, %v2982_v39  ;;  %v2989_v15 = vmul.f32 %v14523_v6, %v9599_v56  ;;  %v14531_v24 = vld [vmem:[#allocation43_spill] sm:$0xff] }
 0x3a6   : > { %v3007_v26 = vadd.f32 %v14519_v17, %v2799_v49  ;;  %v3008_v48 = vadd.f32 %v14520_v30, %v2800_v9  ;;  %v3167_v16 = vmul.f32 %v9769_v3, %v9715_v35  ;;  %v3168_v59 = vmul.f32 %v9769_v3, %v9717_v7  ;;  %v9817_v9 = vld [vmem:[#allocation2 + $0x19] sm:$0xff] }
 0x3a7   : > { %14517 = vst [vmem:[#allocation125_spill] sm:$0xff] %v9773_v18  ;;  %14518 = vst [vmem:[#allocation126_spill] sm:$0xff] %v9775_v58  ;;  %v9779_v11 = vpop.permute.xlu0 %2547  ;;  %v9781_v25 = vpop.permute.xlu1 %2549  ;;  %v1729_v40 = vmul.f32 %v14528_v19, %v9791_v12  ;;  %v2964_v39 = vmul.f32 %v14515_v43, %v9623_v10  ;;  %v1755_v1 = vmul.f32 %v14531_v24, %v9791_v12 }
 0x3a8   : > { %14521 = vst [vmem:[#allocation104_spill] sm:$0xff] %v9779_v11  ;;  %14522 = vst [vmem:[#allocation105_spill] sm:$0xff] %v9781_v25  ;;  %v9795_v0 = vadd.f32 %v3167_v16, %v3007_v26  ;;  %v9797_v57 = vadd.f32 %v3168_v59, %v3008_v48  ;;  %v2990_v49 = vmul.f32 %v14523_v6, %v9623_v10  ;;  %v14534_v26 = vld [vmem:[#allocation44_spill] sm:$0xff]  ;;  %v14546_v25 = vld [vmem:[#allocation53_spill] sm:$0xff] }
 0x3a9   : > { %2999 = vrot.lane.b32.xlu0 %v2989_v15, %s14427_s0  ;;  %2949 = vrot.lane.b32.xlu1 %v2938_v21, %s14427_s0  ;;  %v1781_v30 = vmul.f32 %v14534_v26, %v9791_v12  ;;  %v1730_v48 = vmul.f32 %v14528_v19, %v9817_v9  ;;  %v14535_v21 = vld [vmem:[#allocation45_spill] sm:$0xff]  ;;  %v1756_v59 = vmul.f32 %v14531_v24, %v9817_v9  ;;  %v14536_v19 = vld [vmem:[#allocation46_spill] sm:$0xff] }
 0x3aa   : > { %14524 = vst [vmem:[#allocation41_spill] sm:$0xff] %v9795_v0  ;;  %14525 = vst [vmem:[#allocation127_spill] sm:$0xff] %v9797_v57  ;;  %v1807_v16 = vmul.f32 %v14535_v21, %v9791_v12  ;;  %v1834_v0 = vmul.f32 %v14536_v19, %v9817_v9  ;;  %v1169_v42 = vmul.f32 %v9489_v31, %v14546_v25 }
 0x3ab   : > { %v9799_v28 = vpop.permute.xlu0 %2573  ;;  %v9801_v47 = vpop.permute.xlu1 %2575 }
 0x3ac   : > { %14526 = vst [vmem:[#allocation128_spill] sm:$0xff] %v9799_v28  ;;  %14527 = vst [vmem:[#allocation129_spill] sm:$0xff] %v9801_v47  ;;  %v14544_v28 = vld [vmem:[#allocation51_spill] sm:$0xff] }
 0x3ad   : > { %1739 = vrot.lane.b32.xlu0 %v1729_v40, %s14418_s6  ;;  %2975 = vrot.lane.b32.xlu1 %v2964_v39, %s14427_s0 }
 0x3af   : > { %v9809_v45 = vpop.permute.xlu0 %2599  ;;  %v9811_v41 = vpop.permute.xlu1 %2601 }
 0x3b0   : > { %14529 = vst [vmem:[#allocation42_spill] sm:$0xff] %v9809_v45  ;;  %14530 = vst [vmem:[#allocation130_spill] sm:$0xff] %v9811_v41  ;;  %v14543_v45 = vld [vmem:[#allocation63_spill] sm:$0xff] }
 0x3b1   : > { %1765 = vrot.lane.b32.xlu0 %v1755_v1, %s14418_s6  ;;  %3001 = vrot.lane.b32.xlu1 %v2990_v49, %s14427_s0  ;;  %v1833_v1 = vmul.f32 %v14536_v19, %v9791_v12  ;;  %v1782_v49 = vmul.f32 %v14534_v26, %v9817_v9  ;;  %v1963_v47 = vmul.f32 %v14543_v45, %v9791_v12 }
 0x3b2   : > { %v1964_v61 = vmul.f32 %v14543_v45, %v9817_v9 }
 0x3b3   : > { %v9821_v43 = vpop.permute.xlu0 %2625  ;;  %v9823_v17 = vpop.permute.xlu1 %2627 }
 0x3b4   : > { %14532 = vst [vmem:[#allocation43_spill] sm:$0xff] %v9821_v43  ;;  %14533 = vst [vmem:[#allocation131_spill] sm:$0xff] %v9823_v17  ;;  %v14541_v17 = vld [vmem:[#allocation50_spill] sm:$0xff] }
 0x3b5   : > { %1791 = vrot.lane.b32.xlu0 %v1781_v30, %s14418_s6  ;;  %1741 = vrot.lane.b32.xlu1 %v1730_v48, %s14418_s6  ;;  %v14537_v48 = vld [vmem:[#allocation47_spill] sm:$0xff]  ;;  %v1149_v43 = vmul.f32 %v9489_v31, %v14541_v17 }
 0x3b6   : > { %v1860_v18 = vmul.f32 %v14537_v48, %v9817_v9 }
 0x3b7   : > { %v1266_v6 = vpop.permute.xlu0 %1265  ;;  %v1242_v15 = vpop.permute.xlu1 %1241  ;;  %v1153_v51 = vadd.f32 %v1149_v43, %v14544_v28 }
 0x3b9   : > { %1817 = vrot.lane.b32.xlu0 %v1807_v16, %s14418_s6  ;;  %1767 = vrot.lane.b32.xlu1 %v1756_v59, %s14418_s6  ;;  %v1859_v16 = vmul.f32 %v14537_v48, %v9791_v12  ;;  %v1808_v59 = vmul.f32 %v14535_v21, %v9817_v9  ;;  %v14542_v48 = vld [vmem:[#allocation52_spill] sm:$0xff] }
 0x3bb   : > { %v9837_v40 = vpop.permute.xlu0 %1291  ;;  %v9839_v39 = vpop.permute.xlu1 %1267 }
 0x3bd   : > { %1843 = vrot.lane.b32.xlu0 %v1833_v1, %s14418_s6  ;;  %1793 = vrot.lane.b32.xlu1 %v1782_v49, %s14418_s6  ;;  %v14538_v1 = vld [vmem:[#allocation48_spill] sm:$0xff] }
 0x3be   : > { %v1885_v49 = vmul.f32 %v14538_v1, %v9791_v12  ;;  %v1886_v8 = vmul.f32 %v14538_v1, %v9817_v9 }
 0x3bf   : > { %v9847_v30 = vpop.permute.xlu0 %1317  ;;  %v9849_v24 = vpop.permute.xlu1 %1293 }
 0x3c1   : > { %1869 = vrot.lane.b32.xlu0 %v1859_v16, %s14418_s6  ;;  %1819 = vrot.lane.b32.xlu1 %v1808_v59, %s14418_s6  ;;  %v14539_v16 = vld [vmem:[#allocation49_spill] sm:$0xff] }
 0x3c2   : > { %v1911_v59 = vmul.f32 %v14539_v16, %v9791_v12  ;;  %v1912_v1 = vmul.f32 %v14539_v16, %v9817_v9  ;;  %v14548_v16 = vld [vmem:[#allocation69_spill] sm:$0xff] }
 0x3c3   : > { %v9857_v57 = vpop.permute.xlu0 %1343  ;;  %v9859_v26 = vpop.permute.xlu1 %1319  ;;  %v1989_v43 = vmul.f32 %v14548_v16, %v9791_v12 }
 0x3c5   : > { %1895 = vrot.lane.b32.xlu0 %v1885_v49, %s14418_s6  ;;  %1845 = vrot.lane.b32.xlu1 %v1834_v0, %s14418_s6  ;;  %v14540_v0 = vld [vmem:[#allocation54_spill] sm:$0xff] }
 0x3c6   : > { %v1937_v49 = vmul.f32 %v14540_v0, %v9791_v12 }
 0x3c7   : > { %v9867_v58 = vpop.permute.xlu0 %1369  ;;  %v9869_v21 = vpop.permute.xlu1 %1345 }
 0x3c9   : > { %1921 = vrot.lane.b32.xlu0 %v1911_v59, %s14418_s6  ;;  %1871 = vrot.lane.b32.xlu1 %v1860_v18, %s14418_s6  ;;  %v1159_v18 = vmul.f32 %v9489_v31, %v14542_v48 }
 0x3cb   : > { %v9877_v5 = vpop.permute.xlu0 %1395  ;;  %v9879_v19 = vpop.permute.xlu1 %1371  ;;  %v1163_v11 = vadd.f32 %v1159_v18, %v14547_v23  ;;  %v1179_v18 = vmul.f32 %v9489_v31, %v14550_v44 }
 0x3cd   : > { %1947 = vrot.lane.b32.xlu0 %v1937_v49, %s14427_s0  ;;  %1897 = vrot.lane.b32.xlu1 %v1886_v8, %s14418_s6  ;;  %v1150_v49 = vmul.f32 %v14541_v17, %v9359_v63  ;;  %v14545_v8 = vld [vmem:[#allocation107_spill] sm:$0xff]  ;;  %v1938_v17 = vmul.f32 %v14540_v0, %v9817_v9  ;;  %v1275_v50 = vadd.f32 %v1266_v6, %v1163_v11 }
 0x3ce   : > { %v1249_v20 = vadd.f32 %v14545_v8, %v1153_v51  ;;  %v14549_v8 = vld [vmem:[#allocation65_spill] sm:$0xff]  ;;  %v1173_v0 = vadd.f32 %v1169_v42, %v14551_v62 }
 0x3cf   : > { %v9891_v59 = vpop.permute.xlu0 %1421  ;;  %v9893_v41 = vpop.permute.xlu1 %1397  ;;  %v1649_v55 = vmul.f32 %v14549_v8, %v9791_v12 }
 0x3d0   : > { %v1301_v45 = vadd.f32 %v9837_v40, %v1173_v0  ;;  %v1180_v40 = vmul.f32 %v14550_v44, %v9359_v63 }
 0x3d1   : > { %1973 = vrot.lane.b32.xlu0 %v1963_v47, %s14427_s0  ;;  %1923 = vrot.lane.b32.xlu1 %v1912_v1, %s14418_s6  ;;  %v1154_v47 = vadd.f32 %v1150_v49, %v14544_v28  ;;  %v1160_v1 = vmul.f32 %v14542_v48, %v9359_v63  ;;  %v1170_v28 = vmul.f32 %v14546_v25, %v9359_v63  ;;  %v14552_v48 = vld [vmem:[#allocation70_spill] sm:$0xff] }
 0x3d2   : > { %v2015_v49 = vmul.f32 %v14552_v48, %v9791_v12 }
 0x3d3   : > { %v1448_v22 = vpop.permute.xlu0 %1447  ;;  %v9908_v13 = vpop.permute.xlu1 %1423  ;;  %v1250_v3 = vadd.f32 %v1242_v15, %v1154_v47  ;;  %v1164_v11 = vadd.f32 %v1160_v1, %v14547_v23  ;;  %v14554_v15 = vld [vmem:[#allocation58_spill] sm:$0xff]  ;;  %v14555_v47 = vld [vmem:[#allocation60_spill] sm:$0xff]  ;;  %v1174_v23 = vadd.f32 %v1170_v28, %v14551_v62  ;;  %v14558_v62 = vld [vmem:[#allocation59_spill] sm:$0xff] }
 0x3d4   : > { %v1457_v51 = vadd.f32 %v1448_v22, %v1249_v20  ;;  %v1183_v25 = vadd.f32 %v1179_v18, %v14554_v15 }
 0x3d5   : > { %1999 = vrot.lane.b32.xlu0 %v1989_v43, %s14427_s0  ;;  %1949 = vrot.lane.b32.xlu1 %v1938_v17, %s14427_s0  ;;  %v14553_v43 = vld [vmem:[#allocation71_spill] sm:$0xff]  ;;  %v1276_v38 = vadd.f32 %v9839_v39, %v1164_v11 }
 0x3d6   : > { %v9924_v60 = vadd.f32 %v1649_v55, %v1457_v51  ;;  %v1659_v17 = vmul.f32 %v14553_v43, %v9791_v12  ;;  %v1650_v55 = vmul.f32 %v14549_v8, %v9817_v9  ;;  %v1189_v51 = vmul.f32 %v9489_v31, %v14555_v47  ;;  %v14556_v8 = vld [vmem:[#allocation72_spill] sm:$0xff] }
 0x3d7   : > { %v1474_v20 = vpop.permute.xlu0 %1473  ;;  %v1450_v22 = vpop.permute.xlu1 %1449  ;;  %v2041_v18 = vmul.f32 %v14556_v8, %v9791_v12 }
 0x3d8   : > { %v1483_v6 = vadd.f32 %v1474_v20, %v1275_v50  ;;  %v1458_v42 = vadd.f32 %v1450_v22, %v1250_v3  ;;  %v1990_v20 = vmul.f32 %v14548_v16, %v9817_v9  ;;  %v1193_v28 = vadd.f32 %v1189_v51, %v14558_v62  ;;  %v14560_v51 = vld [vmem:[#allocation74_spill] sm:$0xff] }
 0x3d9   : > { %2025 = vrot.lane.b32.xlu0 %v2015_v49, %s14427_s0  ;;  %1975 = vrot.lane.b32.xlu1 %v1964_v61, %s14427_s0  ;;  %v14557_v61 = vld [vmem:[#allocation73_spill] sm:$0xff]  ;;  %v1660_v49 = vmul.f32 %v14553_v43, %v9817_v9  ;;  %v1327_v16 = vadd.f32 %v9847_v30, %v1183_v25 }
 0x3da   : > { %v9944_v53 = vadd.f32 %v1659_v17, %v1483_v6  ;;  %v9946_v50 = vadd.f32 %v1650_v55, %v1458_v42  ;;  %v1669_v22 = vmul.f32 %v14557_v61, %v9791_v12  ;;  %v14559_v17 = vld [vmem:[#allocation62_spill] sm:$0xff]  ;;  %v1302_v6 = vadd.f32 %v9849_v24, %v1174_v23 }
 0x3db   : > { %v1500_v3 = vpop.permute.xlu0 %1499  ;;  %v1476_v1 = vpop.permute.xlu1 %1475  ;;  %v1199_v11 = vmul.f32 %v9489_v31, %v14559_v17  ;;  %v1184_v24 = vadd.f32 %v1180_v40, %v14554_v15 }
 0x3dc   : > { %v1509_v39 = vadd.f32 %v1500_v3, %v1301_v45  ;;  %v1484_v0 = vadd.f32 %v1476_v1, %v1276_v38  ;;  %v1190_v38 = vmul.f32 %v14555_v47, %v9359_v63  ;;  %v2067_v45 = vmul.f32 %v14560_v51, %v9791_v12  ;;  %v14561_v1 = vld [vmem:[#allocation75_spill] sm:$0xff] }
 0x3dd   : > { %2051 = vrot.lane.b32.xlu0 %v2041_v18, %s14427_s0  ;;  %2001 = vrot.lane.b32.xlu1 %v1990_v20, %s14427_s0  ;;  %v2016_v3 = vmul.f32 %v14552_v48, %v9817_v9  ;;  %v1679_v30 = vmul.f32 %v14561_v1, %v9791_v12  ;;  %v1670_v18 = vmul.f32 %v14557_v61, %v9817_v9  ;;  %v14562_v20 = vld [vmem:[#allocation61_spill] sm:$0xff] }
 0x3de   : > { %v9966_v42 = vadd.f32 %v1669_v22, %v1509_v39  ;;  %v9968_v44 = vadd.f32 %v1660_v49, %v1484_v0  ;;  %v1203_v47 = vadd.f32 %v1199_v11, %v14562_v20  ;;  %v14563_v22 = vld [vmem:[#allocation64_spill] sm:$0xff]  ;;  %v1353_v48 = vadd.f32 %v9857_v57, %v1193_v28 }
 0x3df   : > { %v1526_v43 = vpop.permute.xlu0 %1525  ;;  %v1502_v55 = vpop.permute.xlu1 %1501  ;;  %v1209_v39 = vmul.f32 %v9489_v31, %v14563_v22  ;;  %v1328_v0 = vadd.f32 %v9859_v26, %v1184_v24  ;;  %v1200_v61 = vmul.f32 %v14559_v17, %v9359_v63  ;;  %v1194_v26 = vadd.f32 %v1190_v38, %v14558_v62  ;;  %v14566_v17 = vld [vmem:[#allocation66_spill] sm:$0xff]  ;;  %v14567_v24 = vld [vmem:[#allocation67_spill] sm:$0xff] }
 0x3e0   : > { %v1535_v25 = vadd.f32 %v1526_v43, %v1327_v16  ;;  %v1510_v23 = vadd.f32 %v1502_v55, %v1302_v6  ;;  %v14564_v16 = vld [vmem:[#allocation76_spill] sm:$0xff]  ;;  %v2042_v43 = vmul.f32 %v14556_v8, %v9817_v9  ;;  %v14565_v55 = vld [vmem:[#allocation77_spill] sm:$0xff]  ;;  %v1379_v62 = vadd.f32 %v9867_v58, %v1203_v47 }
 0x3e1   : > { %2077 = vrot.lane.b32.xlu0 %v2067_v45, %s14427_s0  ;;  %2027 = vrot.lane.b32.xlu1 %v2016_v3, %s14427_s0  ;;  %v2093_v6 = vmul.f32 %v14564_v16, %v9791_v12  ;;  %v1689_v57 = vmul.f32 %v14565_v55, %v9791_v12  ;;  %v1680_v3 = vmul.f32 %v14561_v1, %v9817_v9  ;;  %v10010_v8 = vld [vmem:[#allocation2 + $0x12] sm:$0xff] }
 0x3e2   : > { %v9988_v49 = vadd.f32 %v1679_v30, %v1535_v25  ;;  %v9990_v15 = vadd.f32 %v1670_v18, %v1510_v23  ;;  %v1213_v30 = vadd.f32 %v1209_v39, %v14566_v17  ;;  %v1219_v25 = vmul.f32 %v9489_v31, %v14567_v24  ;;  %v14568_v31 = vld [vmem:[#allocation78_spill] sm:$0xff] }
 0x3e3   : > { %v1552_v40 = vpop.permute.xlu0 %1551  ;;  %v1528_v11 = vpop.permute.xlu1 %1527  ;;  %v1354_v38 = vadd.f32 %v9869_v21, %v1194_v26  ;;  %v1204_v18 = vadd.f32 %v1200_v61, %v14562_v20  ;;  %v1210_v58 = vmul.f32 %v14563_v22, %v9359_v63  ;;  %v14570_v20 = vld [vmem:[#allocation68_spill] sm:$0xff] }
 0x3e4   : > { %v1561_v28 = vadd.f32 %v1552_v40, %v1353_v48  ;;  %v1536_v45 = vadd.f32 %v1528_v11, %v1328_v0  ;;  %v2119_v0 = vmul.f32 %v14568_v31, %v9791_v12  ;;  %v2068_v40 = vmul.f32 %v14560_v51, %v9817_v9  ;;  %v14569_v11 = vld [vmem:[#allocation79_spill] sm:$0xff] }
 0x3e5   : > { %2103 = vrot.lane.b32.xlu0 %v2093_v6, %s14427_s0  ;;  %2053 = vrot.lane.b32.xlu1 %v2042_v43, %s14427_s0  ;;  %v1699_v6 = vmul.f32 %v14569_v11, %v9791_v12  ;;  %v1690_v43 = vmul.f32 %v14565_v55, %v9817_v9  ;;  %v1223_v61 = vadd.f32 %v1219_v25, %v14570_v20 }
 0x3e6   : > { %v10014_v23 = vadd.f32 %v1689_v57, %v1561_v28  ;;  %v10016_v1 = vadd.f32 %v1680_v3, %v1536_v45  ;;  %v14571_v57 = vld [vmem:[#allocation80_spill] sm:$0xff]  ;;  %v1405_v26 = vadd.f32 %v9877_v5, %v1213_v30  ;;  %v1380_v28 = vadd.f32 %v9879_v19, %v1204_v18 }
 0x3e7   : > { %v1578_v39 = vpop.permute.xlu0 %1577  ;;  %v1554_v48 = vpop.permute.xlu1 %1553  ;;  %v2229_v51 = vmul.f32 %v14571_v57, %v10010_v8  ;;  %v2326_v55 = vadd.f32 %v9629_v37, %v9512_v14  ;;  %v1220_v3 = vmul.f32 %v14567_v24, %v9359_v63  ;;  %v1214_v19 = vadd.f32 %v1210_v58, %v14566_v17 }
 0x3e8   : > { %v1587_v21 = vadd.f32 %v1578_v39, %v1379_v62  ;;  %v1562_v47 = vadd.f32 %v1554_v48, %v1354_v38  ;;  %v2094_v38 = vmul.f32 %v14564_v16, %v9817_v9  ;;  %v14572_v39 = vld [vmem:[#allocation81_spill] sm:$0xff]  ;;  %v1700_v48 = vmul.f32 %v14569_v11, %v9817_v9 }
 0x3e9   : > { %2129 = vrot.lane.b32.xlu0 %v2119_v0, %s14427_s0  ;;  %2079 = vrot.lane.b32.xlu1 %v2068_v40, %s14427_s0  ;;  %v1709_v5 = vmul.f32 %v14572_v39, %v9791_v12  ;;  %v10052_v0 = vstv %s10003_s8  ;;  %v2534_v14 = vadd.f32 %v9756_v4, %v2326_v55  ;;  %v1431_v63 = vadd.f32 %v9891_v59, %v1223_v61  ;;  %s10599_s8 = sld [smem:[#allocation10 + $0x105]] }
 0x3ea   : > { %v10036_v22 = vadd.f32 %v1699_v6, %v1587_v21  ;;  %v10038_v45 = vadd.f32 %v1690_v43, %v1562_v47  ;;  %v1406_v37 = vadd.f32 %v9893_v41, %v1214_v19  ;;  %v2678_v24 = vmul.f32 %v9631_v29, %v10052_v0  ;;  %v14573_v6 = vld [vmem:[#allocation83_spill] sm:$0xff]  ;;  %v14574_v21 = vld [vmem:[#allocation82_spill] sm:$0xff] }
 0x3eb   : > { %v1604_v25 = vpop.permute.xlu0 %1603  ;;  %v1580_v62 = vpop.permute.xlu1 %1579  ;;  %v2255_v4 = vmul.f32 %v14573_v6, %v10010_v8  ;;  %v2120_v58 = vmul.f32 %v14568_v31, %v9817_v9  ;;  %v1719_v59 = vmul.f32 %v14574_v21, %v9791_v12  ;;  %v10071_v41 = vld [vmem:[#allocation2 + $0x1a] sm:$0xff]  ;;  %v1224_v47 = vadd.f32 %v1220_v3, %v14570_v20  ;;  %v14575_v20 = vld [vmem:[#allocation84_spill] sm:$0xff] }
 0x3ec   : > { %v1613_v30 = vadd.f32 %v1604_v25, %v1405_v26  ;;  %v1588_v18 = vadd.f32 %v1580_v62, %v1380_v28  ;;  %v2682_v26 = vadd.f32 %v2678_v24, %v2534_v14  ;;  %v2281_v3 = vmul.f32 %v14575_v20, %v10010_v8  ;;  %v14577_v14 = vld [vmem:[#allocation85_spill] sm:$0xff] }
 0x3ed   : > { %2239 = vrot.lane.b32.xlu0 %v2229_v51, %s14418_s6  ;;  %2105 = vrot.lane.b32.xlu1 %v2094_v38, %s14427_s0  ;;  %v1710_v51 = vmul.f32 %v14572_v39, %v9817_v9  ;;  %v1432_v31 = vadd.f32 %v9908_v13, %v1224_v47  ;;  %v2230_v62 = vmul.f32 %v14571_v57, %v10071_v41  ;;  %v14576_v13 = vld [vmem:[#allocation88_spill] sm:$0xff] }
 0x3ee   : > { %v10059_v16 = vadd.f32 %v1709_v5, %v1613_v30  ;;  %v10061_v17 = vadd.f32 %v1700_v48, %v1588_v18  ;;  %v1720_v39 = vmul.f32 %v14574_v21, %v9817_v9  ;;  %v2826_v5 = vadd.f32 %v14576_v13, %v2682_v26  ;;  %v14585_v26 = vld [vmem:[#allocation89_spill] sm:$0xff] }
 0x3ef   : > { %v1630_v40 = vpop.permute.xlu0 %1629  ;;  %v1606_v11 = vpop.permute.xlu1 %1605  ;;  %v2256_v57 = vmul.f32 %v14573_v6, %v10071_v41  ;;  %v14581_v6 = vld [vmem:[#allocation86_spill] sm:$0xff]  ;;  %v2282_v47 = vmul.f32 %v14575_v20, %v10071_v41  ;;  %v14587_v20 = vld [vmem:[#allocation23_spill] sm:$0xff] }
 0x3f0   : > { %v1639_v43 = vadd.f32 %v1630_v40, %v1431_v63  ;;  %v1614_v61 = vadd.f32 %v1606_v11, %v1406_v37  ;;  %v2307_v63 = vmul.f32 %v14577_v14, %v10010_v8  ;;  %v10102_v37 = vstv %s7483_s12  ;;  %s10628_s12 = sld [smem:[#allocation10 + $0x56]] }
 0x3f1   : > { %2265 = vrot.lane.b32.xlu0 %v2255_v4, %s14418_s6  ;;  %2131 = vrot.lane.b32.xlu1 %v2120_v58, %s14427_s0  ;;  %14578 = vst [vmem:[#allocation44_spill] sm:$0xff] %v10102_v37  ;;  %v3178_v40 = vmul.f32 %v10102_v37, %v9717_v7 }
 0x3f2   : > { %v10079_v28 = vadd.f32 %v1719_v59, %v1639_v43  ;;  %v10081_v12 = vadd.f32 %v1710_v51, %v1614_v61  ;;  %v2333_v59 = vmul.f32 %v14581_v6, %v10010_v8  ;;  %v14582_v43 = vld [vmem:[#allocation22_spill] sm:$0xff] }
 0x3f3   : > { %v10083_v55 = vpop.permute.xlu0 %2739  ;;  %v1632_v25 = vpop.permute.xlu1 %1631 }
 0x3f4   : > { %v1640_v38 = vadd.f32 %v1632_v25, %v1432_v31  ;;  %v7809_v30 = vpop.f32.mrb[12].mxu1  ;;  %v2359_v31 = vmul.f32 %v14585_v26, %v10010_v8  ;;  %v2308_v25 = vmul.f32 %v14577_v14, %v10071_v41 }
 0x3f5   : > { %2291 = vrot.lane.b32.xlu0 %v2281_v3, %s14418_s6  ;;  %2241 = vrot.lane.b32.xlu1 %v2230_v62, %s14418_s6  ;;  %v829_v24 = vpop.f32.mrb[13].mxu1  ;;  %v14586_v3 = vmov 0.0  }
 0x3f6   : > { %v10094_v19 = vadd.f32 %v1720_v39, %v1640_v38  ;;  %v7874_v11 = vpack.c.bf16 %v7809_v30, %v829_v24  ;;  %v14590_v39 = vld [vmem:[#allocation92_spill] sm:$0xff]  ;;  %v14595_v24 = vld [vmem:[#allocation25_spill] sm:$0xff] }
 0x3f7   : > { %v10096_v18 = vpop.permute.xlu0 %2765  ;;  %v3024_v48 = vpop.permute.xlu1 %3023  ;;  %v2385_v13 = vmul.f32 %v14590_v39, %v10010_v8  ;;  %v14591_v30 = vld [vmem:[#allocation24_spill] sm:$0xff] }
 0x3f8   : > { %v3034_v9 = vadd.f32 %v3024_v48, %v2826_v5  ;;  %7875 = vmatpush3.bf16.msra.mxu1 %v7874_v11  ;;  %v2334_v5 = vmul.f32 %v14581_v6, %v10071_v41  ;;  %v14598_v6 = vld [vmem:[#allocation98_spill] sm:$0xff] }
 0x3f9   : > { %2317 = vrot.lane.b32.xlu0 %v2307_v63, %s14418_s6  ;;  %2267 = vrot.lane.b32.xlu1 %v2256_v57, %s14418_s6  ;;  %v14594_v63 = vld [vmem:[#allocation95_spill] sm:$0xff] }
 0x3fa   : > { %v10108_v4 = vadd.f32 %v3178_v40, %v3034_v9  ;;  %v2411_v57 = vmul.f32 %v14594_v63, %v10010_v8  ;;  %v2360_v9 = vmul.f32 %v14585_v26, %v10071_v41  ;;  %v14599_v26 = vld [vmem:[#allocation26_spill] sm:$0xff] }
 0x3fb   : > { %v10110_v58 = vpop.permute.xlu0 %2791  ;;  %v10112_v21 = vpop.permute.xlu1 %2741  ;;  %7815 = vmatmul.mubr.msk.f32.vlgmr.msra.gmra.mrb[14].mxu1 %vm358_vm7, %v14582_v43 }
 0x3fc   : > { %14579 = vst [vmem:[#allocation45_spill] sm:$0xff] %v10108_v4  ;;  %14580 = vst [vmem:[#allocation46_spill] sm:$0xff] %v10112_v21  ;;  %7817 = vmatprep.mubr.msk.f32.mxu1 %vm8171_vm8, %v14586_v3 }
 0x3fd   : > { %2343 = vrot.lane.b32.xlu0 %v2333_v59, %s14418_s6  ;;  %2293 = vrot.lane.b32.xlu1 %v2282_v47, %s14418_s6  ;;  %v2437_v59 = vmul.f32 %v14598_v6, %v10010_v8  ;;  %v2386_v47 = vmul.f32 %v14590_v39, %v10071_v41  ;;  %v2412_v39 = vmul.f32 %v14594_v63, %v10071_v41 }
 0x3ff   : > { %v10122_v61 = vpop.permute.xlu0 %2817  ;;  %v10124_v51 = vpop.permute.xlu1 %2767  ;;  %7818 = vmatmul.mubr.msk.f32.gmra.mrb[16].mxu1 %vm358_vm7, %v14587_v20 }
 0x400   : > { %14583 = vst [vmem:[#allocation47_spill] sm:$0xff] %v10122_v61  ;;  %14584 = vst [vmem:[#allocation48_spill] sm:$0xff] %v10124_v51  ;;  %7820 = vmatprep.mubr.msk.f32.mxu1 %vm8171_vm8, %v14586_v3  ;;  %v3064_v61 = vstv %s7477_s13 }
 0x401   : > { %2369 = vrot.lane.b32.xlu0 %v2359_v31, %s14418_s6  ;;  %2319 = vrot.lane.b32.xlu1 %v2308_v25, %s14418_s6 }
 0x403   : > { %v10136_v62 = vpop.permute.xlu0 %2843  ;;  %v10138_v38 = vpop.permute.xlu1 %2793  ;;  %7821 = vmatmul.mubr.msk.f32.gmra.mrb[18].mxu1 %vm358_vm7, %v14591_v30 }
 0x404   : > { %14588 = vst [vmem:[#allocation49_spill] sm:$0xff] %v10136_v62  ;;  %14589 = vst [vmem:[#allocation54_spill] sm:$0xff] %v10138_v38  ;;  %7823 = vmatprep.mubr.msk.f32.mxu1 %vm8171_vm8, %v14586_v3  ;;  %v3038_v62 = vstv %s7476_s23  ;;  %s937_s23 = sadd.s32 3, %s8397_s24  ;;  %s10703_s24 = sld [smem:[#allocation10 + $0x9c]] }
 0x405   : > { %2395 = vrot.lane.b32.xlu0 %v2385_v13, %s14418_s6  ;;  %2345 = vrot.lane.b32.xlu1 %v2334_v5, %s14418_s6  ;;  %v14602_v13 = vld [vmem:[#allocation101_spill] sm:$0xff]  ;;  %s10642_s13 = sld [smem:[#allocation8 + %s937_s23]] }
 0x406   : > { %v2463_v5 = vmul.f32 %v14602_v13, %v10010_v8  ;;  %v2464_v30 = vmul.f32 %v14602_v13, %v10071_v41 }
 0x407   : > { %v10150_v48 = vpop.permute.xlu0 %2869  ;;  %v10152_v14 = vpop.permute.xlu1 %2819  ;;  %7824 = vmatmul.mubr.msk.f32.gmra.mrb[20].mxu1 %vm358_vm7, %v14595_v24 }
 0x408   : > { %14592 = vst [vmem:[#allocation50_spill] sm:$0xff] %v10150_v48  ;;  %14593 = vst [vmem:[#allocation52_spill] sm:$0xff] %v10152_v14  ;;  %7826 = vmatprep.mubr.msk.f32.mxu1 %vm8171_vm8, %v14586_v3  ;;  %v3016_v3 = vmul.f32 %v9625_v36, %v9623_v10 }
 0x409   : > { %2421 = vrot.lane.b32.xlu0 %v2411_v57, %s14418_s6  ;;  %2371 = vrot.lane.b32.xlu1 %v2360_v9, %s14418_s6 }
 0x40b   : > { %v10164_v40 = vpop.permute.xlu0 %2895  ;;  %v10166_v11 = vpop.permute.xlu1 %2845  ;;  %7827 = vmatmul.mubr.msk.f32.gmra.mrb[22].mxu1 %vm358_vm7, %v14599_v26  ;;  %v2438_v26 = vmul.f32 %v14598_v6, %v10071_v41 }
 0x40c   : > { %14596 = vst [vmem:[#allocation63_spill] sm:$0xff] %v10164_v40  ;;  %14597 = vst [vmem:[#allocation51_spill] sm:$0xff] %v10166_v11 }
 0x40d   : > { %2447 = vrot.lane.b32.xlu0 %v2437_v59, %s14427_s0  ;;  %2397 = vrot.lane.b32.xlu1 %v2386_v47, %s14418_s6  ;;  %v14604_v59 = vld [vmem:[#allocation102_spill] sm:$0xff] }
 0x40e   : > { %v2489_v47 = vmul.f32 %v14604_v59, %v10010_v8  ;;  %v2490_v43 = vmul.f32 %v14604_v59, %v10071_v41  ;;  %v14613_v59 = vld [vmem:[#allocation109_spill] sm:$0xff] }
 0x40f   : > { %v10178_v31 = vpop.permute.xlu0 %2921  ;;  %v10180_v25 = vpop.permute.xlu1 %2871 }
 0x410   : > { %14600 = vst [vmem:[#allocation107_spill] sm:$0xff] %v10178_v31  ;;  %14601 = vst [vmem:[#allocation53_spill] sm:$0xff] %v10180_v25 }
 0x411   : > { %2473 = vrot.lane.b32.xlu0 %v2463_v5, %s14427_s0  ;;  %2423 = vrot.lane.b32.xlu1 %v2412_v39, %s14418_s6  ;;  %v14606_v5 = vld [vmem:[#allocation103_spill] sm:$0xff] }
 0x412   : > { %v2515_v39 = vmul.f32 %v14606_v5, %v10010_v8 }
 0x413   : > { %v10188_v57 = vpop.permute.xlu0 %2947  ;;  %v10190_v9 = vpop.permute.xlu1 %2897 }
 0x414   : > { %14603 = vst [vmem:[#allocation55_spill] sm:$0xff] %v10190_v9 }
 0x415   : > { %2499 = vrot.lane.b32.xlu0 %v2489_v47, %s14427_s0  ;;  %2449 = vrot.lane.b32.xlu1 %v2438_v26, %s14427_s0  ;;  %v14609_v26 = vld [vmem:[#allocation106_spill] sm:$0xff] }
 0x416   : > { %v2541_v47 = vmul.f32 %v14609_v26, %v10010_v8 }
 0x417   : > { %v10198_v24 = vpop.permute.xlu0 %2973  ;;  %v10200_v63 = vpop.permute.xlu1 %2923 }
 0x418   : > { %14605 = vst [vmem:[#allocation69_spill] sm:$0xff] %v10200_v63  ;;  %v2516_v63 = vmul.f32 %v14606_v5, %v10071_v41  ;;  %v14614_v5 = vld [vmem:[#allocation110_spill] sm:$0xff] }
 0x419   : > { %2525 = vrot.lane.b32.xlu0 %v2515_v39, %s14427_s0  ;;  %2475 = vrot.lane.b32.xlu1 %v2464_v30, %s14427_s0  ;;  %v14611_v39 = vld [vmem:[#allocation108_spill] sm:$0xff] }
 0x41a   : > { %v2567_v30 = vmul.f32 %v14611_v39, %v10010_v8 }
 0x41b   : > { %v10208_v20 = vpop.permute.xlu0 %2999  ;;  %v10210_v6 = vpop.permute.xlu1 %2949 }
 0x41c   : > { %14607 = vst [vmem:[#allocation65_spill] sm:$0xff] %v10208_v20  ;;  %14608 = vst [vmem:[#allocation56_spill] sm:$0xff] %v10210_v6  ;;  %v3090_v20 = vstv %s7478_s16  ;;  %v14615_v6 = vld [vmem:[#allocation111_spill] sm:$0xff]  ;;  %s10644_s16 = sld [smem:[#allocation9 + %s937_s23]] }
 0x41d   : > { %2551 = vrot.lane.b32.xlu0 %v2541_v47, %s14427_s0  ;;  %2501 = vrot.lane.b32.xlu1 %v2490_v43, %s14427_s0  ;;  %v2593_v47 = vmul.f32 %v14613_v59, %v10010_v8  ;;  %v2542_v43 = vmul.f32 %v14609_v26, %v10071_v41  ;;  %v2149_v21 = vmul.f32 %v14615_v6, %v10010_v8  ;;  %s7505_s23 = sld [smem:[#allocation10 + $0x33]] }
 0x41f   : > { %v1740_v4 = vpop.permute.xlu0 %1739  ;;  %v10218_v13 = vpop.permute.xlu1 %2975 }
 0x420   : > { %14610 = vst [vmem:[#allocation57_spill] sm:$0xff] %v10218_v13 }
 0x421   : > { %2577 = vrot.lane.b32.xlu0 %v2567_v30, %s14427_s0  ;;  %2527 = vrot.lane.b32.xlu1 %v2516_v63, %s14427_s0  ;;  %v2619_v30 = vmul.f32 %v14614_v5, %v10010_v8  ;;  %v2568_v63 = vmul.f32 %v14611_v39, %v10071_v41 }
 0x423   : > { %v1766_v31 = vpop.permute.xlu0 %1765  ;;  %v10226_v9 = vpop.permute.xlu1 %3001 }
 0x424   : > { %14612 = vst [vmem:[#allocation70_spill] sm:$0xff] %v10226_v9  ;;  %v1749_v9 = vadd.f32 %v1740_v4, %v9924_v60 }
 0x425   : > { %2603 = vrot.lane.b32.xlu0 %v2593_v47, %s14427_s0  ;;  %2553 = vrot.lane.b32.xlu1 %v2542_v43, %s14427_s0  ;;  %v3013_v47 = vmul.f32 %v9691_v32, %v9625_v36  ;;  %v2594_v43 = vmul.f32 %v14613_v59, %v10071_v41 }
 0x427   : > { %v1792_v40 = vpop.permute.xlu0 %1791  ;;  %v1742_v25 = vpop.permute.xlu1 %1741 }
 0x429   : > { %2629 = vrot.lane.b32.xlu0 %v2619_v30, %s14427_s0  ;;  %2579 = vrot.lane.b32.xlu1 %v2568_v63, %s14427_s0  ;;  %v3015_v30 = vmul.f32 %v9625_v36, %v9599_v56  ;;  %v2620_v63 = vmul.f32 %v14614_v5, %v10071_v41 }
 0x42b   : > { %v10240_v48 = vpop.permute.xlu0 %1817  ;;  %v10242_v26 = vpop.permute.xlu1 %1767 }
 0x42d   : > { %3021 = vrot.lane.b32.xlu0 %v3013_v47, %s14427_s0  ;;  %2605 = vrot.lane.b32.xlu1 %v2594_v43, %s14427_s0  ;;  %v3039_v43 = vmul.f32 %v9691_v32, %v3038_v62 }
 0x42f   : > { %v10250_v39 = vpop.permute.xlu0 %1843  ;;  %v10252_v11 = vpop.permute.xlu1 %1793 }
 0x431   : > { %3025 = vrot.lane.b32.xlu0 %v3015_v30, %s14427_s0  ;;  %2631 = vrot.lane.b32.xlu1 %v2620_v63, %s14427_s0  ;;  %v3041_v30 = vmul.f32 %v3038_v62, %v9599_v56  ;;  %v3040_v63 = vmul.f32 %v9631_v29, %v3038_v62 }
 0x433   : > { %v10260_v59 = vpop.permute.xlu0 %1869  ;;  %v10262_v47 = vpop.permute.xlu1 %1819 }
 0x435   : > { %3047 = vrot.lane.b32.xlu0 %v3039_v43, %s14427_s0  ;;  %3027 = vrot.lane.b32.xlu1 %v3016_v3, %s14427_s0  ;;  %v3065_v3 = vmul.f32 %v9691_v32, %v3064_v61  ;;  %v3042_v43 = vmul.f32 %v3038_v62, %v9623_v10  ;;  %v1775_v62 = vadd.f32 %v1766_v31, %v9944_v53 }
 0x436   : > { %v1750_v53 = vadd.f32 %v1742_v25, %v9946_v50  ;;  %v2150_v50 = vmul.f32 %v14615_v6, %v10071_v41 }
 0x437   : > { %v10269_v5 = vpop.permute.xlu0 %1895  ;;  %v10271_v14 = vpop.permute.xlu1 %1845 }
 0x439   : > { %3051 = vrot.lane.b32.xlu0 %v3041_v30, %s14427_s0  ;;  %3049 = vrot.lane.b32.xlu1 %v3040_v63, %s14427_s0  ;;  %v3067_v30 = vmul.f32 %v3064_v61, %v9599_v56  ;;  %v3066_v63 = vmul.f32 %v9631_v29, %v3064_v61  ;;  %v3091_v56 = vmul.f32 %v9691_v32, %v3090_v20 }
 0x43b   : > { %v10277_v37 = vpop.permute.xlu0 %1921  ;;  %v10279_v36 = vpop.permute.xlu1 %1871 }
 0x43d   : > { %3073 = vrot.lane.b32.xlu0 %v3065_v3, %s14427_s0  ;;  %3053 = vrot.lane.b32.xlu1 %v3042_v43, %s14427_s0  ;;  %v3068_v43 = vmul.f32 %v3064_v61, %v9623_v10  ;;  %v3092_v61 = vmul.f32 %v9631_v29, %v3090_v20  ;;  %v1776_v29 = vadd.f32 %v10242_v26, %v9968_v44 }
 0x43e   : > { %v2160_v44 = vmul.f32 %v9434_v34, %v10071_v41 }
 0x43f   : > { %v1948_v38 = vpop.permute.xlu0 %1947  ;;  %v10286_v13 = vpop.permute.xlu1 %1897 }
 0x440   : > { %v1957_v51 = vadd.f32 %v1948_v38, %v1749_v9  ;;  %v2159_v9 = vmul.f32 %v9434_v34, %v10010_v8 }
 0x441   : > { %3077 = vrot.lane.b32.xlu0 %v3067_v30, %s14427_s0  ;;  %3075 = vrot.lane.b32.xlu1 %v3066_v63, %s14427_s0  ;;  %v1801_v30 = vadd.f32 %v1792_v40, %v9966_v42  ;;  %v10309_v63 = vld [vmem:[#allocation2 + $0x38] sm:$0xff]  ;;  %v2169_v42 = vmul.f32 %v9454_v54, %v10010_v8  ;;  %v1827_v40 = vadd.f32 %v10240_v48, %v9988_v49 }
 0x442   : > { %v10295_v60 = vadd.f32 %v2149_v21, %v1957_v51  ;;  %v3093_v10 = vmul.f32 %v10309_v63, %v3090_v20  ;;  %v2179_v49 = vmul.f32 %v9477_v52, %v10010_v8  ;;  %v1802_v48 = vadd.f32 %v10252_v11, %v9990_v15 }
 0x443   : > { %v1974_v4 = vpop.permute.xlu0 %1973  ;;  %v10297_v3 = vpop.permute.xlu1 %1923  ;;  %v2170_v15 = vmul.f32 %v9454_v54, %v10071_v41  ;;  %v1879_v11 = vadd.f32 %v10260_v59, %v10036_v22  ;;  %v2199_v22 = vmul.f32 %v9525_v27, %v10010_v8  ;;  %v1905_v59 = vadd.f32 %v10269_v5, %v10059_v16 }
 0x444   : > { %v1983_v38 = vadd.f32 %v1974_v4, %v1775_v62  ;;  %v3116_v62 = vstv %s7479_s26  ;;  %v2209_v16 = vmul.f32 %v9548_v46, %v10010_v8  ;;  %s10752_s26 = sld [smem:[#allocation10 + $0x9e]] }
 0x445   : > { %3099 = vrot.lane.b32.xlu0 %v3091_v56, %s14427_s0  ;;  %3079 = vrot.lane.b32.xlu1 %v3068_v43, %s14427_s0 }
 0x446   : > { %v10307_v21 = vadd.f32 %v2159_v9, %v1983_v38 }
 0x447   : > { %v2000_v51 = vpop.permute.xlu0 %1999  ;;  %v1950_v31 = vpop.permute.xlu1 %1949 }
 0x448   : > { %v2009_v4 = vadd.f32 %v2000_v51, %v1801_v30  ;;  %v1958_v56 = vadd.f32 %v1950_v31, %v1750_v53  ;;  %v3117_v30 = vmul.f32 %v9691_v32, %v3116_v62  ;;  %v10330_v53 = vld [vmem:[#allocation2 + $0x40] sm:$0xff]  ;;  %v1853_v32 = vadd.f32 %v10250_v39, %v10014_v23 }
 0x449   : > { %3103 = vrot.lane.b32.xlu0 %v3093_v10, %s14427_s0  ;;  %3101 = vrot.lane.b32.xlu1 %v3092_v61, %s14427_s0  ;;  %v3094_v6 = vmul.f32 %v10330_v53, %v3090_v20  ;;  %v2189_v23 = vmul.f32 %v9502_v33, %v10010_v8  ;;  %v1828_v39 = vadd.f32 %v10262_v47, %v10016_v1 }
 0x44a   : > { %v10325_v25 = vadd.f32 %v2169_v42, %v2009_v4  ;;  %v10327_v43 = vadd.f32 %v2150_v50, %v1958_v56  ;;  %v3119_v4 = vmul.f32 %v10309_v63, %v3116_v62  ;;  %v10348_v56 = vld [vmem:[#allocation2 + $0x30] sm:$0xff]  ;;  %v3226_v42 = vstv %s10313_s29  ;;  %s10755_s29 = sld [smem:[#allocation10 + $0xc0]] }
 0x44b   : > { %v2026_v38 = vpop.permute.xlu0 %2025  ;;  %v1976_v9 = vpop.permute.xlu1 %1975  ;;  %14616 = vst [vmem:[#allocation71_spill] sm:$0xff] %v10348_v56  ;;  %v3118_v34 = vmul.f32 %v10348_v56, %v3116_v62  ;;  %v3120_v54 = vmul.f32 %v10330_v53, %v3116_v62  ;;  %v2180_v1 = vmul.f32 %v9477_v52, %v10071_v41  ;;  %v3228_v52 = vmul.f32 %v3226_v42, %v9717_v7 }
 0x44c   : > { %v2035_v51 = vadd.f32 %v2026_v38, %v1827_v40  ;;  %v1984_v31 = vadd.f32 %v1976_v9, %v1776_v29  ;;  %v1880_v7 = vadd.f32 %v10279_v36, %v10061_v17  ;;  %v2200_v17 = vmul.f32 %v9525_v27, %v10071_v41 }
 0x44d   : > { %3125 = vrot.lane.b32.xlu0 %v3117_v30, %s14427_s0  ;;  %3105 = vrot.lane.b32.xlu1 %v3094_v6, %s14427_s0  ;;  %v3227_v6 = vmul.f32 %v3226_v42, %v9715_v35  ;;  %v1854_v35 = vadd.f32 %v10271_v14, %v10038_v45  ;;  %v2190_v45 = vmul.f32 %v9502_v33, %v10071_v41 }
 0x44e   : > { %v10343_v20 = vadd.f32 %v2179_v49, %v2035_v51  ;;  %v10345_v26 = vadd.f32 %v2160_v44, %v1984_v31  ;;  %v10368_v51 = vld [vmem:[#allocation2 + $0x39] sm:$0xff]  ;;  %v1931_v14 = vadd.f32 %v10277_v37, %v10079_v28  ;;  %v2219_v28 = vmul.f32 %v9569_v2, %v10010_v8  ;;  %v10421_v8 = vld [vmem:[#allocation2 + $0x31] sm:$0xff] }
 0x44f   : > { %v2052_v10 = vpop.permute.xlu0 %2051  ;;  %v2002_v61 = vpop.permute.xlu1 %2001  ;;  %v1906_v37 = vadd.f32 %v10286_v13, %v10081_v12  ;;  %v1932_v12 = vadd.f32 %v10297_v3, %v10094_v19 }
 0x450   : > { %v2061_v50 = vadd.f32 %v2052_v10, %v1853_v32  ;;  %v2010_v40 = vadd.f32 %v2002_v61, %v1802_v48  ;;  %v3229_v48 = vmul.f32 %v3226_v42, %v10368_v51  ;;  %v3252_v10 = vstv %s7489_s30  ;;  %v10386_v61 = vld [vmem:[#allocation2 + $0x41] sm:$0xff]  ;;  %s10803_s30 = sld [smem:[#allocation10 + $0xc2]] }
 0x451   : > { %3129 = vrot.lane.b32.xlu0 %v3119_v4, %s14427_s0  ;;  %3127 = vrot.lane.b32.xlu1 %v3118_v34, %s14427_s0  ;;  %v3254_v27 = vmul.f32 %v10421_v8, %v3252_v10 }
 0x452   : > { %v10362_v29 = vadd.f32 %v2189_v23, %v2061_v50  ;;  %v10364_v38 = vadd.f32 %v2170_v15, %v2010_v40  ;;  %v10402_v15 = vld [vmem:[#allocation2 + $0x29] sm:$0xff] }
 0x453   : > { %v2078_v9 = vpop.permute.xlu0 %2077  ;;  %v2028_v30 = vpop.permute.xlu1 %2027  ;;  %v3253_v33 = vmul.f32 %v10402_v15, %v3252_v10 }
 0x454   : > { %v2087_v31 = vadd.f32 %v2078_v9, %v1879_v11  ;;  %v2036_v49 = vadd.f32 %v2028_v30, %v1828_v39  ;;  %v3230_v11 = vmul.f32 %v3226_v42, %v10386_v61 }
 0x455   : > { %3235 = vrot.lane.b32.xlu0 %v3227_v6, %s14418_s6  ;;  %3131 = vrot.lane.b32.xlu1 %v3120_v54, %s14427_s0  ;;  %v3255_v54 = vmul.f32 %v3252_v10, %v10368_v51 }
 0x456   : > { %v10380_v47 = vadd.f32 %v2199_v22, %v2087_v31  ;;  %v10382_v62 = vadd.f32 %v2180_v1, %v2036_v49  ;;  %v3278_v49 = vstv %s7490_s9  ;;  %v2210_v22 = vmul.f32 %v9548_v46, %v10071_v41  ;;  %s10806_s9 = sld [smem:[#allocation10 + $0xe4]] }
 0x457   : > { %v2104_v44 = vpop.permute.xlu0 %2103  ;;  %v2054_v32 = vpop.permute.xlu1 %2053  ;;  %v2220_v46 = vmul.f32 %v9569_v2, %v10071_v41 }
 0x458   : > { %v2113_v4 = vadd.f32 %v2104_v44, %v1905_v59  ;;  %v2062_v34 = vadd.f32 %v2054_v32, %v1854_v35  ;;  %v3279_v35 = vmul.f32 %v10402_v15, %v3278_v49  ;;  %v3256_v44 = vmul.f32 %v3252_v10, %v10386_v61 }
 0x459   : > { %3239 = vrot.lane.b32.xlu0 %v3229_v48, %s14418_s6  ;;  %3237 = vrot.lane.b32.xlu1 %v3228_v52, %s14418_s6  ;;  %v3281_v52 = vmul.f32 %v3278_v49, %v10368_v51 }
 0x45a   : > { %v10398_v5 = vadd.f32 %v2209_v16, %v2113_v4  ;;  %v10400_v50 = vadd.f32 %v2190_v45, %v2062_v34  ;;  %v3280_v4 = vmul.f32 %v10421_v8, %v3278_v49  ;;  %v3304_v34 = vstv %s7491_s7  ;;  %s10850_s7 = sld [smem:[#allocation10 + $0x108]] }
 0x45b   : > { %v2130_v40 = vpop.permute.xlu0 %2129  ;;  %v2080_v23 = vpop.permute.xlu1 %2079  ;;  %v3305_v10 = vmul.f32 %v10402_v15, %v3304_v34  ;;  %v3282_v16 = vmul.f32 %v3278_v49, %v10386_v61 }
 0x45c   : > { %v2139_v39 = vadd.f32 %v2130_v40, %v1931_v14  ;;  %v2088_v9 = vadd.f32 %v2080_v23, %v1880_v7  ;;  %v3307_v7 = vmul.f32 %v3304_v34, %v10368_v51  ;;  %v3306_v40 = vmul.f32 %v10421_v8, %v3304_v34 }
 0x45d   : > { %3261 = vrot.lane.b32.xlu0 %v3253_v33, %s14418_s6  ;;  %3241 = vrot.lane.b32.xlu1 %v3230_v11, %s14418_s6  ;;  %v3330_v23 = vstv %s7492_s10  ;;  %s10867_s10 = sld [smem:[#allocation10 + $0xe6]] }
 0x45e   : > { %v10414_v36 = vadd.f32 %v2219_v28, %v2139_v39  ;;  %v10416_v30 = vadd.f32 %v2200_v17, %v2088_v9  ;;  %v3331_v39 = vmul.f32 %v10402_v15, %v3330_v23  ;;  %v3308_v9 = vmul.f32 %v3304_v34, %v10386_v61 }
 0x45f   : > { %v10418_v42 = vpop.permute.xlu0 %2239  ;;  %v2106_v6 = vpop.permute.xlu1 %2105  ;;  %v3382_v34 = vstv %s7494_s28  ;;  %s7512_s28 = sld [smem:[#allocation10 + $0x10]] }
 0x460   : > { %v2114_v31 = vadd.f32 %v2106_v6, %v1906_v37  ;;  %v3333_v37 = vmul.f32 %v3330_v23, %v10368_v51  ;;  %v3332_v6 = vmul.f32 %v10421_v8, %v3330_v23 }
 0x461   : > { %3265 = vrot.lane.b32.xlu0 %v3255_v54, %s14418_s6  ;;  %3263 = vrot.lane.b32.xlu1 %v3254_v27, %s14418_s6  ;;  %v3356_v54 = vstv %s7493_s27  ;;  %s7503_s27 = sld [smem:[#allocation10 + $0x10a]] }
 0x462   : > { %v10430_v13 = vadd.f32 %v2210_v22, %v2114_v31  ;;  %v3357_v49 = vmul.f32 %v10402_v15, %v3356_v54  ;;  %v3334_v22 = vmul.f32 %v3330_v23, %v10386_v61  ;;  %v3360_v23 = vmul.f32 %v3356_v54, %v10386_v61 }
 0x463   : > { %v10432_v1 = vpop.permute.xlu0 %2265  ;;  %v2132_v59 = vpop.permute.xlu1 %2131 }
 0x464   : > { %v2140_v32 = vadd.f32 %v2132_v59, %v1932_v12  ;;  %v2249_v12 = vadd.f32 %v10418_v42, %v10295_v60  ;;  %v2275_v60 = vadd.f32 %v10432_v1, %v10307_v21 }
 0x465   : > { %3287 = vrot.lane.b32.xlu0 %v3279_v35, %s14418_s6  ;;  %3267 = vrot.lane.b32.xlu1 %v3256_v44, %s14418_s6  ;;  %v3359_v44 = vmul.f32 %v3356_v54, %v10368_v51 }
 0x466   : > { %v10440_v48 = vadd.f32 %v2220_v46, %v2140_v32  ;;  %v3358_v32 = vmul.f32 %v10421_v8, %v3356_v54  ;;  %v14617_v46 = vld [vmem:[#allocation36_spill] sm:$0xff]  ;;  %v3384_v54 = vmul.f32 %v10421_v8, %v3382_v34 }
 0x467   : > { %v10442_v19 = vpop.permute.xlu0 %2291  ;;  %v10444_v3 = vpop.permute.xlu1 %2241 }
 0x469   : > { %3291 = vrot.lane.b32.xlu0 %v3281_v52, %s14418_s6  ;;  %3289 = vrot.lane.b32.xlu1 %v3280_v4, %s14418_s6  ;;  %v2649_v52 = vmul.f32 %v10309_v63, %v14617_v46 }
 0x46b   : > { %v10450_v2 = vpop.permute.xlu0 %2317  ;;  %v10452_v41 = vpop.permute.xlu1 %2267 }
 0x46d   : > { %3313 = vrot.lane.b32.xlu0 %v3305_v10, %s14418_s6  ;;  %3293 = vrot.lane.b32.xlu1 %v3282_v16, %s14418_s6  ;;  %v10500_v10 = vstv %s7460_s1  ;;  %s7513_s1 = sld [smem:[#allocation10 + $0x34]] }
 0x46f   : > { %v10458_v45 = vpop.permute.xlu0 %2343  ;;  %v10460_v14 = vpop.permute.xlu1 %2293 }
 0x471   : > { %3317 = vrot.lane.b32.xlu0 %v3307_v7, %s14418_s6  ;;  %3315 = vrot.lane.b32.xlu1 %v3306_v40, %s14418_s6  ;;  %v3383_v40 = vmul.f32 %v10402_v15, %v3382_v34 }
 0x473   : > { %v10466_v33 = vpop.permute.xlu0 %2369  ;;  %v10468_v11 = vpop.permute.xlu1 %2319 }
 0x475   : > { %3339 = vrot.lane.b32.xlu0 %v3331_v39, %s14418_s6  ;;  %3319 = vrot.lane.b32.xlu1 %v3308_v9, %s14418_s6  ;;  %v10508_v39 = vstv %s7495_s2  ;;  %v10510_v9 = vld [vmem:[#allocation2 + $0x28] sm:$0xff]  ;;  %s7514_s2 = sld [smem:[#allocation10 + $0x58]] }
 0x476   : > { %14618 = vst [vmem:[#allocation58_spill] sm:$0xff] %v10510_v9  ;;  %v3409_v56 = vmul.f32 %v10402_v15, %v10508_v39 }
 0x477   : > { %v10474_v28 = vpop.permute.xlu0 %2395  ;;  %v10476_v17 = vpop.permute.xlu1 %2345 }
 0x479   : > { %3343 = vrot.lane.b32.xlu0 %v3333_v37, %s14418_s6  ;;  %3341 = vrot.lane.b32.xlu1 %v3332_v6, %s14418_s6  ;;  %v10514_v37 = vmul.f32 %v10510_v9, %v10052_v0 }
 0x47b   : > { %v10482_v27 = vpop.permute.xlu0 %2421  ;;  %v10484_v31 = vpop.permute.xlu1 %2371 }
 0x47d   : > { %3365 = vrot.lane.b32.xlu0 %v3357_v49, %s14418_s6  ;;  %3345 = vrot.lane.b32.xlu1 %v3334_v22, %s14418_s6  ;;  %v14619_v49 = vld [vmem:[#allocation121_spill] sm:$0xff]  ;;  %v10521_v22 = vmul.f32 %v10510_v9, %v10500_v10  ;;  %v3385_v9 = vmul.f32 %v3382_v34, %v10368_v51 }
 0x47e   : > { %v2659_v21 = vmul.f32 %v10309_v63, %v14619_v49 }
 0x47f   : > { %v2448_v59 = vpop.permute.xlu0 %2447  ;;  %v10492_v35 = vpop.permute.xlu1 %2397 }
 0x480   : > { %v2457_v4 = vadd.f32 %v2448_v59, %v2249_v12  ;;  %v10528_v12 = vstv %s7496_s3  ;;  %s7515_s3 = sld [smem:[#allocation10 + $0x7c]] }
 0x481   : > { %3369 = vrot.lane.b32.xlu0 %v3359_v44, %s14418_s6  ;;  %3367 = vrot.lane.b32.xlu1 %v3358_v32, %s14418_s6  ;;  %v2301_v44 = vadd.f32 %v10442_v19, %v10325_v25  ;;  %v2250_v32 = vadd.f32 %v10444_v3, %v10327_v43 }
 0x482   : > { %v2653_v42 = vadd.f32 %v2649_v52, %v2457_v4 }
 0x483   : > { %v2474_v16 = vpop.permute.xlu0 %2473  ;;  %v10504_v7 = vpop.permute.xlu1 %2423 }
 0x484   : > { %v2749_v6 = vadd.f32 %v10083_v55, %v2653_v42  ;;  %v2483_v1 = vadd.f32 %v2474_v16, %v2275_v60  ;;  %v14620_v55 = vld [vmem:[#allocation122_spill] sm:$0xff]  ;;  %v14621_v60 = vld [vmem:[#allocation37_spill] sm:$0xff] }
 0x485   : > { %3391 = vrot.lane.b32.xlu0 %v3383_v40, %s14418_s6  ;;  %3371 = vrot.lane.b32.xlu1 %v3360_v23, %s14418_s6  ;;  %v3149_v59 = vmul.f32 %v14620_v55, %v10368_v51  ;;  %v2669_v42 = vmul.f32 %v10309_v63, %v14621_v60  ;;  %v2650_v40 = vmul.f32 %v10330_v53, %v14617_v46 }
 0x486   : > { %v2663_v52 = vadd.f32 %v2659_v21, %v2483_v1  ;;  %v2957_v4 = vadd.f32 %v10188_v57, %v2749_v6  ;;  %v2327_v57 = vadd.f32 %v10450_v2, %v10343_v20  ;;  %v3410_v46 = vmul.f32 %v10421_v8, %v10508_v39 }
 0x487   : > { %v2500_v16 = vpop.permute.xlu0 %2499  ;;  %v2450_v23 = vpop.permute.xlu1 %2449  ;;  %v10555_v6 = vmul.f32 %v10402_v15, %v10528_v12  ;;  %v2679_v2 = vmul.f32 %v10309_v63, %v10052_v0 }
 0x488   : > { %v2775_v25 = vadd.f32 %v10096_v18, %v2663_v52  ;;  %v2509_v19 = vadd.f32 %v2500_v16, %v2301_v44  ;;  %v2458_v43 = vadd.f32 %v2450_v23, %v2250_v32  ;;  %v10545_v3 = vadd.f32 %v3149_v59, %v2957_v4  ;;  %v14622_v32 = vld [vmem:[#allocation38_spill] sm:$0xff] }
 0x489   : > { %3395 = vrot.lane.b32.xlu0 %v3385_v9, %s14418_s6  ;;  %3393 = vrot.lane.b32.xlu1 %v3384_v54, %s14418_s6  ;;  %v2276_v18 = vadd.f32 %v10452_v41, %v10345_v26  ;;  %v2660_v54 = vmul.f32 %v10330_v53, %v14619_v49  ;;  %v3386_v44 = vmul.f32 %v3382_v34, %v10386_v61  ;;  %v14623_v26 = vld [vmem:[#allocation46_spill] sm:$0xff] }
 0x48a   : > { %v2673_v21 = vadd.f32 %v2669_v42, %v2509_v19  ;;  %v2654_v1 = vadd.f32 %v2650_v40, %v2458_v43  ;;  %v2983_v20 = vadd.f32 %v10198_v24, %v2775_v25  ;;  %v3159_v52 = vmul.f32 %v14622_v32, %v10368_v51  ;;  %v14624_v25 = vld [vmem:[#allocation56_spill] sm:$0xff]  ;;  %v14625_v43 = vld [vmem:[#allocation65_spill] sm:$0xff] }
 0x48b   : > { %v2526_v9 = vpop.permute.xlu0 %2525  ;;  %v2476_v59 = vpop.permute.xlu1 %2475  ;;  %v10572_v24 = vstv %s10523_s4  ;;  %v2353_v40 = vadd.f32 %v10458_v45, %v10362_v29  ;;  %v2302_v49 = vadd.f32 %v10460_v14, %v10364_v38  ;;  %v2689_v29 = vmul.f32 %v10309_v63, %v10500_v10  ;;  %v14626_v14 = vld [vmem:[#allocation40_spill] sm:$0xff]  ;;  %s7516_s4 = sld [smem:[#allocation10 + $0xa0]] }
 0x48c   : > { %v2801_v4 = vadd.f32 %v10110_v58, %v2673_v21  ;;  %v2750_v41 = vadd.f32 %v14623_v26, %v2654_v1  ;;  %v2535_v42 = vadd.f32 %v2526_v9, %v2327_v57  ;;  %v2484_v16 = vadd.f32 %v2476_v59, %v2276_v18  ;;  %v14627_v1 = vld [vmem:[#allocation48_spill] sm:$0xff] }
 0x48d   : > { %3417 = vrot.lane.b32.xlu0 %v3409_v56, %s14418_s6  ;;  %3397 = vrot.lane.b32.xlu1 %v3386_v44, %s14418_s6  ;;  %v10582_v34 = vadd.f32 %v3159_v52, %v2983_v20  ;;  %v3411_v56 = vmul.f32 %v10508_v39, %v10368_v51  ;;  %v3150_v38 = vmul.f32 %v14620_v55, %v10386_v61  ;;  %v10606_v55 = vstv %s10557_s19  ;;  %s7517_s19 = sld [smem:[#allocation10 + $0xc4]] }
 0x48e   : > { %v10584_v58 = vadd.f32 %v2679_v2, %v2535_v42  ;;  %v2664_v23 = vadd.f32 %v2660_v54, %v2484_v16  ;;  %v2958_v19 = vadd.f32 %v14624_v25, %v2750_v41  ;;  %v3009_v57 = vadd.f32 %v14625_v43, %v2801_v4  ;;  %v14628_v41 = vld [vmem:[#allocation57_spill] sm:$0xff] }
 0x48f   : > { %v2552_v45 = vpop.permute.xlu0 %2551  ;;  %v2502_v18 = vpop.permute.xlu1 %2501  ;;  %v3169_v21 = vmul.f32 %v14626_v14, %v10368_v51  ;;  %v2670_v9 = vmul.f32 %v10330_v53, %v14621_v60  ;;  %v2379_v59 = vadd.f32 %v10466_v33, %v10380_v47  ;;  %v2328_v60 = vadd.f32 %v10468_v11, %v10382_v62  ;;  %v14629_v33 = vld [vmem:[#allocation112_spill] sm:$0xff]  ;;  %v14630_v42 = vld [vmem:[#allocation29_spill] sm:$0xff]  ;;  %v14631_v11 = vld [vmem:[#allocation54_spill] sm:$0xff] }
 0x490   : > { %v2776_v20 = vadd.f32 %v14627_v1, %v2664_v23  ;;  %v2561_v2 = vadd.f32 %v2552_v45, %v2353_v40  ;;  %v2510_v54 = vadd.f32 %v2502_v18, %v2302_v49  ;;  %v10608_v44 = vadd.f32 %v3150_v38, %v2958_v19 }
 0x491   : > { %3421 = vrot.lane.b32.xlu0 %v3411_v56, %s14418_s6  ;;  %3419 = vrot.lane.b32.xlu1 %v3410_v46, %s14418_s6  ;;  %v10610_v52 = vadd.f32 %v3169_v21, %v3009_v57  ;;  %v2325_v16 = vadd.f32 %v14630_v42, %v14629_v33  ;;  %v2699_v46 = vmul.f32 %v10309_v63, %v10572_v24  ;;  %v10633_v18 = vstv %s10574_s20  ;;  %s7518_s20 = sld [smem:[#allocation10 + $0xe8]] }
 0x492   : > { %v10614_v4 = vadd.f32 %v2689_v29, %v2561_v2  ;;  %v2674_v26 = vadd.f32 %v2670_v9, %v2510_v54  ;;  %v2984_v47 = vadd.f32 %v14628_v41, %v2776_v20  ;;  %v3412_v23 = vmul.f32 %v10508_v39, %v10386_v61  ;;  %v14632_v29 = vld [vmem:[#allocation124_spill] sm:$0xff] }
 0x493   : > { %v2578_v40 = vpop.permute.xlu0 %2577  ;;  %v2528_v49 = vpop.permute.xlu1 %2527  ;;  %v3160_v62 = vmul.f32 %v14622_v32, %v10386_v61  ;;  %v2680_v43 = vmul.f32 %v10330_v53, %v10052_v0  ;;  %v2533_v45 = vadd.f32 %v14632_v29, %v2325_v16  ;;  %v2405_v39 = vadd.f32 %v10474_v28, %v10398_v5  ;;  %v14633_v5 = vld [vmem:[#allocation70_spill] sm:$0xff]  ;;  %v7367_v16 = vld [vmem:[%s8378_s11 + $0x30] sm:$0xff] }
 0x494   : > { %v2802_v25 = vadd.f32 %v14631_v11, %v2674_v26  ;;  %v2587_v19 = vadd.f32 %v2578_v40, %v2379_v59  ;;  %v2536_v57 = vadd.f32 %v2528_v49, %v2328_v60  ;;  %v2354_v0 = vadd.f32 %v10476_v17, %v10400_v50  ;;  %v14634_v40 = vld [vmem:[#allocation113_spill] sm:$0xff]  ;;  %v14635_v49 = vld [vmem:[#allocation30_spill] sm:$0xff] }
 0x495   : > { %3443 = vrot.lane.b32.xlu0 %v10555_v6, %s14427_s0  ;;  %3423 = vrot.lane.b32.xlu1 %v3412_v23, %s14418_s6  ;;  %v10640_v32 = vadd.f32 %v3160_v62, %v2984_v47  ;;  %v3437_v1 = vmul.f32 %v10528_v12, %v10368_v51  ;;  %v3436_v20 = vmul.f32 %v10421_v8, %v10528_v12  ;;  %v10667_v26 = vstv %s10599_s8  ;;  %s7504_s8 = sld [smem:[#allocation10 + $0xf]] }
 0x496   : > { %v10648_v56 = vadd.f32 %v2699_v46, %v2587_v19  ;;  %v10650_v38 = vadd.f32 %v2680_v43, %v2536_v57  ;;  %v3010_v28 = vadd.f32 %v14633_v5, %v2802_v25  ;;  %v3461_v2 = vmul.f32 %v10402_v15, %v10606_v55  ;;  %v7368_v46 = vld [vmem:[%s8378_s11 + $0x38] sm:$0xff]  ;;  %v14636_v57 = vld [vmem:[#allocation104_spill] sm:$0xff]  ;;  %s10701_s11 = sld [smem:[#allocation10 + $0x7a]] }
 0x497   : > { %v2604_v21 = vpop.permute.xlu0 %2603  ;;  %v2554_v6 = vpop.permute.xlu1 %2553  ;;  %v3170_v50 = vmul.f32 %v14626_v14, %v10386_v61  ;;  %v2709_v17 = vmul.f32 %v10309_v63, %v10633_v18  ;;  %v2690_v54 = vmul.f32 %v10330_v53, %v10500_v10  ;;  %v2681_v60 = vadd.f32 %v10514_v37, %v2533_v45 }
 0x498   : > { %v2613_v9 = vadd.f32 %v2604_v21, %v2405_v39  ;;  %v2562_v59 = vadd.f32 %v2554_v6, %v2354_v0  ;;  %v3462_v14 = vmul.f32 %v10421_v8, %v10606_v55  ;;  %v2431_v47 = vadd.f32 %v10482_v27, %v10414_v36  ;;  %v14638_v6 = vld [vmem:[#allocation114_spill] sm:$0xff] }
 0x499   : > { %3447 = vrot.lane.b32.xlu0 %v3437_v1, %s14427_s0  ;;  %3445 = vrot.lane.b32.xlu1 %v3436_v20, %s14427_s0  ;;  %v10673_v41 = vadd.f32 %v3170_v50, %v3010_v28  ;;  %v2380_v33 = vadd.f32 %v10484_v31, %v10416_v30  ;;  %v2351_v23 = vadd.f32 %v14635_v49, %v14634_v40  ;;  %v939_v27 = vstv %s10642_s13  ;;  %v14637_v28 = vld [vmem:[#allocation87_spill] sm:$0xff]  ;;  %s7520_s13 = sld [smem:[#allocation10 + $0x11]] }
 0x49a   : > { %v10679_v37 = vadd.f32 %v2709_v17, %v2613_v9  ;;  %v10681_v42 = vadd.f32 %v2690_v54, %v2562_v59  ;;  %v2719_v62 = vmul.f32 %v10309_v63, %v10667_v26  ;;  %v3438_v36 = vmul.f32 %v10528_v12, %v10386_v61  ;;  %v14639_v1 = vld [vmem:[#allocation31_spill] sm:$0xff] }
 0x49b   : > { %v2630_v11 = vpop.permute.xlu0 %2629  ;;  %v2580_v25 = vpop.permute.xlu1 %2579  ;;  %v2700_v31 = vmul.f32 %v10330_v53, %v10572_v24  ;;  %v943_v43 = vstv %s10644_s16  ;;  %v2559_v29 = vadd.f32 %v14636_v57, %v2351_v23  ;;  %v10699_v45 = vstv %s10628_s12  ;;  %s7519_s12 = sld [smem:[#allocation10 + $0x10c]]  ;;  %s11087_s16 = sld [smem:[#allocation10 + $0x57]] }
 0x49c   : > { %v2639_v30 = vadd.f32 %v2630_v11, %v2431_v47  ;;  %v2588_v19 = vadd.f32 %v2580_v25, %v2380_v33  ;;  %v940_v63 = vmul.f32 %v7367_v16, %v939_v27  ;;  %v941_v12 = vmul.f32 %v7368_v46, %v939_v27  ;;  %v14640_v47 = vld [vmem:[#allocation44_spill] sm:$0xff]  ;;  %v14641_v16 = vld [vmem:[#allocation105_spill] sm:$0xff]  ;;  %v14642_v11 = vld [vmem:[#allocation47_spill] sm:$0xff] }
 0x49d   : > { %3469 = vrot.lane.b32.xlu0 %v3461_v2, %s14427_s0  ;;  %3449 = vrot.lane.b32.xlu1 %v3438_v36, %s14427_s0  ;;  %v2406_v39 = vadd.f32 %v10492_v35, %v10430_v13  ;;  %v2825_v21 = vadd.f32 %v14637_v28, %v2681_v60  ;;  %v2352_v20 = vadd.f32 %v14639_v1, %v14638_v6  ;;  %v14643_v27 = vld [vmem:[#allocation115_spill] sm:$0xff]  ;;  %v3186_v28 = vstv %s10703_s24  ;;  %v14648_v1 = vld [vmem:[#allocation52_spill] sm:$0xff]  ;;  %s11120_s24 = sld [smem:[#allocation10 + $0x7b]] }
 0x49e   : > { %v10707_v0 = vadd.f32 %v2719_v62, %v2639_v30  ;;  %v10709_v5 = vadd.f32 %v2700_v31, %v2588_v19  ;;  %v3463_v17 = vmul.f32 %v10606_v55, %v10368_v51  ;;  %v944_v9 = vadd.f32 %v943_v43, %v940_v63  ;;  %v14645_v31 = vld [vmem:[#allocation71_spill] sm:$0xff] }
 0x49f   : > { %v3022_v2 = vpop.permute.xlu0 %3021  ;;  %v2606_v50 = vpop.permute.xlu1 %2605  ;;  %v945_v54 = vadd.f32 %v943_v43, %v941_v12  ;;  %v2710_v13 = vmul.f32 %v10330_v53, %v10633_v18  ;;  %v3177_v33 = vmul.f32 %v10402_v15, %v14640_v47  ;;  %v2691_v60 = vadd.f32 %v10521_v22, %v2559_v29  ;;  %v14644_v22 = vld [vmem:[#allocation32_spill] sm:$0xff] }
 0x4a0   : > { %v3033_v59 = vadd.f32 %v3022_v2, %v2825_v21  ;;  %v2614_v35 = vadd.f32 %v2606_v50, %v2406_v39  ;;  %v2560_v46 = vadd.f32 %v14641_v16, %v2352_v20  ;;  %v946_v40 = vmax.f32 %v944_v9, 0.0  ;;  %v14646_v12 = vld [vmem:[#allocation128_spill] sm:$0xff]  ;;  %v14647_v21 = vld [vmem:[#allocation90_spill] sm:$0xff]  ;;  %v14651_v9 = vld [vmem:[#allocation33_spill] sm:$0xff] }
 0x4a1   : > { %3473 = vrot.lane.b32.xlu0 %v3463_v17, %s14427_s0  ;;  %3471 = vrot.lane.b32.xlu1 %v3462_v14, %s14427_s0  ;;  %v947_v49 = vmax.f32 %v945_v54, 0.0  ;;  %v2432_v23 = vadd.f32 %v10504_v7, %v10440_v48  ;;  %v2827_v25 = vadd.f32 %v14642_v11, %v10584_v58  ;;  %v2377_v30 = vadd.f32 %v14644_v22, %v14643_v27  ;;  %v14650_v17 = vld [vmem:[#allocation116_spill] sm:$0xff] }
 0x4a2   : > { %v10726_v62 = vadd.f32 %v2710_v13, %v2614_v35  ;;  %v10730_v36 = vadd.f32 %v3177_v33, %v3033_v59  ;;  %v2688_v19 = vmul.f32 %v14645_v31, %v10500_v10  ;;  %v3487_v48 = vmul.f32 %v10402_v15, %v10699_v45  ;;  %7833 = vmatprep.mubr.msk.f32.mxu0 %vm358_vm7, %v946_v40  ;;  %v14652_v59 = vld [vmem:[#allocation58_spill] sm:$0xff] }
 0x4a3   : > { %v3026_v14 = vpop.permute.xlu0 %3025  ;;  %v2632_v43 = vpop.permute.xlu1 %2631  ;;  %v3464_v7 = vmul.f32 %v10606_v55, %v10386_v61  ;;  %v2720_v57 = vmul.f32 %v10330_v53, %v10667_v26  ;;  %v3179_v63 = vmul.f32 %v14640_v47, %v10368_v51  ;;  %7834 = vmatmul.mubr.msk.f32.vlgmr.msra.gmra.mrb[12].mxu0 %vm358_vm7, %v947_v49  ;;  %v2585_v39 = vadd.f32 %v14646_v12, %v2377_v30  ;;  %v14655_v30 = vld [vmem:[#allocation49_spill] sm:$0xff] }
 0x4a4   : > { %v3035_v58 = vadd.f32 %v3026_v14, %v2827_v25  ;;  %v2640_v29 = vadd.f32 %v2632_v43, %v2432_v23  ;;  %v2692_v10 = vadd.f32 %v2688_v19, %v2560_v46  ;;  %v10750_v55 = vstv %s10701_s11  ;;  %v14653_v23 = vld [vmem:[#allocation129_spill] sm:$0xff]  ;;  %v14654_v25 = vld [vmem:[#allocation91_spill] sm:$0xff]  ;;  %s11099_s11 = sld [smem:[#allocation10 + $0x35]] }
 0x4a5   : > { %3495 = vrot.lane.b32.xlu0 %v3487_v48, %s14427_s0  ;;  %3475 = vrot.lane.b32.xlu1 %v3464_v7, %s14427_s0  ;;  %v2851_v6 = vadd.f32 %v14647_v21, %v2691_v60  ;;  %v2828_v20 = vadd.f32 %v14648_v1, %v10650_v38  ;;  %v14649_v50 = vmov 0.0   ;;  %v2378_v54 = vadd.f32 %v14651_v9, %v14650_v17  ;;  %v14656_v48 = vld [vmem:[#allocation27_spill] sm:$0xff]  ;;  %v14657_v7 = vld [vmem:[#allocation34_spill] sm:$0xff] }
 0x4a6   : > { %v10757_v53 = vadd.f32 %v2720_v57, %v2640_v29  ;;  %v10762_v2 = vadd.f32 %v3179_v63, %v3035_v58  ;;  %7840 = vmatprep.mubr.msk.f32.mxu0 %vm8171_vm8, %v14649_v50  ;;  %v2697_v13 = vmul.f32 %v14652_v59, %v10572_v24  ;;  %v3489_v16 = vmul.f32 %v10699_v45, %v10368_v51  ;;  %v14658_v1 = vld [vmem:[#allocation42_spill] sm:$0xff] }
 0x4a7   : > { %v3048_v35 = vpop.permute.xlu0 %3047  ;;  %v3028_v33 = vpop.permute.xlu1 %3027  ;;  %v3488_v60 = vmul.f32 %v10421_v8, %v10699_v45  ;;  %v3187_v40 = vmul.f32 %v10402_v15, %v3186_v28  ;;  %v3180_v49 = vmul.f32 %v14640_v47, %v10386_v61  ;;  %v2586_v11 = vadd.f32 %v14653_v23, %v2378_v54  ;;  %v14660_v54 = vld [vmem:[#allocation51_spill] sm:$0xff] }
 0x4a8   : > { %v3059_v38 = vadd.f32 %v3048_v35, %v2851_v6  ;;  %v3036_v46 = vadd.f32 %v3028_v33, %v2828_v20  ;;  %v2852_v27 = vadd.f32 %v14654_v25, %v2692_v10  ;;  %v2701_v22 = vadd.f32 %v2697_v13, %v2585_v39 }
 0x4a9   : > { %3499 = vrot.lane.b32.xlu0 %v3489_v16, %s14427_s0  ;;  %3497 = vrot.lane.b32.xlu1 %v3488_v60, %s14427_s0  ;;  %v2853_v19 = vadd.f32 %v14655_v30, %v10614_v4  ;;  %v2403_v47 = vadd.f32 %v14657_v7, %v14656_v48  ;;  %v2698_v58 = vmul.f32 %v14645_v31, %v10572_v24  ;;  %v10801_v24 = vstv %s10752_s26  ;;  %v14661_v16 = vld [vmem:[#allocation117_spill] sm:$0xff]  ;;  %v14662_v60 = vld [vmem:[#allocation119_spill] sm:$0xff]  ;;  %v14663_v30 = vld [vmem:[#allocation130_spill] sm:$0xff]  ;;  %s11133_s26 = sld [smem:[#allocation10 + $0x59]] }
 0x4aa   : > { %v10783_v14 = vadd.f32 %v3187_v40, %v3059_v38  ;;  %v10785_v43 = vadd.f32 %v3180_v49, %v3036_v46  ;;  %v3513_v63 = vmul.f32 %v10402_v15, %v10750_v55  ;;  %v3490_v4 = vmul.f32 %v10699_v45, %v10386_v61  ;;  %v14659_v45 = vld [vmem:[#allocation93_spill] sm:$0xff]  ;;  %v14664_v48 = vld [vmem:[#allocation94_spill] sm:$0xff] }
 0x4ab   : > { %v3052_v57 = vpop.permute.xlu0 %3051  ;;  %v3050_v29 = vpop.permute.xlu1 %3049  ;;  %v3189_v39 = vmul.f32 %v3186_v28, %v10368_v51  ;;  %v3188_v21 = vmul.f32 %v10421_v8, %v3186_v28  ;;  %v2702_v6 = vadd.f32 %v2698_v58, %v2586_v11  ;;  %v2611_v20 = vadd.f32 %v14658_v1, %v2403_v47  ;;  %v14665_v58 = vld [vmem:[#allocation50_spill] sm:$0xff] }
 0x4ac   : > { %v3061_v10 = vadd.f32 %v3052_v57, %v2853_v19  ;;  %v3060_v12 = vadd.f32 %v3050_v29, %v2852_v27  ;;  %v3196_v17 = vstv %s10755_s29  ;;  %v2877_v9 = vadd.f32 %v14659_v45, %v2701_v22  ;;  %s11154_s29 = sld [smem:[#allocation10 + $0x9f]] }
 0x4ad   : > { %3521 = vrot.lane.b32.xlu0 %v3513_v63, %s14427_s0  ;;  %3501 = vrot.lane.b32.xlu1 %v3490_v4, %s14427_s0  ;;  %v2854_v13 = vadd.f32 %v14660_v54, %v10681_v42  ;;  %v2404_v38 = vadd.f32 %v14662_v60, %v14661_v16  ;;  %v2707_v46 = vmul.f32 %v14652_v59, %v10633_v18  ;;  %v14666_v4 = vld [vmem:[#allocation28_spill] sm:$0xff]  ;;  %v3206_v60 = vstv %s10806_s9  ;;  %s11188_s9 = sld [smem:[#allocation10 + $0xc3]] }
 0x4ae   : > { %v10811_v35 = vadd.f32 %v3189_v39, %v3061_v10  ;;  %v10813_v33 = vadd.f32 %v3188_v21, %v3060_v12  ;;  %v3515_v23 = vmul.f32 %v10750_v55, %v10368_v51  ;;  %v3514_v11 = vmul.f32 %v10421_v8, %v10750_v55  ;;  %v14667_v10 = vld [vmem:[#allocation35_spill] sm:$0xff] }
 0x4af   : > { %v3074_v40 = vpop.permute.xlu0 %3073  ;;  %v3054_v49 = vpop.permute.xlu1 %3053  ;;  %v3197_v27 = vmul.f32 %v10402_v15, %v3196_v17  ;;  %v3190_v22 = vmul.f32 %v3186_v28, %v10386_v61  ;;  %v2612_v19 = vadd.f32 %v14663_v30, %v2404_v38  ;;  %v2878_v7 = vadd.f32 %v14664_v48, %v2702_v6  ;;  %v14669_v38 = vld [vmem:[#allocation96_spill] sm:$0xff] }
 0x4b0   : > { %v3085_v25 = vadd.f32 %v3074_v40, %v2877_v9  ;;  %v3062_v42 = vadd.f32 %v3054_v49, %v2854_v13  ;;  %v2711_v47 = vadd.f32 %v2707_v46, %v2611_v20  ;;  %v2879_v57 = vadd.f32 %v14665_v58, %v10648_v56  ;;  %v14668_v13 = vld [vmem:[#allocation43_spill] sm:$0xff] }
 0x4b1   : > { %3525 = vrot.lane.b32.xlu0 %v3515_v23, %s14427_s0  ;;  %3523 = vrot.lane.b32.xlu1 %v3514_v11, %s14427_s0  ;;  %v2429_v28 = vadd.f32 %v14667_v10, %v14666_v4  ;;  %v2708_v12 = vmul.f32 %v14645_v31, %v10633_v18  ;;  %v3539_v6 = vmul.f32 %v10402_v15, %v10801_v24  ;;  %v3564_v18 = vstv %s10803_s30  ;;  %v14671_v11 = vld [vmem:[#allocation118_spill] sm:$0xff]  ;;  %s11167_s30 = sld [smem:[#allocation10 + $0x7d]] }
 0x4b2   : > { %v10831_v29 = vadd.f32 %v3197_v27, %v3085_v25  ;;  %v10833_v63 = vadd.f32 %v3190_v22, %v3062_v42  ;;  %v3516_v56 = vmul.f32 %v10750_v55, %v10386_v61  ;;  %v3199_v45 = vmul.f32 %v3196_v17, %v10368_v51  ;;  %v14670_v55 = vld [vmem:[#allocation53_spill] sm:$0xff]  ;;  %v14672_v25 = vld [vmem:[#allocation120_spill] sm:$0xff] }
 0x4b3   : > { %v3078_v39 = vpop.permute.xlu0 %3077  ;;  %v3076_v21 = vpop.permute.xlu1 %3075  ;;  %v3198_v9 = vmul.f32 %v10421_v8, %v3196_v17  ;;  %v2712_v54 = vadd.f32 %v2708_v12, %v2612_v19  ;;  %v2637_v16 = vadd.f32 %v14668_v13, %v2429_v28  ;;  %v2903_v46 = vadd.f32 %v14669_v38, %v2711_v47  ;;  %v14675_v12 = vld [vmem:[#allocation63_spill] sm:$0xff] }
 0x4b4   : > { %v3087_v1 = vadd.f32 %v3078_v39, %v2879_v57  ;;  %v3086_v20 = vadd.f32 %v3076_v21, %v2878_v7  ;;  %v2880_v40 = vadd.f32 %v14670_v55, %v10709_v5  ;;  %v2430_v42 = vadd.f32 %v14672_v25, %v14671_v11  ;;  %v14673_v57 = vld [vmem:[#allocation131_spill] sm:$0xff] }
 0x4b5   : > { %3547 = vrot.lane.b32.xlu0 %v3539_v6, %s14427_s0  ;;  %3527 = vrot.lane.b32.xlu1 %v3516_v56, %s14427_s0  ;;  %v2717_v27 = vmul.f32 %v14652_v59, %v10667_v26  ;;  %v3541_v19 = vmul.f32 %v10801_v24, %v10368_v51  ;;  %v3540_v48 = vmul.f32 %v10421_v8, %v10801_v24  ;;  %v14674_v59 = vld [vmem:[#allocation97_spill] sm:$0xff] }
 0x4b6   : > { %v10855_v49 = vadd.f32 %v3199_v45, %v3087_v1  ;;  %v10857_v23 = vadd.f32 %v3198_v9, %v3086_v20  ;;  %v3207_v47 = vmul.f32 %v10402_v15, %v3206_v60  ;;  %v3200_v58 = vmul.f32 %v3196_v17, %v10386_v61 }
 0x4b7   : > { %v3100_v22 = vpop.permute.xlu0 %3099  ;;  %v3080_v30 = vpop.permute.xlu1 %3079  ;;  %v2638_v4 = vadd.f32 %v14673_v57, %v2430_v42  ;;  %v2904_v10 = vadd.f32 %v14674_v59, %v2712_v54  ;;  %v2721_v28 = vadd.f32 %v2717_v27, %v2637_v16  ;;  %v2905_v39 = vadd.f32 %v14675_v12, %v10679_v37 }
 0x4b8   : > { %v3111_v5 = vadd.f32 %v3100_v22, %v2903_v46  ;;  %v3088_v7 = vadd.f32 %v3080_v30, %v2880_v40  ;;  %v2718_v17 = vmul.f32 %v14645_v31, %v10667_v26  ;;  %v3565_v20 = vmul.f32 %v10402_v15, %v3564_v18  ;;  %v14676_v31 = vld [vmem:[#allocation99_spill] sm:$0xff] }
 0x4b9   : > { %3551 = vrot.lane.b32.xlu0 %v3541_v19, %s14427_s0  ;;  %3549 = vrot.lane.b32.xlu1 %v3540_v48, %s14427_s0  ;;  %v3542_v45 = vmul.f32 %v10801_v24, %v10386_v61  ;;  %v3209_v13 = vmul.f32 %v3206_v60, %v10368_v51  ;;  %v3208_v37 = vmul.f32 %v10421_v8, %v3206_v60  ;;  %v3216_v26 = vstv %s10850_s7  ;;  %v14677_v46 = vld [vmem:[#allocation55_spill] sm:$0xff]  ;;  %s11201_s7 = sld [smem:[#allocation10 + $0xa1]] }
 0x4ba   : > { %v10877_v21 = vadd.f32 %v3207_v47, %v3111_v5  ;;  %v10879_v6 = vadd.f32 %v3200_v58, %v3088_v7  ;;  %v2722_v16 = vadd.f32 %v2718_v17, %v2638_v4  ;;  %v2929_v38 = vadd.f32 %v14676_v31, %v2721_v28  ;;  %v14680_v47 = vld [vmem:[#allocation100_spill] sm:$0xff] }
 0x4bb   : > { %v3104_v56 = vpop.permute.xlu0 %3103  ;;  %v3102_v1 = vpop.permute.xlu1 %3101  ;;  %v2906_v55 = vadd.f32 %v14677_v46, %v10726_v62  ;;  %v3567_v42 = vmul.f32 %v3564_v18, %v10368_v51  ;;  %v3566_v27 = vmul.f32 %v10421_v8, %v3564_v18  ;;  %v3590_v22 = vstv %s10867_s10  ;;  %v14679_v62 = vld [vmem:[#allocation107_spill] sm:$0xff]  ;;  %s11222_s10 = sld [smem:[#allocation10 + $0xe7]] }
 0x4bc   : > { %v3113_v9 = vadd.f32 %v3104_v56, %v2905_v39  ;;  %v3112_v54 = vadd.f32 %v3102_v1, %v2904_v10  ;;  %v3217_v48 = vmul.f32 %v10402_v15, %v3216_v26  ;;  %v3210_v5 = vmul.f32 %v3206_v60, %v10386_v61 }
 0x4bd   : > { %3573 = vrot.lane.b32.xlu0 %v3565_v20, %s14427_s0  ;;  %3553 = vrot.lane.b32.xlu1 %v3542_v45, %s14427_s0  ;;  %v2931_v7 = vadd.f32 %v14679_v62, %v10707_v0  ;;  %v2930_v58 = vadd.f32 %v14680_v47, %v2722_v16  ;;  %v3591_v28 = vmul.f32 %v10402_v15, %v3590_v22  ;;  %v14683_v0 = vld [vmem:[#allocation69_spill] sm:$0xff]  ;;  %v3616_v16 = vstv %s7503_s27  ;;  %s11235_s27 = sld [smem:[#allocation10 + $0xc5]] }
 0x4be   : > { %v10894_v40 = vadd.f32 %v3209_v13, %v3113_v9  ;;  %v10896_v24 = vadd.f32 %v3208_v37, %v3112_v54  ;;  %v3568_v12 = vmul.f32 %v3564_v18, %v10386_v61  ;;  %v3219_v17 = vmul.f32 %v3216_v26, %v10368_v51  ;;  %v10958_v62 = vld [vmem:[#allocation2 + $0x32] sm:$0xff] }
 0x4bf   : > { %v3126_v11 = vpop.permute.xlu0 %3125  ;;  %v3106_v25 = vpop.permute.xlu1 %3105  ;;  %v3218_v56 = vmul.f32 %v10421_v8, %v3216_v26  ;;  %v2932_v1 = vadd.f32 %v14683_v0, %v10757_v53  ;;  %v3593_v54 = vmul.f32 %v3590_v22, %v10368_v51  ;;  %v3592_v13 = vmul.f32 %v10421_v8, %v3590_v22 }
 0x4c0   : > { %14678 = vst [vmem:[#allocation60_spill] sm:$0xff] %v10896_v24  ;;  %v3137_v30 = vadd.f32 %v3126_v11, %v2929_v38  ;;  %v3114_v19 = vadd.f32 %v3106_v25, %v2906_v55  ;;  %v3220_v31 = vmul.f32 %v3216_v26, %v10386_v61  ;;  %v3617_v55 = vmul.f32 %v10402_v15, %v3616_v16 }
 0x4c1   : > { %3577 = vrot.lane.b32.xlu0 %v3567_v42, %s14427_s0  ;;  %3575 = vrot.lane.b32.xlu1 %v3566_v27, %s14427_s0  ;;  %v3594_v11 = vmul.f32 %v3590_v22, %v10386_v61  ;;  %v3619_v42 = vmul.f32 %v3616_v16, %v10368_v51  ;;  %v3618_v27 = vmul.f32 %v10421_v8, %v3616_v16 }
 0x4c2   : > { %v10908_v57 = vadd.f32 %v3217_v48, %v3137_v30  ;;  %v10910_v4 = vadd.f32 %v3210_v5, %v3114_v19  ;;  %v10947_v30 = vld [vmem:[#allocation2 + $0x2a] sm:$0xff]  ;;  %v3726_v19 = vstv %s7512_s28  ;;  %v3620_v8 = vmul.f32 %v3616_v16, %v10386_v61  ;;  %s11256_s28 = sld [smem:[#allocation10 + $0x10b]] }
 0x4c3   : > { %v3130_v59 = vpop.permute.xlu0 %3129  ;;  %v3128_v10 = vpop.permute.xlu1 %3127  ;;  %v3727_v51 = vmul.f32 %v3726_v19, %v10947_v30  ;;  %v3728_v61 = vmul.f32 %v3726_v19, %v10958_v62 }
 0x4c4   : > { %14681 = vst [vmem:[#allocation72_spill] sm:$0xff] %v10908_v57  ;;  %14682 = vst [vmem:[#allocation73_spill] sm:$0xff] %v10910_v4  ;;  %v3139_v60 = vadd.f32 %v3130_v59, %v2931_v7  ;;  %v3138_v39 = vadd.f32 %v3128_v10, %v2930_v58  ;;  %v10960_v7 = vld [vmem:[#allocation2 + $0x3a] sm:$0xff]  ;;  %v3908_v57 = vstv %s7519_s12  ;;  %s7541_s12 = sld [smem:[#allocation10 + $0xc7]] }
 0x4c5   : > { %3599 = vrot.lane.b32.xlu0 %v3591_v28, %s14427_s0  ;;  %3579 = vrot.lane.b32.xlu1 %v3568_v12, %s14427_s0  ;;  %v3729_v28 = vmul.f32 %v3726_v19, %v10960_v7  ;;  %v10971_v12 = vld [vmem:[#allocation2 + $0x42] sm:$0xff]  ;;  %v3909_v24 = vmul.f32 %v3908_v57, %v10947_v30 }
 0x4c6   : > { %v10920_v20 = vadd.f32 %v3219_v17, %v3139_v60  ;;  %v10922_v45 = vadd.f32 %v3218_v56, %v3138_v39  ;;  %v3752_v60 = vstv %s7513_s1  ;;  %s7526_s1 = sld [smem:[#allocation10 + $0xe9]] }
 0x4c7   : > { %v10924_v9 = vpop.permute.xlu0 %3235  ;;  %v3132_v18 = vpop.permute.xlu1 %3131 }
 0x4c8   : > { %14684 = vst [vmem:[#allocation59_spill] sm:$0xff] %v10920_v20  ;;  %14685 = vst [vmem:[#allocation62_spill] sm:$0xff] %v10922_v45  ;;  %v3140_v37 = vadd.f32 %v3132_v18, %v2932_v1  ;;  %v3753_v1 = vmul.f32 %v3752_v60, %v10947_v30  ;;  %v3730_v18 = vmul.f32 %v3726_v19, %v10971_v12  ;;  %v3646_v20 = vstv %s7504_s8  ;;  %s7540_s8 = sld [smem:[#allocation10 + $0xa3]] }
 0x4c9   : > { %3603 = vrot.lane.b32.xlu0 %v3593_v54, %s14427_s0  ;;  %3601 = vrot.lane.b32.xlu1 %v3592_v13, %s14427_s0 }
 0x4ca   : > { %v10931_v53 = vadd.f32 %v3220_v31, %v3140_v37  ;;  %v3755_v31 = vmul.f32 %v3752_v60, %v10960_v7 }
 0x4cb   : > { %v10933_v38 = vpop.permute.xlu0 %3239  ;;  %v10935_v46 = vpop.permute.xlu1 %3237 }
 0x4cc   : > { %14686 = vst [vmem:[#allocation74_spill] sm:$0xff] %v10931_v53  ;;  %v3882_v53 = vstv %s7518_s20  ;;  %s7539_s20 = sld [smem:[#allocation10 + $0x7f]] }
 0x4cd   : > { %3625 = vrot.lane.b32.xlu0 %v3617_v55, %s14427_s0  ;;  %3605 = vrot.lane.b32.xlu1 %v3594_v11, %s14427_s0  ;;  %v3754_v55 = vmul.f32 %v3752_v60, %v10958_v62  ;;  %v3778_v11 = vstv %s7514_s2  ;;  %s7527_s2 = sld [smem:[#allocation10 + $0x10d]] }
 0x4ce   : > { %v904_v15 = vpop.f32.mrb[14].mxu1 }
 0x4cf   : > { %v10941_v25 = vpop.permute.xlu0 %3261  ;;  %v10943_v26 = vpop.permute.xlu1 %3241  ;;  %929 = vst.msk [vmem:[#allocation2 + $0x50] sm:$0xff] %vm545_vm10, %v904_v15 }
 0x4d0   : > { %v7816_v22 = vpop.f32.mrb[15].mxu1 }
 0x4d1   : > { %3629 = vrot.lane.b32.xlu0 %v3619_v42, %s14427_s0  ;;  %3627 = vrot.lane.b32.xlu1 %v3618_v27, %s14427_s0  ;;  %v3779_v22 = vmul.f32 %v3778_v11, %v10947_v30 }
 0x4d2   : > { %v909_v47 = vpop.f32.mrb[16].mxu1 }
 0x4d3   : > { %v10952_v48 = vpop.permute.xlu0 %3265  ;;  %v10954_v5 = vpop.permute.xlu1 %3263  ;;  %930 = vst.msk [vmem:[#allocation2 + $0x58] sm:$0xff] %vm545_vm10, %v909_v47 }
 0x4d4   : > { %v7819_v58 = vpop.f32.mrb[17].mxu1 }
 0x4d5   : > { %3735 = vrot.lane.b32.xlu0 %v3727_v51, %s14418_s6  ;;  %3631 = vrot.lane.b32.xlu1 %v3620_v8, %s14427_s0  ;;  %v3756_v51 = vmul.f32 %v3752_v60, %v10971_v12  ;;  %v3781_v58 = vmul.f32 %v3778_v11, %v10960_v7 }
 0x4d6   : > { %v914_v39 = vpop.f32.mrb[18].mxu1 }
 0x4d7   : > { %v10965_v59 = vpop.permute.xlu0 %3287  ;;  %v10967_v10 = vpop.permute.xlu1 %3267  ;;  %931 = vst.msk [vmem:[#allocation2 + $0x60] sm:$0xff] %vm545_vm10, %v914_v39 }
 0x4d8   : > { %v7822_v17 = vpop.f32.mrb[19].mxu1 }
 0x4d9   : > { %3739 = vrot.lane.b32.xlu0 %v3729_v28, %s14418_s6  ;;  %3737 = vrot.lane.b32.xlu1 %v3728_v61, %s14418_s6  ;;  %v3780_v28 = vmul.f32 %v3778_v11, %v10958_v62  ;;  %v3804_v61 = vstv %s7515_s3  ;;  %s7536_s3 = sld [smem:[#allocation10 + $0x13]] }
 0x4da   : > { %v919_v54 = vpop.f32.mrb[20].mxu1  ;;  %v3805_v17 = vmul.f32 %v3804_v61, %v10947_v30 }
 0x4db   : > { %v10976_v56 = vpop.permute.xlu0 %3291  ;;  %v10978_v0 = vpop.permute.xlu1 %3289  ;;  %932 = vst.msk [vmem:[#allocation2 + $0x68] sm:$0xff] %vm545_vm10, %v919_v54 }
 0x4dc   : > { %v7825_v13 = vpop.f32.mrb[21].mxu1 }
 0x4dd   : > { %3761 = vrot.lane.b32.xlu0 %v3753_v1, %s14418_s6  ;;  %3741 = vrot.lane.b32.xlu1 %v3730_v18, %s14418_s6  ;;  %v3782_v1 = vmul.f32 %v3778_v11, %v10971_v12  ;;  %v3807_v13 = vmul.f32 %v3804_v61, %v10960_v7 }
 0x4de   : > { %v924_v42 = vpop.f32.mrb[22].mxu1 }
 0x4df   : > { %v10985_v37 = vpop.permute.xlu0 %3313  ;;  %v10987_v16 = vpop.permute.xlu1 %3293  ;;  %933 = vst.msk [vmem:[#allocation2 + $0x70] sm:$0x3] %vm550_vm11, %v924_v42 }
 0x4e0   : > { %v7828_v27 = vpop.f32.mrb[23].mxu1 }
 0x4e1   : > { %3765 = vrot.lane.b32.xlu0 %v3755_v31, %s14418_s6  ;;  %3763 = vrot.lane.b32.xlu1 %v3754_v55, %s14418_s6  ;;  %v3806_v31 = vmul.f32 %v3804_v61, %v10958_v62  ;;  %v3830_v55 = vstv %s7516_s4  ;;  %s7537_s4 = sld [smem:[#allocation10 + $0x37]] }
 0x4e2   : > { %v3831_v27 = vmul.f32 %v3830_v55, %v10947_v30 }
 0x4e3   : > { %v10994_v19 = vpop.permute.xlu0 %3317  ;;  %v10996_v15 = vpop.permute.xlu1 %3315 }
 0x4e5   : > { %3787 = vrot.lane.b32.xlu0 %v3779_v22, %s14418_s6  ;;  %3767 = vrot.lane.b32.xlu1 %v3756_v51, %s14418_s6  ;;  %v3808_v22 = vmul.f32 %v3804_v61, %v10971_v12 }
 0x4e7   : > { %v11002_v8 = vpop.permute.xlu0 %3339  ;;  %v11004_v47 = vpop.permute.xlu1 %3319 }
 0x4e9   : > { %3791 = vrot.lane.b32.xlu0 %v3781_v58, %s14418_s6  ;;  %3789 = vrot.lane.b32.xlu1 %v3780_v28, %s14418_s6  ;;  %v3833_v28 = vmul.f32 %v3830_v55, %v10960_v7 }
 0x4eb   : > { %v11010_v39 = vpop.permute.xlu0 %3343  ;;  %v11012_v60 = vpop.permute.xlu1 %3341 }
 0x4ed   : > { %3813 = vrot.lane.b32.xlu0 %v3805_v17, %s14418_s6  ;;  %3793 = vrot.lane.b32.xlu1 %v3782_v1, %s14418_s6  ;;  %v3832_v17 = vmul.f32 %v3830_v55, %v10958_v62  ;;  %v3856_v1 = vstv %s7517_s19  ;;  %s7538_s19 = sld [smem:[#allocation10 + $0x5b]] }
 0x4ee   : > { %v3860_v45 = vmul.f32 %v3856_v1, %v10971_v12 }
 0x4ef   : > { %v11018_v18 = vpop.permute.xlu0 %3365  ;;  %v11020_v54 = vpop.permute.xlu1 %3345 }
 0x4f1   : > { %3817 = vrot.lane.b32.xlu0 %v3807_v13, %s14418_s6  ;;  %3815 = vrot.lane.b32.xlu1 %v3806_v31, %s14418_s6  ;;  %v3857_v31 = vmul.f32 %v3856_v1, %v10947_v30 }
 0x4f3   : > { %v11026_v42 = vpop.permute.xlu0 %3369  ;;  %v11028_v11 = vpop.permute.xlu1 %3367 }
 0x4f5   : > { %3839 = vrot.lane.b32.xlu0 %v3831_v27, %s14418_s6  ;;  %3819 = vrot.lane.b32.xlu1 %v3808_v22, %s14418_s6  ;;  %v3834_v27 = vmul.f32 %v3830_v55, %v10971_v12 }
 0x4f7   : > { %v11034_v51 = vpop.permute.xlu0 %3391  ;;  %v11036_v58 = vpop.permute.xlu1 %3371 }
 0x4f9   : > { %3843 = vrot.lane.b32.xlu0 %v3833_v28, %s14418_s6  ;;  %3841 = vrot.lane.b32.xlu1 %v3832_v17, %s14418_s6  ;;  %v3859_v28 = vmul.f32 %v3856_v1, %v10960_v7  ;;  %v3858_v17 = vmul.f32 %v3856_v1, %v10958_v62  ;;  %v3647_v1 = vmul.f32 %v3646_v20, %v10947_v30 }
 0x4fb   : > { %v11042_v13 = vpop.permute.xlu0 %3395  ;;  %v11044_v61 = vpop.permute.xlu1 %3393 }
 0x4fc   : > { %14687 = vst [vmem:[#allocation75_spill] sm:$0xff] %v11042_v13  ;;  %14688 = vst [vmem:[#allocation61_spill] sm:$0xff] %v11044_v61 }
 0x4fd   : > { %3865 = vrot.lane.b32.xlu0 %v3857_v31, %s14418_s6  ;;  %3845 = vrot.lane.b32.xlu1 %v3834_v27, %s14418_s6  ;;  %v3883_v27 = vmul.f32 %v3882_v53, %v10947_v30 }
 0x4ff   : > { %v11050_v22 = vpop.permute.xlu0 %3417  ;;  %v11052_v50 = vpop.permute.xlu1 %3397 }
 0x500   : > { %14689 = vst [vmem:[#allocation64_spill] sm:$0xff] %v11050_v22  ;;  %14690 = vst [vmem:[#allocation76_spill] sm:$0xff] %v11052_v50  ;;  %v14693_v50 = vld [vmem:[#allocation39_spill] sm:$0xff] }
 0x501   : > { %3869 = vrot.lane.b32.xlu0 %v3859_v28, %s14418_s6  ;;  %3867 = vrot.lane.b32.xlu1 %v3858_v17, %s14418_s6  ;;  %v3247_v4 = vadd.f32 %v10924_v9, %v14693_v50  ;;  %v3885_v17 = vmul.f32 %v3882_v53, %v10960_v7  ;;  %v14695_v50 = vld [vmem:[#allocation123_spill] sm:$0xff] }
 0x502   : > { %v3248_v9 = vadd.f32 %v10935_v46, %v14695_v50  ;;  %v3934_v50 = vstv %s7520_s13  ;;  %s7543_s13 = sld [smem:[#allocation10 + $0x10f]] }
 0x503   : > { %v11058_v55 = vpop.permute.xlu0 %3421  ;;  %v11060_v31 = vpop.permute.xlu1 %3419 }
 0x504   : > { %14691 = vst [vmem:[#allocation77_spill] sm:$0xff] %v11058_v55  ;;  %14692 = vst [vmem:[#allocation66_spill] sm:$0xff] %v11060_v31  ;;  %v3884_v31 = vmul.f32 %v3882_v53, %v10958_v62 }
 0x505   : > { %3891 = vrot.lane.b32.xlu0 %v3883_v27, %s14418_s6  ;;  %3871 = vrot.lane.b32.xlu1 %v3860_v45, %s14418_s6  ;;  %v3249_v45 = vadd.f32 %v10933_v38, %v10545_v3  ;;  %v3656_v3 = vstv %s7505_s23  ;;  %v14696_v38 = vld [vmem:[#allocation125_spill] sm:$0xff]  ;;  %s7542_s23 = sld [smem:[#allocation10 + $0xeb]] }
 0x506   : > { %v3273_v46 = vadd.f32 %v10941_v25, %v14696_v38  ;;  %v3657_v25 = vmul.f32 %v3656_v3, %v10947_v30  ;;  %v3650_v38 = vmul.f32 %v3646_v20, %v10971_v12 }
 0x507   : > { %v3444_v28 = vpop.permute.xlu0 %3443  ;;  %v11068_v22 = vpop.permute.xlu1 %3423 }
 0x508   : > { %14694 = vst [vmem:[#allocation67_spill] sm:$0xff] %v11068_v22  ;;  %v3455_v55 = vadd.f32 %v3444_v28, %v3247_v4  ;;  %v3886_v4 = vmul.f32 %v3882_v53, %v10971_v12 }
 0x509   : > { %3895 = vrot.lane.b32.xlu0 %v3885_v17, %s14418_s6  ;;  %3893 = vrot.lane.b32.xlu1 %v3884_v31, %s14418_s6  ;;  %v3649_v17 = vmul.f32 %v3646_v20, %v10960_v7  ;;  %v3648_v31 = vmul.f32 %v3646_v20, %v10958_v62  ;;  %v3912_v20 = vmul.f32 %v3908_v57, %v10971_v12 }
 0x50a   : > { %v11079_v27 = vadd.f32 %v3647_v1, %v3455_v55  ;;  %v3250_v55 = vadd.f32 %v10943_v26, %v10608_v44  ;;  %v3275_v44 = vadd.f32 %v10952_v48, %v10582_v34  ;;  %v14697_v26 = vld [vmem:[#allocation126_spill] sm:$0xff]  ;;  %v3658_v34 = vmul.f32 %v3656_v3, %v10958_v62 }
 0x50b   : > { %v3448_v22 = vpop.permute.xlu0 %3447  ;;  %v3446_v61 = vpop.permute.xlu1 %3445  ;;  %v3666_v48 = vstv %s11087_s16  ;;  %s7528_s16 = sld [smem:[#allocation10 + $0x12]] }
 0x50c   : > { %v3457_v28 = vadd.f32 %v3448_v22, %v3249_v45  ;;  %v3456_v13 = vadd.f32 %v3446_v61, %v3248_v9  ;;  %v3911_v45 = vmul.f32 %v3908_v57, %v10960_v7 }
 0x50d   : > { %3917 = vrot.lane.b32.xlu0 %v3909_v24, %s14418_s6  ;;  %3897 = vrot.lane.b32.xlu1 %v3886_v4, %s14418_s6  ;;  %v3910_v24 = vmul.f32 %v3908_v57, %v10958_v62  ;;  %v3276_v57 = vadd.f32 %v10967_v10, %v10640_v32  ;;  %v3301_v32 = vadd.f32 %v10976_v56, %v10610_v52  ;;  %v14699_v10 = vld [vmem:[#allocation127_spill] sm:$0xff]  ;;  %v3676_v56 = vstv %s11120_s24  ;;  %s7529_s24 = sld [smem:[#allocation10 + $0x36]] }
 0x50e   : > { %v11093_v53 = vadd.f32 %v3649_v17, %v3457_v28  ;;  %v11095_v61 = vadd.f32 %v3648_v31, %v3456_v13  ;;  %v3274_v13 = vadd.f32 %v10954_v5, %v14697_v26  ;;  %v14698_v5 = vld [vmem:[#allocation41_spill] sm:$0xff]  ;;  %v3936_v26 = vmul.f32 %v3934_v50, %v10958_v62 }
 0x50f   : > { %v3470_v22 = vpop.permute.xlu0 %3469  ;;  %v3450_v1 = vpop.permute.xlu1 %3449  ;;  %v3668_v52 = vmul.f32 %v3666_v48, %v10958_v62 }
 0x510   : > { %v3481_v9 = vadd.f32 %v3470_v22, %v3273_v46  ;;  %v3458_v4 = vadd.f32 %v3450_v1, %v3250_v55  ;;  %v3935_v55 = vmul.f32 %v3934_v50, %v10947_v30 }
 0x511   : > { %3921 = vrot.lane.b32.xlu0 %v3911_v45, %s14418_s6  ;;  %3919 = vrot.lane.b32.xlu1 %v3910_v24, %s14418_s6  ;;  %v3659_v45 = vmul.f32 %v3656_v3, %v10960_v7  ;;  %v3299_v24 = vadd.f32 %v10965_v59, %v14698_v5  ;;  %v3667_v59 = vmul.f32 %v3666_v48, %v10947_v30 }
 0x512   : > { %v11109_v28 = vadd.f32 %v3657_v25, %v3481_v9  ;;  %v11111_v17 = vadd.f32 %v3650_v38, %v3458_v4 }
 0x513   : > { %v3474_v31 = vpop.permute.xlu0 %3473  ;;  %v3472_v46 = vpop.permute.xlu1 %3471 }
 0x514   : > { %v3483_v22 = vadd.f32 %v3474_v31, %v3275_v44  ;;  %v3482_v1 = vadd.f32 %v3472_v46, %v3274_v13  ;;  %v3937_v44 = vmul.f32 %v3934_v50, %v10960_v7  ;;  %v3960_v13 = vstv %s11099_s11  ;;  %s7544_s11 = sld [smem:[#allocation10 + $0x14]] }
 0x515   : > { %3943 = vrot.lane.b32.xlu0 %v3935_v55, %s14427_s0  ;;  %3923 = vrot.lane.b32.xlu1 %v3912_v20, %s14418_s6  ;;  %v3660_v55 = vmul.f32 %v3656_v3, %v10971_v12  ;;  %v3300_v20 = vadd.f32 %v10978_v0, %v14699_v10  ;;  %v3961_v5 = vmul.f32 %v3960_v13, %v10947_v30 }
 0x516   : > { %v11126_v9 = vadd.f32 %v3659_v45, %v3483_v22  ;;  %v11128_v4 = vadd.f32 %v3658_v34, %v3482_v1  ;;  %v3938_v3 = vmul.f32 %v3934_v50, %v10971_v12  ;;  %v3325_v0 = vadd.f32 %v10985_v37, %v10730_v36 }
 0x517   : > { %v3496_v25 = vpop.permute.xlu0 %3495  ;;  %v3476_v38 = vpop.permute.xlu1 %3475  ;;  %v3302_v50 = vadd.f32 %v10987_v16, %v10673_v41  ;;  %v3677_v36 = vmul.f32 %v3676_v56, %v10947_v30  ;;  %v3670_v37 = vmul.f32 %v3666_v48, %v10971_v12  ;;  %v3327_v41 = vadd.f32 %v10994_v19, %v10762_v2  ;;  %v14700_v16 = vld [vmem:[#allocation45_spill] sm:$0xff] }
 0x518   : > { %v3507_v31 = vadd.f32 %v3496_v25, %v3299_v24  ;;  %v3484_v46 = vadd.f32 %v3476_v38, %v3276_v57  ;;  %v3669_v25 = vmul.f32 %v3666_v48, %v10960_v7  ;;  %v3964_v48 = vmul.f32 %v3960_v13, %v10971_v12 }
 0x519   : > { %3947 = vrot.lane.b32.xlu0 %v3937_v44, %s14427_s0  ;;  %3945 = vrot.lane.b32.xlu1 %v3936_v26, %s14427_s0  ;;  %v3678_v2 = vmul.f32 %v3676_v56, %v10958_v62  ;;  %v3686_v19 = vstv %s11154_s29  ;;  %s7530_s29 = sld [smem:[#allocation10 + $0x5a]] }
 0x51a   : > { %v11143_v22 = vadd.f32 %v3667_v59, %v3507_v31  ;;  %v11145_v1 = vadd.f32 %v3660_v55, %v3484_v46  ;;  %v3963_v46 = vmul.f32 %v3960_v13, %v10960_v7  ;;  %v3962_v59 = vmul.f32 %v3960_v13, %v10958_v62 }
 0x51b   : > { %v3500_v45 = vpop.permute.xlu0 %3499  ;;  %v3498_v34 = vpop.permute.xlu1 %3497  ;;  %v3986_v55 = vstv %s11133_s26  ;;  %v3328_v13 = vadd.f32 %v11004_v47, %v10785_v43  ;;  %v3353_v43 = vadd.f32 %v11010_v39, %v10811_v35  ;;  %v3352_v47 = vadd.f32 %v11012_v60, %v10813_v33  ;;  %s7545_s26 = sld [smem:[#allocation10 + $0x38]] }
 0x51c   : > { %v3509_v24 = vadd.f32 %v3500_v45, %v3301_v32  ;;  %v3508_v57 = vadd.f32 %v3498_v34, %v3300_v20  ;;  %v3326_v20 = vadd.f32 %v10996_v15, %v14700_v16  ;;  %v3351_v15 = vadd.f32 %v11002_v8, %v10783_v14 }
 0x51d   : > { %3969 = vrot.lane.b32.xlu0 %v3961_v5, %s14427_s0  ;;  %3949 = vrot.lane.b32.xlu1 %v3938_v3, %s14427_s0  ;;  %v3687_v14 = vmul.f32 %v3686_v19, %v10947_v30  ;;  %v3680_v8 = vmul.f32 %v3676_v56, %v10971_v12  ;;  %v3688_v35 = vmul.f32 %v3686_v19, %v10958_v62  ;;  %v3696_v33 = vstv %s11188_s9  ;;  %s7531_s9 = sld [smem:[#allocation10 + $0x7e]] }
 0x51e   : > { %v11160_v38 = vadd.f32 %v3669_v25, %v3509_v24  ;;  %v11162_v44 = vadd.f32 %v3668_v52, %v3508_v57  ;;  %v3987_v24 = vmul.f32 %v3986_v55, %v10947_v30  ;;  %v3679_v52 = vmul.f32 %v3676_v56, %v10960_v7 }
 0x51f   : > { %v3522_v26 = vpop.permute.xlu0 %3521  ;;  %v3502_v31 = vpop.permute.xlu1 %3501  ;;  %v3990_v56 = vmul.f32 %v3986_v55, %v10971_v12  ;;  %v3377_v39 = vadd.f32 %v11018_v18, %v10831_v29  ;;  %v3354_v60 = vadd.f32 %v11020_v54, %v10833_v63  ;;  %v3697_v29 = vmul.f32 %v3696_v33, %v10947_v30 }
 0x520   : > { %v3533_v32 = vadd.f32 %v3522_v26, %v3325_v0  ;;  %v3510_v10 = vadd.f32 %v3502_v31, %v3302_v50  ;;  %v3690_v18 = vmul.f32 %v3686_v19, %v10971_v12  ;;  %v3379_v63 = vadd.f32 %v11026_v42, %v10855_v49 }
 0x521   : > { %3973 = vrot.lane.b32.xlu0 %v3963_v46, %s14427_s0  ;;  %3971 = vrot.lane.b32.xlu1 %v3962_v59, %s14427_s0  ;;  %v3989_v46 = vmul.f32 %v3986_v55, %v10960_v7  ;;  %v3988_v59 = vmul.f32 %v3986_v55, %v10958_v62  ;;  %v3378_v54 = vadd.f32 %v11028_v11, %v10857_v23  ;;  %v3706_v23 = vstv %s11222_s10  ;;  %s7532_s10 = sld [smem:[#allocation10 + $0xa2]] }
 0x522   : > { %v11177_v45 = vadd.f32 %v3677_v36, %v3533_v32  ;;  %v11179_v34 = vadd.f32 %v3670_v37, %v3510_v10  ;;  %v4012_v32 = vstv %s11167_s30  ;;  %v3698_v49 = vmul.f32 %v3696_v33, %v10958_v62  ;;  %s7546_s30 = sld [smem:[#allocation10 + $0x5c]] }
 0x523   : > { %v3526_v5 = vpop.permute.xlu0 %3525  ;;  %v3524_v3 = vpop.permute.xlu1 %3523  ;;  %v3403_v42 = vadd.f32 %v11034_v51, %v10877_v21  ;;  %v3380_v11 = vadd.f32 %v11036_v58, %v10879_v6  ;;  %v3700_v21 = vmul.f32 %v3696_v33, %v10971_v12  ;;  %v14709_v6 = vld [vmem:[#allocation75_spill] sm:$0xff]  ;;  %v14710_v58 = vld [vmem:[#allocation60_spill] sm:$0xff] }
 0x524   : > { %v3535_v57 = vadd.f32 %v3526_v5, %v3327_v41  ;;  %v3534_v25 = vadd.f32 %v3524_v3, %v3326_v20  ;;  %v4013_v5 = vmul.f32 %v4012_v32, %v10947_v30  ;;  %v3405_v51 = vadd.f32 %v14709_v6, %v10894_v40 }
 0x525   : > { %3995 = vrot.lane.b32.xlu0 %v3987_v24, %s14427_s0  ;;  %3975 = vrot.lane.b32.xlu1 %v3964_v48, %s14427_s0  ;;  %v3689_v48 = vmul.f32 %v3686_v19, %v10960_v7  ;;  %v4016_v19 = vmul.f32 %v4012_v32, %v10971_v12  ;;  %v3716_v40 = vstv %s11256_s28  ;;  %s7533_s28 = sld [smem:[#allocation10 + $0xc6]] }
 0x526   : > { %v11194_v0 = vadd.f32 %v3679_v52, %v3535_v57  ;;  %v11196_v50 = vadd.f32 %v3678_v2, %v3534_v25  ;;  %v4015_v2 = vmul.f32 %v4012_v32, %v10960_v7 }
 0x527   : > { %v3548_v26 = vpop.permute.xlu0 %3547  ;;  %v3528_v31 = vpop.permute.xlu1 %3527 }
 0x528   : > { %14701 = vst [vmem:[#allocation78_spill] sm:$0xff] %v11194_v0  ;;  %14702 = vst [vmem:[#allocation79_spill] sm:$0xff] %v11196_v50  ;;  %v3559_v10 = vadd.f32 %v3548_v26, %v3351_v15  ;;  %v3536_v36 = vadd.f32 %v3528_v31, %v3328_v13  ;;  %v4014_v15 = vmul.f32 %v4012_v32, %v10958_v62  ;;  %v4038_v13 = vstv %s11201_s7  ;;  %s7547_s7 = sld [smem:[#allocation10 + $0x80]] }
 0x529   : > { %3999 = vrot.lane.b32.xlu0 %v3989_v46, %s14427_s0  ;;  %3997 = vrot.lane.b32.xlu1 %v3988_v59, %s14427_s0 }
 0x52a   : > { %v11211_v37 = vadd.f32 %v3687_v14, %v3559_v10  ;;  %v11213_v41 = vadd.f32 %v3680_v8, %v3536_v36  ;;  %v4039_v14 = vmul.f32 %v4038_v13, %v10947_v30 }
 0x52b   : > { %v3552_v16 = vpop.permute.xlu0 %3551  ;;  %v3550_v20 = vpop.permute.xlu1 %3549 }
 0x52c   : > { %14703 = vst [vmem:[#allocation68_spill] sm:$0xff] %v11211_v37  ;;  %v3561_v3 = vadd.f32 %v3552_v16, %v3353_v43  ;;  %v3560_v24 = vadd.f32 %v3550_v20, %v3352_v47  ;;  %v3699_v47 = vmul.f32 %v3696_v33, %v10960_v7  ;;  %v4042_v33 = vmul.f32 %v4038_v13, %v10971_v12 }
 0x52d   : > { %4021 = vrot.lane.b32.xlu0 %v4013_v5, %s14427_s0  ;;  %4001 = vrot.lane.b32.xlu1 %v3990_v56, %s14427_s0  ;;  %v4041_v56 = vmul.f32 %v4038_v13, %v10960_v7 }
 0x52e   : > { %v11228_v55 = vadd.f32 %v3689_v48, %v3561_v3  ;;  %v11230_v57 = vadd.f32 %v3688_v35, %v3560_v24  ;;  %v4040_v3 = vmul.f32 %v4038_v13, %v10958_v62  ;;  %v4064_v24 = vstv %s11235_s27  ;;  %s7548_s27 = sld [smem:[#allocation10 + $0xa4]] }
 0x52f   : > { %v3574_v25 = vpop.permute.xlu0 %3573  ;;  %v3554_v52 = vpop.permute.xlu1 %3553 }
 0x530   : > { %14704 = vst [vmem:[#allocation80_spill] sm:$0xff] %v11228_v55  ;;  %14705 = vst [vmem:[#allocation81_spill] sm:$0xff] %v11230_v57  ;;  %v3585_v26 = vadd.f32 %v3574_v25, %v3377_v39  ;;  %v3562_v31 = vadd.f32 %v3554_v52, %v3354_v60  ;;  %v3707_v39 = vmul.f32 %v3706_v23, %v10947_v30  ;;  %v14711_v60 = vld [vmem:[#allocation61_spill] sm:$0xff]  ;;  %v4460_v55 = vstv %s7545_s26  ;;  %s11791_s26 = sld [smem:[#allocation10 + $0x112]] }
 0x531   : > { %4025 = vrot.lane.b32.xlu0 %v4015_v2, %s14427_s0  ;;  %4023 = vrot.lane.b32.xlu1 %v4014_v15, %s14427_s0  ;;  %v3404_v25 = vadd.f32 %v14711_v60, %v14710_v58  ;;  %v14722_v58 = vld [vmem:[#allocation66_spill] sm:$0xff] }
 0x532   : > { %v11245_v46 = vadd.f32 %v3697_v29, %v3585_v26  ;;  %v11247_v59 = vadd.f32 %v3690_v18, %v3562_v31  ;;  %v4065_v31 = vmul.f32 %v4064_v24, %v10947_v30 }
 0x533   : > { %v3578_v10 = vpop.permute.xlu0 %3577  ;;  %v3576_v36 = vpop.permute.xlu1 %3575 }
 0x534   : > { %14706 = vst [vmem:[#allocation83_spill] sm:$0xff] %v11245_v46  ;;  %v3587_v8 = vadd.f32 %v3578_v10, %v3379_v63  ;;  %v3586_v43 = vadd.f32 %v3576_v36, %v3378_v54  ;;  %v3709_v63 = vmul.f32 %v3706_v23, %v10960_v7  ;;  %v3708_v54 = vmul.f32 %v3706_v23, %v10958_v62  ;;  %v14713_v10 = vld [vmem:[#allocation72_spill] sm:$0xff] }
 0x535   : > { %4047 = vrot.lane.b32.xlu0 %v4039_v14, %s14427_s0  ;;  %4027 = vrot.lane.b32.xlu1 %v4016_v19, %s14427_s0  ;;  %v14714_v36 = vld [vmem:[#allocation64_spill] sm:$0xff]  ;;  %v14715_v19 = vld [vmem:[#allocation73_spill] sm:$0xff]  ;;  %v11497_v46 = vstv %s7528_s16  ;;  %s7565_s16 = sld [smem:[#allocation10 + $0xca]] }
 0x536   : > { %v11262_v32 = vadd.f32 %v3699_v47, %v3587_v8  ;;  %v11264_v16 = vadd.f32 %v3698_v49, %v3586_v43  ;;  %v3429_v14 = vadd.f32 %v14714_v36, %v14713_v10  ;;  %v14716_v8 = vld [vmem:[#allocation76_spill] sm:$0xff]  ;;  %v14724_v10 = vld [vmem:[#allocation74_spill] sm:$0xff]  ;;  %v14725_v36 = vld [vmem:[#allocation67_spill] sm:$0xff] }
 0x537   : > { %v3600_v20 = vpop.permute.xlu0 %3599  ;;  %v3580_v5 = vpop.permute.xlu1 %3579  ;;  %v3406_v43 = vadd.f32 %v14716_v8, %v14715_v19 }
 0x538   : > { %14707 = vst [vmem:[#allocation82_spill] sm:$0xff] %v11262_v32  ;;  %14708 = vst [vmem:[#allocation84_spill] sm:$0xff] %v11264_v16  ;;  %v3611_v48 = vadd.f32 %v3600_v20, %v3403_v42  ;;  %v3588_v35 = vadd.f32 %v3580_v5, %v3380_v11  ;;  %v4067_v11 = vmul.f32 %v4064_v24, %v10960_v7  ;;  %v4090_v5 = vstv %s7526_s1  ;;  %v14747_v32 = vld [vmem:[#allocation25_spill] sm:$0xff]  ;;  %s7549_s1 = sld [smem:[#allocation10 + $0xc8]] }
 0x539   : > { %4051 = vrot.lane.b32.xlu0 %v4041_v56, %s14427_s0  ;;  %4049 = vrot.lane.b32.xlu1 %v4040_v3, %s14427_s0  ;;  %v4066_v20 = vmul.f32 %v4064_v24, %v10958_v62 }
 0x53a   : > { %v11277_v52 = vadd.f32 %v3707_v39, %v3611_v48  ;;  %v11279_v2 = vadd.f32 %v3700_v21, %v3588_v35  ;;  %v3717_v48 = vmul.f32 %v3716_v40, %v10947_v30  ;;  %v3710_v35 = vmul.f32 %v3706_v23, %v10971_v12  ;;  %v14719_v39 = vld [vmem:[#allocation59_spill] sm:$0xff]  ;;  %v14720_v21 = vld [vmem:[#allocation77_spill] sm:$0xff] }
 0x53b   : > { %v3604_v15 = vpop.permute.xlu0 %3603  ;;  %v3602_v26 = vpop.permute.xlu1 %3601  ;;  %v3431_v6 = vadd.f32 %v14720_v21, %v14719_v39  ;;  %v4068_v23 = vmul.f32 %v4064_v24, %v10971_v12  ;;  %v4094_v21 = vmul.f32 %v4090_v5, %v10971_v12 }
 0x53c   : > { %14712 = vst [vmem:[#allocation88_spill] sm:$0xff] %v11277_v52  ;;  %v3613_v29 = vadd.f32 %v3604_v15, %v3405_v51  ;;  %v3612_v18 = vadd.f32 %v3602_v26, %v3404_v25  ;;  %v14721_v51 = vld [vmem:[#allocation62_spill] sm:$0xff] }
 0x53d   : > { %4073 = vrot.lane.b32.xlu0 %v4065_v31, %s14427_s0  ;;  %4053 = vrot.lane.b32.xlu1 %v4042_v33, %s14427_s0  ;;  %v3430_v60 = vadd.f32 %v14722_v58, %v14721_v51  ;;  %v4091_v33 = vmul.f32 %v4090_v5, %v10947_v30 }
 0x53e   : > { %v11292_v47 = vadd.f32 %v3709_v63, %v3613_v29  ;;  %v11294_v13 = vadd.f32 %v3708_v54, %v3612_v18  ;;  %v3719_v63 = vmul.f32 %v3716_v40, %v10960_v7  ;;  %v3718_v54 = vmul.f32 %v3716_v40, %v10958_v62 }
 0x53f   : > { %v3626_v49 = vpop.permute.xlu0 %3625  ;;  %v3606_v42 = vpop.permute.xlu1 %3605 }
 0x540   : > { %14717 = vst [vmem:[#allocation85_spill] sm:$0xff] %v11292_v47  ;;  %14718 = vst [vmem:[#allocation86_spill] sm:$0xff] %v11294_v13  ;;  %v3637_v56 = vadd.f32 %v3626_v49, %v3429_v14  ;;  %v3614_v3 = vadd.f32 %v3606_v42, %v3406_v43  ;;  %v3432_v14 = vadd.f32 %v14725_v36, %v14724_v10  ;;  %v4252_v10 = vstv %s7537_s4  ;;  %s7535_s4 = sld [smem:[#allocation10 + $0x10e]] }
 0x541   : > { %4077 = vrot.lane.b32.xlu0 %v4067_v11, %s14427_s0  ;;  %4075 = vrot.lane.b32.xlu1 %v4066_v20, %s14427_s0  ;;  %v4093_v49 = vmul.f32 %v4090_v5, %v10960_v7  ;;  %v4092_v42 = vmul.f32 %v4090_v5, %v10958_v62  ;;  %v4116_v20 = vstv %s7527_s2  ;;  %v4356_v13 = vstv %s7541_s12  ;;  %s7534_s2 = sld [smem:[#allocation10 + $0xea]]  ;;  %s7562_s12 = sld [smem:[#allocation10 + $0x5e]] }
 0x542   : > { %v11306_v25 = vadd.f32 %v3717_v48, %v3637_v56  ;;  %v11308_v15 = vadd.f32 %v3710_v35, %v3614_v3  ;;  %v3720_v56 = vmul.f32 %v3716_v40, %v10971_v12  ;;  %v4117_v39 = vmul.f32 %v4116_v20, %v10947_v30  ;;  %v11349_v30 = vld [vmem:[#allocation2 + $0x60] sm:$0xff] }
 0x543   : > { %v3630_v26 = vpop.permute.xlu0 %3629  ;;  %v3628_v31 = vpop.permute.xlu1 %3627  ;;  %v4119_v51 = vmul.f32 %v4116_v20, %v10960_v7  ;;  %v4118_v58 = vmul.f32 %v4116_v20, %v10958_v62 }
 0x544   : > { %14723 = vst [vmem:[#allocation89_spill] sm:$0xff] %v11306_v25  ;;  %v3639_v29 = vadd.f32 %v3630_v26, %v3431_v6  ;;  %v3638_v18 = vadd.f32 %v3628_v31, %v3430_v60  ;;  %v11345_v60 = vld [vmem:[#allocation2 + $0x50] sm:$0xff]  ;;  %v4226_v26 = vstv %s7536_s3  ;;  %s7550_s3 = sld [smem:[#allocation10 + $0xec]] }
 0x545   : > { %4099 = vrot.lane.b32.xlu0 %v4091_v33, %s14427_s0  ;;  %4079 = vrot.lane.b32.xlu1 %v4068_v23, %s14427_s0  ;;  %v4120_v33 = vmul.f32 %v4116_v20, %v10971_v12  ;;  %v4227_v7 = vmul.f32 %v4226_v26, %v11345_v60  ;;  %v11357_v23 = vld [vmem:[#allocation2 + $0x58] sm:$0xff]  ;;  %v4229_v62 = vmul.f32 %v4226_v26, %v11349_v30 }
 0x546   : > { %v11318_v19 = vadd.f32 %v3719_v63, %v3639_v29  ;;  %v11320_v8 = vadd.f32 %v3718_v54, %v3638_v18  ;;  %v11362_v29 = vld [vmem:[#allocation2 + $0x68] sm:$0xff]  ;;  %v4228_v54 = vmul.f32 %v4226_v26, %v11357_v23  ;;  %v4254_v20 = vmul.f32 %v4252_v10, %v11357_v23 }
 0x547   : > { %v11322_v43 = vpop.permute.xlu0 %3735  ;;  %v3632_v24 = vpop.permute.xlu1 %3631  ;;  %v4230_v12 = vmul.f32 %v4226_v26, %v11362_v29  ;;  %v4464_v50 = vmul.f32 %v4460_v55, %v11362_v29 }
 0x548   : > { %14726 = vst [vmem:[#allocation92_spill] sm:$0xff] %v11318_v19  ;;  %14727 = vst [vmem:[#allocation95_spill] sm:$0xff] %v11320_v8  ;;  %v3640_v11 = vadd.f32 %v3632_v24, %v3432_v14  ;;  %v4253_v24 = vmul.f32 %v4252_v10, %v11345_v60 }
 0x549   : > { %4103 = vrot.lane.b32.xlu0 %v4093_v49, %s14427_s0  ;;  %4101 = vrot.lane.b32.xlu1 %v4092_v42, %s14427_s0 }
 0x54a   : > { %v11329_v3 = vadd.f32 %v3720_v56, %v3640_v11  ;;  %v4255_v11 = vmul.f32 %v4252_v10, %v11349_v30  ;;  %v4278_v56 = vstv %s7538_s19  ;;  %s7551_s19 = sld [smem:[#allocation10 + $0x110]] }
 0x54b   : > { %v11331_v48 = vpop.permute.xlu0 %3739  ;;  %v11333_v35 = vpop.permute.xlu1 %3737 }
 0x54d   : > { %4125 = vrot.lane.b32.xlu0 %v4117_v39, %s14427_s0  ;;  %4105 = vrot.lane.b32.xlu1 %v4094_v21, %s14427_s0 }
 0x54f   : > { %v11339_v6 = vpop.permute.xlu0 %3761  ;;  %v11341_v40 = vpop.permute.xlu1 %3741 }
 0x551   : > { %4129 = vrot.lane.b32.xlu0 %v4119_v51, %s14427_s0  ;;  %4127 = vrot.lane.b32.xlu1 %v4118_v58, %s14427_s0  ;;  %v4279_v51 = vmul.f32 %v4278_v56, %v11345_v60  ;;  %v4256_v58 = vmul.f32 %v4252_v10, %v11362_v29 }
 0x553   : > { %v11351_v5 = vpop.permute.xlu0 %3765  ;;  %v11353_v31 = vpop.permute.xlu1 %3763 }
 0x555   : > { %4131 = vrot.lane.b32.xlu1 %v4120_v33, %s14427_s0  ;;  %4235 = vrot.lane.b32.xlu0 %v4227_v7, %s14418_s6  ;;  %v4281_v7 = vmul.f32 %v4278_v56, %v11349_v30 }
 0x557   : > { %v11364_v18 = vpop.permute.xlu0 %3787  ;;  %v11366_v63 = vpop.permute.xlu1 %3767 }
 0x559   : > { %4237 = vrot.lane.b32.xlu1 %v4228_v54, %s14418_s6  ;;  %4239 = vrot.lane.b32.xlu0 %v4229_v62, %s14418_s6  ;;  %v4280_v62 = vmul.f32 %v4278_v56, %v11357_v23  ;;  %v4304_v54 = vstv %s7539_s20  ;;  %s7560_s20 = sld [smem:[#allocation10 + $0x16]] }
 0x55b   : > { %v11372_v36 = vpop.permute.xlu0 %3791  ;;  %v11374_v14 = vpop.permute.xlu1 %3789 }
 0x55d   : > { %4261 = vrot.lane.b32.xlu0 %v4253_v24, %s14418_s6  ;;  %4241 = vrot.lane.b32.xlu1 %v4230_v12, %s14418_s6  ;;  %v4305_v24 = vmul.f32 %v4304_v54, %v11345_v60 }
 0x55f   : > { %v11379_v49 = vpop.permute.xlu0 %3813  ;;  %v11381_v42 = vpop.permute.xlu1 %3793 }
 0x560   : > { %14728 = vst [vmem:[#allocation98_spill] sm:$0xff] %v11379_v49 }
 0x561   : > { %4265 = vrot.lane.b32.xlu0 %v4255_v11, %s14418_s6  ;;  %4263 = vrot.lane.b32.xlu1 %v4254_v20, %s14418_s6  ;;  %v4282_v11 = vmul.f32 %v4278_v56, %v11362_v29 }
 0x563   : > { %v11387_v39 = vpop.permute.xlu0 %3817  ;;  %v11389_v21 = vpop.permute.xlu1 %3815 }
 0x564   : > { %14729 = vst [vmem:[#allocation101_spill] sm:$0xff] %v11387_v39  ;;  %14730 = vst [vmem:[#allocation102_spill] sm:$0xff] %v11389_v21  ;;  %v4486_v21 = vstv %s7546_s30  ;;  %v11697_v39 = vld [vmem:[#allocation2 + $0x69] sm:$0xff]  ;;  %s11876_s30 = sld [smem:[#allocation10 + $0x17]] }
 0x565   : > { %4287 = vrot.lane.b32.xlu0 %v4279_v51, %s14418_s6  ;;  %4267 = vrot.lane.b32.xlu1 %v4256_v58, %s14418_s6  ;;  %v4307_v58 = vmul.f32 %v4304_v54, %v11349_v30 }
 0x567   : > { %v11395_v26 = vpop.permute.xlu0 %3839  ;;  %v11397_v33 = vpop.permute.xlu1 %3819 }
 0x568   : > { %14731 = vst [vmem:[#allocation103_spill] sm:$0xff] %v11395_v26 }
 0x569   : > { %4291 = vrot.lane.b32.xlu0 %v4281_v7, %s14418_s6  ;;  %4289 = vrot.lane.b32.xlu1 %v4280_v62, %s14418_s6  ;;  %v4306_v7 = vmul.f32 %v4304_v54, %v11357_v23  ;;  %v4330_v62 = vstv %s7540_s8  ;;  %s7561_s8 = sld [smem:[#allocation10 + $0x3a]] }
 0x56b   : > { %v11403_v12 = vpop.permute.xlu0 %3843  ;;  %v11405_v10 = vpop.permute.xlu1 %3841 }
 0x56c   : > { %14732 = vst [vmem:[#allocation106_spill] sm:$0xff] %v11403_v12  ;;  %14733 = vst [vmem:[#allocation108_spill] sm:$0xff] %v11405_v10 }
 0x56d   : > { %4313 = vrot.lane.b32.xlu0 %v4305_v24, %s14418_s6  ;;  %4293 = vrot.lane.b32.xlu1 %v4282_v11, %s14418_s6  ;;  %v4331_v24 = vmul.f32 %v4330_v62, %v11345_v60  ;;  %v4308_v11 = vmul.f32 %v4304_v54, %v11362_v29 }
 0x56f   : > { %v11411_v20 = vpop.permute.xlu0 %3865  ;;  %v11413_v51 = vpop.permute.xlu1 %3845  ;;  %v4752_v0 = vstv %s7561_s8  ;;  %s12176_s8 = sld [smem:[#allocation10 + $0xef]] }
 0x570   : > { %14734 = vst [vmem:[#allocation109_spill] sm:$0xff] %v11411_v20 }
 0x571   : > { %4317 = vrot.lane.b32.xlu0 %v4307_v58, %s14418_s6  ;;  %4315 = vrot.lane.b32.xlu1 %v4306_v7, %s14418_s6  ;;  %v4333_v58 = vmul.f32 %v4330_v62, %v11349_v30  ;;  %v4332_v7 = vmul.f32 %v4330_v62, %v11357_v23 }
 0x573   : > { %v11419_v8 = vpop.permute.xlu0 %3869  ;;  %v11421_v56 = vpop.permute.xlu1 %3867 }
 0x574   : > { %14735 = vst [vmem:[#allocation110_spill] sm:$0xff] %v11419_v8  ;;  %14736 = vst [vmem:[#allocation111_spill] sm:$0xff] %v11421_v56  ;;  %v4334_v56 = vmul.f32 %v4330_v62, %v11362_v29 }
 0x575   : > { %4339 = vrot.lane.b32.xlu0 %v4331_v24, %s14418_s6  ;;  %4319 = vrot.lane.b32.xlu1 %v4308_v11, %s14418_s6 }
 0x576   : > { %v7835_v47 = vpop.f32.mrb[12].mxu0 }
 0x577   : > { %v11427_v19 = vpop.permute.xlu0 %3891  ;;  %v11429_v25 = vpop.permute.xlu1 %3871 }
 0x578   : > { %14737 = vst [vmem:[#allocation36_spill] sm:$0xff] %v11427_v19  ;;  %v1020_v54 = vpop.f32.mrb[13].mxu0  ;;  %v4357_v19 = vmul.f32 %v4356_v13, %v11345_v60 }
 0x579   : > { %4343 = vrot.lane.b32.xlu0 %v4333_v58, %s14418_s6  ;;  %4341 = vrot.lane.b32.xlu1 %v4332_v7, %s14418_s6  ;;  %v7881_v52 = vpack.c.bf16 %v7835_v47, %v1020_v54  ;;  %v4359_v7 = vmul.f32 %v4356_v13, %v11349_v30  ;;  %v4358_v47 = vmul.f32 %v4356_v13, %v11357_v23  ;;  %v14741_v54 = vld [vmem:[#allocation22_spill] sm:$0xff] }
 0x57b   : > { %v11435_v24 = vpop.permute.xlu0 %3895  ;;  %v11437_v11 = vpop.permute.xlu1 %3893  ;;  %7882 = vmatpush3.bf16.msra.mxu0 %v7881_v52 }
 0x57c   : > { %14738 = vst [vmem:[#allocation121_spill] sm:$0xff] %v11435_v24  ;;  %14739 = vst [vmem:[#allocation122_spill] sm:$0xff] %v11437_v11  ;;  %v4382_v11 = vstv %s7542_s23  ;;  %v14742_v24 = vmov 0.0   ;;  %s7563_s23 = sld [smem:[#allocation10 + $0x82]] }
 0x57d   : > { %4365 = vrot.lane.b32.xlu0 %v4357_v19, %s14418_s6  ;;  %4345 = vrot.lane.b32.xlu1 %v4334_v56, %s14418_s6  ;;  %v4383_v62 = vmul.f32 %v4382_v11, %v11345_v60  ;;  %v4360_v56 = vmul.f32 %v4356_v13, %v11362_v29  ;;  %v14746_v13 = vld [vmem:[#allocation24_spill] sm:$0xff]  ;;  %v4386_v8 = vmul.f32 %v4382_v11, %v11362_v29 }
 0x57e   : > { %7841 = vmatmul.mubr.msk.f32.vlgmr.msra.gmra.mrb[14].mxu0 %vm358_vm7, %v14741_v54  ;;  %v4385_v54 = vmul.f32 %v4382_v11, %v11349_v30 }
 0x57f   : > { %v11443_v16 = vpop.permute.xlu0 %3917  ;;  %v11445_v58 = vpop.permute.xlu1 %3897  ;;  %7843 = vmatprep.mubr.msk.f32.mxu0 %vm8171_vm8, %v14742_v24 }
 0x580   : > { %14740 = vst [vmem:[#allocation37_spill] sm:$0xff] %v11443_v16  ;;  %v14745_v16 = vld [vmem:[#allocation23_spill] sm:$0xff] }
 0x581   : > { %4369 = vrot.lane.b32.xlu0 %v4359_v7, %s14418_s6  ;;  %4367 = vrot.lane.b32.xlu1 %v4358_v47, %s14418_s6 }
 0x582   : > { %7844 = vmatmul.mubr.msk.f32.gmra.mrb[16].mxu0 %vm358_vm7, %v14745_v16  ;;  %v4408_v16 = vstv %s7543_s13  ;;  %s7564_s13 = sld [smem:[#allocation10 + $0xa6]] }
 0x583   : > { %v11455_v52 = vpop.permute.xlu0 %3921  ;;  %v11457_v19 = vpop.permute.xlu1 %3919  ;;  %7846 = vmatprep.mubr.msk.f32.mxu0 %vm8171_vm8, %v14742_v24  ;;  %v4411_v20 = vmul.f32 %v4408_v16, %v11349_v30 }
 0x584   : > { %14743 = vst [vmem:[#allocation38_spill] sm:$0xff] %v11455_v52  ;;  %14744 = vst [vmem:[#allocation46_spill] sm:$0xff] %v11457_v19  ;;  %v4384_v19 = vmul.f32 %v4382_v11, %v11357_v23  ;;  %v4409_v52 = vmul.f32 %v4408_v16, %v11345_v60  ;;  %v4410_v11 = vmul.f32 %v4408_v16, %v11357_v23 }
 0x585   : > { %4391 = vrot.lane.b32.xlu0 %v4383_v62, %s14418_s6  ;;  %4371 = vrot.lane.b32.xlu1 %v4360_v56, %s14418_s6 }
 0x586   : > { %7847 = vmatmul.mubr.msk.f32.gmra.mrb[18].mxu0 %vm358_vm7, %v14746_v13 }
 0x587   : > { %v11467_v7 = vpop.permute.xlu0 %3943  ;;  %v11469_v47 = vpop.permute.xlu1 %3923  ;;  %7849 = vmatprep.mubr.msk.f32.mxu0 %vm8171_vm8, %v14742_v24 }
 0x589   : > { %4395 = vrot.lane.b32.xlu0 %v4385_v54, %s14418_s6  ;;  %4393 = vrot.lane.b32.xlu1 %v4384_v19, %s14418_s6  ;;  %v3750_v19 = vadd.f32 %v11341_v40, %v11111_v17 }
 0x58a   : > { %7850 = vmatmul.mubr.msk.f32.gmra.mrb[20].mxu0 %vm358_vm7, %v14747_v32  ;;  %v14748_v32 = vld [vmem:[#allocation26_spill] sm:$0xff] }
 0x58b   : > { %v11479_v62 = vpop.permute.xlu0 %3947  ;;  %v11481_v56 = vpop.permute.xlu1 %3945  ;;  %7852 = vmatprep.mubr.msk.f32.mxu0 %vm8171_vm8, %v14742_v24 }
 0x58d   : > { %4417 = vrot.lane.b32.xlu0 %v4409_v52, %s14418_s6  ;;  %4397 = vrot.lane.b32.xlu1 %v4386_v8, %s14418_s6  ;;  %v4434_v52 = vstv %s7544_s11  ;;  %v4150_v8 = vmul.f32 %v11497_v46, %v11362_v29  ;;  %s7566_s11 = sld [smem:[#allocation10 + $0xee]] }
 0x58e   : > { %7853 = vmatmul.mubr.msk.f32.gmra.mrb[22].mxu0 %vm358_vm7, %v14748_v32  ;;  %v4435_v57 = vmul.f32 %v4434_v52, %v11345_v60  ;;  %v4412_v32 = vmul.f32 %v4408_v16, %v11362_v29  ;;  %v4438_v26 = vmul.f32 %v4434_v52, %v11362_v29  ;;  %vm7141_vm7 = vcmask 261120  }
 0x58f   : > { %v11493_v54 = vpop.permute.xlu0 %3969  ;;  %v3950_v13 = vpop.permute.xlu1 %3949 }
 0x590   : > { %v3958_v24 = vadd.f32 %v3950_v13, %v3750_v19  ;;  %v3776_v19 = vadd.f32 %v11366_v63, %v11145_v1 }
 0x591   : > { %4421 = vrot.lane.b32.xlu0 %v4411_v20, %s14418_s6  ;;  %4419 = vrot.lane.b32.xlu1 %v4410_v11, %s14418_s6  ;;  %v4437_v11 = vmul.f32 %v4434_v52, %v11349_v30 }
 0x592   : > { %v11505_v17 = vadd.f32 %v4150_v8, %v3958_v24  ;;  %v4436_v24 = vmul.f32 %v4434_v52, %v11357_v23  ;;  %v11521_v8 = vstv %s7529_s24  ;;  %s11777_s24 = sld [smem:[#allocation10 + $0x15]] }
 0x593   : > { %v11507_v40 = vpop.permute.xlu0 %3973  ;;  %v11509_v10 = vpop.permute.xlu1 %3971  ;;  %v4882_v49 = vstv %s7566_s11  ;;  %s7587_s11 = sld [smem:[#allocation10 + $0x85]] }
 0x595   : > { %4443 = vrot.lane.b32.xlu0 %v4435_v57, %s14427_s0  ;;  %4423 = vrot.lane.b32.xlu1 %v4412_v32, %s14418_s6  ;;  %v4160_v57 = vmul.f32 %v11521_v8, %v11362_v29  ;;  %v4461_v32 = vmul.f32 %v4460_v55, %v11345_v60 }
 0x597   : > { %v11517_v20 = vpop.permute.xlu0 %3995  ;;  %v3976_v13 = vpop.permute.xlu1 %3975 }
 0x598   : > { %v3984_v12 = vadd.f32 %v3976_v13, %v3776_v19  ;;  %v3802_v19 = vadd.f32 %v11381_v42, %v11179_v34 }
 0x599   : > { %4447 = vrot.lane.b32.xlu0 %v4437_v11, %s14427_s0  ;;  %4445 = vrot.lane.b32.xlu1 %v4436_v24, %s14427_s0  ;;  %v4462_v24 = vmul.f32 %v4460_v55, %v11357_v23 }
 0x59a   : > { %v11527_v1 = vadd.f32 %v4160_v57, %v3984_v12  ;;  %v4463_v12 = vmul.f32 %v4460_v55, %v11349_v30  ;;  %v11543_v57 = vstv %s7530_s29  ;;  %s11856_s29 = sld [smem:[#allocation10 + $0x39]] }
 0x59b   : > { %v11529_v63 = vpop.permute.xlu0 %3999  ;;  %v11531_v16 = vpop.permute.xlu1 %3997  ;;  %v4170_v52 = vmul.f32 %v11543_v57, %v11362_v29 }
 0x59c   : > { %14749 = vst [vmem:[#allocation56_spill] sm:$0xff] %v11527_v1  ;;  %v4778_v1 = vstv %s7562_s12  ;;  %s7575_s12 = sld [smem:[#allocation10 + $0x113]] }
 0x59d   : > { %4469 = vrot.lane.b32.xlu0 %v4461_v32, %s14427_s0  ;;  %4449 = vrot.lane.b32.xlu1 %v4438_v26, %s14427_s0  ;;  %v4487_v32 = vmul.f32 %v4486_v21, %v11345_v60 }
 0x59f   : > { %v11539_v13 = vpop.permute.xlu0 %4021  ;;  %v4002_v11 = vpop.permute.xlu1 %4001 }
 0x5a0   : > { %14750 = vst [vmem:[#allocation65_spill] sm:$0xff] %v11539_v13  ;;  %v4010_v37 = vadd.f32 %v4002_v11, %v3802_v19  ;;  %v3828_v19 = vadd.f32 %v11397_v33, %v11213_v41 }
 0x5a1   : > { %4473 = vrot.lane.b32.xlu0 %v4463_v12, %s14427_s0  ;;  %4471 = vrot.lane.b32.xlu1 %v4462_v24, %s14427_s0  ;;  %v4488_v24 = vmul.f32 %v4486_v21, %v11357_v23 }
 0x5a2   : > { %v11549_v34 = vadd.f32 %v4170_v52, %v4010_v37  ;;  %v4489_v37 = vmul.f32 %v4486_v21, %v11349_v30  ;;  %v11565_v52 = vstv %s7531_s9  ;;  %s11905_s9 = sld [smem:[#allocation10 + $0x3b]] }
 0x5a3   : > { %v11551_v42 = vpop.permute.xlu0 %4025  ;;  %v11553_v26 = vpop.permute.xlu1 %4023  ;;  %v4180_v55 = vmul.f32 %v11565_v52, %v11362_v29 }
 0x5a4   : > { %14751 = vst [vmem:[#allocation40_spill] sm:$0xff] %v11549_v34  ;;  %14752 = vst [vmem:[#allocation48_spill] sm:$0xff] %v11551_v42 }
 0x5a5   : > { %14753 = vst [vmem:[#allocation57_spill] sm:$0xff] %v11553_v26  ;;  %4495 = vrot.lane.b32.xlu0 %v4487_v32, %s14427_s0  ;;  %4475 = vrot.lane.b32.xlu1 %v4464_v50, %s14427_s0  ;;  %v4512_v26 = vstv %s7547_s7  ;;  %s11917_s7 = sld [smem:[#allocation10 + $0x5d]] }
 0x5a6   : > { %v4513_v32 = vmul.f32 %v4512_v26, %v11345_v60 }
 0x5a7   : > { %v11561_v11 = vpop.permute.xlu0 %4047  ;;  %v4028_v12 = vpop.permute.xlu1 %4027 }
 0x5a8   : > { %14754 = vst [vmem:[#allocation112_spill] sm:$0xff] %v11561_v11  ;;  %v4036_v34 = vadd.f32 %v4028_v12, %v3828_v19  ;;  %v4490_v11 = vmul.f32 %v4486_v21, %v11362_v29  ;;  %v3854_v19 = vadd.f32 %v11413_v51, %v11247_v59 }
 0x5a9   : > { %4499 = vrot.lane.b32.xlu0 %v4489_v37, %s14427_s0  ;;  %4497 = vrot.lane.b32.xlu1 %v4488_v24, %s14427_s0  ;;  %v4514_v24 = vmul.f32 %v4512_v26, %v11357_v23 }
 0x5aa   : > { %v11571_v50 = vadd.f32 %v4180_v55, %v4036_v34  ;;  %v4515_v34 = vmul.f32 %v4512_v26, %v11349_v30  ;;  %v11587_v55 = vstv %s7532_s10  ;;  %s11951_s10 = sld [smem:[#allocation10 + $0x5f]] }
 0x5ab   : > { %v11573_v41 = vpop.permute.xlu0 %4051  ;;  %v11575_v33 = vpop.permute.xlu1 %4049  ;;  %v4190_v21 = vmul.f32 %v11587_v55, %v11362_v29 }
 0x5ac   : > { %14755 = vst [vmem:[#allocation29_spill] sm:$0xff] %v11571_v50  ;;  %14756 = vst [vmem:[#allocation54_spill] sm:$0xff] %v11573_v41 }
 0x5ad   : > { %14757 = vst [vmem:[#allocation124_spill] sm:$0xff] %v11575_v33  ;;  %4521 = vrot.lane.b32.xlu0 %v4513_v32, %s14427_s0  ;;  %4501 = vrot.lane.b32.xlu1 %v4490_v11, %s14427_s0  ;;  %v4538_v33 = vstv %s7548_s27  ;;  %s11963_s27 = sld [smem:[#allocation10 + $0x81]] }
 0x5ae   : > { %v4539_v32 = vmul.f32 %v4538_v33, %v11345_v60 }
 0x5af   : > { %v11583_v12 = vpop.permute.xlu0 %4073  ;;  %v4054_v37 = vpop.permute.xlu1 %4053 }
 0x5b0   : > { %14758 = vst [vmem:[#allocation70_spill] sm:$0xff] %v11583_v12  ;;  %v4062_v50 = vadd.f32 %v4054_v37, %v3854_v19  ;;  %v4516_v12 = vmul.f32 %v4512_v26, %v11362_v29  ;;  %v3880_v19 = vadd.f32 %v11429_v25, %v11279_v2 }
 0x5b1   : > { %4525 = vrot.lane.b32.xlu0 %v4515_v34, %s14427_s0  ;;  %4523 = vrot.lane.b32.xlu1 %v4514_v24, %s14427_s0  ;;  %v4540_v24 = vmul.f32 %v4538_v33, %v11357_v23 }
 0x5b2   : > { %v11593_v59 = vadd.f32 %v4190_v21, %v4062_v50  ;;  %v4541_v50 = vmul.f32 %v4538_v33, %v11349_v30  ;;  %v11609_v21 = vstv %s7533_s28  ;;  %s11997_s28 = sld [smem:[#allocation10 + $0x83]] }
 0x5b3   : > { %v11595_v51 = vpop.permute.xlu0 %4077  ;;  %v11597_v11 = vpop.permute.xlu1 %4075  ;;  %v4200_v26 = vmul.f32 %v11609_v21, %v11362_v29 }
 0x5b4   : > { %14759 = vst [vmem:[#allocation113_spill] sm:$0xff] %v11593_v59  ;;  %14760 = vst [vmem:[#allocation30_spill] sm:$0xff] %v11595_v51  ;;  %v11687_v51 = vld [vmem:[#allocation2 + $0x61] sm:$0xff] }
 0x5b5   : > { %14761 = vst [vmem:[#allocation104_spill] sm:$0xff] %v11597_v11  ;;  %4547 = vrot.lane.b32.xlu0 %v4539_v32, %s14427_s0  ;;  %4527 = vrot.lane.b32.xlu1 %v4516_v12, %s14427_s0  ;;  %v4564_v11 = vstv %s7549_s1  ;;  %s12009_s1 = sld [smem:[#allocation10 + $0xa5]] }
 0x5b6   : > { %v4565_v32 = vmul.f32 %v4564_v11, %v11345_v60 }
 0x5b7   : > { %v11605_v37 = vpop.permute.xlu0 %4099  ;;  %v4080_v34 = vpop.permute.xlu1 %4079 }
 0x5b8   : > { %14762 = vst [vmem:[#allocation87_spill] sm:$0xff] %v11605_v37  ;;  %v4088_v59 = vadd.f32 %v4080_v34, %v3880_v19  ;;  %v4542_v37 = vmul.f32 %v4538_v33, %v11362_v29  ;;  %v3906_v19 = vadd.f32 %v11445_v58, %v11308_v15 }
 0x5b9   : > { %4551 = vrot.lane.b32.xlu0 %v4541_v50, %s14427_s0  ;;  %4549 = vrot.lane.b32.xlu1 %v4540_v24, %s14427_s0  ;;  %v4566_v24 = vmul.f32 %v4564_v11, %v11357_v23 }
 0x5ba   : > { %v11615_v2 = vadd.f32 %v4200_v26, %v4088_v59  ;;  %v4567_v59 = vmul.f32 %v4564_v11, %v11349_v30  ;;  %v11631_v26 = vstv %s7534_s2  ;;  %s12046_s2 = sld [smem:[#allocation10 + $0xa7]] }
 0x5bb   : > { %v11617_v25 = vpop.permute.xlu0 %4103  ;;  %v11619_v12 = vpop.permute.xlu1 %4101  ;;  %v4210_v33 = vmul.f32 %v11631_v26, %v11362_v29 }
 0x5bc   : > { %14763 = vst [vmem:[#allocation114_spill] sm:$0xff] %v11615_v2  ;;  %14764 = vst [vmem:[#allocation31_spill] sm:$0xff] %v11617_v25  ;;  %v11685_v25 = vld [vmem:[#allocation2 + $0x59] sm:$0xff] }
 0x5bd   : > { %14765 = vst [vmem:[#allocation44_spill] sm:$0xff] %v11619_v12  ;;  %4573 = vrot.lane.b32.xlu0 %v4565_v32, %s14427_s0  ;;  %4553 = vrot.lane.b32.xlu1 %v4542_v37, %s14427_s0  ;;  %v4590_v12 = vstv %s7550_s3  ;;  %s12058_s3 = sld [smem:[#allocation10 + $0xc9]] }
 0x5be   : > { %v4591_v32 = vmul.f32 %v4590_v12, %v11345_v60 }
 0x5bf   : > { %v11627_v34 = vpop.permute.xlu0 %4125  ;;  %v4106_v50 = vpop.permute.xlu1 %4105 }
 0x5c0   : > { %14766 = vst [vmem:[#allocation105_spill] sm:$0xff] %v11627_v34  ;;  %v4114_v2 = vadd.f32 %v4106_v50, %v3906_v19  ;;  %v4568_v34 = vmul.f32 %v4564_v11, %v11362_v29  ;;  %v3932_v19 = vadd.f32 %v11469_v47, %v11329_v3 }
 0x5c1   : > { %4577 = vrot.lane.b32.xlu0 %v4567_v59, %s14427_s0  ;;  %4575 = vrot.lane.b32.xlu1 %v4566_v24, %s14427_s0  ;;  %v4592_v24 = vmul.f32 %v4590_v12, %v11357_v23 }
 0x5c2   : > { %v11637_v15 = vadd.f32 %v4210_v33, %v4114_v2  ;;  %v4593_v2 = vmul.f32 %v4590_v12, %v11349_v30  ;;  %v11653_v33 = vstv %s7535_s4  ;;  %s12105_s4 = sld [smem:[#allocation10 + $0xed]] }
 0x5c3   : > { %v11639_v58 = vpop.permute.xlu0 %4129  ;;  %v11641_v37 = vpop.permute.xlu1 %4127  ;;  %v4220_v11 = vmul.f32 %v11653_v33, %v11362_v29 }
 0x5c4   : > { %14767 = vst [vmem:[#allocation47_spill] sm:$0xff] %v11637_v15  ;;  %14768 = vst [vmem:[#allocation115_spill] sm:$0xff] %v11639_v58  ;;  %v4594_v58 = vmul.f32 %v4590_v12, %v11362_v29 }
 0x5c5   : > { %14769 = vst [vmem:[#allocation32_spill] sm:$0xff] %v11641_v37  ;;  %4599 = vrot.lane.b32.xlu0 %v4591_v32, %s14427_s0  ;;  %4579 = vrot.lane.b32.xlu1 %v4568_v34, %s14427_s0  ;;  %v4616_v37 = vstv %s7551_s19  ;;  %s12117_s19 = sld [smem:[#allocation10 + $0xcb]] }
 0x5c6   : > { %v4617_v32 = vmul.f32 %v4616_v37, %v11345_v60 }
 0x5c7   : > { %v4132_v50 = vpop.permute.xlu1 %4131  ;;  %v11649_v59 = vpop.permute.xlu0 %4235 }
 0x5c8   : > { %v4140_v15 = vadd.f32 %v4132_v50, %v3932_v19 }
 0x5c9   : > { %4603 = vrot.lane.b32.xlu0 %v4593_v2, %s14427_s0  ;;  %4601 = vrot.lane.b32.xlu1 %v4592_v24, %s14427_s0  ;;  %v4619_v2 = vmul.f32 %v4616_v37, %v11349_v30  ;;  %v11675_v24 = vld [vmem:[#allocation2 + $0x51] sm:$0xff] }
 0x5ca   : > { %v11659_v3 = vadd.f32 %v4220_v11, %v4140_v15  ;;  %v4618_v15 = vmul.f32 %v4616_v37, %v11357_v23  ;;  %v4726_v11 = vstv %s7560_s20  ;;  %s12151_s20 = sld [smem:[#allocation10 + $0x111]] }
 0x5cb   : > { %v11661_v47 = vpop.permute.xlu1 %4237  ;;  %v11663_v34 = vpop.permute.xlu0 %4239  ;;  %v4728_v42 = vmul.f32 %v4726_v11, %v11685_v25 }
 0x5cc   : > { %14770 = vst [vmem:[#allocation71_spill] sm:$0xff] %v11659_v3  ;;  %v4620_v3 = vmul.f32 %v4616_v37, %v11362_v29 }
 0x5cd   : > { %4625 = vrot.lane.b32.xlu0 %v4617_v32, %s14427_s0  ;;  %4605 = vrot.lane.b32.xlu1 %v4594_v58, %s14427_s0  ;;  %v4727_v58 = vmul.f32 %v4726_v11, %v11675_v24 }
 0x5cf   : > { %v11669_v19 = vpop.permute.xlu0 %4261  ;;  %v11671_v50 = vpop.permute.xlu1 %4241 }
 0x5d1   : > { %4629 = vrot.lane.b32.xlu0 %v4619_v2, %s14427_s0  ;;  %4627 = vrot.lane.b32.xlu1 %v4618_v15, %s14427_s0  ;;  %v4729_v15 = vmul.f32 %v4726_v11, %v11687_v51 }
 0x5d3   : > { %v11679_v12 = vpop.permute.xlu0 %4265  ;;  %v11681_v32 = vpop.permute.xlu1 %4263 }
 0x5d5   : > { %4735 = vrot.lane.b32.xlu0 %v4727_v58, %s14418_s6  ;;  %4631 = vrot.lane.b32.xlu1 %v4620_v3, %s14427_s0  ;;  %v4753_v3 = vmul.f32 %v4752_v0, %v11675_v24  ;;  %v4730_v58 = vmul.f32 %v4726_v11, %v11697_v39 }
 0x5d7   : > { %v11691_v41 = vpop.permute.xlu0 %4287  ;;  %v11693_v2 = vpop.permute.xlu1 %4267 }
 0x5d8   : > { %14771 = vst [vmem:[#allocation128_spill] sm:$0xff] %v11691_v41  ;;  %14772 = vst [vmem:[#allocation90_spill] sm:$0xff] %v11693_v2  ;;  %v11810_v41 = vmul.f32 %v11543_v57, %v11349_v30 }
 0x5d9   : > { %4739 = vrot.lane.b32.xlu0 %v4729_v15, %s14418_s6  ;;  %4737 = vrot.lane.b32.xlu1 %v4728_v42, %s14418_s6  ;;  %v4755_v15 = vmul.f32 %v4752_v0, %v11687_v51  ;;  %v4754_v42 = vmul.f32 %v4752_v0, %v11685_v25 }
 0x5db   : > { %v11701_v29 = vpop.permute.xlu0 %4291  ;;  %v11703_v37 = vpop.permute.xlu1 %4289 }
 0x5dc   : > { %14773 = vst [vmem:[#allocation52_spill] sm:$0xff] %v11701_v29  ;;  %14774 = vst [vmem:[#allocation116_spill] sm:$0xff] %v11703_v37  ;;  %v4804_v29 = vstv %s7563_s23  ;;  %s7584_s23 = sld [smem:[#allocation10 + $0x19]] }
 0x5dd   : > { %4761 = vrot.lane.b32.xlu0 %v4753_v3, %s14418_s6  ;;  %4741 = vrot.lane.b32.xlu1 %v4730_v58, %s14418_s6  ;;  %v4779_v3 = vmul.f32 %v4778_v1, %v11675_v24  ;;  %v4756_v58 = vmul.f32 %v4752_v0, %v11697_v39 }
 0x5df   : > { %v11709_v13 = vpop.permute.xlu0 %4313  ;;  %v11711_v2 = vpop.permute.xlu1 %4293 }
 0x5e0   : > { %14775 = vst [vmem:[#allocation33_spill] sm:$0xff] %v11709_v13  ;;  %14776 = vst [vmem:[#allocation58_spill] sm:$0xff] %v11711_v2 }
 0x5e1   : > { %4765 = vrot.lane.b32.xlu0 %v4755_v15, %s14418_s6  ;;  %4763 = vrot.lane.b32.xlu1 %v4754_v42, %s14418_s6  ;;  %v4781_v15 = vmul.f32 %v4778_v1, %v11687_v51  ;;  %v4780_v42 = vmul.f32 %v4778_v1, %v11685_v25 }
 0x5e3   : > { %v11717_v37 = vpop.permute.xlu0 %4317  ;;  %v11719_v11 = vpop.permute.xlu1 %4315 }
 0x5e4   : > { %14777 = vst [vmem:[#allocation129_spill] sm:$0xff] %v11717_v37  ;;  %14778 = vst [vmem:[#allocation91_spill] sm:$0xff] %v11719_v11  ;;  %v4830_v37 = vstv %s7564_s13  ;;  %s7585_s13 = sld [smem:[#allocation10 + $0x3d]] }
 0x5e5   : > { %4787 = vrot.lane.b32.xlu0 %v4779_v3, %s14418_s6  ;;  %4767 = vrot.lane.b32.xlu1 %v4756_v58, %s14418_s6  ;;  %v4805_v3 = vmul.f32 %v4804_v29, %v11675_v24  ;;  %v4782_v58 = vmul.f32 %v4778_v1, %v11697_v39 }
 0x5e7   : > { %v11725_v2 = vpop.permute.xlu0 %4339  ;;  %v11727_v13 = vpop.permute.xlu1 %4319 }
 0x5e8   : > { %14779 = vst [vmem:[#allocation49_spill] sm:$0xff] %v11725_v2  ;;  %14780 = vst [vmem:[#allocation27_spill] sm:$0xff] %v11727_v13 }
 0x5e9   : > { %4791 = vrot.lane.b32.xlu0 %v4781_v15, %s14418_s6  ;;  %4789 = vrot.lane.b32.xlu1 %v4780_v42, %s14418_s6  ;;  %v4807_v15 = vmul.f32 %v4804_v29, %v11687_v51  ;;  %v4806_v42 = vmul.f32 %v4804_v29, %v11685_v25 }
 0x5eb   : > { %v11733_v11 = vpop.permute.xlu0 %4343  ;;  %v11735_v0 = vpop.permute.xlu1 %4341 }
 0x5ec   : > { %14781 = vst [vmem:[#allocation34_spill] sm:$0xff] %v11733_v11  ;;  %14782 = vst [vmem:[#allocation42_spill] sm:$0xff] %v11735_v0  ;;  %v4856_v11 = vstv %s7565_s16  ;;  %s7586_s16 = sld [smem:[#allocation10 + $0x61]] }
 0x5ed   : > { %4813 = vrot.lane.b32.xlu0 %v4805_v3, %s14418_s6  ;;  %4793 = vrot.lane.b32.xlu1 %v4782_v58, %s14418_s6  ;;  %v4831_v3 = vmul.f32 %v4830_v37, %v11675_v24  ;;  %v4808_v58 = vmul.f32 %v4804_v29, %v11697_v39 }
 0x5ef   : > { %v11741_v13 = vpop.permute.xlu0 %4365  ;;  %v11743_v2 = vpop.permute.xlu1 %4345 }
 0x5f0   : > { %14783 = vst [vmem:[#allocation93_spill] sm:$0xff] %v11741_v13  ;;  %14784 = vst [vmem:[#allocation51_spill] sm:$0xff] %v11743_v2 }
 0x5f1   : > { %4817 = vrot.lane.b32.xlu0 %v4807_v15, %s14418_s6  ;;  %4815 = vrot.lane.b32.xlu1 %v4806_v42, %s14418_s6  ;;  %v4833_v15 = vmul.f32 %v4830_v37, %v11687_v51  ;;  %v4832_v42 = vmul.f32 %v4830_v37, %v11685_v25 }
 0x5f3   : > { %v11749_v0 = vpop.permute.xlu0 %4369  ;;  %v11751_v1 = vpop.permute.xlu1 %4367 }
 0x5f4   : > { %14785 = vst [vmem:[#allocation117_spill] sm:$0xff] %v11749_v0  ;;  %14786 = vst [vmem:[#allocation119_spill] sm:$0xff] %v11751_v1 }
 0x5f5   : > { %4839 = vrot.lane.b32.xlu0 %v4831_v3, %s14418_s6  ;;  %4819 = vrot.lane.b32.xlu1 %v4808_v58, %s14418_s6  ;;  %v4857_v3 = vmul.f32 %v4856_v11, %v11675_v24  ;;  %v4834_v58 = vmul.f32 %v4830_v37, %v11697_v39  ;;  %v11785_v37 = vmul.f32 %v11521_v8, %v11345_v60 }
 0x5f7   : > { %v11757_v2 = vpop.permute.xlu0 %4391  ;;  %v11759_v13 = vpop.permute.xlu1 %4371 }
 0x5f8   : > { %14787 = vst [vmem:[#allocation130_spill] sm:$0xff] %v11757_v2  ;;  %14788 = vst [vmem:[#allocation94_spill] sm:$0xff] %v11759_v13  ;;  %v4147_v13 = vmul.f32 %v11497_v46, %v11345_v60  ;;  %v4148_v2 = vmul.f32 %v11497_v46, %v11357_v23 }
 0x5f9   : > { %4843 = vrot.lane.b32.xlu0 %v4833_v15, %s14418_s6  ;;  %4841 = vrot.lane.b32.xlu1 %v4832_v42, %s14418_s6  ;;  %v3747_v15 = vadd.f32 %v11322_v43, %v11079_v27  ;;  %v4149_v42 = vmul.f32 %v11497_v46, %v11349_v30  ;;  %v11799_v27 = vmul.f32 %v11543_v57, %v11345_v60 }
 0x5fb   : > { %v11765_v1 = vpop.permute.xlu0 %4395  ;;  %v11767_v29 = vpop.permute.xlu1 %4393  ;;  %v3955_v0 = vadd.f32 %v11467_v7, %v3747_v15  ;;  %v11826_v7 = vmul.f32 %v11565_v52, %v11357_v23  ;;  %v3748_v15 = vadd.f32 %v11333_v35, %v11095_v61  ;;  %v4860_v35 = vmul.f32 %v4856_v11, %v11697_v39 }
 0x5fc   : > { %14789 = vst [vmem:[#allocation50_spill] sm:$0xff] %v11765_v1  ;;  %14790 = vst [vmem:[#allocation28_spill] sm:$0xff] %v11767_v29  ;;  %v11789_v29 = vmul.f32 %v11521_v8, %v11349_v30  ;;  %v4858_v1 = vmul.f32 %v4856_v11, %v11685_v25 }
 0x5fd   : > { %4865 = vrot.lane.b32.xlu0 %v4857_v3, %s14418_s6  ;;  %4845 = vrot.lane.b32.xlu1 %v4834_v58, %s14418_s6  ;;  %v11795_v3 = vmul.f32 %v11521_v8, %v11357_v23  ;;  %v4859_v58 = vmul.f32 %v4856_v11, %v11687_v51  ;;  %v11814_v8 = vmul.f32 %v11543_v57, %v11357_v23 }
 0x5fe   : > { %v3749_v57 = vadd.f32 %v11331_v48, %v11093_v53  ;;  %v4883_v48 = vmul.f32 %v4882_v49, %v11675_v24  ;;  %v11872_v11 = vmul.f32 %v11631_v26, %v11345_v60 }
 0x5ff   : > { %v11801_v43 = vpop.permute.xlu0 %4417  ;;  %v11803_v46 = vpop.permute.xlu1 %4397 }
 0x600   : > { %14791 = vst [vmem:[#allocation35_spill] sm:$0xff] %v11801_v43  ;;  %14792 = vst [vmem:[#allocation43_spill] sm:$0xff] %v11803_v46  ;;  %v11818_v43 = vmul.f32 %v11565_v52, %v11345_v60  ;;  %v11822_v46 = vmul.f32 %v11565_v52, %v11349_v30  ;;  %v11844_v52 = vmul.f32 %v11587_v55, %v11357_v23 }
 0x601   : > { %4869 = vrot.lane.b32.xlu0 %v4859_v58, %s14418_s6  ;;  %4867 = vrot.lane.b32.xlu1 %v4858_v1, %s14418_s6  ;;  %v11848_v1 = vmul.f32 %v11609_v21, %v11345_v60  ;;  %v3957_v58 = vadd.f32 %v11479_v62, %v3749_v57  ;;  %v4646_v62 = vstv %s11777_s24  ;;  %s7588_s24 = sld [smem:[#allocation10 + $0xa9]] }
 0x602   : > { %14793 = vst [vmem:[#allocation96_spill] sm:$0xff] %v11818_v43  ;;  %14794 = vst [vmem:[#allocation53_spill] sm:$0xff] %v11822_v46  ;;  %v11836_v43 = vmul.f32 %v11587_v55, %v11345_v60  ;;  %v11840_v46 = vmul.f32 %v11587_v55, %v11349_v30  ;;  %v3956_v55 = vadd.f32 %v11481_v56, %v3748_v15 }
 0x603   : > { %14795 = vst [vmem:[#allocation118_spill] sm:$0xff] %v11844_v52  ;;  %14796 = vst [vmem:[#allocation120_spill] sm:$0xff] %v11848_v1  ;;  %v11850_v53 = vpop.permute.xlu0 %4421  ;;  %v11852_v61 = vpop.permute.xlu1 %4419  ;;  %v4151_v52 = vadd.f32 %v4147_v13, %v3955_v0  ;;  %v11862_v1 = vmul.f32 %v11609_v21, %v11349_v30  ;;  %v4908_v13 = vstv %s11791_s26  ;;  %v11892_v0 = vmul.f32 %v11653_v33, %v11345_v60  ;;  %s7589_s26 = sld [smem:[#allocation10 + $0xcd]] }
 0x604   : > { %14797 = vst [vmem:[#allocation131_spill] sm:$0xff] %v11850_v53  ;;  %14798 = vst [vmem:[#allocation97_spill] sm:$0xff] %v11852_v61  ;;  %v3773_v53 = vadd.f32 %v11339_v6, %v11109_v28  ;;  %v11868_v61 = vmul.f32 %v11609_v21, %v11357_v23  ;;  %v11882_v28 = vmul.f32 %v11631_v26, %v11349_v30 }
 0x605   : > { %4891 = vrot.lane.b32.xlu0 %v4883_v48, %s14418_s6  ;;  %4871 = vrot.lane.b32.xlu1 %v4860_v35, %s14418_s6  ;;  %v4247_v56 = vadd.f32 %v11649_v59, %v4151_v52  ;;  %v11886_v6 = vmul.f32 %v11631_v26, %v11357_v23  ;;  %v4885_v59 = vmul.f32 %v4882_v49, %v11687_v51 }
 0x606   : > { %v3981_v21 = vadd.f32 %v11493_v54, %v3773_v53  ;;  %v4884_v52 = vmul.f32 %v4882_v49, %v11685_v25  ;;  %v4152_v30 = vadd.f32 %v4148_v2, %v3956_v55  ;;  %v4153_v48 = vadd.f32 %v4149_v42, %v3957_v58 }
 0x607   : > { %v4444_v57 = vpop.permute.xlu0 %4443  ;;  %v11894_v15 = vpop.permute.xlu1 %4423  ;;  %v4647_v23 = vmul.f32 %v4646_v62, %v11675_v24  ;;  %v3775_v54 = vadd.f32 %v11351_v5, %v11126_v9  ;;  %v4909_v60 = vmul.f32 %v4908_v13, %v11675_v24  ;;  %v4886_v26 = vmul.f32 %v4882_v49, %v11697_v39 }
 0x608   : > { %v4455_v35 = vadd.f32 %v4444_v57, %v4247_v56  ;;  %v3774_v2 = vadd.f32 %v11353_v31, %v11128_v4  ;;  %v4248_v42 = vadd.f32 %v11661_v47, %v4152_v30  ;;  %v4249_v53 = vadd.f32 %v11663_v34, %v4153_v48 }
 0x609   : > { %4895 = vrot.lane.b32.xlu0 %v4885_v59, %s14418_s6  ;;  %4893 = vrot.lane.b32.xlu1 %v4884_v52, %s14418_s6  ;;  %v4161_v9 = vadd.f32 %v11785_v37, %v3981_v21  ;;  %v4649_v56 = vmul.f32 %v4646_v62, %v11687_v51  ;;  %v4648_v49 = vmul.f32 %v4646_v62, %v11685_v25  ;;  %v4656_v57 = vstv %s11856_s29  ;;  %s7590_s29 = sld [smem:[#allocation10 + $0xf1]] }
 0x60a   : > { %v11911_v58 = vadd.f32 %v4647_v23, %v4455_v35  ;;  %v3983_v4 = vadd.f32 %v11507_v40, %v3775_v54  ;;  %v3982_v31 = vadd.f32 %v11509_v10, %v3774_v2  ;;  %v3799_v59 = vadd.f32 %v11364_v18, %v11143_v22 }
 0x60b   : > { %v4448_v5 = vpop.permute.xlu0 %4447  ;;  %v4446_v55 = vpop.permute.xlu1 %4445  ;;  %v4911_v37 = vmul.f32 %v4908_v13, %v11687_v51  ;;  %v4910_v21 = vmul.f32 %v4908_v13, %v11685_v25  ;;  %v4934_v52 = vstv %s11876_s30  ;;  %v4273_v30 = vadd.f32 %v11669_v19, %v4161_v9  ;;  %s7576_s30 = sld [smem:[#allocation10 + $0x18]] }
 0x60c   : > { %v4457_v47 = vadd.f32 %v4448_v5, %v4249_v53  ;;  %v4456_v34 = vadd.f32 %v4446_v55, %v4248_v42  ;;  %v4250_v40 = vadd.f32 %v11671_v50, %v11505_v17  ;;  %v4007_v22 = vadd.f32 %v11517_v20, %v3799_v59  ;;  %v14801_v59 = vld [vmem:[#allocation56_spill] sm:$0xff] }
 0x60d   : > { %4917 = vrot.lane.b32.xlu0 %v4909_v60, %s14418_s6  ;;  %4897 = vrot.lane.b32.xlu1 %v4886_v26, %s14418_s6  ;;  %v4912_v23 = vmul.f32 %v4908_v13, %v11697_v39  ;;  %v4657_v54 = vmul.f32 %v4656_v57, %v11675_v24  ;;  %v4650_v60 = vmul.f32 %v4646_v62, %v11697_v39  ;;  %v11949_v62 = vstv %s11905_s9  ;;  %s7591_s9 = sld [smem:[#allocation10 + $0x115]] }
 0x60e   : > { %v11931_v10 = vadd.f32 %v4649_v56, %v4457_v47  ;;  %v11933_v48 = vadd.f32 %v4648_v49, %v4456_v34  ;;  %v4163_v19 = vadd.f32 %v11789_v29, %v3983_v4  ;;  %v4162_v26 = vadd.f32 %v11795_v3, %v3982_v31  ;;  %v14799_v49 = vld [vmem:[#allocation98_spill] sm:$0xff]  ;;  %v14800_v47 = vld [vmem:[#allocation128_spill] sm:$0xff] }
 0x60f   : > { %v4470_v18 = vpop.permute.xlu0 %4469  ;;  %v4450_v35 = vpop.permute.xlu1 %4449  ;;  %v3801_v2 = vadd.f32 %v11372_v36, %v11160_v38  ;;  %v3800_v20 = vadd.f32 %v11374_v14, %v11162_v44  ;;  %v4935_v13 = vmul.f32 %v4934_v52, %v11675_v24  ;;  %v4171_v44 = vadd.f32 %v11799_v27, %v4007_v22 }
 0x610   : > { %v4481_v17 = vadd.f32 %v4470_v18, %v4273_v30  ;;  %v4458_v50 = vadd.f32 %v4450_v35, %v4250_v40  ;;  %v4275_v29 = vadd.f32 %v11679_v12, %v4163_v19  ;;  %v4274_v3 = vadd.f32 %v11681_v32, %v4162_v26  ;;  %v14803_v30 = vld [vmem:[#allocation65_spill] sm:$0xff] }
 0x611   : > { %4921 = vrot.lane.b32.xlu0 %v4911_v37, %s14418_s6  ;;  %4919 = vrot.lane.b32.xlu1 %v4910_v21, %s14418_s6  ;;  %v4659_v53 = vmul.f32 %v4656_v57, %v11687_v51  ;;  %v4658_v9 = vmul.f32 %v4656_v57, %v11685_v25  ;;  %v4666_v5 = vstv %s11917_s7  ;;  %v4009_v55 = vadd.f32 %v11529_v63, %v3801_v2  ;;  %v14802_v37 = vld [vmem:[#allocation90_spill] sm:$0xff]  ;;  %s7577_s7 = sld [smem:[#allocation10 + $0x3c]] }
 0x612   : > { %v11955_v42 = vadd.f32 %v4657_v54, %v4481_v17  ;;  %v11957_v38 = vadd.f32 %v4650_v60, %v4458_v50  ;;  %v4008_v12 = vadd.f32 %v11531_v16, %v3800_v20  ;;  %v3825_v4 = vadd.f32 %v14799_v49, %v11177_v45  ;;  %v14804_v17 = vld [vmem:[#allocation78_spill] sm:$0xff]  ;;  %v14805_v50 = vld [vmem:[#allocation101_spill] sm:$0xff]  ;;  %v14806_v20 = vld [vmem:[#allocation79_spill] sm:$0xff] }
 0x613   : > { %v4474_v36 = vpop.permute.xlu0 %4473  ;;  %v4472_v14 = vpop.permute.xlu1 %4471  ;;  %v4937_v27 = vmul.f32 %v4934_v52, %v11687_v51  ;;  %v4936_v31 = vmul.f32 %v4934_v52, %v11685_v25  ;;  %v4299_v34 = vadd.f32 %v14800_v47, %v4171_v44  ;;  %v4276_v63 = vadd.f32 %v14802_v37, %v14801_v59  ;;  %v14809_v44 = vld [vmem:[#allocation116_spill] sm:$0xff] }
 0x614   : > { %v4483_v32 = vadd.f32 %v4474_v36, %v4275_v29  ;;  %v4482_v56 = vadd.f32 %v4472_v14, %v4274_v3  ;;  %v4033_v45 = vadd.f32 %v14803_v30, %v3825_v4  ;;  %v4961_v18 = vmul.f32 %v11949_v62, %v11675_v24  ;;  %v14811_v4 = vld [vmem:[#allocation48_spill] sm:$0xff] }
 0x615   : > { %4943 = vrot.lane.b32.xlu0 %v4935_v13, %s14427_s0  ;;  %4923 = vrot.lane.b32.xlu1 %v4912_v23, %s14418_s6  ;;  %v4667_v35 = vmul.f32 %v4666_v5, %v11675_v24  ;;  %v4660_v23 = vmul.f32 %v4656_v57, %v11697_v39  ;;  %v4173_v54 = vadd.f32 %v11810_v41, %v4009_v55  ;;  %v14807_v13 = vld [vmem:[#allocation102_spill] sm:$0xff]  ;;  %v11995_v57 = vstv %s11951_s10  ;;  %v14808_v41 = vld [vmem:[#allocation52_spill] sm:$0xff]  ;;  %s7592_s10 = sld [smem:[#allocation10 + $0x1a]] }
 0x616   : > { %v11976_v21 = vadd.f32 %v4659_v53, %v4483_v32  ;;  %v11978_v16 = vadd.f32 %v4658_v9, %v4482_v56  ;;  %v4172_v60 = vadd.f32 %v11814_v8, %v4008_v12  ;;  %v3827_v2 = vadd.f32 %v14805_v50, %v14804_v17  ;;  %v14810_v9 = vld [vmem:[#allocation96_spill] sm:$0xff] }
 0x617   : > { %v4496_v40 = vpop.permute.xlu0 %4495  ;;  %v4476_v22 = vpop.permute.xlu1 %4475  ;;  %v3826_v29 = vadd.f32 %v14807_v13, %v14806_v20  ;;  %v4938_v3 = vmul.f32 %v4934_v52, %v11697_v39  ;;  %v4301_v8 = vadd.f32 %v14808_v41, %v4173_v54  ;;  %v4181_v55 = vadd.f32 %v14810_v9, %v4033_v45  ;;  %v14813_v37 = vld [vmem:[#allocation68_spill] sm:$0xff]  ;;  %v14817_v54 = vld [vmem:[#allocation58_spill] sm:$0xff] }
 0x618   : > { %v4507_v19 = vadd.f32 %v4496_v40, %v4299_v34  ;;  %v4484_v26 = vadd.f32 %v4476_v22, %v4276_v63  ;;  %v4300_v36 = vadd.f32 %v14809_v44, %v4172_v60  ;;  %v4669_v56 = vmul.f32 %v4666_v5, %v11687_v51  ;;  %v14814_v63 = vld [vmem:[#allocation103_spill] sm:$0xff]  ;;  %v14815_v22 = vld [vmem:[#allocation33_spill] sm:$0xff]  ;;  %v14818_v17 = vld [vmem:[#allocation112_spill] sm:$0xff] }
 0x619   : > { %4947 = vrot.lane.b32.xlu0 %v4937_v27, %s14427_s0  ;;  %4945 = vrot.lane.b32.xlu1 %v4936_v31, %s14427_s0  ;;  %v4668_v52 = vmul.f32 %v4666_v5, %v11685_v25  ;;  %v4676_v49 = vstv %s11963_s27  ;;  %v4035_v27 = vadd.f32 %v14811_v4, %v3827_v2  ;;  %v14812_v31 = vld [vmem:[#allocation57_spill] sm:$0xff]  ;;  %v3851_v30 = vadd.f32 %v14814_v63, %v14813_v37  ;;  %v14820_v9 = vld [vmem:[#allocation80_spill] sm:$0xff]  ;;  %s12404_s27 = sld [smem:[#allocation10 + $0x60]] }
 0x61a   : > { %v12001_v14 = vadd.f32 %v4667_v35, %v4507_v19  ;;  %v12003_v53 = vadd.f32 %v4660_v23, %v4484_v26  ;;  %v4034_v47 = vadd.f32 %v14812_v31, %v3826_v29  ;;  %v4963_v45 = vmul.f32 %v11949_v62, %v11687_v51  ;;  %v14816_v23 = vld [vmem:[#allocation40_spill] sm:$0xff]  ;;  %v14825_v31 = vld [vmem:[#allocation91_spill] sm:$0xff] }
 0x61b   : > { %v4500_v12 = vpop.permute.xlu0 %4499  ;;  %v4498_v32 = vpop.permute.xlu1 %4497  ;;  %v4962_v40 = vmul.f32 %v11949_v62, %v11685_v25  ;;  %v4325_v35 = vadd.f32 %v14815_v22, %v4181_v55  ;;  %v4302_v60 = vadd.f32 %v14817_v54, %v14816_v23  ;;  %v4987_v20 = vmul.f32 %v11995_v57, %v11675_v24  ;;  %v14821_v55 = vld [vmem:[#allocation106_spill] sm:$0xff]  ;;  %v14827_v23 = vld [vmem:[#allocation124_spill] sm:$0xff] }
 0x61c   : > { %v4509_v34 = vadd.f32 %v4500_v12, %v4301_v8  ;;  %v4508_v59 = vadd.f32 %v4498_v32, %v4300_v36  ;;  %v4677_v13 = vmul.f32 %v4676_v49, %v11675_v24  ;;  %v4670_v29 = vmul.f32 %v4666_v5, %v11697_v39  ;;  %v14822_v32 = vld [vmem:[#allocation81_spill] sm:$0xff]  ;;  %v14826_v22 = vld [vmem:[#allocation54_spill] sm:$0xff] }
 0x61d   : > { %4969 = vrot.lane.b32.xlu0 %v4961_v18, %s14427_s0  ;;  %4949 = vrot.lane.b32.xlu1 %v4938_v3, %s14427_s0  ;;  %v4059_v18 = vadd.f32 %v14818_v17, %v3851_v30  ;;  %v14819_v3 = vld [vmem:[#allocation53_spill] sm:$0xff]  ;;  %v4182_v8 = vadd.f32 %v11826_v7, %v4034_v47  ;;  %v3853_v12 = vadd.f32 %v14821_v55, %v14820_v9  ;;  %v12044_v4 = vstv %s11997_s28  ;;  %v14833_v55 = vld [vmem:[#allocation70_spill] sm:$0xff]  ;;  %s12416_s28 = sld [smem:[#allocation10 + $0x3e]] }
 0x61e   : > { %v12024_v19 = vadd.f32 %v4669_v56, %v4509_v34  ;;  %v12026_v26 = vadd.f32 %v4668_v52, %v4508_v59  ;;  %v4183_v41 = vadd.f32 %v14819_v3, %v4035_v27  ;;  %v14823_v56 = vld [vmem:[#allocation108_spill] sm:$0xff]  ;;  %v4964_v5 = vmul.f32 %v11949_v62, %v11697_v39  ;;  %v14824_v7 = vld [vmem:[#allocation129_spill] sm:$0xff] }
 0x61f   : > { %v4522_v50 = vpop.permute.xlu0 %4521  ;;  %v4502_v2 = vpop.permute.xlu1 %4501  ;;  %v3852_v52 = vadd.f32 %v14823_v56, %v14822_v32  ;;  %v4326_v47 = vadd.f32 %v14825_v31, %v4182_v8  ;;  %v4191_v37 = vadd.f32 %v11836_v43, %v4059_v18  ;;  %v4678_v62 = vmul.f32 %v4676_v49, %v11685_v25  ;;  %v14832_v8 = vld [vmem:[#allocation27_spill] sm:$0xff] }
 0x620   : > { %v4533_v44 = vadd.f32 %v4522_v50, %v4325_v35  ;;  %v4510_v36 = vadd.f32 %v4502_v2, %v4302_v60  ;;  %v4327_v27 = vadd.f32 %v14824_v7, %v4183_v41  ;;  %v4061_v35 = vadd.f32 %v14826_v22, %v3853_v12  ;;  %v14828_v50 = vld [vmem:[#allocation83_spill] sm:$0xff]  ;;  %v14829_v2 = vld [vmem:[#allocation109_spill] sm:$0xff] }
 0x621   : > { %4973 = vrot.lane.b32.xlu0 %v4963_v45, %s14427_s0  ;;  %4971 = vrot.lane.b32.xlu1 %v4962_v40, %s14427_s0  ;;  %v4679_v45 = vmul.f32 %v4676_v49, %v11687_v51  ;;  %v4686_v40 = vstv %s12009_s1  ;;  %v4060_v54 = vadd.f32 %v14827_v23, %v3852_v52  ;;  %v4989_v43 = vmul.f32 %v11995_v57, %v11687_v51  ;;  %v14831_v41 = vld [vmem:[#allocation29_spill] sm:$0xff]  ;;  %v14838_v22 = vld [vmem:[#allocation111_spill] sm:$0xff]  ;;  %s12437_s1 = sld [smem:[#allocation10 + $0x84]] }
 0x622   : > { %v12050_v34 = vadd.f32 %v4677_v13, %v4533_v44  ;;  %v12052_v59 = vadd.f32 %v4670_v29, %v4510_v36  ;;  %v3877_v13 = vadd.f32 %v14829_v2, %v14828_v50  ;;  %v4988_v18 = vmul.f32 %v11995_v57, %v11685_v25  ;;  %v14830_v29 = vld [vmem:[#allocation49_spill] sm:$0xff] }
 0x623   : > { %v4526_v63 = vpop.permute.xlu0 %4525  ;;  %v4524_v30 = vpop.permute.xlu1 %4523  ;;  %v4351_v3 = vadd.f32 %v14830_v29, %v4191_v37  ;;  %v4328_v44 = vadd.f32 %v14832_v8, %v14831_v41  ;;  %v5013_v56 = vmul.f32 %v12044_v4, %v11675_v24  ;;  %v4687_v52 = vmul.f32 %v4686_v40, %v11675_v24 }
 0x624   : > { %v4535_v60 = vadd.f32 %v4526_v63, %v4327_v27  ;;  %v4534_v17 = vadd.f32 %v4524_v30, %v4326_v47  ;;  %v4193_v7 = vadd.f32 %v11840_v46, %v4061_v35  ;;  %v14834_v27 = vld [vmem:[#allocation118_spill] sm:$0xff]  ;;  %v4696_v8 = vstv %s12058_s3  ;;  %s12471_s3 = sld [smem:[#allocation10 + $0xa8]] }
 0x625   : > { %4995 = vrot.lane.b32.xlu0 %v4987_v20, %s14427_s0  ;;  %4975 = vrot.lane.b32.xlu1 %v4964_v5, %s14427_s0  ;;  %v4085_v20 = vadd.f32 %v14833_v55, %v3877_v13  ;;  %v4680_v5 = vmul.f32 %v4676_v49, %v11697_v39  ;;  %v4192_v31 = vadd.f32 %v14834_v27, %v4060_v54  ;;  %v14835_v63 = vld [vmem:[#allocation82_spill] sm:$0xff]  ;;  %v14841_v13 = vld [vmem:[#allocation120_spill] sm:$0xff] }
 0x626   : > { %v12073_v36 = vadd.f32 %v4679_v45, %v4535_v60  ;;  %v12075_v9 = vadd.f32 %v4678_v62, %v4534_v17  ;;  %v14836_v30 = vld [vmem:[#allocation110_spill] sm:$0xff]  ;;  %v14837_v62 = vld [vmem:[#allocation84_spill] sm:$0xff]  ;;  %v4990_v49 = vmul.f32 %v11995_v57, %v11697_v39  ;;  %v12093_v60 = vstv %s12046_s2  ;;  %s12450_s2 = sld [smem:[#allocation10 + $0x62]] }
 0x627   : > { %v4548_v12 = vpop.permute.xlu0 %4547  ;;  %v4528_v32 = vpop.permute.xlu1 %4527  ;;  %v3879_v45 = vadd.f32 %v14836_v30, %v14835_v63  ;;  %v3878_v23 = vadd.f32 %v14838_v22, %v14837_v62  ;;  %v14839_v46 = vld [vmem:[#allocation34_spill] sm:$0xff]  ;;  %v4201_v29 = vadd.f32 %v14841_v13, %v4085_v20  ;;  %v14843_v55 = vld [vmem:[#allocation104_spill] sm:$0xff]  ;;  %v5015_v20 = vmul.f32 %v12044_v4, %v11687_v51  ;;  %v14847_v63 = vld [vmem:[#allocation113_spill] sm:$0xff] }
 0x628   : > { %v4559_v47 = vadd.f32 %v4548_v12, %v4351_v3  ;;  %v4536_v37 = vadd.f32 %v4528_v32, %v4328_v44  ;;  %v4353_v35 = vadd.f32 %v14839_v46, %v4193_v7  ;;  %v14840_v54 = vld [vmem:[#allocation42_spill] sm:$0xff]  ;;  %v14844_v7 = vld [vmem:[#allocation88_spill] sm:$0xff]  ;;  %v14848_v30 = vld [vmem:[#allocation51_spill] sm:$0xff] }
 0x629   : > { %4999 = vrot.lane.b32.xlu0 %v4989_v43, %s14427_s0  ;;  %4997 = vrot.lane.b32.xlu1 %v4988_v18, %s14427_s0  ;;  %v4352_v17 = vadd.f32 %v14840_v54, %v4192_v31  ;;  %v4689_v43 = vmul.f32 %v4686_v40, %v11687_v51  ;;  %v4688_v18 = vmul.f32 %v4686_v40, %v11685_v25  ;;  %v14842_v57 = vld [vmem:[#allocation30_spill] sm:$0xff] }
 0x62a   : > { %v12097_v50 = vadd.f32 %v4687_v52, %v4559_v47  ;;  %v12099_v2 = vadd.f32 %v4680_v5, %v4536_v37  ;;  %v4087_v44 = vadd.f32 %v14842_v57, %v3879_v45  ;;  %v4086_v12 = vadd.f32 %v14843_v55, %v3878_v23  ;;  %v14845_v5 = vld [vmem:[#allocation36_spill] sm:$0xff]  ;;  %v14846_v47 = vld [vmem:[#allocation93_spill] sm:$0xff]  ;;  %v14852_v55 = vld [vmem:[#allocation86_spill] sm:$0xff] }
 0x62b   : > { %v4552_v3 = vpop.permute.xlu0 %4551  ;;  %v4550_v41 = vpop.permute.xlu1 %4549  ;;  %v3903_v27 = vadd.f32 %v14845_v5, %v14844_v7  ;;  %v5014_v31 = vmul.f32 %v12044_v4, %v11685_v25  ;;  %v4377_v37 = vadd.f32 %v14846_v47, %v4201_v29  ;;  %v4354_v45 = vadd.f32 %v14848_v30, %v14847_v63  ;;  %v14854_v7 = vld [vmem:[#allocation117_spill] sm:$0xff] }
 0x62c   : > { %v4561_v32 = vadd.f32 %v4552_v3, %v4353_v35  ;;  %v4560_v52 = vadd.f32 %v4550_v41, %v4352_v17  ;;  %v5039_v35 = vmul.f32 %v12093_v60, %v11675_v24  ;;  %v4697_v54 = vmul.f32 %v4696_v8, %v11675_v24 }
 0x62d   : > { %5021 = vrot.lane.b32.xlu0 %v5013_v56, %s14427_s0  ;;  %5001 = vrot.lane.b32.xlu1 %v4990_v49, %s14427_s0  ;;  %v14849_v56 = vld [vmem:[#allocation87_spill] sm:$0xff]  ;;  %v4690_v17 = vmul.f32 %v4686_v40, %v11697_v39  ;;  %v4203_v13 = vadd.f32 %v11862_v1, %v4087_v44  ;;  %v4202_v29 = vadd.f32 %v11868_v61, %v4086_v12  ;;  %v4706_v63 = vstv %s12105_s4  ;;  %s12484_s4 = sld [smem:[#allocation10 + $0x86]] }
 0x62e   : > { %v12122_v62 = vadd.f32 %v4689_v43, %v4561_v32  ;;  %v12124_v22 = vadd.f32 %v4688_v18, %v4560_v52  ;;  %v4111_v23 = vadd.f32 %v14849_v56, %v3903_v27  ;;  %v14850_v43 = vld [vmem:[#allocation85_spill] sm:$0xff]  ;;  %v14853_v32 = vld [vmem:[#allocation122_spill] sm:$0xff]  ;;  %v5016_v40 = vmul.f32 %v12044_v4, %v11697_v39  ;;  %v14855_v44 = vld [vmem:[#allocation119_spill] sm:$0xff] }
 0x62f   : > { %v4574_v49 = vpop.permute.xlu0 %4573  ;;  %v4554_v46 = vpop.permute.xlu1 %4553  ;;  %v14851_v18 = vld [vmem:[#allocation121_spill] sm:$0xff]  ;;  %v3904_v52 = vadd.f32 %v14853_v32, %v14852_v55  ;;  %v4379_v1 = vadd.f32 %v14854_v7, %v4203_v13  ;;  %v4378_v61 = vadd.f32 %v14855_v44, %v4202_v29  ;;  %v14856_v4 = vld [vmem:[#allocation31_spill] sm:$0xff]  ;;  %v12164_v29 = vstv %s12117_s19  ;;  %s12505_s19 = sld [smem:[#allocation10 + $0xcc]] }
 0x630   : > { %v4585_v3 = vadd.f32 %v4574_v49, %v4377_v37  ;;  %v4562_v41 = vadd.f32 %v4554_v46, %v4354_v45  ;;  %v3905_v57 = vadd.f32 %v14851_v18, %v14850_v43  ;;  %v4211_v27 = vadd.f32 %v11872_v11, %v4111_v23  ;;  %v14857_v45 = vld [vmem:[#allocation44_spill] sm:$0xff]  ;;  %v14861_v43 = vld [vmem:[#allocation114_spill] sm:$0xff] }
 0x631   : > { %5025 = vrot.lane.b32.xlu0 %v5015_v20, %s14427_s0  ;;  %5023 = vrot.lane.b32.xlu1 %v5014_v31, %s14427_s0  ;;  %v4699_v20 = vmul.f32 %v4696_v8, %v11687_v51  ;;  %v4698_v31 = vmul.f32 %v4696_v8, %v11685_v25  ;;  %v4112_v56 = vadd.f32 %v14857_v45, %v3904_v52  ;;  %v14862_v18 = vld [vmem:[#allocation94_spill] sm:$0xff] }
 0x632   : > { %v12143_v12 = vadd.f32 %v4697_v54, %v4585_v3  ;;  %v12145_v5 = vadd.f32 %v4690_v17, %v4562_v41  ;;  %v4113_v30 = vadd.f32 %v14856_v4, %v3905_v57  ;;  %v14858_v54 = vld [vmem:[#allocation89_spill] sm:$0xff]  ;;  %v5041_v11 = vmul.f32 %v12093_v60, %v11687_v51  ;;  %v14860_v3 = vld [vmem:[#allocation130_spill] sm:$0xff] }
 0x633   : > { %v4578_v47 = vpop.permute.xlu0 %4577  ;;  %v4576_v37 = vpop.permute.xlu1 %4575  ;;  %v14859_v17 = vld [vmem:[#allocation37_spill] sm:$0xff]  ;;  %v5040_v23 = vmul.f32 %v12093_v60, %v11685_v25  ;;  %v4403_v41 = vadd.f32 %v14860_v3, %v4211_v27  ;;  %v4380_v57 = vadd.f32 %v14862_v18, %v14861_v43  ;;  %v4707_v44 = vmul.f32 %v4706_v63, %v11675_v24  ;;  %v14865_v4 = vld [vmem:[#allocation38_spill] sm:$0xff]  ;;  %v14872_v18 = vld [vmem:[#allocation115_spill] sm:$0xff] }
 0x634   : > { %v4587_v49 = vadd.f32 %v4578_v47, %v4379_v1  ;;  %v4586_v46 = vadd.f32 %v4576_v37, %v4378_v61  ;;  %v3929_v13 = vadd.f32 %v14859_v17, %v14858_v54  ;;  %v5042_v1 = vmul.f32 %v12093_v60, %v11697_v39 }
 0x635   : > { %5047 = vrot.lane.b32.xlu0 %v5039_v35, %s14427_s0  ;;  %5027 = vrot.lane.b32.xlu1 %v5016_v40, %s14427_s0  ;;  %v14863_v35 = vld [vmem:[#allocation105_spill] sm:$0xff]  ;;  %v4700_v61 = vmul.f32 %v4696_v8, %v11697_v39  ;;  %v4213_v27 = vadd.f32 %v11882_v28, %v4113_v30  ;;  %v4212_v47 = vadd.f32 %v11886_v6, %v4112_v56  ;;  %v14868_v8 = vld [vmem:[#allocation50_spill] sm:$0xff]  ;;  %v14869_v30 = vld [vmem:[#allocation28_spill] sm:$0xff] }
 0x636   : > { %v12169_v55 = vadd.f32 %v4699_v20, %v4587_v49  ;;  %v12171_v32 = vadd.f32 %v4698_v31, %v4586_v46  ;;  %v4137_v52 = vadd.f32 %v14863_v35, %v3929_v13  ;;  %v14864_v31 = vld [vmem:[#allocation92_spill] sm:$0xff]  ;;  %v14866_v49 = vld [vmem:[#allocation95_spill] sm:$0xff]  ;;  %v14867_v46 = vld [vmem:[#allocation46_spill] sm:$0xff]  ;;  %v5065_v60 = vmul.f32 %v12164_v29, %v11675_v24 }
 0x637   : > { %v4600_v40 = vpop.permute.xlu0 %4599  ;;  %v4580_v7 = vpop.permute.xlu1 %4579  ;;  %v3931_v45 = vadd.f32 %v14865_v4, %v14864_v31  ;;  %v3930_v54 = vadd.f32 %v14867_v46, %v14866_v49  ;;  %v4405_v28 = vadd.f32 %v14868_v8, %v4213_v27  ;;  %v4404_v6 = vadd.f32 %v14869_v30, %v4212_v47  ;;  %v14873_v35 = vld [vmem:[#allocation32_spill] sm:$0xff]  ;;  %v7991_v47 = vld [vmem:[#allocation2 + $0x58] sm:$0xff]  ;;  %v14875_v31 = vld [vmem:[#allocation47_spill] sm:$0xff] }
 0x638   : > { %v4611_v37 = vadd.f32 %v4600_v40, %v4403_v41  ;;  %v4588_v20 = vadd.f32 %v4580_v7, %v4380_v57  ;;  %v4221_v13 = vadd.f32 %v11892_v0, %v4137_v52  ;;  %v4709_v43 = vmul.f32 %v4706_v63, %v11687_v51  ;;  %v14876_v4 = vld [vmem:[#allocation43_spill] sm:$0xff] }
 0x639   : > { %5051 = vrot.lane.b32.xlu0 %v5041_v11, %s14427_s0  ;;  %5049 = vrot.lane.b32.xlu1 %v5040_v23, %s14427_s0  ;;  %v4708_v11 = vmul.f32 %v4706_v63, %v11685_v25  ;;  %v4716_v23 = vstv %s12151_s20  ;;  %v4139_v57 = vadd.f32 %v14872_v18, %v3931_v45  ;;  %v4138_v40 = vadd.f32 %v14873_v35, %v3930_v54  ;;  %s12518_s20 = sld [smem:[#allocation10 + $0xaa]] }
 0x63a   : > { %v12192_v56 = vadd.f32 %v4707_v44, %v4611_v37  ;;  %v12194_v17 = vadd.f32 %v4700_v61, %v4588_v20  ;;  %v7990_v44 = vld [vmem:[#allocation2 + $0x60] sm:$0xff]  ;;  %v4218_v0 = vmul.f32 %v7991_v47, %v11653_v33  ;;  %v5067_v52 = vmul.f32 %v12164_v29, %v11687_v51  ;;  %v14874_v37 = vld [vmem:[#allocation35_spill] sm:$0xff] }
 0x63b   : > { %v4604_v3 = vpop.permute.xlu0 %4603  ;;  %v4602_v41 = vpop.permute.xlu1 %4601  ;;  %v4219_v61 = vmul.f32 %v7990_v44, %v11653_v33  ;;  %v4429_v20 = vadd.f32 %v14874_v37, %v4221_v13  ;;  %v4406_v45 = vadd.f32 %v14876_v4, %v14875_v31  ;;  %v5066_v33 = vmul.f32 %v12164_v29, %v11685_v25 }
 0x63c   : > { %14870 = vst [vmem:[#allocation63_spill] sm:$0xff] %v12192_v56  ;;  %14871 = vst [vmem:[#allocation99_spill] sm:$0xff] %v12194_v17  ;;  %v4613_v7 = vadd.f32 %v4604_v3, %v4405_v28  ;;  %v4612_v27 = vadd.f32 %v4602_v41, %v4404_v6  ;;  %v4710_v28 = vmul.f32 %v4706_v63, %v11697_v39  ;;  %v14879_v41 = vld [vmem:[#allocation131_spill] sm:$0xff]  ;;  %v5408_v17 = vstv %s7591_s9  ;;  %s7613_s9 = sld [smem:[#allocation10 + $0xd0]] }
 0x63d   : > { %5073 = vrot.lane.b32.xlu0 %v5065_v60, %s14427_s0  ;;  %5053 = vrot.lane.b32.xlu1 %v5042_v1, %s14427_s0  ;;  %v5090_v60 = vstv %s12176_s8  ;;  %v4717_v1 = vmul.f32 %v4716_v23, %v11675_v24  ;;  %v4223_v30 = vadd.f32 %v4219_v61, %v4139_v57  ;;  %v4222_v6 = vadd.f32 %v4218_v0, %v4138_v40  ;;  %s12539_s8 = sld [smem:[#allocation10 + $0xf0]] }
 0x63e   : > { %v12211_v49 = vadd.f32 %v4709_v43, %v4613_v7  ;;  %v12213_v46 = vadd.f32 %v4708_v11, %v4612_v27  ;;  %v14880_v11 = vld [vmem:[#allocation97_spill] sm:$0xff]  ;;  %v5091_v63 = vmul.f32 %v5090_v60, %v11675_v24  ;;  %v5068_v57 = vmul.f32 %v12164_v29, %v11697_v39 }
 0x63f   : > { %v4626_v54 = vpop.permute.xlu0 %4625  ;;  %v4606_v8 = vpop.permute.xlu1 %4605  ;;  %v4431_v43 = vadd.f32 %v14879_v41, %v4223_v30  ;;  %v4430_v18 = vadd.f32 %v14880_v11, %v4222_v6  ;;  %v4719_v47 = vmul.f32 %v4716_v23, %v11687_v51  ;;  %v4718_v0 = vmul.f32 %v4716_v23, %v11685_v25  ;;  %v12264_v11 = vld [vmem:[#allocation2 + $0x52] sm:$0xff] }
 0x640   : > { %14877 = vst [vmem:[#allocation55_spill] sm:$0xff] %v12211_v49  ;;  %14878 = vst [vmem:[#allocation107_spill] sm:$0xff] %v12213_v46  ;;  %v4637_v13 = vadd.f32 %v4626_v54, %v4429_v20  ;;  %v4614_v3 = vadd.f32 %v4606_v8, %v4406_v45  ;;  %v5093_v45 = vmul.f32 %v5090_v60, %v11687_v51 }
 0x641   : > { %5077 = vrot.lane.b32.xlu0 %v5067_v52, %s14427_s0  ;;  %5075 = vrot.lane.b32.xlu1 %v5066_v33, %s14427_s0  ;;  %v14883_v52 = vld [vmem:[#allocation71_spill] sm:$0xff]  ;;  %v5092_v54 = vmul.f32 %v5090_v60, %v11685_v25  ;;  %v5116_v33 = vstv %s7575_s12  ;;  %s12552_s12 = sld [smem:[#allocation10 + $0xce]] }
 0x642   : > { %v12224_v35 = vadd.f32 %v4717_v1, %v4637_v13  ;;  %v12226_v7 = vadd.f32 %v4710_v28, %v4614_v3  ;;  %v4432_v37 = vadd.f32 %v11894_v15, %v14883_v52  ;;  %v4720_v1 = vmul.f32 %v4716_v23, %v11697_v39  ;;  %v12288_v52 = vld [vmem:[#allocation2 + $0x6a] sm:$0xff] }
 0x643   : > { %v4630_v27 = vpop.permute.xlu0 %4629  ;;  %v4628_v44 = vpop.permute.xlu1 %4627  ;;  %v5117_v6 = vmul.f32 %v5116_v33, %v11675_v24  ;;  %v5094_v13 = vmul.f32 %v5090_v60, %v11697_v39  ;;  %v5119_v41 = vmul.f32 %v5116_v33, %v11687_v51  ;;  %v12275_v51 = vld [vmem:[#allocation2 + $0x5a] sm:$0xff] }
 0x644   : > { %14881 = vst [vmem:[#allocation100_spill] sm:$0xff] %v12224_v35  ;;  %14882 = vst [vmem:[#allocation69_spill] sm:$0xff] %v12226_v7  ;;  %v4639_v40 = vadd.f32 %v4630_v27, %v4431_v43  ;;  %v4638_v61 = vadd.f32 %v4628_v44, %v4430_v18  ;;  %v5118_v43 = vmul.f32 %v5116_v33, %v11685_v25  ;;  %v5226_v18 = vstv %s7584_s23  ;;  %v12277_v25 = vld [vmem:[#allocation2 + $0x62] sm:$0xff]  ;;  %s12573_s23 = sld [smem:[#allocation10 + $0x114]] }
 0x645   : > { %5099 = vrot.lane.b32.xlu0 %v5091_v63, %s14427_s0  ;;  %5079 = vrot.lane.b32.xlu1 %v5068_v57, %s14427_s0  ;;  %v5227_v44 = vmul.f32 %v5226_v18, %v12264_v11  ;;  %v5120_v63 = vmul.f32 %v5116_v33, %v11697_v39  ;;  %v5228_v39 = vmul.f32 %v5226_v18, %v12275_v51  ;;  %v5356_v7 = vstv %s7589_s26  ;;  %s7610_s26 = sld [smem:[#allocation10 + $0x64]] }
 0x646   : > { %v12237_v20 = vadd.f32 %v4719_v47, %v4639_v40  ;;  %v12239_v31 = vadd.f32 %v4718_v0, %v4638_v61  ;;  %v5229_v0 = vmul.f32 %v5226_v18, %v12277_v25 }
 0x647   : > { %v12241_v4 = vpop.permute.xlu0 %4735  ;;  %v4632_v29 = vpop.permute.xlu1 %4631 }
 0x648   : > { %14884 = vst [vmem:[#allocation39_spill] sm:$0xff] %v12237_v20  ;;  %14885 = vst [vmem:[#allocation123_spill] sm:$0xff] %v12239_v31  ;;  %v4640_v8 = vadd.f32 %v4632_v29, %v4432_v37  ;;  %v5252_v37 = vstv %s7585_s13  ;;  %s7598_s13 = sld [smem:[#allocation10 + $0xf2]] }
 0x649   : > { %5103 = vrot.lane.b32.xlu0 %v5093_v45, %s14427_s0  ;;  %5101 = vrot.lane.b32.xlu1 %v5092_v54, %s14427_s0  ;;  %v5253_v33 = vmul.f32 %v5252_v37, %v12264_v11 }
 0x64a   : > { %v12248_v15 = vadd.f32 %v4720_v1, %v4640_v8  ;;  %v5230_v1 = vmul.f32 %v5226_v18, %v12288_v52 }
 0x64b   : > { %v12250_v28 = vpop.permute.xlu0 %4739  ;;  %v12252_v30 = vpop.permute.xlu1 %4737 }
 0x64c   : > { %14886 = vst [vmem:[#allocation125_spill] sm:$0xff] %v12248_v15 }
 0x64d   : > { %5125 = vrot.lane.b32.xlu0 %v5117_v6, %s14427_s0  ;;  %5105 = vrot.lane.b32.xlu1 %v5094_v13, %s14427_s0 }
 0x64f   : > { %v12258_v3 = vpop.permute.xlu0 %4761  ;;  %v12260_v23 = vpop.permute.xlu1 %4741 }
 0x651   : > { %5129 = vrot.lane.b32.xlu0 %v5119_v41, %s14427_s0  ;;  %5127 = vrot.lane.b32.xlu1 %v5118_v43, %s14427_s0  ;;  %v1095_v24 = vpop.f32.mrb[14].mxu0 }
 0x652   : > { %1120 = vst.msk [vmem:[#allocation2 + $0x78] sm:$0xff] %vm545_vm10, %v1095_v24  ;;  %v7842_v57 = vpop.f32.mrb[15].mxu0  ;;  %v5255_v24 = vmul.f32 %v5252_v37, %v12277_v25 }
 0x653   : > { %v12268_v60 = vpop.permute.xlu0 %4765  ;;  %v12270_v27 = vpop.permute.xlu1 %4763 }
 0x655   : > { %5235 = vrot.lane.b32.xlu0 %v5227_v44, %s14418_s6  ;;  %5131 = vrot.lane.b32.xlu1 %v5120_v63, %s14427_s0  ;;  %v1100_v40 = vpop.f32.mrb[16].mxu0  ;;  %v5254_v44 = vmul.f32 %v5252_v37, %v12275_v51  ;;  %v5278_v63 = vstv %s7586_s16  ;;  %s7599_s16 = sld [smem:[#allocation10 + $0x116]] }
 0x656   : > { %1121 = vst.msk [vmem:[#allocation2 + $0x80] sm:$0xff] %vm545_vm10, %v1100_v40  ;;  %v7845_v29 = vpop.f32.mrb[17].mxu0 }
 0x657   : > { %v12281_v61 = vpop.permute.xlu0 %4787  ;;  %v12283_v47 = vpop.permute.xlu1 %4767  ;;  %v5256_v29 = vmul.f32 %v5252_v37, %v12288_v52 }
 0x659   : > { %5239 = vrot.lane.b32.xlu0 %v5229_v0, %s14418_s6  ;;  %5237 = vrot.lane.b32.xlu1 %v5228_v39, %s14418_s6  ;;  %v1105_v45 = vpop.f32.mrb[18].mxu0  ;;  %v5279_v39 = vmul.f32 %v5278_v63, %v12264_v11 }
 0x65a   : > { %1122 = vst.msk [vmem:[#allocation2 + $0x88] sm:$0xff] %vm545_vm10, %v1105_v45  ;;  %v7848_v6 = vpop.f32.mrb[19].mxu0 }
 0x65b   : > { %v12292_v54 = vpop.permute.xlu0 %4791  ;;  %v12294_v8 = vpop.permute.xlu1 %4789  ;;  %v5281_v6 = vmul.f32 %v5278_v63, %v12277_v25 }
 0x65d   : > { %5261 = vrot.lane.b32.xlu0 %v5253_v33, %s14418_s6  ;;  %5241 = vrot.lane.b32.xlu1 %v5230_v1, %s14418_s6  ;;  %v1110_v13 = vpop.f32.mrb[20].mxu0 }
 0x65e   : > { %1123 = vst.msk [vmem:[#allocation2 + $0x90] sm:$0xff] %vm545_vm10, %v1110_v13  ;;  %v7851_v18 = vpop.f32.mrb[21].mxu0  ;;  %v5280_v13 = vmul.f32 %v5278_v63, %v12275_v51 }
 0x65f   : > { %v12301_v41 = vpop.permute.xlu0 %4813  ;;  %v12303_v43 = vpop.permute.xlu1 %4793 }
 0x661   : > { %5265 = vrot.lane.b32.xlu0 %v5255_v24, %s14418_s6  ;;  %5263 = vrot.lane.b32.xlu1 %v5254_v44, %s14418_s6  ;;  %v1115_v57 = vpop.f32.mrb[22].mxu0  ;;  %v5304_v24 = vstv %s7587_s11  ;;  %s7608_s11 = sld [smem:[#allocation10 + $0x1c]] }
 0x662   : > { %1124 = vst.msk [vmem:[#allocation2 + $0x98] sm:$0x3] %vm550_vm11, %v1115_v57  ;;  %v7854_v45 = vpop.f32.mrb[23].mxu0  ;;  %v5305_v18 = vmul.f32 %v5304_v24, %v12264_v11  ;;  %v5282_v57 = vmul.f32 %v5278_v63, %v12288_v52 }
 0x663   : > { %v12310_v40 = vpop.permute.xlu0 %4817  ;;  %v12312_v0 = vpop.permute.xlu1 %4815  ;;  %v5307_v45 = vmul.f32 %v5304_v24, %v12277_v25 }
 0x665   : > { %5287 = vrot.lane.b32.xlu0 %v5279_v39, %s14418_s6  ;;  %5267 = vrot.lane.b32.xlu1 %v5256_v29, %s14418_s6 }
 0x667   : > { %v12319_v33 = vpop.permute.xlu0 %4839  ;;  %v12321_v1 = vpop.permute.xlu1 %4819 }
 0x669   : > { %5291 = vrot.lane.b32.xlu0 %v5281_v6, %s14418_s6  ;;  %5289 = vrot.lane.b32.xlu1 %v5280_v13, %s14418_s6  ;;  %v5306_v6 = vmul.f32 %v5304_v24, %v12275_v51  ;;  %v5330_v13 = vstv %s7588_s24  ;;  %s7609_s24 = sld [smem:[#allocation10 + $0x40]] }
 0x66b   : > { %v12327_v37 = vpop.permute.xlu0 %4843  ;;  %v12329_v44 = vpop.permute.xlu1 %4841 }
 0x66d   : > { %5313 = vrot.lane.b32.xlu0 %v5305_v18, %s14418_s6  ;;  %5293 = vrot.lane.b32.xlu1 %v5282_v57, %s14418_s6  ;;  %v5331_v18 = vmul.f32 %v5330_v13, %v12264_v11  ;;  %v5308_v57 = vmul.f32 %v5304_v24, %v12288_v52 }
 0x66f   : > { %v12335_v39 = vpop.permute.xlu0 %4865  ;;  %v12337_v29 = vpop.permute.xlu1 %4845 }
 0x671   : > { %5317 = vrot.lane.b32.xlu0 %v5307_v45, %s14418_s6  ;;  %5315 = vrot.lane.b32.xlu1 %v5306_v6, %s14418_s6  ;;  %v5333_v45 = vmul.f32 %v5330_v13, %v12277_v25  ;;  %v5332_v6 = vmul.f32 %v5330_v13, %v12275_v51 }
 0x673   : > { %v12343_v15 = vpop.permute.xlu0 %4869  ;;  %v12345_v63 = vpop.permute.xlu1 %4867 }
 0x675   : > { %5339 = vrot.lane.b32.xlu0 %v5331_v18, %s14418_s6  ;;  %5319 = vrot.lane.b32.xlu1 %v5308_v57, %s14418_s6  ;;  %v5357_v18 = vmul.f32 %v5356_v7, %v12264_v11  ;;  %v5334_v57 = vmul.f32 %v5330_v13, %v12288_v52 }
 0x677   : > { %v12351_v31 = vpop.permute.xlu0 %4891  ;;  %v12353_v20 = vpop.permute.xlu1 %4871 }
 0x678   : > { %14887 = vst [vmem:[#allocation126_spill] sm:$0xff] %v12351_v31  ;;  %14888 = vst [vmem:[#allocation41_spill] sm:$0xff] %v12353_v20  ;;  %v5409_v31 = vmul.f32 %v5408_v17, %v12264_v11 }
 0x679   : > { %5343 = vrot.lane.b32.xlu0 %v5333_v45, %s14418_s6  ;;  %5341 = vrot.lane.b32.xlu1 %v5332_v6, %s14418_s6  ;;  %v5359_v45 = vmul.f32 %v5356_v7, %v12277_v25  ;;  %v5358_v6 = vmul.f32 %v5356_v7, %v12275_v51 }
 0x67b   : > { %v12359_v35 = vpop.permute.xlu0 %4895  ;;  %v12361_v24 = vpop.permute.xlu1 %4893 }
 0x67c   : > { %14889 = vst [vmem:[#allocation127_spill] sm:$0xff] %v12359_v35  ;;  %14890 = vst [vmem:[#allocation45_spill] sm:$0xff] %v12361_v24  ;;  %v5382_v35 = vstv %s7590_s29  ;;  %v4747_v24 = vadd.f32 %v12241_v4, %v11911_v58  ;;  %v4748_v58 = vadd.f32 %v12252_v30, %v11933_v48  ;;  %v4773_v48 = vadd.f32 %v12258_v3, %v11955_v42  ;;  %s7611_s29 = sld [smem:[#allocation10 + $0x88]] }
 0x67d   : > { %5365 = vrot.lane.b32.xlu0 %v5357_v18, %s14418_s6  ;;  %5345 = vrot.lane.b32.xlu1 %v5334_v57, %s14418_s6  ;;  %v5383_v57 = vmul.f32 %v5382_v35, %v12264_v11 }
 0x67f   : > { %v12367_v46 = vpop.permute.xlu0 %4917  ;;  %v12369_v49 = vpop.permute.xlu1 %4897 }
 0x680   : > { %14891 = vst [vmem:[#allocation75_spill] sm:$0xff] %v12367_v46  ;;  %14892 = vst [vmem:[#allocation60_spill] sm:$0xff] %v12369_v49  ;;  %v5360_v46 = vmul.f32 %v5356_v7, %v12288_v52  ;;  %v5146_v49 = vstv %s7576_s30  ;;  %s7612_s30 = sld [smem:[#allocation10 + $0xac]] }
 0x681   : > { %5369 = vrot.lane.b32.xlu0 %v5359_v45, %s14418_s6  ;;  %5367 = vrot.lane.b32.xlu1 %v5358_v6, %s14418_s6  ;;  %v5385_v6 = vmul.f32 %v5382_v35, %v12277_v25  ;;  %v5147_v7 = vmul.f32 %v5146_v49, %v12264_v11  ;;  %v5150_v3 = vmul.f32 %v5146_v49, %v12288_v52 }
 0x683   : > { %v12375_v13 = vpop.permute.xlu0 %4921  ;;  %v12377_v18 = vpop.permute.xlu1 %4919 }
 0x684   : > { %14893 = vst [vmem:[#allocation61_spill] sm:$0xff] %v12375_v13  ;;  %14894 = vst [vmem:[#allocation72_spill] sm:$0xff] %v12377_v18  ;;  %v5384_v18 = vmul.f32 %v5382_v35, %v12275_v51 }
 0x685   : > { %5391 = vrot.lane.b32.xlu0 %v5383_v57, %s14418_s6  ;;  %5371 = vrot.lane.b32.xlu1 %v5360_v46, %s14418_s6  ;;  %v4749_v46 = vadd.f32 %v12250_v28, %v11931_v10  ;;  %v5156_v10 = vstv %s7577_s7  ;;  %v4750_v28 = vadd.f32 %v12260_v23, %v11957_v38  ;;  %v4775_v38 = vadd.f32 %v12268_v60, %v11976_v21  ;;  %s7614_s7 = sld [smem:[#allocation10 + $0xf4]] }
 0x686   : > { %v5157_v42 = vmul.f32 %v5156_v10, %v12264_v11  ;;  %v5158_v21 = vmul.f32 %v5156_v10, %v12275_v51  ;;  %v4799_v60 = vadd.f32 %v12281_v61, %v12001_v14  ;;  %v5160_v61 = vmul.f32 %v5156_v10, %v12288_v52 }
 0x687   : > { %v4944_v45 = vpop.permute.xlu0 %4943  ;;  %v12385_v20 = vpop.permute.xlu1 %4923 }
 0x688   : > { %14895 = vst [vmem:[#allocation64_spill] sm:$0xff] %v12385_v20  ;;  %v4955_v13 = vadd.f32 %v4944_v45, %v4747_v24  ;;  %v5386_v24 = vmul.f32 %v5382_v35, %v12288_v52 }
 0x689   : > { %5395 = vrot.lane.b32.xlu0 %v5385_v6, %s14418_s6  ;;  %5393 = vrot.lane.b32.xlu1 %v5384_v18, %s14418_s6  ;;  %v5149_v6 = vmul.f32 %v5146_v49, %v12277_v25  ;;  %v5148_v18 = vmul.f32 %v5146_v49, %v12275_v51  ;;  %v5412_v49 = vmul.f32 %v5408_v17, %v12288_v52 }
 0x68a   : > { %v12396_v4 = vadd.f32 %v5147_v7, %v4955_v13  ;;  %v5411_v7 = vmul.f32 %v5408_v17, %v12277_v25 }
 0x68b   : > { %v4948_v57 = vpop.permute.xlu0 %4947  ;;  %v4946_v20 = vpop.permute.xlu1 %4945 }
 0x68c   : > { %v4957_v45 = vadd.f32 %v4948_v57, %v4749_v46  ;;  %v4956_v56 = vadd.f32 %v4946_v20, %v4748_v58  ;;  %v5434_v46 = vstv %s7592_s10  ;;  %s7615_s10 = sld [smem:[#allocation10 + $0x118]] }
 0x68d   : > { %5417 = vrot.lane.b32.xlu0 %v5409_v31, %s14418_s6  ;;  %5397 = vrot.lane.b32.xlu1 %v5386_v24, %s14418_s6  ;;  %v5410_v31 = vmul.f32 %v5408_v17, %v12275_v51  ;;  %v4776_v17 = vadd.f32 %v12283_v47, %v12003_v53  ;;  %v4801_v53 = vadd.f32 %v12292_v54, %v12024_v19 }
 0x68e   : > { %v12410_v35 = vadd.f32 %v5149_v6, %v4957_v45  ;;  %v12412_v20 = vadd.f32 %v5148_v18, %v4956_v56  ;;  %v4774_v56 = vadd.f32 %v12270_v27, %v11978_v16  ;;  %v5435_v18 = vmul.f32 %v5434_v46, %v12264_v11 }
 0x68f   : > { %v4970_v30 = vpop.permute.xlu0 %4969  ;;  %v4950_v13 = vpop.permute.xlu1 %4949  ;;  %v5166_v16 = vstv %s12404_s27  ;;  %v4800_v47 = vadd.f32 %v12294_v8, %v12026_v26  ;;  %v5176_v26 = vstv %s12437_s1  ;;  %v4825_v54 = vadd.f32 %v12301_v41, %v12050_v34  ;;  %s7600_s27 = sld [smem:[#allocation10 + $0x1b]]  ;;  %s7601_s1 = sld [smem:[#allocation10 + $0x3f]] }
 0x690   : > { %v4981_v58 = vadd.f32 %v4970_v30, %v4773_v48  ;;  %v4958_v57 = vadd.f32 %v4950_v13, %v4750_v28  ;;  %v5159_v30 = vmul.f32 %v5156_v10, %v12277_v25  ;;  %v5167_v14 = vmul.f32 %v5166_v16, %v12264_v11 }
 0x691   : > { %5421 = vrot.lane.b32.xlu0 %v5411_v7, %s14418_s6  ;;  %5419 = vrot.lane.b32.xlu1 %v5410_v31, %s14418_s6  ;;  %v5438_v10 = vmul.f32 %v5434_v46, %v12288_v52  ;;  %v5168_v19 = vmul.f32 %v5166_v16, %v12275_v51  ;;  %v4802_v8 = vadd.f32 %v12303_v43, %v12052_v59 }
 0x692   : > { %v12426_v23 = vadd.f32 %v5157_v42, %v4981_v58  ;;  %v12428_v24 = vadd.f32 %v5150_v3, %v4958_v57  ;;  %v5437_v58 = vmul.f32 %v5434_v46, %v12277_v25  ;;  %v5436_v57 = vmul.f32 %v5434_v46, %v12275_v51 }
 0x693   : > { %v4974_v45 = vpop.permute.xlu0 %4973  ;;  %v4972_v6 = vpop.permute.xlu1 %4971  ;;  %v5460_v42 = vstv %s12416_s28  ;;  %v5177_v34 = vmul.f32 %v5176_v26, %v12264_v11  ;;  %v5170_v41 = vmul.f32 %v5166_v16, %v12288_v52  ;;  %v4827_v59 = vadd.f32 %v12310_v40, %v12073_v36  ;;  %s7616_s28 = sld [smem:[#allocation10 + $0x1d]] }
 0x694   : > { %v4983_v48 = vadd.f32 %v4974_v45, %v4775_v38  ;;  %v4982_v28 = vadd.f32 %v4972_v6, %v4774_v56  ;;  %v4826_v43 = vadd.f32 %v12312_v0, %v12075_v9  ;;  %v5178_v36 = vmul.f32 %v5176_v26, %v12275_v51 }
 0x695   : > { %5443 = vrot.lane.b32.xlu0 %v5435_v18, %s14427_s0  ;;  %5423 = vrot.lane.b32.xlu1 %v5412_v49, %s14418_s6  ;;  %v5461_v49 = vmul.f32 %v5460_v42, %v12264_v11  ;;  %v5186_v9 = vstv %s12471_s3  ;;  %v4851_v40 = vadd.f32 %v12319_v33, %v12097_v50  ;;  %v4828_v0 = vadd.f32 %v12321_v1, %v12099_v2  ;;  %s7602_s3 = sld [smem:[#allocation10 + $0x63]] }
 0x696   : > { %v12443_v27 = vadd.f32 %v5159_v30, %v4983_v48  ;;  %v12445_v13 = vadd.f32 %v5158_v21, %v4982_v28  ;;  %v5169_v30 = vmul.f32 %v5166_v16, %v12277_v25  ;;  %v5464_v16 = vmul.f32 %v5460_v42, %v12288_v52 }
 0x697   : > { %v4996_v7 = vpop.permute.xlu0 %4995  ;;  %v4976_v31 = vpop.permute.xlu1 %4975  ;;  %v5187_v50 = vmul.f32 %v5186_v9, %v12264_v11  ;;  %v5180_v33 = vmul.f32 %v5176_v26, %v12288_v52  ;;  %v4853_v2 = vadd.f32 %v12327_v37, %v12122_v62  ;;  %v4852_v1 = vadd.f32 %v12329_v44, %v12124_v22 }
 0x698   : > { %v5007_v3 = vadd.f32 %v4996_v7, %v4799_v60  ;;  %v4984_v38 = vadd.f32 %v4976_v31, %v4776_v17  ;;  %v5463_v7 = vmul.f32 %v5460_v42, %v12277_v25  ;;  %v5462_v31 = vmul.f32 %v5460_v42, %v12275_v51 }
 0x699   : > { %5447 = vrot.lane.b32.xlu0 %v5437_v58, %s14427_s0  ;;  %5445 = vrot.lane.b32.xlu1 %v5436_v57, %s14427_s0  ;;  %v5486_v58 = vstv %s12450_s2  ;;  %v5188_v62 = vmul.f32 %v5186_v9, %v12275_v51  ;;  %v5196_v22 = vstv %s12505_s19  ;;  %v4877_v37 = vadd.f32 %v12335_v39, %v12143_v12  ;;  %s7617_s2 = sld [smem:[#allocation10 + $0x41]]  ;;  %s7603_s19 = sld [smem:[#allocation10 + $0x87]] }
 0x69a   : > { %v12460_v56 = vadd.f32 %v5167_v14, %v5007_v3  ;;  %v12462_v45 = vadd.f32 %v5160_v61, %v4984_v38  ;;  %v4854_v44 = vadd.f32 %v12337_v29, %v12145_v5  ;;  %v5197_v12 = vmul.f32 %v5196_v22, %v12264_v11 }
 0x69b   : > { %v5000_v6 = vpop.permute.xlu0 %4999  ;;  %v4998_v18 = vpop.permute.xlu1 %4997  ;;  %v5190_v39 = vmul.f32 %v5186_v9, %v12288_v52  ;;  %v4879_v5 = vadd.f32 %v12343_v15, %v12169_v55  ;;  %v4878_v29 = vadd.f32 %v12345_v63, %v12171_v32  ;;  %v5198_v55 = vmul.f32 %v5196_v22, %v12275_v51  ;;  %v14902_v15 = vld [vmem:[#allocation63_spill] sm:$0xff]  ;;  %v14903_v63 = vld [vmem:[#allocation126_spill] sm:$0xff] }
 0x69c   : > { %v5009_v48 = vadd.f32 %v5000_v6, %v4801_v53  ;;  %v5008_v28 = vadd.f32 %v4998_v18, %v4800_v47  ;;  %v5487_v47 = vmul.f32 %v5486_v58, %v12264_v11  ;;  %v5206_v32 = vstv %s12539_s8  ;;  %s7604_s8 = sld [smem:[#allocation10 + $0xab]] }
 0x69d   : > { %5469 = vrot.lane.b32.xlu0 %v5461_v49, %s14427_s0  ;;  %5449 = vrot.lane.b32.xlu1 %v5438_v10, %s14427_s0  ;;  %v5179_v49 = vmul.f32 %v5176_v26, %v12277_v25  ;;  %v5490_v26 = vmul.f32 %v5486_v58, %v12288_v52 }
 0x69e   : > { %v12477_v46 = vadd.f32 %v5169_v30, %v5009_v48  ;;  %v12479_v21 = vadd.f32 %v5168_v19, %v5008_v28  ;;  %v5489_v30 = vmul.f32 %v5486_v58, %v12277_v25  ;;  %v5488_v19 = vmul.f32 %v5486_v58, %v12275_v51 }
 0x69f   : > { %v5022_v60 = vpop.permute.xlu0 %5021  ;;  %v5002_v17 = vpop.permute.xlu1 %5001 }
 0x6a0   : > { %v5033_v57 = vadd.f32 %v5022_v60, %v4825_v54  ;;  %v5010_v3 = vadd.f32 %v5002_v17, %v4802_v8  ;;  %v5512_v54 = vstv %s12484_s4  ;;  %s7618_s4 = sld [smem:[#allocation10 + $0x65]] }
 0x6a1   : > { %5473 = vrot.lane.b32.xlu0 %v5463_v7, %s14427_s0  ;;  %5471 = vrot.lane.b32.xlu1 %v5462_v31, %s14427_s0 }
 0x6a2   : > { %v12494_v38 = vadd.f32 %v5177_v34, %v5033_v57  ;;  %v12496_v14 = vadd.f32 %v5170_v41, %v5010_v3  ;;  %v5513_v3 = vmul.f32 %v5512_v54, %v12264_v11 }
 0x6a3   : > { %v5026_v61 = vpop.permute.xlu0 %5025  ;;  %v5024_v53 = vpop.permute.xlu1 %5023 }
 0x6a4   : > { %v5035_v6 = vadd.f32 %v5026_v61, %v4827_v59  ;;  %v5034_v18 = vadd.f32 %v5024_v53, %v4826_v43  ;;  %v5189_v59 = vmul.f32 %v5186_v9, %v12277_v25  ;;  %v5516_v9 = vmul.f32 %v5512_v54, %v12288_v52 }
 0x6a5   : > { %5495 = vrot.lane.b32.xlu0 %v5487_v47, %s14427_s0  ;;  %5475 = vrot.lane.b32.xlu1 %v5464_v16, %s14427_s0  ;;  %v5515_v47 = vmul.f32 %v5512_v54, %v12277_v25  ;;  %v5514_v16 = vmul.f32 %v5512_v54, %v12275_v51 }
 0x6a6   : > { %v12511_v42 = vadd.f32 %v5179_v49, %v5035_v6  ;;  %v12513_v10 = vadd.f32 %v5178_v36, %v5034_v18  ;;  %v5538_v6 = vstv %s12518_s20  ;;  %s7619_s20 = sld [smem:[#allocation10 + $0x89]] }
 0x6a7   : > { %v5048_v48 = vpop.permute.xlu0 %5047  ;;  %v5028_v28 = vpop.permute.xlu1 %5027 }
 0x6a8   : > { %14896 = vst [vmem:[#allocation73_spill] sm:$0xff] %v12511_v42  ;;  %14897 = vst [vmem:[#allocation76_spill] sm:$0xff] %v12513_v10  ;;  %v5059_v8 = vadd.f32 %v5048_v48, %v4851_v40  ;;  %v5036_v60 = vadd.f32 %v5028_v28, %v4828_v0  ;;  %v5539_v28 = vmul.f32 %v5538_v6, %v12264_v11 }
 0x6a9   : > { %5499 = vrot.lane.b32.xlu0 %v5489_v30, %s14427_s0  ;;  %5497 = vrot.lane.b32.xlu1 %v5488_v19, %s14427_s0 }
 0x6aa   : > { %v12528_v17 = vadd.f32 %v5187_v50, %v5059_v8  ;;  %v12530_v7 = vadd.f32 %v5180_v33, %v5036_v60  ;;  %v5199_v8 = vmul.f32 %v5196_v22, %v12277_v25  ;;  %v4903_v60 = vadd.f32 %v14903_v63, %v14902_v15  ;;  %v14904_v50 = vld [vmem:[#allocation99_spill] sm:$0xff]  ;;  %v14905_v33 = vld [vmem:[#allocation41_spill] sm:$0xff]  ;;  %v14916_v63 = vld [vmem:[#allocation60_spill] sm:$0xff] }
 0x6ab   : > { %v5052_v31 = vpop.permute.xlu0 %5051  ;;  %v5050_v57 = vpop.permute.xlu1 %5049  ;;  %v4880_v54 = vadd.f32 %v14905_v33, %v14904_v50  ;;  %v14915_v15 = vld [vmem:[#allocation69_spill] sm:$0xff] }
 0x6ac   : > { %14898 = vst [vmem:[#allocation59_spill] sm:$0xff] %v12528_v17  ;;  %v5061_v34 = vadd.f32 %v5052_v31, %v4853_v2  ;;  %v5060_v41 = vadd.f32 %v5050_v57, %v4852_v1 }
 0x6ad   : > { %5521 = vrot.lane.b32.xlu0 %v5513_v3, %s14427_s0  ;;  %5501 = vrot.lane.b32.xlu1 %v5490_v26, %s14427_s0  ;;  %v5541_v3 = vmul.f32 %v5538_v6, %v12277_v25  ;;  %v5540_v26 = vmul.f32 %v5538_v6, %v12275_v51 }
 0x6ae   : > { %v12545_v58 = vadd.f32 %v5189_v59, %v5061_v34  ;;  %v12547_v43 = vadd.f32 %v5188_v62, %v5060_v41  ;;  %v5564_v34 = vstv %s12552_s12  ;;  %v5207_v62 = vmul.f32 %v5206_v32, %v12264_v11  ;;  %s7620_s12 = sld [smem:[#allocation10 + $0xad]] }
 0x6af   : > { %v5074_v61 = vpop.permute.xlu0 %5073  ;;  %v5054_v53 = vpop.permute.xlu1 %5053 }
 0x6b0   : > { %14899 = vst [vmem:[#allocation77_spill] sm:$0xff] %v12545_v58  ;;  %14900 = vst [vmem:[#allocation62_spill] sm:$0xff] %v12547_v43  ;;  %v5085_v18 = vadd.f32 %v5074_v61, %v4877_v37  ;;  %v5062_v49 = vadd.f32 %v5054_v53, %v4854_v44  ;;  %v5200_v37 = vmul.f32 %v5196_v22, %v12288_v52  ;;  %v14908_v44 = vld [vmem:[#allocation55_spill] sm:$0xff]  ;;  %v5960_v58 = vstv %s7617_s2  ;;  %s13090_s2 = sld [smem:[#allocation10 + $0x11b]] }
 0x6b1   : > { %5525 = vrot.lane.b32.xlu0 %v5515_v47, %s14427_s0  ;;  %5523 = vrot.lane.b32.xlu1 %v5514_v16, %s14427_s0  ;;  %v14909_v61 = vld [vmem:[#allocation127_spill] sm:$0xff]  ;;  %v14911_v16 = vld [vmem:[#allocation45_spill] sm:$0xff]  ;;  %v5542_v22 = vmul.f32 %v5538_v6, %v12288_v52 }
 0x6b2   : > { %v12562_v36 = vadd.f32 %v5197_v12, %v5085_v18  ;;  %v12564_v40 = vadd.f32 %v5190_v39, %v5062_v49  ;;  %v4905_v53 = vadd.f32 %v14909_v61, %v14908_v44  ;;  %v14910_v47 = vld [vmem:[#allocation107_spill] sm:$0xff]  ;;  %v14920_v44 = vld [vmem:[#allocation61_spill] sm:$0xff] }
 0x6b3   : > { %v5078_v0 = vpop.permute.xlu0 %5077  ;;  %v5076_v48 = vpop.permute.xlu1 %5075  ;;  %v4904_v18 = vadd.f32 %v14911_v16, %v14910_v47  ;;  %v14922_v47 = vld [vmem:[#allocation72_spill] sm:$0xff] }
 0x6b4   : > { %14901 = vst [vmem:[#allocation66_spill] sm:$0xff] %v12562_v36  ;;  %v5087_v30 = vadd.f32 %v5078_v0, %v4879_v5  ;;  %v5086_v19 = vadd.f32 %v5076_v48, %v4878_v29  ;;  %v5565_v29 = vmul.f32 %v5564_v34, %v12264_v11 }
 0x6b5   : > { %5547 = vrot.lane.b32.xlu0 %v5539_v28, %s14427_s0  ;;  %5527 = vrot.lane.b32.xlu1 %v5516_v9, %s14427_s0  ;;  %v5209_v28 = vmul.f32 %v5206_v32, %v12277_v25  ;;  %v5208_v9 = vmul.f32 %v5206_v32, %v12275_v51 }
 0x6b6   : > { %v12579_v2 = vadd.f32 %v5199_v8, %v5087_v30  ;;  %v12581_v1 = vadd.f32 %v5198_v55, %v5086_v19  ;;  %v5216_v30 = vstv %s12573_s23  ;;  %v14913_v19 = vld [vmem:[#allocation100_spill] sm:$0xff]  ;;  %v14914_v8 = vld [vmem:[#allocation75_spill] sm:$0xff]  ;;  %s7605_s23 = sld [smem:[#allocation10 + $0xcf]] }
 0x6b7   : > { %v5100_v31 = vpop.permute.xlu0 %5099  ;;  %v5080_v57 = vpop.permute.xlu1 %5079  ;;  %v4929_v55 = vadd.f32 %v14914_v8, %v14913_v19  ;;  %v14924_v19 = vld [vmem:[#allocation125_spill] sm:$0xff]  ;;  %v14925_v8 = vld [vmem:[#allocation64_spill] sm:$0xff] }
 0x6b8   : > { %14906 = vst [vmem:[#allocation74_spill] sm:$0xff] %v12579_v2  ;;  %14907 = vst [vmem:[#allocation67_spill] sm:$0xff] %v12581_v1  ;;  %v5111_v41 = vadd.f32 %v5100_v31, %v4903_v60  ;;  %v5088_v59 = vadd.f32 %v5080_v57, %v4880_v54  ;;  %v4906_v60 = vadd.f32 %v14916_v63, %v14915_v15 }
 0x6b9   : > { %5551 = vrot.lane.b32.xlu0 %v5541_v3, %s14427_s0  ;;  %5549 = vrot.lane.b32.xlu1 %v5540_v26, %s14427_s0  ;;  %v5567_v31 = vmul.f32 %v5564_v34, %v12277_v25  ;;  %v5566_v57 = vmul.f32 %v5564_v34, %v12275_v51  ;;  %v5590_v3 = vstv %s7598_s13  ;;  %s7621_s13 = sld [smem:[#allocation10 + $0xd1]] }
 0x6ba   : > { %v12594_v49 = vadd.f32 %v5207_v62, %v5111_v41  ;;  %v12596_v12 = vadd.f32 %v5200_v37, %v5088_v59  ;;  %v5217_v59 = vmul.f32 %v5216_v30, %v12264_v11  ;;  %v5210_v62 = vmul.f32 %v5206_v32, %v12288_v52  ;;  %v14919_v37 = vld [vmem:[#allocation39_spill] sm:$0xff] }
 0x6bb   : > { %v5104_v39 = vpop.permute.xlu0 %5103  ;;  %v5102_v5 = vpop.permute.xlu1 %5101  ;;  %v4931_v61 = vadd.f32 %v14920_v44, %v14919_v37  ;;  %v5568_v32 = vmul.f32 %v5564_v34, %v12288_v52  ;;  %v5594_v44 = vmul.f32 %v5590_v3, %v12288_v52 }
 0x6bc   : > { %14912 = vst [vmem:[#allocation22_spill] sm:$0xff] %v12594_v49  ;;  %v5113_v0 = vadd.f32 %v5104_v39, %v4905_v53  ;;  %v5112_v48 = vadd.f32 %v5102_v5, %v4904_v18  ;;  %v14921_v53 = vld [vmem:[#allocation123_spill] sm:$0xff] }
 0x6bd   : > { %5573 = vrot.lane.b32.xlu0 %v5565_v29, %s14427_s0  ;;  %5553 = vrot.lane.b32.xlu1 %v5542_v22, %s14427_s0  ;;  %v4930_v16 = vadd.f32 %v14922_v47, %v14921_v53  ;;  %v5591_v22 = vmul.f32 %v5590_v3, %v12264_v11 }
 0x6be   : > { %v12609_v50 = vadd.f32 %v5209_v28, %v5113_v0  ;;  %v12611_v6 = vadd.f32 %v5208_v9, %v5112_v48  ;;  %v5219_v28 = vmul.f32 %v5216_v30, %v12277_v25  ;;  %v5218_v9 = vmul.f32 %v5216_v30, %v12275_v51 }
 0x6bf   : > { %v5126_v33 = vpop.permute.xlu0 %5125  ;;  %v5106_v54 = vpop.permute.xlu1 %5105 }
 0x6c0   : > { %14917 = vst [vmem:[#allocation23_spill] sm:$0xff] %v12609_v50  ;;  %14918 = vst [vmem:[#allocation24_spill] sm:$0xff] %v12611_v6  ;;  %v5137_v26 = vadd.f32 %v5126_v33, %v4929_v55  ;;  %v5114_v41 = vadd.f32 %v5106_v54, %v4906_v60  ;;  %v4932_v55 = vadd.f32 %v14925_v8, %v14924_v19  ;;  %v5752_v19 = vstv %s7609_s24  ;;  %s7607_s24 = sld [smem:[#allocation10 + $0x117]] }
 0x6c1   : > { %5577 = vrot.lane.b32.xlu0 %v5567_v31, %s14427_s0  ;;  %5575 = vrot.lane.b32.xlu1 %v5566_v57, %s14427_s0  ;;  %v5593_v33 = vmul.f32 %v5590_v3, %v12277_v25  ;;  %v5592_v54 = vmul.f32 %v5590_v3, %v12275_v51  ;;  %v5616_v57 = vstv %s7599_s16  ;;  %v5856_v6 = vstv %s7613_s9  ;;  %s7606_s16 = sld [smem:[#allocation10 + $0xf3]]  ;;  %s7634_s9 = sld [smem:[#allocation10 + $0x67]] }
 0x6c2   : > { %v12623_v18 = vadd.f32 %v5217_v59, %v5137_v26  ;;  %v12625_v39 = vadd.f32 %v5210_v62, %v5114_v41  ;;  %v5220_v26 = vmul.f32 %v5216_v30, %v12288_v52  ;;  %v5617_v37 = vmul.f32 %v5616_v57, %v12264_v11  ;;  %v12666_v11 = vld [vmem:[#allocation2 + $0x88] sm:$0xff] }
 0x6c3   : > { %v5130_v5 = vpop.permute.xlu0 %5129  ;;  %v5128_v29 = vpop.permute.xlu1 %5127  ;;  %v5619_v53 = vmul.f32 %v5616_v57, %v12277_v25  ;;  %v5618_v47 = vmul.f32 %v5616_v57, %v12275_v51  ;;  %v5620_v25 = vmul.f32 %v5616_v57, %v12288_v52 }
 0x6c4   : > { %14923 = vst [vmem:[#allocation25_spill] sm:$0xff] %v12623_v18  ;;  %v5139_v0 = vadd.f32 %v5130_v5, %v4931_v61  ;;  %v5138_v48 = vadd.f32 %v5128_v29, %v4930_v16  ;;  %v12662_v16 = vld [vmem:[#allocation2 + $0x78] sm:$0xff]  ;;  %v5726_v5 = vstv %s7608_s11  ;;  %s7622_s11 = sld [smem:[#allocation10 + $0xf5]] }
 0x6c5   : > { %5599 = vrot.lane.b32.xlu0 %v5591_v22, %s14427_s0  ;;  %5579 = vrot.lane.b32.xlu1 %v5568_v32, %s14427_s0  ;;  %v5727_v22 = vmul.f32 %v5726_v5, %v12662_v16  ;;  %v12674_v32 = vld [vmem:[#allocation2 + $0x80] sm:$0xff]  ;;  %v5729_v51 = vmul.f32 %v5726_v5, %v12666_v11 }
 0x6c6   : > { %v12635_v15 = vadd.f32 %v5219_v28, %v5139_v0  ;;  %v12637_v63 = vadd.f32 %v5218_v9, %v5138_v48  ;;  %v12679_v0 = vld [vmem:[#allocation2 + $0x90] sm:$0xff]  ;;  %v5728_v9 = vmul.f32 %v5726_v5, %v12674_v32  ;;  %v5754_v57 = vmul.f32 %v5752_v19, %v12674_v32 }
 0x6c7   : > { %v12639_v60 = vpop.permute.xlu0 %5235  ;;  %v5132_v34 = vpop.permute.xlu1 %5131  ;;  %v5730_v52 = vmul.f32 %v5726_v5, %v12679_v0  ;;  %v5964_v10 = vmul.f32 %v5960_v58, %v12679_v0 }
 0x6c8   : > { %14926 = vst [vmem:[#allocation26_spill] sm:$0xff] %v12635_v15  ;;  %14927 = vst [vmem:[#allocation98_spill] sm:$0xff] %v12637_v63  ;;  %v5140_v31 = vadd.f32 %v5132_v34, %v4932_v55  ;;  %v5753_v34 = vmul.f32 %v5752_v19, %v12662_v16 }
 0x6c9   : > { %5603 = vrot.lane.b32.xlu0 %v5593_v33, %s14427_s0  ;;  %5601 = vrot.lane.b32.xlu1 %v5592_v54, %s14427_s0 }
 0x6ca   : > { %v12646_v41 = vadd.f32 %v5220_v26, %v5140_v31  ;;  %v5755_v31 = vmul.f32 %v5752_v19, %v12666_v11  ;;  %v5778_v26 = vstv %s7610_s26  ;;  %s7623_s26 = sld [smem:[#allocation10 + $0x119]] }
 0x6cb   : > { %v12648_v59 = vpop.permute.xlu0 %5239  ;;  %v12650_v62 = vpop.permute.xlu1 %5237 }
 0x6cd   : > { %5625 = vrot.lane.b32.xlu0 %v5617_v37, %s14427_s0  ;;  %5605 = vrot.lane.b32.xlu1 %v5594_v44, %s14427_s0 }
 0x6cf   : > { %v12656_v61 = vpop.permute.xlu0 %5261  ;;  %v12658_v30 = vpop.permute.xlu1 %5241 }
 0x6d0   : > { %v5250_v1 = vadd.f32 %v12658_v30, %v12428_v24 }
 0x6d1   : > { %5629 = vrot.lane.b32.xlu0 %v5619_v53, %s14427_s0  ;;  %5627 = vrot.lane.b32.xlu1 %v5618_v47, %s14427_s0  ;;  %v5779_v53 = vmul.f32 %v5778_v26, %v12662_v16  ;;  %v5756_v47 = vmul.f32 %v5752_v19, %v12679_v0 }
 0x6d3   : > { %v12668_v3 = vpop.permute.xlu0 %5265  ;;  %v12670_v29 = vpop.permute.xlu1 %5263 }
 0x6d5   : > { %5735 = vrot.lane.b32.xlu0 %v5727_v22, %s14418_s6  ;;  %5631 = vrot.lane.b32.xlu1 %v5620_v25, %s14427_s0  ;;  %v5781_v25 = vmul.f32 %v5778_v26, %v12666_v11 }
 0x6d7   : > { %v12681_v48 = vpop.permute.xlu0 %5287  ;;  %v12683_v28 = vpop.permute.xlu1 %5267 }
 0x6d9   : > { %5739 = vrot.lane.b32.xlu0 %v5729_v51, %s14418_s6  ;;  %5737 = vrot.lane.b32.xlu1 %v5728_v9, %s14418_s6  ;;  %v5780_v51 = vmul.f32 %v5778_v26, %v12674_v32  ;;  %v5804_v9 = vstv %s7611_s29  ;;  %s7632_s29 = sld [smem:[#allocation10 + $0x1f]] }
 0x6db   : > { %v12689_v8 = vpop.permute.xlu0 %5291  ;;  %v12691_v55 = vpop.permute.xlu1 %5289 }
 0x6dd   : > { %5761 = vrot.lane.b32.xlu0 %v5753_v34, %s14418_s6  ;;  %5741 = vrot.lane.b32.xlu1 %v5730_v52, %s14418_s6  ;;  %v5805_v34 = vmul.f32 %v5804_v9, %v12662_v16 }
 0x6df   : > { %v12696_v33 = vpop.permute.xlu0 %5313  ;;  %v12698_v54 = vpop.permute.xlu1 %5293 }
 0x6e0   : > { %14928 = vst [vmem:[#allocation128_spill] sm:$0xff] %v12696_v33 }
 0x6e1   : > { %5765 = vrot.lane.b32.xlu0 %v5755_v31, %s14418_s6  ;;  %5763 = vrot.lane.b32.xlu1 %v5754_v57, %s14418_s6  ;;  %v5782_v31 = vmul.f32 %v5778_v26, %v12679_v0 }
 0x6e3   : > { %v12704_v37 = vpop.permute.xlu0 %5317  ;;  %v12706_v44 = vpop.permute.xlu1 %5315 }
 0x6e4   : > { %14929 = vst [vmem:[#allocation56_spill] sm:$0xff] %v12704_v37  ;;  %14930 = vst [vmem:[#allocation90_spill] sm:$0xff] %v12706_v44  ;;  %v5986_v44 = vstv %s7618_s4  ;;  %v12996_v37 = vld [vmem:[#allocation2 + $0x91] sm:$0xff]  ;;  %s13175_s4 = sld [smem:[#allocation10 + $0x20]] }
 0x6e5   : > { %5787 = vrot.lane.b32.xlu0 %v5779_v53, %s14418_s6  ;;  %5767 = vrot.lane.b32.xlu1 %v5756_v47, %s14418_s6  ;;  %v5807_v47 = vmul.f32 %v5804_v9, %v12666_v11 }
 0x6e7   : > { %v12712_v5 = vpop.permute.xlu0 %5339  ;;  %v12714_v22 = vpop.permute.xlu1 %5319 }
 0x6e8   : > { %14931 = vst [vmem:[#allocation65_spill] sm:$0xff] %v12712_v5 }
 0x6e9   : > { %5791 = vrot.lane.b32.xlu0 %v5781_v25, %s14418_s6  ;;  %5789 = vrot.lane.b32.xlu1 %v5780_v51, %s14418_s6  ;;  %v5806_v25 = vmul.f32 %v5804_v9, %v12674_v32  ;;  %v5830_v51 = vstv %s7612_s30  ;;  %s7633_s30 = sld [smem:[#allocation10 + $0x43]] }
 0x6eb   : > { %v12720_v52 = vpop.permute.xlu0 %5343  ;;  %v12722_v19 = vpop.permute.xlu1 %5341 }
 0x6ec   : > { %14932 = vst [vmem:[#allocation78_spill] sm:$0xff] %v12720_v52  ;;  %14933 = vst [vmem:[#allocation101_spill] sm:$0xff] %v12722_v19  ;;  %v5934_v19 = vstv %s7616_s28  ;;  %s7638_s28 = sld [smem:[#allocation10 + $0xf7]] }
 0x6ed   : > { %5813 = vrot.lane.b32.xlu0 %v5805_v34, %s14418_s6  ;;  %5793 = vrot.lane.b32.xlu1 %v5782_v31, %s14418_s6  ;;  %v5831_v34 = vmul.f32 %v5830_v51, %v12662_v16  ;;  %v5808_v31 = vmul.f32 %v5804_v9, %v12679_v0  ;;  %v5938_v5 = vmul.f32 %v5934_v19, %v12679_v0 }
 0x6ef   : > { %v12728_v57 = vpop.permute.xlu0 %5365  ;;  %v12730_v53 = vpop.permute.xlu1 %5345  ;;  %v6252_v42 = vstv %s7633_s30  ;;  %s13475_s30 = sld [smem:[#allocation10 + $0xf8]] }
 0x6f0   : > { %14934 = vst [vmem:[#allocation79_spill] sm:$0xff] %v12728_v57  ;;  %v12798_v57 = vstv %s7600_s27  ;;  %s7637_s27 = sld [smem:[#allocation10 + $0xd3]] }
 0x6f1   : > { %5817 = vrot.lane.b32.xlu0 %v5807_v47, %s14418_s6  ;;  %5815 = vrot.lane.b32.xlu1 %v5806_v25, %s14418_s6  ;;  %v5833_v47 = vmul.f32 %v5830_v51, %v12666_v11  ;;  %v5832_v25 = vmul.f32 %v5830_v51, %v12674_v32 }
 0x6f2   : > { %v6382_v33 = vstv %s7638_s28  ;;  %s7659_s28 = sld [smem:[#allocation10 + $0x8e]] }
 0x6f3   : > { %v12736_v63 = vpop.permute.xlu0 %5369  ;;  %v12738_v26 = vpop.permute.xlu1 %5367 }
 0x6f4   : > { %14935 = vst [vmem:[#allocation102_spill] sm:$0xff] %v12736_v63  ;;  %14936 = vst [vmem:[#allocation52_spill] sm:$0xff] %v12738_v26  ;;  %v5882_v26 = vstv %s7614_s7  ;;  %s7635_s7 = sld [smem:[#allocation10 + $0x8b]] }
 0x6f5   : > { %5839 = vrot.lane.b32.xlu0 %v5831_v34, %s14418_s6  ;;  %5819 = vrot.lane.b32.xlu1 %v5808_v31, %s14418_s6  ;;  %v5857_v34 = vmul.f32 %v5856_v6, %v12662_v16  ;;  %v5834_v31 = vmul.f32 %v5830_v51, %v12679_v0 }
 0x6f7   : > { %v12744_v15 = vpop.permute.xlu0 %5391  ;;  %v12746_v18 = vpop.permute.xlu1 %5371 }
 0x6f8   : > { %14937 = vst [vmem:[#allocation116_spill] sm:$0xff] %v12744_v15 }
 0x6f9   : > { %5843 = vrot.lane.b32.xlu0 %v5833_v47, %s14418_s6  ;;  %5841 = vrot.lane.b32.xlu1 %v5832_v25, %s14418_s6  ;;  %v5859_v47 = vmul.f32 %v5856_v6, %v12666_v11  ;;  %v5858_v25 = vmul.f32 %v5856_v6, %v12674_v32 }
 0x6fb   : > { %v12752_v50 = vpop.permute.xlu0 %5395  ;;  %v12754_v9 = vpop.permute.xlu1 %5393 }
 0x6fc   : > { %14938 = vst [vmem:[#allocation96_spill] sm:$0xff] %v12752_v50  ;;  %14939 = vst [vmem:[#allocation48_spill] sm:$0xff] %v12754_v9 }
 0x6fd   : > { %5865 = vrot.lane.b32.xlu0 %v5857_v34, %s14418_s6  ;;  %5845 = vrot.lane.b32.xlu1 %v5834_v31, %s14418_s6  ;;  %v5883_v34 = vmul.f32 %v5882_v26, %v12662_v16  ;;  %v5860_v31 = vmul.f32 %v5856_v6, %v12679_v0 }
 0x6ff   : > { %v12760_v15 = vpop.permute.xlu0 %5417  ;;  %v12762_v49 = vpop.permute.xlu1 %5397 }
 0x700   : > { %14940 = vst [vmem:[#allocation57_spill] sm:$0xff] %v12760_v15 }
 0x701   : > { %5869 = vrot.lane.b32.xlu0 %v5859_v47, %s14418_s6  ;;  %5867 = vrot.lane.b32.xlu1 %v5858_v25, %s14418_s6  ;;  %v5885_v47 = vmul.f32 %v5882_v26, %v12666_v11  ;;  %v5884_v25 = vmul.f32 %v5882_v26, %v12674_v32 }
 0x703   : > { %v12768_v9 = vpop.permute.xlu0 %5421  ;;  %v12770_v51 = vpop.permute.xlu1 %5419 }
 0x704   : > { %14941 = vst [vmem:[#allocation68_spill] sm:$0xff] %v12768_v9  ;;  %14942 = vst [vmem:[#allocation103_spill] sm:$0xff] %v12770_v51  ;;  %v5908_v9 = vstv %s7615_s10  ;;  %v5886_v51 = vmul.f32 %v5882_v26, %v12679_v0  ;;  %v5650_v26 = vmul.f32 %v12798_v57, %v12679_v0  ;;  %s7636_s10 = sld [smem:[#allocation10 + $0xaf]] }
 0x705   : > { %5891 = vrot.lane.b32.xlu0 %v5883_v34, %s14418_s6  ;;  %5871 = vrot.lane.b32.xlu1 %v5860_v31, %s14418_s6  ;;  %v5909_v31 = vmul.f32 %v5908_v9, %v12662_v16  ;;  %v5910_v2 = vmul.f32 %v5908_v9, %v12674_v32  ;;  %v5912_v43 = vmul.f32 %v5908_v9, %v12679_v0 }
 0x707   : > { %v12776_v15 = vpop.permute.xlu0 %5443  ;;  %v12778_v50 = vpop.permute.xlu1 %5423 }
 0x709   : > { %5895 = vrot.lane.b32.xlu0 %v5885_v47, %s14418_s6  ;;  %5893 = vrot.lane.b32.xlu1 %v5884_v25, %s14418_s6  ;;  %v5911_v25 = vmul.f32 %v5908_v9, %v12666_v11 }
 0x70b   : > { %v12784_v6 = vpop.permute.xlu0 %5447  ;;  %v12786_v34 = vpop.permute.xlu1 %5445 }
 0x70d   : > { %5917 = vrot.lane.b32.xlu0 %v5909_v31, %s14418_s6  ;;  %5897 = vrot.lane.b32.xlu1 %v5886_v51, %s14418_s6  ;;  %v5935_v31 = vmul.f32 %v5934_v19, %v12662_v16 }
 0x70f   : > { %v12794_v63 = vpop.permute.xlu0 %5469  ;;  %v5450_v47 = vpop.permute.xlu1 %5449 }
 0x710   : > { %v5458_v36 = vadd.f32 %v5450_v47, %v5250_v1  ;;  %v5276_v1 = vadd.f32 %v12683_v28, %v12462_v45 }
 0x711   : > { %5921 = vrot.lane.b32.xlu0 %v5911_v25, %s14418_s6  ;;  %5919 = vrot.lane.b32.xlu1 %v5910_v2, %s14418_s6  ;;  %v5936_v25 = vmul.f32 %v5934_v19, %v12674_v32 }
 0x712   : > { %v12804_v24 = vadd.f32 %v5650_v26, %v5458_v36  ;;  %v5937_v36 = vmul.f32 %v5934_v19, %v12666_v11  ;;  %v12820_v26 = vstv %s7601_s1  ;;  %s13076_s1 = sld [smem:[#allocation10 + $0x1e]] }
 0x713   : > { %v12806_v30 = vpop.permute.xlu0 %5473  ;;  %v12808_v51 = vpop.permute.xlu1 %5471  ;;  %v5660_v9 = vmul.f32 %v12820_v26, %v12679_v0 }
 0x715   : > { %5943 = vrot.lane.b32.xlu0 %v5935_v31, %s14427_s0  ;;  %5923 = vrot.lane.b32.xlu1 %v5912_v43, %s14418_s6  ;;  %v5961_v31 = vmul.f32 %v5960_v58, %v12662_v16 }
 0x717   : > { %v12816_v47 = vpop.permute.xlu0 %5495  ;;  %v5476_v2 = vpop.permute.xlu1 %5475 }
 0x718   : > { %v5484_v52 = vadd.f32 %v5476_v2, %v5276_v1  ;;  %v5302_v1 = vadd.f32 %v12698_v54, %v12496_v14 }
 0x719   : > { %5947 = vrot.lane.b32.xlu0 %v5937_v36, %s14427_s0  ;;  %5945 = vrot.lane.b32.xlu1 %v5936_v25, %s14427_s0  ;;  %v5962_v25 = vmul.f32 %v5960_v58, %v12674_v32 }
 0x71a   : > { %v12826_v45 = vadd.f32 %v5660_v9, %v5484_v52  ;;  %v5963_v52 = vmul.f32 %v5960_v58, %v12666_v11  ;;  %v12842_v9 = vstv %s7602_s3  ;;  %s13155_s3 = sld [smem:[#allocation10 + $0x42]] }
 0x71b   : > { %v12828_v43 = vpop.permute.xlu0 %5499  ;;  %v12830_v28 = vpop.permute.xlu1 %5497  ;;  %v5670_v19 = vmul.f32 %v12842_v9, %v12679_v0 }
 0x71c   : > { %14943 = vst [vmem:[#allocation33_spill] sm:$0xff] %v12826_v45  ;;  %v6278_v45 = vstv %s7634_s9  ;;  %s7647_s9 = sld [smem:[#allocation10 + $0x11c]] }
 0x71d   : > { %5969 = vrot.lane.b32.xlu0 %v5961_v31, %s14427_s0  ;;  %5949 = vrot.lane.b32.xlu1 %v5938_v5, %s14427_s0  ;;  %v5987_v31 = vmul.f32 %v5986_v44, %v12662_v16 }
 0x71f   : > { %v12838_v2 = vpop.permute.xlu0 %5521  ;;  %v5502_v36 = vpop.permute.xlu1 %5501 }
 0x720   : > { %14944 = vst [vmem:[#allocation40_spill] sm:$0xff] %v12838_v2  ;;  %v5510_v17 = vadd.f32 %v5502_v36, %v5302_v1  ;;  %v5328_v1 = vadd.f32 %v12714_v22, %v12530_v7 }
 0x721   : > { %5973 = vrot.lane.b32.xlu0 %v5963_v52, %s14427_s0  ;;  %5971 = vrot.lane.b32.xlu1 %v5962_v25, %s14427_s0  ;;  %v5988_v25 = vmul.f32 %v5986_v44, %v12674_v32 }
 0x722   : > { %v12848_v14 = vadd.f32 %v5670_v19, %v5510_v17  ;;  %v5989_v17 = vmul.f32 %v5986_v44, %v12666_v11  ;;  %v12864_v19 = vstv %s7603_s19  ;;  %s13204_s19 = sld [smem:[#allocation10 + $0x44]] }
 0x723   : > { %v12850_v54 = vpop.permute.xlu0 %5525  ;;  %v12852_v5 = vpop.permute.xlu1 %5523  ;;  %v5680_v58 = vmul.f32 %v12864_v19, %v12679_v0 }
 0x724   : > { %14945 = vst [vmem:[#allocation58_spill] sm:$0xff] %v12848_v14  ;;  %14946 = vst [vmem:[#allocation112_spill] sm:$0xff] %v12850_v54 }
 0x725   : > { %14947 = vst [vmem:[#allocation53_spill] sm:$0xff] %v12852_v5  ;;  %5995 = vrot.lane.b32.xlu0 %v5987_v31, %s14427_s0  ;;  %5975 = vrot.lane.b32.xlu1 %v5964_v10, %s14427_s0  ;;  %v6012_v5 = vstv %s7619_s20  ;;  %s13216_s20 = sld [smem:[#allocation10 + $0x66]] }
 0x726   : > { %v6013_v31 = vmul.f32 %v6012_v5, %v12662_v16 }
 0x727   : > { %v12860_v36 = vpop.permute.xlu0 %5547  ;;  %v5528_v52 = vpop.permute.xlu1 %5527 }
 0x728   : > { %14948 = vst [vmem:[#allocation80_spill] sm:$0xff] %v12860_v36  ;;  %v5536_v14 = vadd.f32 %v5528_v52, %v5328_v1  ;;  %v5990_v36 = vmul.f32 %v5986_v44, %v12679_v0  ;;  %v5354_v1 = vadd.f32 %v12730_v53, %v12564_v40 }
 0x729   : > { %5999 = vrot.lane.b32.xlu0 %v5989_v17, %s14427_s0  ;;  %5997 = vrot.lane.b32.xlu1 %v5988_v25, %s14427_s0  ;;  %v6014_v25 = vmul.f32 %v6012_v5, %v12674_v32 }
 0x72a   : > { %v12870_v10 = vadd.f32 %v5680_v58, %v5536_v14  ;;  %v6015_v14 = vmul.f32 %v6012_v5, %v12666_v11  ;;  %v12886_v58 = vstv %s7604_s8  ;;  %s13250_s8 = sld [smem:[#allocation10 + $0x68]] }
 0x72b   : > { %v12872_v7 = vpop.permute.xlu0 %5551  ;;  %v12874_v22 = vpop.permute.xlu1 %5549  ;;  %v5690_v44 = vmul.f32 %v12886_v58, %v12679_v0 }
 0x72c   : > { %14949 = vst [vmem:[#allocation106_spill] sm:$0xff] %v12870_v10  ;;  %14950 = vst [vmem:[#allocation81_spill] sm:$0xff] %v12872_v7 }
 0x72d   : > { %14951 = vst [vmem:[#allocation108_spill] sm:$0xff] %v12874_v22  ;;  %6021 = vrot.lane.b32.xlu0 %v6013_v31, %s14427_s0  ;;  %6001 = vrot.lane.b32.xlu1 %v5990_v36, %s14427_s0  ;;  %v6038_v22 = vstv %s7620_s12  ;;  %s13262_s12 = sld [smem:[#allocation10 + $0x8a]] }
 0x72e   : > { %v6039_v31 = vmul.f32 %v6038_v22, %v12662_v16 }
 0x72f   : > { %v12882_v52 = vpop.permute.xlu0 %5573  ;;  %v5554_v17 = vpop.permute.xlu1 %5553 }
 0x730   : > { %14952 = vst [vmem:[#allocation129_spill] sm:$0xff] %v12882_v52  ;;  %v5562_v10 = vadd.f32 %v5554_v17, %v5354_v1  ;;  %v6016_v52 = vmul.f32 %v6012_v5, %v12679_v0  ;;  %v5380_v1 = vadd.f32 %v12746_v18, %v12596_v12 }
 0x731   : > { %6025 = vrot.lane.b32.xlu0 %v6015_v14, %s14427_s0  ;;  %6023 = vrot.lane.b32.xlu1 %v6014_v25, %s14427_s0  ;;  %v6040_v25 = vmul.f32 %v6038_v22, %v12674_v32 }
 0x732   : > { %v12892_v40 = vadd.f32 %v5690_v44, %v5562_v10  ;;  %v6041_v10 = vmul.f32 %v6038_v22, %v12666_v11  ;;  %v12908_v44 = vstv %s7605_s23  ;;  %s13296_s23 = sld [smem:[#allocation10 + $0x8c]] }
 0x733   : > { %v12894_v53 = vpop.permute.xlu0 %5577  ;;  %v12896_v36 = vpop.permute.xlu1 %5575  ;;  %v5700_v5 = vmul.f32 %v12908_v44, %v12679_v0 }
 0x734   : > { %14953 = vst [vmem:[#allocation91_spill] sm:$0xff] %v12892_v40  ;;  %14954 = vst [vmem:[#allocation54_spill] sm:$0xff] %v12894_v53  ;;  %v12986_v53 = vld [vmem:[#allocation2 + $0x89] sm:$0xff] }
 0x735   : > { %14955 = vst [vmem:[#allocation124_spill] sm:$0xff] %v12896_v36  ;;  %6047 = vrot.lane.b32.xlu0 %v6039_v31, %s14427_s0  ;;  %6027 = vrot.lane.b32.xlu1 %v6016_v52, %s14427_s0  ;;  %v6064_v36 = vstv %s7621_s13  ;;  %s13308_s13 = sld [smem:[#allocation10 + $0xae]] }
 0x736   : > { %v6065_v31 = vmul.f32 %v6064_v36, %v12662_v16 }
 0x737   : > { %v12904_v17 = vpop.permute.xlu0 %5599  ;;  %v5580_v14 = vpop.permute.xlu1 %5579 }
 0x738   : > { %14956 = vst [vmem:[#allocation83_spill] sm:$0xff] %v12904_v17  ;;  %v5588_v40 = vadd.f32 %v5580_v14, %v5380_v1  ;;  %v6042_v17 = vmul.f32 %v6038_v22, %v12679_v0  ;;  %v5406_v1 = vadd.f32 %v12762_v49, %v12625_v39 }
 0x739   : > { %6051 = vrot.lane.b32.xlu0 %v6041_v10, %s14427_s0  ;;  %6049 = vrot.lane.b32.xlu1 %v6040_v25, %s14427_s0  ;;  %v6066_v25 = vmul.f32 %v6064_v36, %v12674_v32 }
 0x73a   : > { %v12914_v12 = vadd.f32 %v5700_v5, %v5588_v40  ;;  %v6067_v40 = vmul.f32 %v6064_v36, %v12666_v11  ;;  %v12930_v5 = vstv %s7606_s16  ;;  %s13345_s16 = sld [smem:[#allocation10 + $0xb0]] }
 0x73b   : > { %v12916_v18 = vpop.permute.xlu0 %5603  ;;  %v12918_v52 = vpop.permute.xlu1 %5601  ;;  %v5710_v22 = vmul.f32 %v12930_v5, %v12679_v0 }
 0x73c   : > { %14957 = vst [vmem:[#allocation109_spill] sm:$0xff] %v12914_v12  ;;  %14958 = vst [vmem:[#allocation49_spill] sm:$0xff] %v12916_v18  ;;  %v12984_v18 = vld [vmem:[#allocation2 + $0x81] sm:$0xff] }
 0x73d   : > { %14959 = vst [vmem:[#allocation29_spill] sm:$0xff] %v12918_v52  ;;  %6073 = vrot.lane.b32.xlu0 %v6065_v31, %s14427_s0  ;;  %6053 = vrot.lane.b32.xlu1 %v6042_v17, %s14427_s0  ;;  %v6090_v52 = vstv %s7622_s11  ;;  %s13357_s11 = sld [smem:[#allocation10 + $0xd2]] }
 0x73e   : > { %v6091_v31 = vmul.f32 %v6090_v52, %v12662_v16 }
 0x73f   : > { %v12926_v14 = vpop.permute.xlu0 %5625  ;;  %v5606_v10 = vpop.permute.xlu1 %5605 }
 0x740   : > { %14960 = vst [vmem:[#allocation27_spill] sm:$0xff] %v12926_v14  ;;  %v5614_v12 = vadd.f32 %v5606_v10, %v5406_v1  ;;  %v6068_v14 = vmul.f32 %v6064_v36, %v12679_v0  ;;  %v5432_v1 = vadd.f32 %v12778_v50, %v12646_v41 }
 0x741   : > { %6077 = vrot.lane.b32.xlu0 %v6067_v40, %s14427_s0  ;;  %6075 = vrot.lane.b32.xlu1 %v6066_v25, %s14427_s0  ;;  %v6092_v25 = vmul.f32 %v6090_v52, %v12674_v32 }
 0x742   : > { %v12936_v49 = vadd.f32 %v5710_v22, %v5614_v12  ;;  %v6093_v12 = vmul.f32 %v6090_v52, %v12666_v11  ;;  %v12952_v22 = vstv %s7607_s24  ;;  %s13404_s24 = sld [smem:[#allocation10 + $0xf6]] }
 0x743   : > { %v12938_v39 = vpop.permute.xlu0 %5629  ;;  %v12940_v17 = vpop.permute.xlu1 %5627  ;;  %v5720_v36 = vmul.f32 %v12952_v22, %v12679_v0 }
 0x744   : > { %14961 = vst [vmem:[#allocation70_spill] sm:$0xff] %v12936_v49  ;;  %14962 = vst [vmem:[#allocation118_spill] sm:$0xff] %v12938_v39  ;;  %v6094_v39 = vmul.f32 %v6090_v52, %v12679_v0 }
 0x745   : > { %14963 = vst [vmem:[#allocation82_spill] sm:$0xff] %v12940_v17  ;;  %6099 = vrot.lane.b32.xlu0 %v6091_v31, %s14427_s0  ;;  %6079 = vrot.lane.b32.xlu1 %v6068_v14, %s14427_s0  ;;  %v6116_v17 = vstv %s7623_s26  ;;  %s13416_s26 = sld [smem:[#allocation10 + $0xd4]] }
 0x746   : > { %v6117_v31 = vmul.f32 %v6116_v17, %v12662_v16 }
 0x747   : > { %v12948_v10 = vpop.permute.xlu0 %5735  ;;  %v5632_v40 = vpop.permute.xlu1 %5631 }
 0x748   : > { %v5640_v49 = vadd.f32 %v5632_v40, %v5432_v1 }
 0x749   : > { %6103 = vrot.lane.b32.xlu0 %v6093_v12, %s14427_s0  ;;  %6101 = vrot.lane.b32.xlu1 %v6092_v25, %s14427_s0  ;;  %v6119_v12 = vmul.f32 %v6116_v17, %v12666_v11  ;;  %v12974_v25 = vld [vmem:[#allocation2 + $0x79] sm:$0xff] }
 0x74a   : > { %v12958_v50 = vadd.f32 %v5720_v36, %v5640_v49  ;;  %v6118_v49 = vmul.f32 %v6116_v17, %v12674_v32  ;;  %v6226_v36 = vstv %s7632_s29  ;;  %s13450_s29 = sld [smem:[#allocation10 + $0x11a]] }
 0x74b   : > { %v12960_v41 = vpop.permute.xlu0 %5739  ;;  %v12962_v14 = vpop.permute.xlu1 %5737  ;;  %v6228_v54 = vmul.f32 %v6226_v36, %v12984_v18 }
 0x74c   : > { %14964 = vst [vmem:[#allocation110_spill] sm:$0xff] %v12958_v50  ;;  %v6120_v50 = vmul.f32 %v6116_v17, %v12679_v0 }
 0x74d   : > { %6125 = vrot.lane.b32.xlu0 %v6117_v31, %s14427_s0  ;;  %6105 = vrot.lane.b32.xlu1 %v6094_v39, %s14427_s0  ;;  %v6227_v39 = vmul.f32 %v6226_v36, %v12974_v25 }
 0x74f   : > { %v12968_v1 = vpop.permute.xlu0 %5761  ;;  %v12970_v40 = vpop.permute.xlu1 %5741 }
 0x751   : > { %6129 = vrot.lane.b32.xlu0 %v6119_v12, %s14427_s0  ;;  %6127 = vrot.lane.b32.xlu1 %v6118_v49, %s14427_s0  ;;  %v6229_v49 = vmul.f32 %v6226_v36, %v12986_v53 }
 0x753   : > { %v12978_v52 = vpop.permute.xlu0 %5765  ;;  %v12980_v31 = vpop.permute.xlu1 %5763 }
 0x755   : > { %6235 = vrot.lane.b32.xlu0 %v6227_v39, %s14418_s6  ;;  %6131 = vrot.lane.b32.xlu1 %v6120_v50, %s14427_s0  ;;  %v6253_v50 = vmul.f32 %v6252_v42, %v12974_v25  ;;  %v6230_v39 = vmul.f32 %v6226_v36, %v12996_v37 }
 0x757   : > { %v12990_v7 = vpop.permute.xlu0 %5787  ;;  %v12992_v12 = vpop.permute.xlu1 %5767 }
 0x758   : > { %14965 = vst [vmem:[#allocation84_spill] sm:$0xff] %v12990_v7  ;;  %14966 = vst [vmem:[#allocation111_spill] sm:$0xff] %v12992_v12  ;;  %v13109_v7 = vmul.f32 %v12842_v9, %v12666_v11 }
 0x759   : > { %6239 = vrot.lane.b32.xlu0 %v6229_v49, %s14418_s6  ;;  %6237 = vrot.lane.b32.xlu1 %v6228_v54, %s14418_s6  ;;  %v6255_v49 = vmul.f32 %v6252_v42, %v12986_v53  ;;  %v6254_v54 = vmul.f32 %v6252_v42, %v12984_v18 }
 0x75b   : > { %v13000_v0 = vpop.permute.xlu0 %5791  ;;  %v13002_v17 = vpop.permute.xlu1 %5789 }
 0x75c   : > { %14967 = vst [vmem:[#allocation34_spill] sm:$0xff] %v13000_v0  ;;  %14968 = vst [vmem:[#allocation42_spill] sm:$0xff] %v13002_v17  ;;  %v6304_v0 = vstv %s7635_s7  ;;  %s7656_s7 = sld [smem:[#allocation10 + $0x22]] }
 0x75d   : > { %6261 = vrot.lane.b32.xlu0 %v6253_v50, %s14418_s6  ;;  %6241 = vrot.lane.b32.xlu1 %v6230_v39, %s14418_s6  ;;  %v6279_v50 = vmul.f32 %v6278_v45, %v12974_v25  ;;  %v6256_v39 = vmul.f32 %v6252_v42, %v12996_v37 }
 0x75f   : > { %v13008_v2 = vpop.permute.xlu0 %5813  ;;  %v13010_v12 = vpop.permute.xlu1 %5793 }
 0x760   : > { %14969 = vst [vmem:[#allocation120_spill] sm:$0xff] %v13008_v2  ;;  %14970 = vst [vmem:[#allocation30_spill] sm:$0xff] %v13010_v12 }
 0x761   : > { %6265 = vrot.lane.b32.xlu0 %v6255_v49, %s14418_s6  ;;  %6263 = vrot.lane.b32.xlu1 %v6254_v54, %s14418_s6  ;;  %v6281_v49 = vmul.f32 %v6278_v45, %v12986_v53  ;;  %v6280_v54 = vmul.f32 %v6278_v45, %v12984_v18 }
 0x763   : > { %v13016_v17 = vpop.permute.xlu0 %5817  ;;  %v13018_v36 = vpop.permute.xlu1 %5815 }
 0x764   : > { %14971 = vst [vmem:[#allocation104_spill] sm:$0xff] %v13016_v17  ;;  %14972 = vst [vmem:[#allocation88_spill] sm:$0xff] %v13018_v36  ;;  %v6330_v17 = vstv %s7636_s10  ;;  %s7657_s10 = sld [smem:[#allocation10 + $0x46]] }
 0x765   : > { %6287 = vrot.lane.b32.xlu0 %v6279_v50, %s14418_s6  ;;  %6267 = vrot.lane.b32.xlu1 %v6256_v39, %s14418_s6  ;;  %v6305_v50 = vmul.f32 %v6304_v0, %v12974_v25  ;;  %v6282_v39 = vmul.f32 %v6278_v45, %v12996_v37 }
 0x767   : > { %v13024_v12 = vpop.permute.xlu0 %5839  ;;  %v13026_v2 = vpop.permute.xlu1 %5819 }
 0x768   : > { %14973 = vst [vmem:[#allocation36_spill] sm:$0xff] %v13024_v12  ;;  %14974 = vst [vmem:[#allocation93_spill] sm:$0xff] %v13026_v2 }
 0x769   : > { %6291 = vrot.lane.b32.xlu0 %v6281_v49, %s14418_s6  ;;  %6289 = vrot.lane.b32.xlu1 %v6280_v54, %s14418_s6  ;;  %v6307_v49 = vmul.f32 %v6304_v0, %v12986_v53  ;;  %v6306_v54 = vmul.f32 %v6304_v0, %v12984_v18 }
 0x76b   : > { %v13032_v36 = vpop.permute.xlu0 %5843  ;;  %v13034_v42 = vpop.permute.xlu1 %5841 }
 0x76c   : > { %14975 = vst [vmem:[#allocation113_spill] sm:$0xff] %v13032_v36  ;;  %14976 = vst [vmem:[#allocation51_spill] sm:$0xff] %v13034_v42  ;;  %v6356_v36 = vstv %s7637_s27  ;;  %s7658_s27 = sld [smem:[#allocation10 + $0x6a]] }
 0x76d   : > { %6313 = vrot.lane.b32.xlu0 %v6305_v50, %s14418_s6  ;;  %6293 = vrot.lane.b32.xlu1 %v6282_v39, %s14418_s6  ;;  %v6331_v50 = vmul.f32 %v6330_v17, %v12974_v25  ;;  %v6308_v39 = vmul.f32 %v6304_v0, %v12996_v37 }
 0x76f   : > { %v13040_v2 = vpop.permute.xlu0 %5865  ;;  %v13042_v12 = vpop.permute.xlu1 %5845 }
 0x770   : > { %14977 = vst [vmem:[#allocation87_spill] sm:$0xff] %v13040_v2  ;;  %14978 = vst [vmem:[#allocation85_spill] sm:$0xff] %v13042_v12 }
 0x771   : > { %6317 = vrot.lane.b32.xlu0 %v6307_v49, %s14418_s6  ;;  %6315 = vrot.lane.b32.xlu1 %v6306_v54, %s14418_s6  ;;  %v6333_v49 = vmul.f32 %v6330_v17, %v12986_v53  ;;  %v6332_v54 = vmul.f32 %v6330_v17, %v12984_v18 }
 0x773   : > { %v13048_v42 = vpop.permute.xlu0 %5869  ;;  %v13050_v45 = vpop.permute.xlu1 %5867 }
 0x774   : > { %14979 = vst [vmem:[#allocation121_spill] sm:$0xff] %v13048_v42  ;;  %14980 = vst [vmem:[#allocation86_spill] sm:$0xff] %v13050_v45 }
 0x775   : > { %6339 = vrot.lane.b32.xlu0 %v6331_v50, %s14418_s6  ;;  %6319 = vrot.lane.b32.xlu1 %v6308_v39, %s14418_s6  ;;  %v6357_v50 = vmul.f32 %v6356_v36, %v12974_v25  ;;  %v6334_v39 = vmul.f32 %v6330_v17, %v12996_v37  ;;  %v13084_v17 = vmul.f32 %v12820_v26, %v12662_v16 }
 0x777   : > { %v13056_v12 = vpop.permute.xlu0 %5891  ;;  %v13058_v2 = vpop.permute.xlu1 %5871 }
 0x778   : > { %14981 = vst [vmem:[#allocation122_spill] sm:$0xff] %v13056_v12  ;;  %14982 = vst [vmem:[#allocation117_spill] sm:$0xff] %v13058_v2  ;;  %v5647_v2 = vmul.f32 %v12798_v57, %v12662_v16  ;;  %v5649_v12 = vmul.f32 %v12798_v57, %v12666_v11 }
 0x779   : > { %6343 = vrot.lane.b32.xlu0 %v6333_v49, %s14418_s6  ;;  %6341 = vrot.lane.b32.xlu1 %v6332_v54, %s14418_s6  ;;  %v5247_v49 = vadd.f32 %v12639_v60, %v12396_v4  ;;  %v5648_v54 = vmul.f32 %v12798_v57, %v12674_v32  ;;  %v13098_v4 = vmul.f32 %v12842_v9, %v12662_v16 }
 0x77b   : > { %v13064_v45 = vpop.permute.xlu0 %5895  ;;  %v13066_v0 = vpop.permute.xlu1 %5893  ;;  %v5455_v42 = vadd.f32 %v12776_v15, %v5247_v49  ;;  %v13125_v15 = vmul.f32 %v12864_v19, %v12674_v32  ;;  %v5248_v49 = vadd.f32 %v12650_v62, %v12412_v20  ;;  %v6360_v62 = vmul.f32 %v6356_v36, %v12996_v37 }
 0x77c   : > { %14983 = vst [vmem:[#allocation119_spill] sm:$0xff] %v13064_v45  ;;  %14984 = vst [vmem:[#allocation31_spill] sm:$0xff] %v13066_v0  ;;  %v13088_v0 = vmul.f32 %v12820_v26, %v12666_v11  ;;  %v6358_v45 = vmul.f32 %v6356_v36, %v12984_v18 }
 0x77d   : > { %6365 = vrot.lane.b32.xlu0 %v6357_v50, %s14418_s6  ;;  %6345 = vrot.lane.b32.xlu1 %v6334_v39, %s14418_s6  ;;  %v13094_v50 = vmul.f32 %v12820_v26, %v12674_v32  ;;  %v6359_v39 = vmul.f32 %v6356_v36, %v12986_v53  ;;  %v13113_v26 = vmul.f32 %v12842_v9, %v12674_v32 }
 0x77e   : > { %v5249_v9 = vadd.f32 %v12648_v59, %v12410_v35  ;;  %v6383_v59 = vmul.f32 %v6382_v33, %v12974_v25  ;;  %v13171_v36 = vmul.f32 %v12930_v5, %v12662_v16 }
 0x77f   : > { %v13100_v60 = vpop.permute.xlu0 %5917  ;;  %v13102_v57 = vpop.permute.xlu1 %5897 }
 0x780   : > { %14985 = vst [vmem:[#allocation44_spill] sm:$0xff] %v13100_v60  ;;  %14986 = vst [vmem:[#allocation89_spill] sm:$0xff] %v13102_v57  ;;  %v13117_v60 = vmul.f32 %v12864_v19, %v12662_v16  ;;  %v13121_v57 = vmul.f32 %v12864_v19, %v12666_v11  ;;  %v13143_v19 = vmul.f32 %v12886_v58, %v12674_v32 }
 0x781   : > { %6369 = vrot.lane.b32.xlu0 %v6359_v39, %s14418_s6  ;;  %6367 = vrot.lane.b32.xlu1 %v6358_v45, %s14418_s6  ;;  %v13147_v45 = vmul.f32 %v12908_v44, %v12662_v16  ;;  %v5457_v39 = vadd.f32 %v12784_v6, %v5249_v9  ;;  %v6146_v6 = vstv %s13076_s1  ;;  %s7660_s1 = sld [smem:[#allocation10 + $0xb2]] }
 0x782   : > { %14987 = vst [vmem:[#allocation37_spill] sm:$0xff] %v13117_v60  ;;  %14988 = vst [vmem:[#allocation130_spill] sm:$0xff] %v13121_v57  ;;  %v13135_v60 = vmul.f32 %v12886_v58, %v12662_v16  ;;  %v13139_v57 = vmul.f32 %v12886_v58, %v12666_v11  ;;  %v5456_v58 = vadd.f32 %v12786_v34, %v5248_v49 }
 0x783   : > { %14989 = vst [vmem:[#allocation114_spill] sm:$0xff] %v13143_v19  ;;  %14990 = vst [vmem:[#allocation94_spill] sm:$0xff] %v13147_v45  ;;  %v13149_v35 = vpop.permute.xlu0 %5921  ;;  %v13151_v20 = vpop.permute.xlu1 %5919  ;;  %v5651_v19 = vadd.f32 %v5647_v2, %v5455_v42  ;;  %v13161_v45 = vmul.f32 %v12908_v44, %v12666_v11  ;;  %v6408_v2 = vstv %s13090_s2  ;;  %v13191_v42 = vmul.f32 %v12952_v22, %v12662_v16  ;;  %s7661_s2 = sld [smem:[#allocation10 + $0xd6]] }
 0x784   : > { %14991 = vst [vmem:[#allocation105_spill] sm:$0xff] %v13149_v35  ;;  %14992 = vst [vmem:[#allocation92_spill] sm:$0xff] %v13151_v20  ;;  %v5273_v35 = vadd.f32 %v12656_v61, %v12426_v23  ;;  %v13167_v20 = vmul.f32 %v12908_v44, %v12674_v32  ;;  %v13181_v23 = vmul.f32 %v12930_v5, %v12666_v11 }
 0x785   : > { %6391 = vrot.lane.b32.xlu0 %v6383_v59, %s14418_s6  ;;  %6371 = vrot.lane.b32.xlu1 %v6360_v62, %s14418_s6  ;;  %v5747_v34 = vadd.f32 %v12948_v10, %v5651_v19  ;;  %v13185_v61 = vmul.f32 %v12930_v5, %v12674_v32  ;;  %v6385_v10 = vmul.f32 %v6382_v33, %v12986_v53 }
 0x786   : > { %v5481_v44 = vadd.f32 %v12794_v63, %v5273_v35  ;;  %v6384_v19 = vmul.f32 %v6382_v33, %v12984_v18  ;;  %v5653_v11 = vadd.f32 %v5649_v12, %v5457_v39  ;;  %v5652_v59 = vadd.f32 %v5648_v54, %v5456_v58 }
 0x787   : > { %v5944_v9 = vpop.permute.xlu0 %5943  ;;  %v13193_v49 = vpop.permute.xlu1 %5923  ;;  %v6147_v32 = vmul.f32 %v6146_v6, %v12974_v25  ;;  %v5275_v63 = vadd.f32 %v12668_v3, %v12443_v27  ;;  %v6409_v16 = vmul.f32 %v6408_v2, %v12974_v25  ;;  %v6386_v5 = vmul.f32 %v6382_v33, %v12996_v37 }
 0x788   : > { %v5955_v62 = vadd.f32 %v5944_v9, %v5747_v34  ;;  %v5274_v12 = vadd.f32 %v12670_v29, %v12445_v13  ;;  %v5749_v54 = vadd.f32 %v12960_v41, %v5653_v11  ;;  %v5748_v35 = vadd.f32 %v12962_v14, %v5652_v59 }
 0x789   : > { %6395 = vrot.lane.b32.xlu0 %v6385_v10, %s14418_s6  ;;  %6393 = vrot.lane.b32.xlu1 %v6384_v19, %s14418_s6  ;;  %v5661_v27 = vadd.f32 %v13084_v17, %v5481_v44  ;;  %v6149_v34 = vmul.f32 %v6146_v6, %v12986_v53  ;;  %v6148_v33 = vmul.f32 %v6146_v6, %v12984_v18  ;;  %v6156_v9 = vstv %s13155_s3  ;;  %s7662_s3 = sld [smem:[#allocation10 + $0xfa]] }
 0x78a   : > { %v13210_v39 = vadd.f32 %v6147_v32, %v5955_v62  ;;  %v5483_v13 = vadd.f32 %v12806_v30, %v5275_v63  ;;  %v5482_v29 = vadd.f32 %v12808_v51, %v5274_v12  ;;  %v5299_v10 = vadd.f32 %v12681_v48, %v12460_v56 }
 0x78b   : > { %v5948_v3 = vpop.permute.xlu0 %5947  ;;  %v5946_v58 = vpop.permute.xlu1 %5945  ;;  %v6411_v17 = vmul.f32 %v6408_v2, %v12986_v53  ;;  %v6410_v44 = vmul.f32 %v6408_v2, %v12984_v18  ;;  %v6434_v19 = vstv %s13175_s4  ;;  %v5773_v11 = vadd.f32 %v12968_v1, %v5661_v27  ;;  %s7648_s4 = sld [smem:[#allocation10 + $0x21]] }
 0x78c   : > { %v5957_v41 = vadd.f32 %v5948_v3, %v5749_v54  ;;  %v5956_v14 = vadd.f32 %v5946_v58, %v5748_v35  ;;  %v5750_v30 = vadd.f32 %v12970_v40, %v12804_v24  ;;  %v5507_v56 = vadd.f32 %v12816_v47, %v5299_v10  ;;  %v14995_v10 = vld [vmem:[#allocation33_spill] sm:$0xff] }
 0x78d   : > { %6417 = vrot.lane.b32.xlu0 %v6409_v16, %s14418_s6  ;;  %6397 = vrot.lane.b32.xlu1 %v6386_v5, %s14418_s6  ;;  %v6412_v32 = vmul.f32 %v6408_v2, %v12996_v37  ;;  %v6157_v63 = vmul.f32 %v6156_v9, %v12974_v25  ;;  %v6150_v16 = vmul.f32 %v6146_v6, %v12996_v37  ;;  %v13248_v6 = vstv %s13204_s19  ;;  %s7663_s19 = sld [smem:[#allocation10 + $0x11e]] }
 0x78e   : > { %v13230_v51 = vadd.f32 %v6149_v34, %v5957_v41  ;;  %v13232_v59 = vadd.f32 %v6148_v33, %v5956_v14  ;;  %v5663_v1 = vadd.f32 %v13088_v0, %v5483_v13  ;;  %v5662_v5 = vadd.f32 %v13094_v50, %v5482_v29  ;;  %v14993_v33 = vld [vmem:[#allocation128_spill] sm:$0xff] }
 0x78f   : > { %v5970_v48 = vpop.permute.xlu0 %5969  ;;  %v5950_v62 = vpop.permute.xlu1 %5949  ;;  %v5301_v12 = vadd.f32 %v12689_v8, %v12477_v46  ;;  %v5300_v47 = vadd.f32 %v12691_v55, %v12479_v21  ;;  %v6435_v2 = vmul.f32 %v6434_v19, %v12974_v25  ;;  %v5671_v21 = vadd.f32 %v13098_v4, %v5507_v56  ;;  %v14994_v41 = vld [vmem:[#allocation84_spill] sm:$0xff] }
 0x790   : > { %v5981_v24 = vadd.f32 %v5970_v48, %v5773_v11  ;;  %v5958_v40 = vadd.f32 %v5950_v62, %v5750_v30  ;;  %v5775_v0 = vadd.f32 %v12978_v52, %v5663_v1  ;;  %v5774_v50 = vadd.f32 %v12980_v31, %v5662_v5  ;;  %v14997_v11 = vld [vmem:[#allocation40_spill] sm:$0xff] }
 0x791   : > { %6421 = vrot.lane.b32.xlu0 %v6411_v17, %s14418_s6  ;;  %6419 = vrot.lane.b32.xlu1 %v6410_v44, %s14418_s6  ;;  %v6159_v35 = vmul.f32 %v6156_v9, %v12986_v53  ;;  %v6158_v27 = vmul.f32 %v6156_v9, %v12984_v18  ;;  %v6166_v3 = vstv %s13216_s20  ;;  %v5509_v58 = vadd.f32 %v12828_v43, %v5301_v12  ;;  %v14996_v17 = vld [vmem:[#allocation111_spill] sm:$0xff]  ;;  %s7649_s20 = sld [smem:[#allocation10 + $0x45]] }
 0x792   : > { %v13254_v54 = vadd.f32 %v6157_v63, %v5981_v24  ;;  %v13256_v46 = vadd.f32 %v6150_v16, %v5958_v40  ;;  %v5508_v52 = vadd.f32 %v12830_v28, %v5300_v47  ;;  %v5325_v13 = vadd.f32 %v14993_v33, %v12494_v38  ;;  %v14998_v24 = vld [vmem:[#allocation73_spill] sm:$0xff]  ;;  %v14999_v40 = vld [vmem:[#allocation56_spill] sm:$0xff] }
 0x793   : > { %v5974_v8 = vpop.permute.xlu0 %5973  ;;  %v5972_v55 = vpop.permute.xlu1 %5971  ;;  %v6437_v4 = vmul.f32 %v6434_v19, %v12986_v53  ;;  %v6436_v29 = vmul.f32 %v6434_v19, %v12984_v18  ;;  %v5799_v14 = vadd.f32 %v14994_v41, %v5671_v21  ;;  %v5776_v43 = vadd.f32 %v14996_v17, %v14995_v10  ;;  %v15000_v47 = vld [vmem:[#allocation76_spill] sm:$0xff]  ;;  %v15003_v21 = vld [vmem:[#allocation42_spill] sm:$0xff]  ;;  %v15007_v17 = vld [vmem:[#allocation59_spill] sm:$0xff] }
 0x794   : > { %v5983_v31 = vadd.f32 %v5974_v8, %v5775_v0  ;;  %v5982_v34 = vadd.f32 %v5972_v55, %v5774_v50  ;;  %v5533_v38 = vadd.f32 %v14997_v11, %v5325_v13  ;;  %v6461_v48 = vmul.f32 %v13248_v6, %v12974_v25  ;;  %v15005_v13 = vld [vmem:[#allocation112_spill] sm:$0xff] }
 0x795   : > { %6443 = vrot.lane.b32.xlu0 %v6435_v2, %s14427_s0  ;;  %6423 = vrot.lane.b32.xlu1 %v6412_v32, %s14418_s6  ;;  %v6167_v62 = vmul.f32 %v6166_v3, %v12974_v25  ;;  %v6160_v32 = vmul.f32 %v6156_v9, %v12996_v37  ;;  %v5673_v63 = vadd.f32 %v13109_v7, %v5509_v58  ;;  %v15001_v2 = vld [vmem:[#allocation90_spill] sm:$0xff]  ;;  %v13294_v9 = vstv %s13250_s8  ;;  %s7664_s8 = sld [smem:[#allocation10 + $0x23]] }
 0x796   : > { %v13275_v44 = vadd.f32 %v6159_v35, %v5983_v31  ;;  %v13277_v28 = vadd.f32 %v6158_v27, %v5982_v34  ;;  %v5672_v16 = vadd.f32 %v13113_v26, %v5508_v52  ;;  %v5327_v12 = vadd.f32 %v14999_v40, %v14998_v24  ;;  %v15002_v7 = vld [vmem:[#allocation34_spill] sm:$0xff]  ;;  %v15004_v27 = vld [vmem:[#allocation37_spill] sm:$0xff]  ;;  %v15012_v24 = vld [vmem:[#allocation80_spill] sm:$0xff] }
 0x797   : > { %v5996_v30 = vpop.permute.xlu0 %5995  ;;  %v5976_v56 = vpop.permute.xlu1 %5975  ;;  %v5326_v0 = vadd.f32 %v15001_v2, %v15000_v47  ;;  %v6438_v50 = vmul.f32 %v6434_v19, %v12996_v37  ;;  %v5801_v26 = vadd.f32 %v15002_v7, %v5673_v63  ;;  %v5681_v58 = vadd.f32 %v15004_v27, %v5533_v38  ;;  %v15011_v63 = vld [vmem:[#allocation30_spill] sm:$0xff]  ;;  %v15014_v27 = vld [vmem:[#allocation77_spill] sm:$0xff] }
 0x798   : > { %v6007_v1 = vadd.f32 %v5996_v30, %v5799_v14  ;;  %v5984_v5 = vadd.f32 %v5976_v56, %v5776_v43  ;;  %v5800_v8 = vadd.f32 %v15003_v21, %v5672_v16  ;;  %v6169_v34 = vmul.f32 %v6166_v3, %v12986_v53  ;;  %v15008_v43 = vld [vmem:[#allocation65_spill] sm:$0xff]  ;;  %v15009_v56 = vld [vmem:[#allocation120_spill] sm:$0xff] }
 0x799   : > { %6447 = vrot.lane.b32.xlu0 %v6437_v4, %s14427_s0  ;;  %6445 = vrot.lane.b32.xlu1 %v6436_v29, %s14427_s0  ;;  %v6168_v19 = vmul.f32 %v6166_v3, %v12984_v18  ;;  %v6176_v33 = vstv %s13262_s12  ;;  %v5535_v4 = vadd.f32 %v15005_v13, %v5327_v12  ;;  %v15006_v29 = vld [vmem:[#allocation53_spill] sm:$0xff]  ;;  %v5351_v11 = vadd.f32 %v15008_v43, %v15007_v17  ;;  %s13700_s12 = sld [smem:[#allocation10 + $0x69]] }
 0x79a   : > { %v13300_v55 = vadd.f32 %v6167_v62, %v6007_v1  ;;  %v13302_v35 = vadd.f32 %v6160_v32, %v5984_v5  ;;  %v5534_v41 = vadd.f32 %v15006_v29, %v5326_v0  ;;  %v6463_v38 = vmul.f32 %v13248_v6, %v12986_v53  ;;  %v15010_v32 = vld [vmem:[#allocation58_spill] sm:$0xff]  ;;  %v15019_v29 = vld [vmem:[#allocation88_spill] sm:$0xff] }
 0x79b   : > { %v6000_v52 = vpop.permute.xlu0 %5999  ;;  %v5998_v31 = vpop.permute.xlu1 %5997  ;;  %v6462_v30 = vmul.f32 %v13248_v6, %v12984_v18  ;;  %v5825_v62 = vadd.f32 %v15009_v56, %v5681_v58  ;;  %v5802_v16 = vadd.f32 %v15011_v63, %v15010_v32  ;;  %v6487_v47 = vmul.f32 %v13294_v9, %v12974_v25  ;;  %v15015_v58 = vld [vmem:[#allocation78_spill] sm:$0xff]  ;;  %v15020_v56 = vld [vmem:[#allocation81_spill] sm:$0xff]  ;;  %v15021_v32 = vld [vmem:[#allocation108_spill] sm:$0xff] }
 0x79c   : > { %v6009_v14 = vadd.f32 %v6000_v52, %v5801_v26  ;;  %v6008_v10 = vadd.f32 %v5998_v31, %v5800_v8  ;;  %v6177_v2 = vmul.f32 %v6176_v33, %v12974_v25  ;;  %v6170_v0 = vmul.f32 %v6166_v3, %v12996_v37  ;;  %v15016_v31 = vld [vmem:[#allocation62_spill] sm:$0xff] }
 0x79d   : > { %6469 = vrot.lane.b32.xlu0 %v6461_v48, %s14427_s0  ;;  %6449 = vrot.lane.b32.xlu1 %v6438_v50, %s14427_s0  ;;  %v5559_v48 = vadd.f32 %v15012_v24, %v5351_v11  ;;  %v15013_v50 = vld [vmem:[#allocation130_spill] sm:$0xff]  ;;  %v5682_v26 = vadd.f32 %v13125_v15, %v5534_v41  ;;  %v5353_v52 = vadd.f32 %v15015_v58, %v15014_v27  ;;  %v13343_v13 = vstv %s13296_s23  ;;  %v15018_v15 = vld [vmem:[#allocation104_spill] sm:$0xff]  ;;  %v15027_v58 = vld [vmem:[#allocation129_spill] sm:$0xff]  ;;  %s13712_s23 = sld [smem:[#allocation10 + $0x47]] }
 0x79e   : > { %v13323_v1 = vadd.f32 %v6169_v34, %v6009_v14  ;;  %v13325_v5 = vadd.f32 %v6168_v19, %v6008_v10  ;;  %v5683_v7 = vadd.f32 %v15013_v50, %v5535_v4  ;;  %v15017_v34 = vld [vmem:[#allocation101_spill] sm:$0xff]  ;;  %v6464_v3 = vmul.f32 %v13248_v6, %v12996_v37 }
 0x79f   : > { %v6022_v40 = vpop.permute.xlu0 %6021  ;;  %v6002_v12 = vpop.permute.xlu1 %6001  ;;  %v5352_v19 = vadd.f32 %v15017_v34, %v15016_v31  ;;  %v5826_v41 = vadd.f32 %v15019_v29, %v5682_v26  ;;  %v5691_v17 = vadd.f32 %v13135_v60, %v5559_v48  ;;  %v6178_v6 = vmul.f32 %v6176_v33, %v12984_v18  ;;  %v15026_v26 = vld [vmem:[#allocation93_spill] sm:$0xff] }
 0x7a0   : > { %v6033_v21 = vadd.f32 %v6022_v40, %v5825_v62  ;;  %v6010_v8 = vadd.f32 %v6002_v12, %v5802_v16  ;;  %v5827_v4 = vadd.f32 %v15018_v15, %v5683_v7  ;;  %v5561_v62 = vadd.f32 %v15020_v56, %v5353_v52  ;;  %v15022_v40 = vld [vmem:[#allocation66_spill] sm:$0xff]  ;;  %v15023_v12 = vld [vmem:[#allocation79_spill] sm:$0xff]  ;;  %v15032_v56 = vld [vmem:[#allocation52_spill] sm:$0xff] }
 0x7a1   : > { %6473 = vrot.lane.b32.xlu0 %v6463_v38, %s14427_s0  ;;  %6471 = vrot.lane.b32.xlu1 %v6462_v30, %s14427_s0  ;;  %v6179_v38 = vmul.f32 %v6176_v33, %v12986_v53  ;;  %v6186_v30 = vstv %s13308_s13  ;;  %v5560_v63 = vadd.f32 %v15021_v32, %v5352_v19  ;;  %v6489_v60 = vmul.f32 %v13294_v9, %v12986_v53  ;;  %v15025_v7 = vld [vmem:[#allocation106_spill] sm:$0xff]  ;;  %s13733_s13 = sld [smem:[#allocation10 + $0x8d]] }
 0x7a2   : > { %v13349_v14 = vadd.f32 %v6177_v2, %v6033_v21  ;;  %v13351_v10 = vadd.f32 %v6170_v0, %v6010_v8  ;;  %v5377_v2 = vadd.f32 %v15023_v12, %v15022_v40  ;;  %v6488_v48 = vmul.f32 %v13294_v9, %v12984_v18  ;;  %v15024_v0 = vld [vmem:[#allocation36_spill] sm:$0xff] }
 0x7a3   : > { %v6026_v43 = vpop.permute.xlu0 %6025  ;;  %v6024_v11 = vpop.permute.xlu1 %6023  ;;  %v5851_v50 = vadd.f32 %v15024_v0, %v5691_v17  ;;  %v5828_v21 = vadd.f32 %v15026_v26, %v15025_v7  ;;  %v6513_v34 = vmul.f32 %v13343_v13, %v12974_v25  ;;  %v6187_v19 = vmul.f32 %v6186_v30, %v12974_v25 }
 0x7a4   : > { %v6035_v16 = vadd.f32 %v6026_v43, %v5827_v4  ;;  %v6034_v24 = vadd.f32 %v6024_v11, %v5826_v41  ;;  %v5693_v15 = vadd.f32 %v13139_v57, %v5561_v62  ;;  %v15028_v4 = vld [vmem:[#allocation114_spill] sm:$0xff]  ;;  %v15033_v57 = vld [vmem:[#allocation113_spill] sm:$0xff]  ;;  %v6196_v26 = vstv %s13357_s11  ;;  %s13780_s11 = sld [smem:[#allocation10 + $0x8f]] }
 0x7a5   : > { %6495 = vrot.lane.b32.xlu0 %v6487_v47, %s14427_s0  ;;  %6475 = vrot.lane.b32.xlu1 %v6464_v3, %s14427_s0  ;;  %v5585_v47 = vadd.f32 %v15027_v58, %v5377_v2  ;;  %v6180_v3 = vmul.f32 %v6176_v33, %v12996_v37  ;;  %v5692_v29 = vadd.f32 %v15028_v4, %v5560_v63  ;;  %v15029_v43 = vld [vmem:[#allocation74_spill] sm:$0xff]  ;;  %v15034_v63 = vld [vmem:[#allocation51_spill] sm:$0xff]  ;;  %v15037_v58 = vld [vmem:[#allocation124_spill] sm:$0xff] }
 0x7a6   : > { %v13372_v8 = vadd.f32 %v6179_v38, %v6035_v16  ;;  %v13374_v27 = vadd.f32 %v6178_v6, %v6034_v24  ;;  %v15030_v11 = vld [vmem:[#allocation102_spill] sm:$0xff]  ;;  %v15031_v6 = vld [vmem:[#allocation67_spill] sm:$0xff]  ;;  %v6490_v33 = vmul.f32 %v13294_v9, %v12996_v37  ;;  %v13392_v16 = vstv %s13345_s16  ;;  %s13767_s16 = sld [smem:[#allocation10 + $0xb1]] }
 0x7a7   : > { %v6048_v52 = vpop.permute.xlu0 %6047  ;;  %v6028_v31 = vpop.permute.xlu1 %6027  ;;  %v5379_v38 = vadd.f32 %v15030_v11, %v15029_v43  ;;  %v5378_v32 = vadd.f32 %v15032_v56, %v15031_v6  ;;  %v5853_v62 = vadd.f32 %v15033_v57, %v5693_v15  ;;  %v5852_v24 = vadd.f32 %v15034_v63, %v5692_v29  ;;  %v15035_v2 = vld [vmem:[#allocation94_spill] sm:$0xff]  ;;  %v15041_v43 = vld [vmem:[#allocation91_spill] sm:$0xff]  ;;  %v15042_v11 = vld [vmem:[#allocation85_spill] sm:$0xff] }
 0x7a8   : > { %v6059_v41 = vadd.f32 %v6048_v52, %v5851_v50  ;;  %v6036_v17 = vadd.f32 %v6028_v31, %v5828_v21  ;;  %v5701_v0 = vadd.f32 %v15035_v2, %v5585_v47  ;;  %v15036_v9 = vld [vmem:[#allocation54_spill] sm:$0xff]  ;;  %v6515_v47 = vmul.f32 %v13343_v13, %v12986_v53 }
 0x7a9   : > { %6499 = vrot.lane.b32.xlu0 %v6489_v60, %s14427_s0  ;;  %6497 = vrot.lane.b32.xlu1 %v6488_v48, %s14427_s0  ;;  %v6189_v60 = vmul.f32 %v6186_v30, %v12986_v53  ;;  %v6188_v48 = vmul.f32 %v6186_v30, %v12984_v18  ;;  %v5587_v21 = vadd.f32 %v15036_v9, %v5379_v38  ;;  %v15038_v15 = vld [vmem:[#allocation22_spill] sm:$0xff] }
 0x7aa   : > { %v13396_v40 = vadd.f32 %v6187_v19, %v6059_v41  ;;  %v13398_v12 = vadd.f32 %v6180_v3, %v6036_v17  ;;  %v5586_v52 = vadd.f32 %v15037_v58, %v5378_v32  ;;  %v15039_v3 = vld [vmem:[#allocation116_spill] sm:$0xff]  ;;  %v6514_v29 = vmul.f32 %v13343_v13, %v12984_v18  ;;  %v15040_v41 = vld [vmem:[#allocation87_spill] sm:$0xff] }
 0x7ab   : > { %v6052_v50 = vpop.permute.xlu0 %6051  ;;  %v6050_v7 = vpop.permute.xlu1 %6049  ;;  %v5403_v4 = vadd.f32 %v15039_v3, %v15038_v15  ;;  %v5877_v17 = vadd.f32 %v15040_v41, %v5701_v0  ;;  %v5854_v38 = vadd.f32 %v15042_v11, %v15041_v43  ;;  %v6197_v63 = vmul.f32 %v6196_v26, %v12974_v25  ;;  %v15046_v58 = vld [vmem:[#allocation24_spill] sm:$0xff]  ;;  %v15048_v15 = vld [vmem:[#allocation121_spill] sm:$0xff] }
 0x7ac   : > { %v6061_v31 = vadd.f32 %v6052_v50, %v5853_v62  ;;  %v6060_v19 = vadd.f32 %v6050_v7, %v5852_v24  ;;  %v6539_v62 = vmul.f32 %v13392_v16, %v12974_v25  ;;  %v6190_v24 = vmul.f32 %v6186_v30, %v12996_v37 }
 0x7ad   : > { %6521 = vrot.lane.b32.xlu0 %v6513_v34, %s14427_s0  ;;  %6501 = vrot.lane.b32.xlu1 %v6490_v33, %s14427_s0  ;;  %v15043_v34 = vld [vmem:[#allocation83_spill] sm:$0xff]  ;;  %v5703_v2 = vadd.f32 %v13161_v45, %v5587_v21  ;;  %v5702_v0 = vadd.f32 %v13167_v20, %v5586_v52  ;;  %v6516_v30 = vmul.f32 %v13343_v13, %v12996_v37  ;;  %v15049_v21 = vld [vmem:[#allocation86_spill] sm:$0xff]  ;;  %v6206_v43 = vstv %s13404_s24  ;;  %v15050_v13 = vld [vmem:[#allocation49_spill] sm:$0xff]  ;;  %s13801_s24 = sld [smem:[#allocation10 + $0xd5]] }
 0x7ae   : > { %v13421_v6 = vadd.f32 %v6189_v60, %v6061_v31  ;;  %v13423_v56 = vadd.f32 %v6188_v48, %v6060_v19  ;;  %v5611_v32 = vadd.f32 %v15043_v34, %v5403_v4  ;;  %v15044_v60 = vld [vmem:[#allocation23_spill] sm:$0xff]  ;;  %v15045_v48 = vld [vmem:[#allocation96_spill] sm:$0xff] }
 0x7af   : > { %v6074_v33 = vpop.permute.xlu0 %6073  ;;  %v6054_v57 = vpop.permute.xlu1 %6053  ;;  %v5405_v9 = vadd.f32 %v15045_v48, %v15044_v60  ;;  %v15047_v31 = vld [vmem:[#allocation48_spill] sm:$0xff]  ;;  %v5879_v45 = vadd.f32 %v15048_v15, %v5703_v2  ;;  %v5878_v20 = vadd.f32 %v15049_v21, %v5702_v0  ;;  %v13463_v0 = vstv %s13416_s26  ;;  %v15055_v60 = vld [vmem:[#allocation109_spill] sm:$0xff]  ;;  %s13814_s26 = sld [smem:[#allocation10 + $0xb3]] }
 0x7b0   : > { %v6085_v50 = vadd.f32 %v6074_v33, %v5877_v17  ;;  %v6062_v7 = vadd.f32 %v6054_v57, %v5854_v38  ;;  %v5404_v19 = vadd.f32 %v15047_v31, %v15046_v58  ;;  %v5711_v4 = vadd.f32 %v13171_v36, %v5611_v32  ;;  %v15051_v38 = vld [vmem:[#allocation29_spill] sm:$0xff] }
 0x7b1   : > { %6525 = vrot.lane.b32.xlu0 %v6515_v47, %s14427_s0  ;;  %6523 = vrot.lane.b32.xlu1 %v6514_v29, %s14427_s0  ;;  %v6199_v47 = vmul.f32 %v6196_v26, %v12986_v53  ;;  %v6198_v29 = vmul.f32 %v6196_v26, %v12984_v18  ;;  %v5613_v11 = vadd.f32 %v15050_v13, %v5405_v9  ;;  %v15056_v48 = vld [vmem:[#allocation117_spill] sm:$0xff]  ;;  %v15059_v13 = vld [vmem:[#allocation68_spill] sm:$0xff] }
 0x7b2   : > { %v13442_v52 = vadd.f32 %v6197_v63, %v6085_v50  ;;  %v13444_v3 = vadd.f32 %v6190_v24, %v6062_v7  ;;  %v5612_v34 = vadd.f32 %v15051_v38, %v5404_v19  ;;  %v15052_v63 = vld [vmem:[#allocation25_spill] sm:$0xff]  ;;  %v6541_v36 = vmul.f32 %v13392_v16, %v12986_v53  ;;  %v15054_v50 = vld [vmem:[#allocation122_spill] sm:$0xff] }
 0x7b3   : > { %v6078_v41 = vpop.permute.xlu0 %6077  ;;  %v6076_v17 = vpop.permute.xlu1 %6075  ;;  %v15053_v24 = vld [vmem:[#allocation57_spill] sm:$0xff]  ;;  %v6540_v32 = vmul.f32 %v13392_v16, %v12984_v18  ;;  %v5903_v7 = vadd.f32 %v15054_v50, %v5711_v4  ;;  %v5880_v9 = vadd.f32 %v15056_v48, %v15055_v60  ;;  %v6207_v21 = vmul.f32 %v6206_v43, %v12974_v25  ;;  %v15066_v48 = vld [vmem:[#allocation118_spill] sm:$0xff] }
 0x7b4   : > { %v6087_v33 = vadd.f32 %v6078_v41, %v5879_v45  ;;  %v6086_v57 = vadd.f32 %v6076_v17, %v5878_v20  ;;  %v5429_v2 = vadd.f32 %v15053_v24, %v15052_v63  ;;  %v6542_v45 = vmul.f32 %v13392_v16, %v12996_v37 }
 0x7b5   : > { %6547 = vrot.lane.b32.xlu0 %v6539_v62, %s14427_s0  ;;  %6527 = vrot.lane.b32.xlu1 %v6516_v30, %s14427_s0  ;;  %v15057_v62 = vld [vmem:[#allocation27_spill] sm:$0xff]  ;;  %v6200_v20 = vmul.f32 %v6196_v26, %v12996_v37  ;;  %v5713_v4 = vadd.f32 %v13181_v23, %v5613_v11  ;;  %v5712_v41 = vadd.f32 %v13185_v61, %v5612_v34 }
 0x7b6   : > { %v13468_v58 = vadd.f32 %v6199_v47, %v6087_v33  ;;  %v13470_v31 = vadd.f32 %v6198_v29, %v6086_v57  ;;  %v5637_v19 = vadd.f32 %v15057_v62, %v5429_v2  ;;  %v15058_v29 = vld [vmem:[#allocation26_spill] sm:$0xff]  ;;  %v15061_v57 = vld [vmem:[#allocation103_spill] sm:$0xff]  ;;  %v6565_v16 = vmul.f32 %v13463_v0, %v12974_v25 }
 0x7b7   : > { %v6100_v30 = vpop.permute.xlu0 %6099  ;;  %v6080_v15 = vpop.permute.xlu1 %6079  ;;  %v5431_v38 = vadd.f32 %v15059_v13, %v15058_v29  ;;  %v15060_v33 = vld [vmem:[#allocation98_spill] sm:$0xff]  ;;  %v15062_v26 = vld [vmem:[#allocation119_spill] sm:$0xff]  ;;  %v6209_v60 = vmul.f32 %v6206_v43, %v12986_v53  ;;  %v15070_v13 = vld [vmem:[#allocation89_spill] sm:$0xff] }
 0x7b8   : > { %v6111_v17 = vadd.f32 %v6100_v30, %v5903_v7  ;;  %v6088_v47 = vadd.f32 %v6080_v15, %v5880_v9  ;;  %v5430_v63 = vadd.f32 %v15061_v57, %v15060_v33  ;;  %v5905_v23 = vadd.f32 %v15062_v26, %v5713_v4  ;;  %v15063_v11 = vld [vmem:[#allocation31_spill] sm:$0xff]  ;;  %v15067_v62 = vld [vmem:[#allocation82_spill] sm:$0xff] }
 0x7b9   : > { %6551 = vrot.lane.b32.xlu0 %v6541_v36, %s14427_s0  ;;  %6549 = vrot.lane.b32.xlu1 %v6540_v32, %s14427_s0  ;;  %v5904_v61 = vadd.f32 %v15063_v11, %v5712_v41  ;;  %v5721_v2 = vadd.f32 %v13191_v42, %v5637_v19  ;;  %v6208_v36 = vmul.f32 %v6206_v43, %v12984_v18  ;;  %v6216_v32 = vstv %s13450_s29  ;;  %v7993_v41 = vld [vmem:[#allocation2 + $0x80] sm:$0xff]  ;;  %s13835_s29 = sld [smem:[#allocation10 + $0xf9]] }
 0x7ba   : > { %v13491_v34 = vadd.f32 %v6207_v21, %v6111_v17  ;;  %v13493_v24 = vadd.f32 %v6200_v20, %v6088_v47  ;;  %v5639_v9 = vadd.f32 %v15066_v48, %v5431_v38  ;;  %v5638_v30 = vadd.f32 %v15067_v62, %v5430_v63  ;;  %v7992_v21 = vld [vmem:[#allocation2 + $0x88] sm:$0xff]  ;;  %v15068_v17 = vld [vmem:[#allocation44_spill] sm:$0xff]  ;;  %v15069_v29 = vld [vmem:[#allocation70_spill] sm:$0xff] }
 0x7bb   : > { %v6104_v50 = vpop.permute.xlu0 %6103  ;;  %v6102_v7 = vpop.permute.xlu1 %6101  ;;  %v5719_v20 = vmul.f32 %v7992_v21, %v12952_v22  ;;  %v5718_v42 = vmul.f32 %v7993_v41, %v12952_v22  ;;  %v6567_v19 = vmul.f32 %v13463_v0, %v12986_v53  ;;  %v5929_v47 = vadd.f32 %v15068_v17, %v5721_v2 }
 0x7bc   : > { %15064 = vst [vmem:[#allocation38_spill] sm:$0xff] %v13491_v34  ;;  %15065 = vst [vmem:[#allocation95_spill] sm:$0xff] %v13493_v24  ;;  %v6113_v15 = vadd.f32 %v6104_v50, %v5905_v23  ;;  %v6112_v4 = vadd.f32 %v6102_v7, %v5904_v61  ;;  %v5906_v38 = vadd.f32 %v15070_v13, %v15069_v29  ;;  %v15073_v7 = vld [vmem:[#allocation105_spill] sm:$0xff] }
 0x7bd   : > { %6573 = vrot.lane.b32.xlu0 %v6565_v16, %s14427_s0  ;;  %6553 = vrot.lane.b32.xlu1 %v6542_v45, %s14427_s0  ;;  %v6566_v22 = vmul.f32 %v13463_v0, %v12984_v18  ;;  %v6590_v16 = vstv %s13475_s30  ;;  %v6217_v45 = vmul.f32 %v6216_v32, %v12974_v25  ;;  %v6210_v23 = vmul.f32 %v6206_v43, %v12996_v37  ;;  %s13848_s30 = sld [smem:[#allocation10 + $0xd7]] }
 0x7be   : > { %v13510_v33 = vadd.f32 %v6209_v60, %v6113_v15  ;;  %v13512_v57 = vadd.f32 %v6208_v36, %v6112_v4  ;;  %v5723_v11 = vadd.f32 %v5719_v20, %v5639_v9  ;;  %v5722_v61 = vadd.f32 %v5718_v42, %v5638_v30  ;;  %v15074_v36 = vld [vmem:[#allocation92_spill] sm:$0xff] }
 0x7bf   : > { %v6126_v63 = vpop.permute.xlu0 %6125  ;;  %v6106_v26 = vpop.permute.xlu1 %6105  ;;  %v6591_v43 = vmul.f32 %v6590_v16, %v12974_v25  ;;  %v6568_v9 = vmul.f32 %v13463_v0, %v12996_v37  ;;  %v6219_v41 = vmul.f32 %v6216_v32, %v12986_v53  ;;  %v6218_v42 = vmul.f32 %v6216_v32, %v12984_v18 }
 0x7c0   : > { %15071 = vst [vmem:[#allocation46_spill] sm:$0xff] %v13510_v33  ;;  %15072 = vst [vmem:[#allocation50_spill] sm:$0xff] %v13512_v57  ;;  %v6137_v2 = vadd.f32 %v6126_v63, %v5929_v47  ;;  %v6114_v50 = vadd.f32 %v6106_v26, %v5906_v38  ;;  %v5931_v60 = vadd.f32 %v15073_v7, %v5723_v11  ;;  %v6856_v57 = vstv %s7661_s2 }
 0x7c1   : > { %6577 = vrot.lane.b32.xlu0 %v6567_v19, %s14427_s0  ;;  %6575 = vrot.lane.b32.xlu1 %v6566_v22, %s14427_s0  ;;  %v5930_v48 = vadd.f32 %v15074_v36, %v5722_v61  ;;  %v15077_v19 = vld [vmem:[#allocation110_spill] sm:$0xff]  ;;  %v6593_v38 = vmul.f32 %v6590_v16, %v12986_v53  ;;  %v6592_v63 = vmul.f32 %v6590_v16, %v12984_v18  ;;  %v6616_v22 = vstv %s7647_s9  ;;  %s13869_s9 = sld [smem:[#allocation10 + $0x11d]] }
 0x7c2   : > { %v13523_v62 = vadd.f32 %v6217_v45, %v6137_v2  ;;  %v13525_v15 = vadd.f32 %v6210_v23, %v6114_v50  ;;  %v5932_v17 = vadd.f32 %v13193_v49, %v15077_v19  ;;  %v6220_v45 = vmul.f32 %v6216_v32, %v12996_v37  ;;  %v13563_v36 = vld [vmem:[#allocation2 + $0x7a] sm:$0xff] }
 0x7c3   : > { %v6130_v4 = vpop.permute.xlu0 %6129  ;;  %v6128_v21 = vpop.permute.xlu1 %6127  ;;  %v6617_v61 = vmul.f32 %v6616_v22, %v12974_v25  ;;  %v6594_v2 = vmul.f32 %v6590_v16, %v12996_v37  ;;  %v6619_v7 = vmul.f32 %v6616_v22, %v12986_v53  ;;  %v13575_v53 = vld [vmem:[#allocation2 + $0x8a] sm:$0xff] }
 0x7c4   : > { %15075 = vst [vmem:[#allocation28_spill] sm:$0xff] %v13523_v62  ;;  %15076 = vst [vmem:[#allocation115_spill] sm:$0xff] %v13525_v15  ;;  %v6139_v30 = vadd.f32 %v6130_v4, %v5931_v60  ;;  %v6138_v20 = vadd.f32 %v6128_v21, %v5930_v48  ;;  %v6618_v60 = vmul.f32 %v6616_v22, %v12984_v18  ;;  %v6726_v48 = vstv %s7656_s7  ;;  %s7670_s7 = sld [smem:[#allocation10 + $0xfb]] }
 0x7c5   : > { %6599 = vrot.lane.b32.xlu0 %v6591_v43, %s14427_s0  ;;  %6579 = vrot.lane.b32.xlu1 %v6568_v9, %s14427_s0  ;;  %v6727_v4 = vmul.f32 %v6726_v48, %v13563_v36  ;;  %v6620_v21 = vmul.f32 %v6616_v22, %v12996_v37  ;;  %v13573_v43 = vld [vmem:[#allocation2 + $0x82] sm:$0xff] }
 0x7c6   : > { %v13536_v47 = vadd.f32 %v6219_v41, %v6139_v30  ;;  %v13538_v29 = vadd.f32 %v6218_v42, %v6138_v20  ;;  %v6729_v30 = vmul.f32 %v6726_v48, %v13575_v53  ;;  %v6728_v20 = vmul.f32 %v6726_v48, %v13573_v43  ;;  %v13585_v41 = vld [vmem:[#allocation2 + $0x92] sm:$0xff] }
 0x7c7   : > { %v13540_v13 = vpop.permute.xlu0 %6235  ;;  %v6132_v0 = vpop.permute.xlu1 %6131  ;;  %v6752_v42 = vstv %s7657_s10  ;;  %s7671_s10 = sld [smem:[#allocation10 + $0x11f]] }
 0x7c8   : > { %15078 = vst [vmem:[#allocation32_spill] sm:$0xff] %v13538_v29  ;;  %v6140_v26 = vadd.f32 %v6132_v0, %v5932_v17  ;;  %v6753_v17 = vmul.f32 %v6752_v42, %v13563_v36  ;;  %v6730_v0 = vmul.f32 %v6726_v48, %v13585_v41  ;;  %v6754_v22 = vmul.f32 %v6752_v42, %v13573_v43 }
 0x7c9   : > { %6603 = vrot.lane.b32.xlu0 %v6593_v38, %s14427_s0  ;;  %6601 = vrot.lane.b32.xlu1 %v6592_v63, %s14427_s0 }
 0x7ca   : > { %v13547_v49 = vadd.f32 %v6220_v45, %v6140_v26  ;;  %v6755_v26 = vmul.f32 %v6752_v42, %v13575_v53  ;;  %v6778_v45 = vstv %s7658_s27 }
 0x7cb   : > { %v13549_v23 = vpop.permute.xlu0 %6239  ;;  %v13551_v11 = vpop.permute.xlu1 %6237 }
 0x7cd   : > { %6625 = vrot.lane.b32.xlu0 %v6617_v61, %s14427_s0  ;;  %6605 = vrot.lane.b32.xlu1 %v6594_v2, %s14427_s0 }
 0x7cf   : > { %v13557_v50 = vpop.permute.xlu0 %6261  ;;  %v13559_v32 = vpop.permute.xlu1 %6241 }
 0x7d1   : > { %6629 = vrot.lane.b32.xlu0 %v6619_v7, %s14427_s0  ;;  %6627 = vrot.lane.b32.xlu1 %v6618_v60, %s14427_s0  ;;  %v6779_v7 = vmul.f32 %v6778_v45, %v13563_v36  ;;  %v6756_v60 = vmul.f32 %v6752_v42, %v13585_v41 }
 0x7d3   : > { %v13567_v25 = vpop.permute.xlu0 %6265  ;;  %v13569_v16 = vpop.permute.xlu1 %6263 }
 0x7d5   : > { %6735 = vrot.lane.b32.xlu0 %v6727_v4, %s14418_s6  ;;  %6631 = vrot.lane.b32.xlu1 %v6620_v21, %s14427_s0  ;;  %v6781_v21 = vmul.f32 %v6778_v45, %v13575_v53 }
 0x7d7   : > { %v13579_v18 = vpop.permute.xlu0 %6287  ;;  %v13581_v9 = vpop.permute.xlu1 %6267 }
 0x7d9   : > { %6739 = vrot.lane.b32.xlu0 %v6729_v30, %s14418_s6  ;;  %6737 = vrot.lane.b32.xlu1 %v6728_v20, %s14418_s6  ;;  %v6780_v30 = vmul.f32 %v6778_v45, %v13573_v43  ;;  %v6804_v20 = vstv %s7659_s28  ;;  %s7706_s28 = sshll.u32 %s8229_s22, 12  ;;  %s7182_s22 = scalar_lea.sflag [#allocation5], %s8374_s15 }
 0x7db   : > { %v13589_v37 = vpop.permute.xlu0 %6291  ;;  %v13591_v19 = vpop.permute.xlu1 %6289 }
 0x7dd   : > { %6761 = vrot.lane.b32.xlu0 %v6753_v17, %s14418_s6  ;;  %6741 = vrot.lane.b32.xlu1 %v6730_v0, %s14418_s6  ;;  %v6805_v0 = vmul.f32 %v6804_v20, %v13563_v36 }
 0x7df   : > { %v13597_v38 = vpop.permute.xlu0 %6313  ;;  %v13599_v63 = vpop.permute.xlu1 %6293 }
 0x7e1   : > { %6765 = vrot.lane.b32.xlu0 %v6755_v26, %s14418_s6  ;;  %6763 = vrot.lane.b32.xlu1 %v6754_v22, %s14418_s6  ;;  %v6782_v26 = vmul.f32 %v6778_v45, %v13585_v41 }
 0x7e3   : > { %v13605_v61 = vpop.permute.xlu0 %6317  ;;  %v13607_v2 = vpop.permute.xlu1 %6315 }
 0x7e5   : > { %6787 = vrot.lane.b32.xlu0 %v6779_v7, %s14418_s6  ;;  %6767 = vrot.lane.b32.xlu1 %v6756_v60, %s14418_s6  ;;  %v6807_v60 = vmul.f32 %v6804_v20, %v13575_v53 }
 0x7e7   : > { %v13613_v48 = vpop.permute.xlu0 %6339  ;;  %v13615_v4 = vpop.permute.xlu1 %6319 }
 0x7e9   : > { %6791 = vrot.lane.b32.xlu0 %v6781_v21, %s14418_s6  ;;  %6789 = vrot.lane.b32.xlu1 %v6780_v30, %s14418_s6  ;;  %v6806_v21 = vmul.f32 %v6804_v20, %v13573_v43  ;;  %v6830_v30 = vstv %s7660_s1 }
 0x7eb   : > { %v13621_v17 = vpop.permute.xlu0 %6343  ;;  %v13623_v42 = vpop.permute.xlu1 %6341 }
 0x7ed   : > { %6813 = vrot.lane.b32.xlu0 %v6805_v0, %s14418_s6  ;;  %6793 = vrot.lane.b32.xlu1 %v6782_v26, %s14418_s6  ;;  %v6831_v0 = vmul.f32 %v6830_v30, %v13563_v36  ;;  %v6808_v26 = vmul.f32 %v6804_v20, %v13585_v41 }
 0x7ef   : > { %v13629_v22 = vpop.permute.xlu0 %6365  ;;  %v13631_v7 = vpop.permute.xlu1 %6345 }
 0x7f1   : > { %6817 = vrot.lane.b32.xlu0 %v6807_v60, %s14418_s6  ;;  %6815 = vrot.lane.b32.xlu1 %v6806_v21, %s14418_s6  ;;  %v6833_v60 = vmul.f32 %v6830_v30, %v13575_v53  ;;  %v6832_v21 = vmul.f32 %v6830_v30, %v13573_v43 }
 0x7f3   : > { %v13637_v29 = vpop.permute.xlu0 %6369  ;;  %v13639_v45 = vpop.permute.xlu1 %6367 }
 0x7f5   : > { %6839 = vrot.lane.b32.xlu0 %v6831_v0, %s14418_s6  ;;  %6819 = vrot.lane.b32.xlu1 %v6808_v26, %s14418_s6  ;;  %v6857_v0 = vmul.f32 %v6856_v57, %v13563_v36  ;;  %v6834_v26 = vmul.f32 %v6830_v30, %v13585_v41 }
 0x7f7   : > { %v13645_v15 = vpop.permute.xlu0 %6391  ;;  %v13647_v62 = vpop.permute.xlu1 %6371 }
 0x7f8   : > { %15079 = vst [vmem:[#allocation35_spill] sm:$0xff] %v13645_v15  ;;  %15080 = vst [vmem:[#allocation47_spill] sm:$0xff] %v13647_v62 }
 0x7f9   : > { %6843 = vrot.lane.b32.xlu0 %v6833_v60, %s14418_s6  ;;  %6841 = vrot.lane.b32.xlu1 %v6832_v21, %s14418_s6  ;;  %v6859_v60 = vmul.f32 %v6856_v57, %v13575_v53  ;;  %v6858_v21 = vmul.f32 %v6856_v57, %v13573_v43 }
 0x7fb   : > { %v13653_v33 = vpop.permute.xlu0 %6395  ;;  %v13655_v20 = vpop.permute.xlu1 %6393 }
 0x7fc   : > { %15081 = vst [vmem:[#allocation43_spill] sm:$0xff] %v13653_v33  ;;  %15082 = vst [vmem:[#allocation131_spill] sm:$0xff] %v13655_v20  ;;  %v6882_v33 = vstv %s7662_s3 }
 0x7fd   : > { %6865 = vrot.lane.b32.xlu0 %v6857_v0, %s14418_s6  ;;  %6845 = vrot.lane.b32.xlu1 %v6834_v26, %s14418_s6  ;;  %v6883_v0 = vmul.f32 %v6882_v33, %v13563_v36  ;;  %v6860_v26 = vmul.f32 %v6856_v57, %v13585_v41  ;;  %v6884_v34 = vmul.f32 %v6882_v33, %v13573_v43 }
 0x7ff   : > { %v13661_v62 = vpop.permute.xlu0 %6417  ;;  %v13663_v24 = vpop.permute.xlu1 %6397 }
 0x800   : > { %15083 = vst [vmem:[#allocation97_spill] sm:$0xff] %v13661_v62  ;;  %15084 = vst [vmem:[#allocation71_spill] sm:$0xff] %v13663_v24  ;;  %v6646_v24 = vstv %s7648_s4  ;;  %s14115_s4 = scalar_lea.hbm %s14168_s5, %s7706_s28 }
 0x801   : > { %6869 = vrot.lane.b32.xlu0 %v6859_v60, %s14418_s6  ;;  %6867 = vrot.lane.b32.xlu1 %v6858_v21, %s14418_s6  ;;  %v6247_v60 = vadd.f32 %v13540_v13, %v13210_v39  ;;  %v6249_v39 = vadd.f32 %v13549_v23, %v13230_v51  ;;  %v6248_v13 = vadd.f32 %v13551_v11, %v13232_v59  ;;  %v6656_v51 = vstv %s7649_s20  ;;  %s8175_s20 = smov [#allocation13]  }
 0x802   : > { %v6273_v59 = vadd.f32 %v13557_v50, %v13254_v54  ;;  %v6250_v23 = vadd.f32 %v13559_v32, %v13256_v46  ;;  %v6657_v54 = vmul.f32 %v6656_v51, %v13563_v36  ;;  %v6650_v50 = vmul.f32 %v6646_v24, %v13585_v41 }
 0x803   : > { %v6422_v30 = vpop.permute.xlu0 %6421  ;;  %v13669_v20 = vpop.permute.xlu1 %6419  ;;  %v6275_v46 = vadd.f32 %v13567_v25, %v13275_v44  ;;  %v6274_v32 = vadd.f32 %v13569_v16, %v13277_v28  ;;  %v6658_v44 = vmul.f32 %v6656_v51, %v13573_v43  ;;  %v6666_v28 = vstv %s13700_s12 }
 0x804   : > { %15085 = vst [vmem:[#allocation63_spill] sm:$0xff] %v13669_v20  ;;  %v13674_v62 = vadd.f32 %v6422_v30, %v13536_v47  ;;  %v6885_v20 = vmul.f32 %v6882_v33, %v13575_v53  ;;  %v6908_v30 = vstv %s7663_s19  ;;  %v6299_v25 = vadd.f32 %v13579_v18, %v13300_v55 }
 0x805   : > { %6891 = vrot.lane.b32.xlu0 %v6883_v0, %s14418_s6  ;;  %6871 = vrot.lane.b32.xlu1 %v6860_v26, %s14418_s6  ;;  %v6647_v0 = vmul.f32 %v6646_v24, %v13563_v36  ;;  %v6276_v16 = vadd.f32 %v13581_v9, %v13302_v35  ;;  %v6667_v55 = vmul.f32 %v6666_v28, %v13563_v36 }
 0x806   : > { %15086 = vst [vmem:[#allocation126_spill] sm:$0xff] %v13674_v62  ;;  %v6660_v18 = vmul.f32 %v6656_v51, %v13585_v41  ;;  %v6301_v35 = vadd.f32 %v13589_v37, %v13323_v1  ;;  %v6300_v9 = vadd.f32 %v13591_v19, %v13325_v5  ;;  %v6668_v1 = vmul.f32 %v6666_v28, %v13573_v43 }
 0x807   : > { %v6444_v21 = vpop.permute.xlu0 %6443  ;;  %v6424_v15 = vpop.permute.xlu1 %6423  ;;  %v6676_v5 = vstv %s13733_s13  ;;  %v6325_v37 = vadd.f32 %v13597_v38, %v13349_v14  ;;  %v6302_v19 = vadd.f32 %v13599_v63, %v13351_v10  ;;  %v6670_v38 = vmul.f32 %v6666_v28, %v13585_v41 }
 0x808   : > { %v6455_v57 = vadd.f32 %v6444_v21, %v6247_v60  ;;  %v13683_v47 = vadd.f32 %v6424_v15, %v13547_v49  ;;  %v6909_v15 = vmul.f32 %v6908_v30, %v13563_v36  ;;  %v6886_v49 = vmul.f32 %v6882_v33, %v13585_v41 }
 0x809   : > { %6895 = vrot.lane.b32.xlu0 %v6885_v20, %s14418_s6  ;;  %6893 = vrot.lane.b32.xlu1 %v6884_v34, %s14418_s6  ;;  %v6649_v20 = vmul.f32 %v6646_v24, %v13575_v53  ;;  %v6648_v34 = vmul.f32 %v6646_v24, %v13573_v43  ;;  %v6912_v24 = vmul.f32 %v6908_v30, %v13585_v41 }
 0x80a   : > { %15087 = vst [vmem:[#allocation99_spill] sm:$0xff] %v13683_v47  ;;  %v13692_v26 = vadd.f32 %v6647_v0, %v6455_v57  ;;  %v6911_v0 = vmul.f32 %v6908_v30, %v13575_v53  ;;  %v6677_v14 = vmul.f32 %v6676_v5, %v13563_v36  ;;  %v6327_v10 = vadd.f32 %v13605_v61, %v13372_v8 }
 0x80b   : > { %v6448_v62 = vpop.permute.xlu0 %6447  ;;  %v6446_v60 = vpop.permute.xlu1 %6445  ;;  %v6326_v63 = vadd.f32 %v13607_v2, %v13374_v27  ;;  %v6678_v8 = vmul.f32 %v6676_v5, %v13573_v43  ;;  %v6686_v27 = vstv %s13767_s16  ;;  %v6351_v61 = vadd.f32 %v13613_v48, %v13396_v40 }
 0x80c   : > { %v6457_v21 = vadd.f32 %v6448_v62, %v6249_v39  ;;  %v6456_v47 = vadd.f32 %v6446_v60, %v6248_v13  ;;  %v6910_v39 = vmul.f32 %v6908_v30, %v13573_v43  ;;  %v6934_v13 = vstv %s7664_s8  ;;  %s8086_s8 = sshll.u32 %s8175_s20, 4  ;;  %s8087_s8 = int_to_ptr.vmem [resolvable:$false] %s8086_s8 }
 0x80d   : > { %6917 = vrot.lane.b32.xlu0 %v6909_v15, %s14418_s6  ;;  %6897 = vrot.lane.b32.xlu1 %v6886_v49, %s14418_s6  ;;  %v6328_v2 = vadd.f32 %v13615_v4, %v13398_v12  ;;  %v6687_v40 = vmul.f32 %v6686_v27, %v13563_v36  ;;  %v6680_v48 = vmul.f32 %v6676_v5, %v13585_v41  ;;  %s8088_s12 = scalar_lea.vmem %s8087_s8, 8192 }
 0x80e   : > { %v13706_v33 = vadd.f32 %v6649_v20, %v6457_v21  ;;  %v13708_v62 = vadd.f32 %v6648_v34, %v6456_v47  ;;  %v6935_v34 = vmul.f32 %v6934_v13, %v13563_v36  ;;  %v6353_v12 = vadd.f32 %v13621_v17, %v13421_v6 }
 0x80f   : > { %v6470_v11 = vpop.permute.xlu0 %6469  ;;  %v6450_v57 = vpop.permute.xlu1 %6449  ;;  %v6352_v4 = vadd.f32 %v13623_v42, %v13423_v56  ;;  %v6688_v6 = vmul.f32 %v6686_v27, %v13573_v43  ;;  %v6696_v56 = vstv %s13801_s24  ;;  %v6377_v17 = vadd.f32 %v13629_v22, %v13442_v52 }
 0x810   : > { %v6481_v60 = vadd.f32 %v6470_v11, %v6273_v59  ;;  %v6458_v15 = vadd.f32 %v6450_v57, %v6250_v23  ;;  %v6659_v11 = vmul.f32 %v6656_v51, %v13575_v53  ;;  %v6938_v51 = vmul.f32 %v6934_v13, %v13585_v41 }
 0x811   : > { %6921 = vrot.lane.b32.xlu0 %v6911_v0, %s14418_s6  ;;  %6919 = vrot.lane.b32.xlu1 %v6910_v39, %s14418_s6  ;;  %v6354_v42 = vadd.f32 %v13631_v7, %v13444_v3  ;;  %v6697_v52 = vmul.f32 %v6696_v56, %v13563_v36  ;;  %v6690_v22 = vmul.f32 %v6686_v27, %v13585_v41 }
 0x812   : > { %v13722_v47 = vadd.f32 %v6657_v54, %v6481_v60  ;;  %v13724_v49 = vadd.f32 %v6650_v50, %v6458_v15  ;;  %v6937_v60 = vmul.f32 %v6934_v13, %v13575_v53  ;;  %v6936_v15 = vmul.f32 %v6934_v13, %v13573_v43 }
 0x813   : > { %v6474_v21 = vpop.permute.xlu0 %6473  ;;  %v6472_v20 = vpop.permute.xlu1 %6471  ;;  %v6960_v54 = vstv %s13712_s23  ;;  %v6379_v3 = vadd.f32 %v13637_v29, %v13468_v58  ;;  %v6378_v7 = vadd.f32 %v13639_v45, %v13470_v31  ;;  %v6698_v58 = vmul.f32 %v6696_v56, %v13573_v43  ;;  %v15088_v29 = vld [vmem:[#allocation38_spill] sm:$0xff]  ;;  %v15089_v45 = vld [vmem:[#allocation35_spill] sm:$0xff] }
 0x814   : > { %v6483_v59 = vadd.f32 %v6474_v21, %v6275_v46  ;;  %v6482_v23 = vadd.f32 %v6472_v20, %v6274_v32  ;;  %v6706_v31 = vstv %s13835_s29 }
 0x815   : > { %6943 = vrot.lane.b32.xlu0 %v6935_v34, %s14427_s0  ;;  %6923 = vrot.lane.b32.xlu1 %v6912_v24, %s14418_s6  ;;  %s13746_s6 = sld [smem:[#allocation10 + $0x6b]]  ;;  %v6961_v24 = vmul.f32 %v6960_v54, %v13563_v36 }
 0x816   : > { %v13739_v30 = vadd.f32 %v6659_v11, %v6483_v59  ;;  %v13741_v57 = vadd.f32 %v6658_v44, %v6482_v23  ;;  %v6669_v11 = vmul.f32 %v6666_v28, %v13575_v53  ;;  %v6964_v28 = vmul.f32 %v6960_v54, %v13585_v41 }
 0x817   : > { %v6496_v0 = vpop.permute.xlu0 %6495  ;;  %v6476_v39 = vpop.permute.xlu1 %6475 }
 0x818   : > { %v6507_v50 = vadd.f32 %v6496_v0, %v6299_v25  ;;  %v6484_v46 = vadd.f32 %v6476_v39, %v6276_v16  ;;  %v6963_v0 = vmul.f32 %v6960_v54, %v13575_v53  ;;  %v6962_v39 = vmul.f32 %v6960_v54, %v13573_v43 }
 0x819   : > { %6947 = vrot.lane.b32.xlu0 %v6937_v60, %s14427_s0  ;;  %6945 = vrot.lane.b32.xlu1 %v6936_v15, %s14427_s0 }
 0x81a   : > { %v13756_v32 = vadd.f32 %v6667_v55, %v6507_v50  ;;  %v13758_v21 = vadd.f32 %v6660_v18, %v6484_v46 }
 0x81b   : > { %v6500_v20 = vpop.permute.xlu0 %6499  ;;  %v6498_v34 = vpop.permute.xlu1 %6497  ;;  %v6986_v60 = vstv %s13746_s6 }
 0x81c   : > { %v6509_v59 = vadd.f32 %v6500_v20, %v6301_v35  ;;  %v6508_v23 = vadd.f32 %v6498_v34, %v6300_v9  ;;  %v6987_v9 = vmul.f32 %v6986_v60, %v13563_v36 }
 0x81d   : > { %6969 = vrot.lane.b32.xlu0 %v6961_v24, %s14427_s0  ;;  %6949 = vrot.lane.b32.xlu1 %v6938_v51, %s14427_s0  ;;  %v6679_v24 = vmul.f32 %v6676_v5, %v13575_v53  ;;  %v6990_v5 = vmul.f32 %v6986_v60, %v13585_v41 }
 0x81e   : > { %v13773_v13 = vadd.f32 %v6669_v11, %v6509_v59  ;;  %v13775_v44 = vadd.f32 %v6668_v1, %v6508_v23  ;;  %v6989_v11 = vmul.f32 %v6986_v60, %v13575_v53  ;;  %v6988_v1 = vmul.f32 %v6986_v60, %v13573_v43 }
 0x81f   : > { %v6522_v25 = vpop.permute.xlu0 %6521  ;;  %v6502_v16 = vpop.permute.xlu1 %6501 }
 0x820   : > { %v6533_v15 = vadd.f32 %v6522_v25, %v6325_v37  ;;  %v6510_v50 = vadd.f32 %v6502_v16, %v6302_v19  ;;  %v7012_v37 = vstv %s13780_s11 }
 0x821   : > { %6973 = vrot.lane.b32.xlu0 %v6963_v0, %s14427_s0  ;;  %6971 = vrot.lane.b32.xlu1 %v6962_v39, %s14427_s0 }
 0x822   : > { %v13790_v46 = vadd.f32 %v6677_v14, %v6533_v15  ;;  %v13792_v55 = vadd.f32 %v6670_v38, %v6510_v50  ;;  %v7013_v50 = vmul.f32 %v7012_v37, %v13563_v36 }
 0x823   : > { %v6526_v18 = vpop.permute.xlu0 %6525  ;;  %v6524_v35 = vpop.permute.xlu1 %6523 }
 0x824   : > { %v6535_v20 = vadd.f32 %v6526_v18, %v6327_v10  ;;  %v6534_v34 = vadd.f32 %v6524_v35, %v6326_v63  ;;  %v6689_v10 = vmul.f32 %v6686_v27, %v13575_v53  ;;  %v7016_v27 = vmul.f32 %v7012_v37, %v13585_v41 }
 0x825   : > { %6995 = vrot.lane.b32.xlu0 %v6987_v9, %s14427_s0  ;;  %6975 = vrot.lane.b32.xlu1 %v6964_v28, %s14427_s0  ;;  %v7015_v9 = vmul.f32 %v7012_v37, %v13575_v53  ;;  %v7014_v28 = vmul.f32 %v7012_v37, %v13573_v43 }
 0x826   : > { %v13807_v54 = vadd.f32 %v6679_v24, %v6535_v20  ;;  %v13809_v51 = vadd.f32 %v6678_v8, %v6534_v34  ;;  %v7038_v20 = vstv %s13814_s26 }
 0x827   : > { %v6548_v59 = vpop.permute.xlu0 %6547  ;;  %v6528_v23 = vpop.permute.xlu1 %6527 }
 0x828   : > { %v6559_v19 = vadd.f32 %v6548_v59, %v6351_v61  ;;  %v6536_v25 = vadd.f32 %v6528_v23, %v6328_v2  ;;  %v7039_v23 = vmul.f32 %v7038_v20, %v13563_v36 }
 0x829   : > { %6999 = vrot.lane.b32.xlu0 %v6989_v11, %s14427_s0  ;;  %6997 = vrot.lane.b32.xlu1 %v6988_v1, %s14427_s0 }
 0x82a   : > { %v13824_v16 = vadd.f32 %v6687_v40, %v6559_v19  ;;  %v13826_v0 = vadd.f32 %v6680_v48, %v6536_v25  ;;  %v6699_v19 = vmul.f32 %v6696_v56, %v13575_v53  ;;  %v6403_v25 = vadd.f32 %v15089_v45, %v15088_v29  ;;  %v15090_v40 = vld [vmem:[#allocation95_spill] sm:$0xff] }
 0x82b   : > { %v6552_v39 = vpop.permute.xlu0 %6551  ;;  %v6550_v15 = vpop.permute.xlu1 %6549  ;;  %v15091_v48 = vld [vmem:[#allocation47_spill] sm:$0xff] }
 0x82c   : > { %v6561_v14 = vadd.f32 %v6552_v39, %v6353_v12  ;;  %v6560_v38 = vadd.f32 %v6550_v15, %v6352_v4  ;;  %v6380_v37 = vadd.f32 %v15091_v48, %v15090_v40  ;;  %v15098_v29 = vld [vmem:[#allocation115_spill] sm:$0xff] }
 0x82d   : > { %7021 = vrot.lane.b32.xlu0 %v7013_v50, %s14427_s0  ;;  %7001 = vrot.lane.b32.xlu1 %v6990_v5, %s14427_s0  ;;  %v7041_v50 = vmul.f32 %v7038_v20, %v13575_v53  ;;  %v7040_v5 = vmul.f32 %v7038_v20, %v13573_v43  ;;  %v15099_v45 = vld [vmem:[#allocation71_spill] sm:$0xff] }
 0x82e   : > { %v13841_v60 = vadd.f32 %v6689_v10, %v6561_v14  ;;  %v13843_v63 = vadd.f32 %v6688_v6, %v6560_v38  ;;  %v7064_v14 = vstv %s13848_s30  ;;  %v6707_v6 = vmul.f32 %v6706_v31, %v13563_v36 }
 0x82f   : > { %v6574_v18 = vpop.permute.xlu0 %6573  ;;  %v6554_v35 = vpop.permute.xlu1 %6553 }
 0x830   : > { %v6585_v34 = vadd.f32 %v6574_v18, %v6377_v17  ;;  %v6562_v24 = vadd.f32 %v6554_v35, %v6354_v42  ;;  %v6700_v17 = vmul.f32 %v6696_v56, %v13585_v41  ;;  %v15092_v42 = vld [vmem:[#allocation46_spill] sm:$0xff]  ;;  %v15093_v18 = vld [vmem:[#allocation43_spill] sm:$0xff]  ;;  %v7042_v56 = vmul.f32 %v7038_v20, %v13585_v41 }
 0x831   : > { %7025 = vrot.lane.b32.xlu0 %v7015_v9, %s14427_s0  ;;  %7023 = vrot.lane.b32.xlu1 %v7014_v28, %s14427_s0  ;;  %v6405_v35 = vadd.f32 %v15093_v18, %v15092_v42  ;;  %v15094_v9 = vld [vmem:[#allocation50_spill] sm:$0xff]  ;;  %v15095_v28 = vld [vmem:[#allocation131_spill] sm:$0xff] }
 0x832   : > { %v13858_v8 = vadd.f32 %v6697_v52, %v6585_v34  ;;  %v13860_v61 = vadd.f32 %v6690_v22, %v6562_v24  ;;  %v6404_v34 = vadd.f32 %v15095_v28, %v15094_v9  ;;  %v15101_v42 = vld [vmem:[#allocation63_spill] sm:$0xff] }
 0x833   : > { %v6578_v2 = vpop.permute.xlu0 %6577  ;;  %v6576_v59 = vpop.permute.xlu1 %6575 }
 0x834   : > { %v6587_v11 = vadd.f32 %v6578_v2, %v6379_v3  ;;  %v6586_v1 = vadd.f32 %v6576_v59, %v6378_v7  ;;  %v7065_v7 = vmul.f32 %v7064_v14, %v13563_v36 }
 0x835   : > { %7047 = vrot.lane.b32.xlu0 %v7039_v23, %s14427_s0  ;;  %7027 = vrot.lane.b32.xlu1 %v7016_v27, %s14427_s0  ;;  %v6709_v23 = vmul.f32 %v6706_v31, %v13575_v53  ;;  %v6708_v27 = vmul.f32 %v6706_v31, %v13573_v43 }
 0x836   : > { %v13875_v12 = vadd.f32 %v6699_v19, %v6587_v11  ;;  %v13877_v4 = vadd.f32 %v6698_v58, %v6586_v1  ;;  %v6716_v11 = vstv %s13869_s9  ;;  %v15096_v1 = vld [vmem:[#allocation28_spill] sm:$0xff]  ;;  %v15097_v19 = vld [vmem:[#allocation97_spill] sm:$0xff] }
 0x837   : > { %v6600_v39 = vpop.permute.xlu0 %6599  ;;  %v6580_v15 = vpop.permute.xlu1 %6579  ;;  %v6429_v58 = vadd.f32 %v15097_v19, %v15096_v1 }
 0x838   : > { %v6611_v38 = vadd.f32 %v6600_v39, %v6403_v25  ;;  %v6588_v10 = vadd.f32 %v6580_v15, %v6380_v37  ;;  %v6406_v25 = vadd.f32 %v15099_v45, %v15098_v29  ;;  %v7067_v39 = vmul.f32 %v7064_v14, %v13575_v53  ;;  %v15107_v29 = vld [vmem:[#allocation99_spill] sm:$0xff] }
 0x839   : > { %7051 = vrot.lane.b32.xlu0 %v7041_v50, %s14427_s0  ;;  %7049 = vrot.lane.b32.xlu1 %v7040_v5, %s14427_s0  ;;  %v7066_v15 = vmul.f32 %v7064_v14, %v13573_v43  ;;  %v7090_v50 = vstv %s7670_s7 }
 0x83a   : > { %v13890_v24 = vadd.f32 %v6707_v6, %v6611_v38  ;;  %v13892_v52 = vadd.f32 %v6700_v17, %v6588_v10  ;;  %v6717_v10 = vmul.f32 %v6716_v11, %v13563_v36  ;;  %v6710_v6 = vmul.f32 %v6706_v31, %v13585_v41  ;;  %v15100_v17 = vld [vmem:[#allocation32_spill] sm:$0xff] }
 0x83b   : > { %v6604_v22 = vpop.permute.xlu0 %6603  ;;  %v6602_v3 = vpop.permute.xlu1 %6601  ;;  %v6430_v18 = vadd.f32 %v15101_v42, %v15100_v17 }
 0x83c   : > { %v6613_v2 = vadd.f32 %v6604_v22, %v6405_v35  ;;  %v6612_v59 = vadd.f32 %v6602_v3, %v6404_v34  ;;  %v7091_v22 = vmul.f32 %v7090_v50, %v13563_v36  ;;  %v7068_v3 = vmul.f32 %v7064_v14, %v13585_v41 }
 0x83d   : > { %7073 = vrot.lane.b32.xlu0 %v7065_v7, %s14427_s0  ;;  %7053 = vrot.lane.b32.xlu1 %v7042_v56, %s14427_s0  ;;  %v15104_v7 = vld [vmem:[#allocation126_spill] sm:$0xff]  ;;  %v7092_v14 = vmul.f32 %v7090_v50, %v13573_v43 }
 0x83e   : > { %v13905_v40 = vadd.f32 %v6709_v23, %v6613_v2  ;;  %v13907_v20 = vadd.f32 %v6708_v27, %v6612_v59  ;;  %v6719_v2 = vmul.f32 %v6716_v11, %v13575_v53  ;;  %v6718_v59 = vmul.f32 %v6716_v11, %v13573_v43 }
 0x83f   : > { %v6626_v48 = vpop.permute.xlu0 %6625  ;;  %v6606_v37 = vpop.permute.xlu1 %6605 }
 0x840   : > { %v6637_v5 = vadd.f32 %v6626_v48, %v6429_v58  ;;  %v6614_v38 = vadd.f32 %v6606_v37, %v6406_v25  ;;  %v7093_v58 = vmul.f32 %v7090_v50, %v13575_v53  ;;  %v7116_v25 = vstv %s7671_s10 }
 0x841   : > { %7077 = vrot.lane.b32.xlu0 %v7067_v39, %s14427_s0  ;;  %7075 = vrot.lane.b32.xlu1 %v7066_v15, %s14427_s0  ;;  %v6720_v48 = vmul.f32 %v6716_v11, %v13585_v41  ;;  %v7119_v11 = vmul.f32 %v7116_v25, %v13575_v53  ;;  %v7118_v17 = vmul.f32 %v7116_v25, %v13573_v43 }
 0x842   : > { %v13917_v35 = vadd.f32 %v6717_v10, %v6637_v5  ;;  %v13919_v9 = vadd.f32 %v6710_v6, %v6614_v38  ;;  %v7117_v5 = vmul.f32 %v7116_v25, %v13563_v36  ;;  %v7094_v38 = vmul.f32 %v7090_v50, %v13585_v41 }
 0x843   : > { %v6630_v28 = vpop.permute.xlu0 %6629  ;;  %v6628_v34 = vpop.permute.xlu1 %6627  ;;  %v7120_v36 = vmul.f32 %v7116_v25, %v13585_v41 }
 0x844   : > { %15102 = vst [vmem:[#allocation41_spill] sm:$0xff] %v13917_v35  ;;  %15103 = vst [vmem:[#allocation55_spill] sm:$0xff] %v13919_v9  ;;  %v6639_v56 = vadd.f32 %v6630_v28, %v15104_v7  ;;  %v6638_v31 = vadd.f32 %v6628_v34, %v6430_v18 }
 0x845   : > { %7099 = vrot.lane.b32.xlu0 %v7091_v22, %s14427_s0  ;;  %7079 = vrot.lane.b32.xlu1 %v7068_v3, %s14427_s0 }
 0x846   : > { %v13928_v23 = vadd.f32 %v6719_v2, %v6639_v56  ;;  %v13930_v27 = vadd.f32 %v6718_v59, %v6638_v31 }
 0x847   : > { %v6736_v1 = vpop.permute.xlu0 %6735  ;;  %v6632_v19 = vpop.permute.xlu1 %6631 }
 0x848   : > { %15105 = vst [vmem:[#allocation127_spill] sm:$0xff] %v13928_v23  ;;  %15106 = vst [vmem:[#allocation107_spill] sm:$0xff] %v13930_v27  ;;  %v6640_v45 = vadd.f32 %v6632_v19, %v15107_v29 }
 0x849   : > { %7103 = vrot.lane.b32.xlu0 %v7093_v58, %s14427_s0  ;;  %7101 = vrot.lane.b32.xlu1 %v7092_v14, %s14427_s0 }
 0x84a   : > { %v13938_v37 = vadd.f32 %v6720_v48, %v6640_v45 }
 0x84b   : > { %v6740_v39 = vpop.permute.xlu0 %6739  ;;  %v6738_v15 = vpop.permute.xlu1 %6737 }
 0x84c   : > { %15108 = vst [vmem:[#allocation45_spill] sm:$0xff] %v13938_v37  ;;  %v6749_v9 = vadd.f32 %v6740_v39, %v13706_v33  ;;  %v6748_v35 = vadd.f32 %v6738_v15, %v13708_v62 }
 0x84d   : > { %7125 = vrot.lane.b32.xlu0 %v7117_v5, %s14427_s0  ;;  %7105 = vrot.lane.b32.xlu1 %v7094_v38, %s14427_s0 }
 0x84f   : > { %v6762_v10 = vpop.permute.xlu0 %6761  ;;  %v6742_v6 = vpop.permute.xlu1 %6741 }
 0x851   : > { %7129 = vrot.lane.b32.xlu0 %v7119_v11, %s14427_s0  ;;  %7127 = vrot.lane.b32.xlu1 %v7118_v17, %s14427_s0 }
 0x853   : > { %v6766_v42 = vpop.permute.xlu0 %6765  ;;  %v6764_v18 = vpop.permute.xlu1 %6763 }
 0x855   : > { %7131 = vrot.lane.b32.xlu1 %v7120_v36, %s14427_s0  ;;  %s7327_s0 = sshll.u32 %s8374_s15, 8  ;;  %v6747_v36 = vadd.f32 %v6736_v1, %v13692_v26 }
 0x856   : > { %s13996_s27 = scalar_lea.vmem [#allocation13], %s7327_s0 }
 0x857   : > { %v6788_v50 = vpop.permute.xlu0 %6787  ;;  %v6768_v28 = vpop.permute.xlu1 %6767  ;;  %s7195_s1 = sshll.u32 %s13996_s27, 4  ;;  %s14117_s1 = int_to_ptr.vmem [resolvable:$true] %s7195_s1 }
 0x858   : > { %s8082_s19 = scalar_lea.vmem %s14117_s1, 4096  ;;  %p8089_p0 = scmp.lt.s32.totalorder %s14117_s1, %s8087_s8 }
 0x859   : > { %p8083_p3 = scmp.ne.s32.totalorder %s14117_s1, %s8082_s19  ;;  %p8090_p13 = scmp.lt.s32.totalorder %s8088_s12, %s8082_s19 }
 0x85b   : > { %v6792_v34 = vpop.permute.xlu0 %6791  ;;  %v6790_v22 = vpop.permute.xlu1 %6789  ;;  %p8084_p7 = pnand %p8083_p3, %p8325_p6  ;;  %p8091_p5 = por %p8090_p13, %p8089_p0 }
 0x85d   : > { %p8085_p12 = pneg %p8084_p7 }
 0x85f   : > { %v13950_v3 = vpop.permute.xlu0 %6813  ;;  %v13952_v7 = vpop.permute.xlu1 %6793  ;;  %p8092_p10 = pnand %p8091_p5, %p8085_p12 }
 0x863   : > { %v13954_v53 = vpop.permute.xlu0 %6817  ;;  %v13956_v43 = vpop.permute.xlu1 %6815 }
 0x867   : > { %v13958_v56 = vpop.permute.xlu0 %6839  ;;  %v13960_v31 = vpop.permute.xlu1 %6819 }
 0x86b   : > { %v13962_v41 = vpop.permute.xlu0 %6843  ;;  %v13964_v2 = vpop.permute.xlu1 %6841 }
 0x86f   : > { %v13966_v59 = vpop.permute.xlu0 %6865  ;;  %v13968_v19 = vpop.permute.xlu1 %6845 }
 0x873   : > { %v13970_v58 = vpop.permute.xlu0 %6869  ;;  %v13972_v14 = vpop.permute.xlu1 %6867 }
 0x877   : > { %v13974_v29 = vpop.permute.xlu0 %6891  ;;  %v13976_v45 = vpop.permute.xlu1 %6871 }
 0x87b   : > { %v13978_v25 = vpop.permute.xlu0 %6895  ;;  %v13980_v48 = vpop.permute.xlu1 %6893 }
 0x87f   : > { %v13982_v5 = vpop.permute.xlu0 %6917  ;;  %v13984_v38 = vpop.permute.xlu1 %6897 }
 0x883   : > { %v13986_v11 = vpop.permute.xlu0 %6921  ;;  %v13988_v17 = vpop.permute.xlu1 %6919 }
 0x884   : > { %15109 = vst [vmem:[#allocation100_spill] sm:$0xff] %v13986_v11  ;;  %15110 = vst [vmem:[#allocation75_spill] sm:$0xff] %v13988_v17 }
 0x887   : > { %v6944_v37 = vpop.permute.xlu0 %6943  ;;  %v13992_v27 = vpop.permute.xlu1 %6923 }
 0x888   : > { %15111 = vst [vmem:[#allocation69_spill] sm:$0xff] %v13992_v27  ;;  %v6955_v23 = vadd.f32 %v6944_v37, %v6747_v36  ;;  %v6773_v27 = vadd.f32 %v6762_v10, %v13722_v47  ;;  %v6750_v37 = vadd.f32 %v6742_v6, %v13724_v49  ;;  %v6774_v36 = vadd.f32 %v6764_v18, %v13741_v57 }
 0x889   : > { %v6799_v10 = vadd.f32 %v6788_v50, %v13756_v32  ;;  %v6776_v6 = vadd.f32 %v6768_v28, %v13758_v21  ;;  %v6801_v18 = vadd.f32 %v6792_v34, %v13773_v13 }
 0x88a   : > { %7142 = vst.msk [vmem:[%s13996_s27] sm:$0xff] %vm7141_vm7, %v6955_v23  ;;  %v6775_v23 = vadd.f32 %v6766_v42, %v13739_v30 }
 0x88b   : > { %v6948_v17 = vpop.permute.xlu0 %6947  ;;  %v6946_v26 = vpop.permute.xlu1 %6945 }
 0x88c   : > { %v6957_v1 = vadd.f32 %v6948_v17, %v6749_v9  ;;  %v6956_v11 = vadd.f32 %v6946_v26, %v6748_v35  ;;  %v6825_v17 = vadd.f32 %v13950_v3, %v13790_v46  ;;  %v6802_v26 = vadd.f32 %v13952_v7, %v13792_v55 }
 0x88e   : > { %7144 = vst.msk [vmem:[%s13996_s27 + $0x10] sm:$0xff] %vm7141_vm7, %v6957_v1  ;;  %7143 = vst.msk [vmem:[%s13996_s27 + $0x8] sm:$0xff] %vm7141_vm7, %v6956_v11  ;;  %v6800_v11 = vadd.f32 %v6790_v22, %v13775_v44  ;;  %v6827_v1 = vadd.f32 %v13954_v53, %v13807_v54 }
 0x88f   : > { %v6970_v33 = vpop.permute.xlu0 %6969  ;;  %v6950_v62 = vpop.permute.xlu1 %6949 }
 0x890   : > { %v6981_v39 = vadd.f32 %v6970_v33, %v6773_v27  ;;  %v6958_v15 = vadd.f32 %v6950_v62, %v6750_v37  ;;  %v6826_v37 = vadd.f32 %v13956_v43, %v13809_v51  ;;  %v6851_v33 = vadd.f32 %v13958_v56, %v13824_v16 }
 0x891   : > { %v6828_v62 = vadd.f32 %v13960_v31, %v13826_v0 }
 0x892   : > { %7672 = vst.msk [vmem:[%s13996_s27 + $0x20] sm:$0xff] %vm7141_vm7, %v6981_v39  ;;  %7145 = vst.msk [vmem:[%s13996_s27 + $0x18] sm:$0xff] %vm7141_vm7, %v6958_v15  ;;  %v6853_v39 = vadd.f32 %v13962_v41, %v13841_v60  ;;  %v6852_v15 = vadd.f32 %v13964_v2, %v13843_v63 }
 0x893   : > { %v6974_v47 = vpop.permute.xlu0 %6973  ;;  %v6972_v49 = vpop.permute.xlu1 %6971 }
 0x894   : > { %v6983_v35 = vadd.f32 %v6974_v47, %v6775_v23  ;;  %v6982_v9 = vadd.f32 %v6972_v49, %v6774_v36  ;;  %v6877_v23 = vadd.f32 %v13966_v59, %v13858_v8  ;;  %v6854_v36 = vadd.f32 %v13968_v19, %v13860_v61 }
 0x895   : > { %v6879_v47 = vadd.f32 %v13970_v58, %v13875_v12  ;;  %v6878_v49 = vadd.f32 %v13972_v14, %v13877_v4 }
 0x896   : > { %7674 = vst.msk [vmem:[%s13996_s27 + $0x30] sm:$0xff] %vm7141_vm7, %v6983_v35  ;;  %7673 = vst.msk [vmem:[%s13996_s27 + $0x28] sm:$0xff] %vm7141_vm7, %v6982_v9  ;;  %v6903_v35 = vadd.f32 %v13974_v29, %v13890_v24  ;;  %v6880_v9 = vadd.f32 %v13976_v45, %v13892_v52 }
 0x897   : > { %v6996_v30 = vpop.permute.xlu0 %6995  ;;  %v6976_v57 = vpop.permute.xlu1 %6975 }
 0x898   : > { %v7007_v27 = vadd.f32 %v6996_v30, %v6799_v10  ;;  %v6984_v42 = vadd.f32 %v6976_v57, %v6776_v6  ;;  %v6905_v10 = vadd.f32 %v13978_v25, %v13905_v40  ;;  %v6904_v6 = vadd.f32 %v13980_v48, %v13907_v20  ;;  %v15112_v30 = vld [vmem:[#allocation41_spill] sm:$0xff] }
 0x899   : > { %v6929_v57 = vadd.f32 %v13982_v5, %v15112_v30  ;;  %v15117_v5 = vld [vmem:[#allocation75_spill] sm:$0xff] }
 0x89a   : > { %7676 = vst.msk [vmem:[%s13996_s27 + $0x40] sm:$0xff] %vm7141_vm7, %v7007_v27  ;;  %7675 = vst.msk [vmem:[%s13996_s27 + $0x38] sm:$0xff] %vm7141_vm7, %v6984_v42  ;;  %v15113_v27 = vld [vmem:[#allocation55_spill] sm:$0xff] }
 0x89b   : > { %v7000_v32 = vpop.permute.xlu0 %6999  ;;  %v6998_v21 = vpop.permute.xlu1 %6997  ;;  %v6906_v40 = vadd.f32 %v13984_v38, %v15113_v27 }
 0x89c   : > { %v7009_v50 = vadd.f32 %v7000_v32, %v6801_v18  ;;  %v7008_v28 = vadd.f32 %v6998_v21, %v6800_v11  ;;  %v15114_v18 = vld [vmem:[#allocation127_spill] sm:$0xff]  ;;  %v15115_v11 = vld [vmem:[#allocation100_spill] sm:$0xff] }
 0x89d   : > { %v6931_v32 = vadd.f32 %v15115_v11, %v15114_v18  ;;  %v15116_v21 = vld [vmem:[#allocation107_spill] sm:$0xff] }
 0x89e   : > { %7678 = vst.msk [vmem:[%s13996_s27 + $0x50] sm:$0xff] %vm7141_vm7, %v7009_v50  ;;  %7677 = vst.msk [vmem:[%s13996_s27 + $0x48] sm:$0xff] %vm7141_vm7, %v7008_v28  ;;  %v6930_v50 = vadd.f32 %v15117_v5, %v15116_v21 }
 0x89f   : > { %v7022_v13 = vpop.permute.xlu0 %7021  ;;  %v7002_v44 = vpop.permute.xlu1 %7001 }
 0x8a0   : > { %v7033_v34 = vadd.f32 %v7022_v13, %v6825_v17  ;;  %v7010_v22 = vadd.f32 %v7002_v44, %v6802_v26  ;;  %v15118_v13 = vld [vmem:[#allocation45_spill] sm:$0xff] }
 0x8a1   : > { %v15119_v44 = vld [vmem:[#allocation69_spill] sm:$0xff] }
 0x8a2   : > { %7680 = vst.msk [vmem:[%s13996_s27 + $0x60] sm:$0xff] %vm7141_vm7, %v7033_v34  ;;  %7679 = vst.msk [vmem:[%s13996_s27 + $0x58] sm:$0xff] %vm7141_vm7, %v7010_v22  ;;  %v6932_v34 = vadd.f32 %v15119_v44, %v15118_v13 }
 0x8a3   : > { %v7026_v46 = vpop.permute.xlu0 %7025  ;;  %v7024_v55 = vpop.permute.xlu1 %7023 }
 0x8a4   : > { %v7035_v3 = vadd.f32 %v7026_v46, %v6827_v1  ;;  %v7034_v7 = vadd.f32 %v7024_v55, %v6826_v37 }
 0x8a6   : > { %7682 = vst.msk [vmem:[%s13996_s27 + $0x70] sm:$0xff] %vm7141_vm7, %v7035_v3  ;;  %7681 = vst.msk [vmem:[%s13996_s27 + $0x68] sm:$0xff] %vm7141_vm7, %v7034_v7 }
 0x8a7   : > { %v7048_v54 = vpop.permute.xlu0 %7047  ;;  %v7028_v51 = vpop.permute.xlu1 %7027 }
 0x8a8   : > { %v7059_v53 = vadd.f32 %v7048_v54, %v6851_v33  ;;  %v7036_v43 = vadd.f32 %v7028_v51, %v6828_v62 }
 0x8aa   : > { %7684 = vst.msk [vmem:[%s13996_s27 + $0x80] sm:$0xff] %vm7141_vm7, %v7059_v53  ;;  %7683 = vst.msk [vmem:[%s13996_s27 + $0x78] sm:$0xff] %vm7141_vm7, %v7036_v43 }
 0x8ab   : > { %v7052_v16 = vpop.permute.xlu0 %7051  ;;  %v7050_v0 = vpop.permute.xlu1 %7049 }
 0x8ac   : > { %v7061_v56 = vadd.f32 %v7052_v16, %v6853_v39  ;;  %v7060_v31 = vadd.f32 %v7050_v0, %v6852_v15 }
 0x8ae   : > { %7686 = vst.msk [vmem:[%s13996_s27 + $0x90] sm:$0xff] %vm7141_vm7, %v7061_v56  ;;  %7685 = vst.msk [vmem:[%s13996_s27 + $0x88] sm:$0xff] %vm7141_vm7, %v7060_v31 }
 0x8af   : > { %v7074_v60 = vpop.permute.xlu0 %7073  ;;  %v7054_v63 = vpop.permute.xlu1 %7053 }
 0x8b0   : > { %v7085_v41 = vadd.f32 %v7074_v60, %v6877_v23  ;;  %v7062_v2 = vadd.f32 %v7054_v63, %v6854_v36 }
 0x8b2   : > { %7688 = vst.msk [vmem:[%s13996_s27 + $0xa0] sm:$0xff] %vm7141_vm7, %v7085_v41  ;;  %7687 = vst.msk [vmem:[%s13996_s27 + $0x98] sm:$0xff] %vm7141_vm7, %v7062_v2 }
 0x8b3   : > { %v7078_v8 = vpop.permute.xlu0 %7077  ;;  %v7076_v61 = vpop.permute.xlu1 %7075 }
 0x8b4   : > { %v7087_v59 = vadd.f32 %v7078_v8, %v6879_v47  ;;  %v7086_v19 = vadd.f32 %v7076_v61, %v6878_v49 }
 0x8b6   : > { %7690 = vst.msk [vmem:[%s13996_s27 + $0xb0] sm:$0xff] %vm7141_vm7, %v7087_v59  ;;  %7689 = vst.msk [vmem:[%s13996_s27 + $0xa8] sm:$0xff] %vm7141_vm7, %v7086_v19 }
 0x8b7   : > { %v7100_v12 = vpop.permute.xlu0 %7099  ;;  %v7080_v4 = vpop.permute.xlu1 %7079 }
 0x8b8   : > { %v7111_v58 = vadd.f32 %v7100_v12, %v6903_v35  ;;  %v7088_v14 = vadd.f32 %v7080_v4, %v6880_v9 }
 0x8ba   : > { %7692 = vst.msk [vmem:[%s13996_s27 + $0xc0] sm:$0xff] %vm7141_vm7, %v7111_v58  ;;  %7691 = vst.msk [vmem:[%s13996_s27 + $0xb8] sm:$0xff] %vm7141_vm7, %v7088_v14 }
 0x8bb   : > { %v7104_v24 = vpop.permute.xlu0 %7103  ;;  %v7102_v52 = vpop.permute.xlu1 %7101 }
 0x8bc   : > { %v7113_v29 = vadd.f32 %v7104_v24, %v6905_v10  ;;  %v7112_v45 = vadd.f32 %v7102_v52, %v6904_v6 }
 0x8be   : > { %7694 = vst.msk [vmem:[%s13996_s27 + $0xd0] sm:$0xff] %vm7141_vm7, %v7113_v29  ;;  %7693 = vst.msk [vmem:[%s13996_s27 + $0xc8] sm:$0xff] %vm7141_vm7, %v7112_v45 }
 0x8bf   : > { %v7126_v20 = vpop.permute.xlu0 %7125  ;;  %v7106_v25 = vpop.permute.xlu1 %7105 }
 0x8c0   : > { %v7137_v48 = vadd.f32 %v7126_v20, %v6929_v57  ;;  %v7114_v42 = vadd.f32 %v7106_v25, %v6906_v40 }
 0x8c2   : > { %7696 = vst.msk [vmem:[%s13996_s27 + $0xe0] sm:$0xff] %vm7141_vm7, %v7137_v48  ;;  %7695 = vst.msk [vmem:[%s13996_s27 + $0xd8] sm:$0xff] %vm7141_vm7, %v7114_v42 }
 0x8c3   : > { %v7130_v38 = vpop.permute.xlu0 %7129  ;;  %v7128_v28 = vpop.permute.xlu1 %7127 }
 0x8c4   : > { %v7139_v17 = vadd.f32 %v7130_v38, %v6931_v32  ;;  %v7138_v26 = vadd.f32 %v7128_v28, %v6930_v50 }
 0x8c6   : > { %7698 = vst.msk [vmem:[%s13996_s27 + $0xf0] sm:$0xff] %vm7141_vm7, %v7139_v17  ;;  %7697 = vst.msk [vmem:[%s13996_s27 + $0xe8] sm:$0xff] %vm7141_vm7, %v7138_v26 }
 0x8c7   : > { %v7132_v22 = vpop.permute.xlu1 %7131 }
 0x8c8   : > { %v7140_v1 = vadd.f32 %v7132_v22, %v6932_v34 }
 0x8ca   : > { %7699 = vst.msk [vmem:[%s13996_s27 + $0xf8] sm:$0xff] %vm7141_vm7, %v7140_v1 }
 0x8cb   : > { %8095 = shalt.err (!%p8092_p10)
}
 0x8cc   : > { %s8096_s23 = scalar_lea.hbm %s14115_s4, 4096  ;;  %s8100_s16 = scalar_lea.hbm %s14168_s5, 8192 }
 0x8cd   : > { %p8097_p11 = scmp.ne.s32.totalorder %s14115_s4, %s8096_s23  ;;  %p8101_p2 = scmp.lt.u32.totalorder %s14115_s4, %s14168_s5 }
 0x8ce   : > { %p8102_p4 = scmp.lt.u32.totalorder %s8100_s16, %s8096_s23  ;;  %p8104_p3 = scmp.lt.u32.totalorder %s8096_s23, %s14115_s4 }
 0x8cf   : > { %p8098_p9 = pnand %p8097_p11, %p8325_p6 }
 0x8d0   : > { %p8103_p8 = por %p8102_p4, %p8101_p2 }
 0x8d1   : > { %p8099_p1 = pneg %p8098_p9 }
 0x8d2   : > { %p8105_p7 = por %p8104_p3, %p8103_p8 }
 0x8d4   : > { %p8106_p12 = pnand %p8105_p7, %p8099_p1 }
 0x8d6   : > { %8109 = shalt.err (!%p8106_p12)
}
 0x8d7   : > { %s8176_s26 = smov 128   ;;  %s8177_s29 = smov 8  }
 0x8d8   : > { %7901 = dma.vmem_to_hbm [thread:$0]  (%p8325_p6), %s14117_s1, 4096, %s14115_s4, %s7182_s22, %s8176_s26, %s8176_s26, %s8177_s29  }
 0x8d9 PF: > { %s7210_s30 = sand.u32 1, %s8148_s18   ;;  %p15120_p0 = scmp.ne.s32.totalorder %s14361_s25, 0 }
 0x8da   : > { %p15121_p13 = scmp.ge.s32.totalorder %s8160_s21, 2  ;;  %s7211_s9 = scalar_lea.sflag [#allocation5], %s7210_s30 }
 0x8dc   : > { %p7921_p5 = pnand %p15121_p13, %p15120_p0 }
 0x8de   : > { %8143 = dma.done.wait (!%p7921_p5), %s7211_s9, 4096  }
 0x8df   : > { %8145 = vsyncadd (!%p7921_p5), %s7211_s9, 4294963200  ;;  %s15122_s18 = sld [smem:[#allocation19_spill]]  ;;  %s15123_s19 = sld [smem:[#allocation20_spill]] }
 0x8e0   : > { %s15124_s20 = sld [smem:[#allocation21_spill]]  ;;  %p21_p10 = scmp.ge.s32.totalorder %s8312_s14, 4  }
 0x8e1   : > { %s15125_s21 = smov %s8312_s14 }
 0x8e2   :  { %23 = sbr.rel (!%p21_p10) target bundleno = 14 (0xe), region = 116 }
 0x8e9   :  { %7216 = vsyncpa [#allocation4], 1 }
 0x8ea   :  { %7218 = vsyncpa [#allocation4 + $0x1], 1 }
 0x8eb   :  { %7219 = vsyncpa [#allocation5], 1 }
 0x8ec   :  { %7221 = vsyncpa [#allocation5 + $0x1], 1 }
 0x8ed   :  { %7222 = vsyncpa [#allocation6], 1 }
 0x8ee   :  { %7224 = vsyncpa [#allocation6 + $0x1], 1 }
 0x8ef   :  { %7225 = vsyncpa [#allocation7], 1 }
 0x8f0   :  { %7227 = vsyncpa [#allocation7 + $0x1], 1 }
 0x8f1   :  { %7228 = vsyncpa [#allocation11], 1 }

</bundles_post_ra>
